<compile_context>
chip_gen: v6e
topology: v6e:2x2x1
jax: 0.10.0
libtpu: 0.0.40
codegen_flags: <defaults>
</compile_context>

<pallas_src>
import jax
import jax.numpy as jnp
import numpy as np
from jax.experimental import pallas as pl
from jax.experimental.pallas import tpu as pltpu


_ARG_ORDER = (
    "Lh", "Rh0", "Rh1", "Rh2", "Rh3", "bnh", "Sh", "ShT",
    "Rc", "bc", "B", "Pn", "Sctx",
    "L1", "R1c", "R1x", "bn1", "S1", "S1T",
    "L2", "R2", "bn2", "S2", "S2T",
    "Wfc1", "bfc1", "Wfc2p", "bfc2p", "Wfc2d", "bfc2d",
    "Wr1", "br1", "Wr2", "br2",
)


# --------------------------------------------------------------------------
# Parameters (PyTorch layout: conv OIHW, linear (out, in)).
# --------------------------------------------------------------------------
def init_params(key, cfg):
    img_c = cfg["img_channels"]
    ctx_c = cfg["context_channels"]
    hd = cfg["hidden_dim"]
    k = cfg["kernel_size"]
    nc = cfg["num_classes"]
    dec = cfg["decoder_out_channel"]
    keys = iter(jax.random.split(key, 80))

    def conv(cout, cin, kk):
        return (0.1 * jax.random.normal(next(keys), (cout, cin, kk, kk), jnp.float32),
                0.1 * jax.random.normal(next(keys), (cout,), jnp.float32))

    def lin(cout, cin):
        return (0.1 * jax.random.normal(next(keys), (cout, cin), jnp.float32),
                0.1 * jax.random.normal(next(keys), (cout,), jnp.float32))

    def bn(c):  # mildly randomized affine params so the BN path is exercised
        return (1.0 + 0.1 * jax.random.normal(next(keys), (c,), jnp.float32),
                0.1 * jax.random.normal(next(keys), (c,), jnp.float32))

    P = {}
    cin = img_c
    for i in range(4):
        P[f"h{i}_w"], P[f"h{i}_b"] = conv(hd[i], cin, 5)
        P[f"h{i}_g"], P[f"h{i}_be"] = bn(hd[i])
        cin = hd[i]
    P["ctx_w"], P["ctx_b"] = conv(ctx_c, hd[3], 5)
    for pre in ("pred", "det"):
        P[f"{pre}_c1_w"], P[f"{pre}_c1_b"] = conv(dec, ctx_c + img_c, k)
        P[f"{pre}_c1_g"], P[f"{pre}_c1_be"] = bn(dec)
        P[f"{pre}_c2_w"], P[f"{pre}_c2_b"] = conv(dec, dec, k)
        P[f"{pre}_c2_g"], P[f"{pre}_c2_be"] = bn(dec)
        P[f"{pre}_fc1_w"], P[f"{pre}_fc1_b"] = lin(100, dec)
    P["pred_fc2_w"], P["pred_fc2_b"] = lin(nc, 100)
    P["det_fc2_w"], P["det_fc2_b"] = lin(2, 100)
    P["reg_fc1_w"], P["reg_fc1_b"] = lin(100, ctx_c)
    P["reg_fc2_w"], P["reg_fc2_b"] = lin(nc, 100)
    return P


# --------------------------------------------------------------------------
# One-time host-side preparation of kernel-ready operands (numpy).
# --------------------------------------------------------------------------
def prepare_params(P, cfg, batch):
    H, W = cfg["img_H"], cfg["img_W"]
    Cimg = cfg["img_channels"]
    Cctx = cfg["context_channels"]
    hd = list(cfg["hidden_dim"])
    k = cfg["kernel_size"]
    pad = (k - 1) // 2
    nc = cfg["num_classes"]
    dec = cfg["decoder_out_channel"]
    N = batch
    Cf = 2 * dec                          # pred + det channels fused

    Ho1, Wo1 = H - k + 1, W - k + 1       # branch conv1 output (valid)
    Hp1, Wp1 = Ho1 // 2, Wo1 // 2         # after MaxPool2d(2)
    Ho2, Wo2 = Hp1 - k + 1, Wp1 - k + 1   # branch conv2 output
    Hp2, Wq2 = Ho2 // 2, Wo2 // 2         # after second MaxPool2d(2)

    def A(x):
        return np.asarray(x, np.float32)

    def build_L(kk, p, n_out_rows, n_in_rows, H_out, H_in, out_row, in_row):
        L = np.zeros((kk, n_out_rows, n_in_rows), np.float32)
        for di in range(kk):
            for n in range(N):
                for ho in range(H_out):
                    hi = ho + di - p
                    if 0 <= hi < H_in:
                        L[di, out_row(n, ho), in_row(n, hi)] = 1.0
        return L

    def build_R(w, kk, p, n_in_cols, n_out_cols, W_out, W_in, ci_list, in_col, out_col):
        # w: (Cout, Cin_total, kk, kk) in PyTorch OIHW layout.
        R = np.zeros((kk, n_in_cols, n_out_cols), np.float32)
        cout_n = w.shape[0]
        for di in range(kk):
            for wo in range(W_out):
                for dj in range(kk):
                    wi = wo + dj - p
                    if not (0 <= wi < W_in):
                        continue
                    for ci in ci_list:
                        for co in range(cout_n):
                            R[di, in_col(wi, ci), out_col(wo, co)] += w[co, ci, di, dj]
        return R

    def sel_mat(n_cols, C):
        # S[col, c] = 1 if the column carries channel c (c is fastest-varying).
        return (np.arange(n_cols)[:, None] % C == np.arange(C)[None, :]).astype(np.float32)

    std_row = lambda n, h: n * H + h
    prep = {}

    # ---- h_phi: 4 x (Conv 5x5 same + BN + ReLU), standard (n*H+h, w*C+c) layout
    prep["Lh"] = build_L(5, pad, N * H, N * H, H, H, std_row, std_row)
    cins = [Cimg] + hd[:3]
    bn_rows = []
    for i in range(4):
        cin, cout = cins[i], hd[i]
        prep[f"Rh{i}"] = build_R(
            A(P[f"h{i}_w"]), 5, pad, W * cin, W * cout, W, W, range(cin),
            lambda wv, ci, cin=cin: wv * cin + ci,
            lambda wo, co, cout=cout: wo * cout + co)
        bn_rows.append(np.stack([np.tile(A(P[f"h{i}_b"]), W),
                                 np.tile(A(P[f"h{i}_g"]), W),
                                 np.tile(A(P[f"h{i}_be"]), W)], axis=0))
    prep["bnh"] = np.stack(bn_rows, axis=0)            # (4, 3, W*hidden)
    Sh = sel_mat(W * hd[3], hd[3])
    prep["Sh"], prep["ShT"] = Sh, Sh.T.copy()

    # ---- context conv (5x5 same, bias only)
    prep["Rc"] = build_R(
        A(P["ctx_w"]), 5, pad, W * hd[3], W * Cctx, W, W, range(hd[3]),
        lambda wv, ci: wv * hd[3] + ci,
        lambda wo, co: wo * Cctx + co)
    prep["bc"] = np.tile(A(P["ctx_b"]), W)[None, :]

    # ---- batch-mean-and-tile operator, per-sample row selector, channel sums
    B = np.zeros((N * H, N * H), np.float32)
    for n in range(N):
        for h in range(H):
            for n2 in range(N):
                B[n * H + h, n2 * H + h] = 1.0 / N
    prep["B"] = B
    Pn = np.zeros((N, N * H), np.float32)
    for n in range(N):
        Pn[n, n * H:(n + 1) * H] = 1.0
    prep["Pn"] = Pn
    prep["Sctx"] = sel_mat(W * Cctx, Cctx)

    # ---- fused prediction+detection branch, conv1 (valid, kernel k)
    # output rows ordered (h%2, n, h//2), cols (w%2, w//2, c) so MaxPool2d(2)
    # becomes an elementwise max of halves inside the kernel.
    w1f = np.concatenate([A(P["pred_c1_w"]), A(P["det_c1_w"])], axis=0)   # (Cf, Cctx+Cimg, k, k)
    b1f = np.concatenate([A(P["pred_c1_b"]), A(P["det_c1_b"])])
    g1f = np.concatenate([A(P["pred_c1_g"]), A(P["det_c1_g"])])
    be1f = np.concatenate([A(P["pred_c1_be"]), A(P["det_c1_be"])])
    r1_out_row = lambda n, ho: (ho % 2) * (N * Hp1) + n * Hp1 + (ho // 2)
    r1_out_col = lambda wo, co: (wo % 2) * (Wp1 * Cf) + (wo // 2) * Cf + co
    prep["L1"] = build_L(k, 0, N * Ho1, N * H, Ho1, H, r1_out_row, std_row)
    prep["R1c"] = build_R(w1f, k, 0, W * Cctx, Wo1 * Cf, Wo1, W,
                          range(Cctx),
                          lambda wv, ci: wv * Cctx + ci, r1_out_col)
    prep["R1x"] = build_R(w1f, k, 0, W * Cimg, Wo1 * Cf, Wo1, W,
                          range(Cctx, Cctx + Cimg),
                          lambda wv, ci: wv * Cimg + (ci - Cctx), r1_out_col)
    prep["bn1"] = np.stack([np.tile(b1f, Wo1), np.tile(g1f, Wo1), np.tile(be1f, Wo1)], axis=0)
    S1 = sel_mat(Wo1 * Cf, Cf)
    prep["S1"], prep["S1T"] = S1, S1.T.copy()

    # ---- branch conv2 (valid, kernel k), block-diagonal fused pred/det weights
    w2f = np.zeros((Cf, Cf, k, k), np.float32)
    w2f[:dec, :dec] = A(P["pred_c2_w"])
    w2f[dec:, dec:] = A(P["det_c2_w"])
    b2f = np.concatenate([A(P["pred_c2_b"]), A(P["det_c2_b"])])
    g2f = np.concatenate([A(P["pred_c2_g"]), A(P["det_c2_g"])])
    be2f = np.concatenate([A(P["pred_c2_be"]), A(P["det_c2_be"])])
    p1_row = lambda n, h: n * Hp1 + h
    p1_col = lambda wv, ci: wv * Cf + ci
    r2_out_row = lambda n, ho: (ho % 2) * (N * Hp2) + n * Hp2 + (ho // 2)
    r2_out_col = lambda wo, co: (wo % 2) * (Wq2 * Cf) + (wo // 2) * Cf + co
    prep["L2"] = build_L(k, 0, N * Ho2, N * Hp1, Ho2, Hp1, r2_out_row, p1_row)
    prep["R2"] = build_R(w2f, k, 0, Wp1 * Cf, Wo2 * Cf, Wo2, Wp1,
                         range(Cf), p1_col, r2_out_col)
    prep["bn2"] = np.stack([np.tile(b2f, Wo2), np.tile(g2f, Wo2), np.tile(be2f, Wo2)], axis=0)
    S2 = sel_mat(Wo2 * Cf, Cf)
    prep["S2"], prep["S2T"] = S2, S2.T.copy()

    # ---- fully-connected heads (pred/det block-diagonal fused)
    Wfc1 = np.zeros((Cf, 200), np.float32)
    Wfc1[:dec, :100] = A(P["pred_fc1_w"]).T
    Wfc1[dec:, 100:] = A(P["det_fc1_w"]).T
    prep["Wfc1"] = Wfc1
    prep["bfc1"] = np.concatenate([A(P["pred_fc1_b"]), A(P["det_fc1_b"])])[None, :]
    Wfc2p = np.zeros((200, nc), np.float32)
    Wfc2p[:100] = A(P["pred_fc2_w"]).T
    Wfc2d = np.zeros((200, 2), np.float32)
    Wfc2d[100:] = A(P["det_fc2_w"]).T
    prep["Wfc2p"], prep["bfc2p"] = Wfc2p, A(P["pred_fc2_b"])[None, :]
    prep["Wfc2d"], prep["bfc2d"] = Wfc2d, A(P["det_fc2_b"])[None, :]
    prep["Wr1"], prep["br1"] = A(P["reg_fc1_w"]).T, A(P["reg_fc1_b"])[None, :]
    prep["Wr2"], prep["br2"] = A(P["reg_fc2_w"]).T, A(P["reg_fc2_b"])[None, :]

    return {kk_: jnp.asarray(v) for kk_, v in prep.items()}


# --------------------------------------------------------------------------
# The fused Pallas kernel.
# --------------------------------------------------------------------------
def make_kernel(N, H, W, dec, k):
    Cf = 2 * dec
    Ho1, Wo1 = H - k + 1, W - k + 1
    Hp1, Wp1 = Ho1 // 2, Wo1 // 2
    Ho2, Wo2 = Hp1 - k + 1, Wp1 - k + 1
    Hp2, Wq2 = Ho2 // 2, Wo2 // 2
    cnt_h = float(N * H * W)
    cnt1 = float(N * Ho1 * Wo1)
    cnt2 = float(N * Ho2 * Wo2)
    eps = 1e-5

    def mm(a, b):
        return jnp.dot(a, b, preferred_element_type=jnp.float32)

    def kernel(x_ref, Lh_ref, Rh0_ref, Rh1_ref, Rh2_ref, Rh3_ref, bnh_ref,
               Sh_ref, ShT_ref, Rc_ref, bc_ref, B_ref, Pn_ref, Sctx_ref,
               L1_ref, R1c_ref, R1x_ref, bn1_ref, S1_ref, S1T_ref,
               L2_ref, R2_ref, bn2_ref, S2_ref, S2T_ref,
               Wfc1_ref, bfc1_ref, Wfc2p_ref, bfc2p_ref, Wfc2d_ref, bfc2d_ref,
               Wr1_ref, br1_ref, Wr2_ref, br2_ref,
               pred_ref, det_ref, reg_ref):

        def conv(x_parts, L_ref, R_refs):
            # sum_di  L[di] @ (sum_parts  X_part @ R_part[di])
            out = None
            for di in range(L_ref.shape[0]):
                z = None
                for xp, Rr in zip(x_parts, R_refs):
                    t = mm(xp, Rr[di])
                    z = t if z is None else z + t
                t = mm(L_ref[di], z)
                out = t if out is None else out + t
            return out

        def bn_relu(y, cnt, S, ST, brow, grow, berow):
            y = y + brow                                           # conv bias
            cs = mm(jnp.sum(y, axis=0, keepdims=True), S)          # per-channel sum
            css = mm(jnp.sum(y * y, axis=0, keepdims=True), S)     # per-channel sum sq
            mean = cs * (1.0 / cnt)
            var = css * (1.0 / cnt) - mean * mean                  # one-pass stats
            inv = jax.lax.rsqrt(var + eps)
            mean_l = mm(mean, ST)                                  # broadcast to lanes
            inv_l = mm(inv, ST)
            return jnp.maximum((y - mean_l) * inv_l * grow + berow, 0.0)

        def softmax(z):
            m = jnp.max(z, axis=1, keepdims=True)
            e = jnp.exp(z - m)
            return e / jnp.sum(e, axis=1, keepdims=True)

        x2d = x_ref[...]                                           # (N*H, W*Cimg)

        # ---- h_phi: 4 x (Conv5x5 same + BN + ReLU) ----
        a = x2d
        for i, Rr in enumerate((Rh0_ref, Rh1_ref, Rh2_ref, Rh3_ref)):
            p = bnh_ref[i]                                         # (3, W*hidden)
            a = bn_relu(conv([a], Lh_ref, [Rr]), cnt_h,
                        Sh_ref[...], ShT_ref[...], p[0:1], p[1:2], p[2:3])

        # ---- context conv (bias only) ----
        ctx = conv([a], Lh_ref, [Rc_ref]) + bc_ref[...]            # (N*H, W*Cctx)

        # Batch-mean of the context, tiled back over the batch (single matmul).
        # NOTE: PyTorch reshapes the (C,H,W) mean to (1,C,img_W,img_H); for the
        # square images of this model that reshape is the identity.
        ctx_t = mm(B_ref[...], ctx)                                # (N*H, W*Cctx)

        # ---- fused prediction + detection branch ----
        # conv1 on concat([ctx_mean, x], channel) expressed as two matmul
        # contributions (no explicit concatenation needed).
        p1c = bn1_ref[...]
        y1 = bn_relu(conv([ctx_t, x2d], L1_ref, [R1c_ref, R1x_ref]), cnt1,
                     S1_ref[...], S1T_ref[...], p1c[0:1], p1c[1:2], p1c[2:3])
        ph = jnp.maximum(y1[0:N * Hp1, :], y1[N * Hp1:2 * N * Hp1, :])
        p1 = jnp.maximum(ph[:, 0:Wp1 * Cf], ph[:, Wp1 * Cf:2 * Wp1 * Cf])  # MaxPool2d(2)

        p2c = bn2_ref[...]
        y2 = bn_relu(conv([p1], L2_ref, [R2_ref]), cnt2,
                     S2_ref[...], S2T_ref[...], p2c[0:1], p2c[1:2], p2c[2:3])
        h2 = jnp.maximum(y2[0:N * Hp2, :], y2[N * Hp2:2 * N * Hp2, :])
        feat = jnp.maximum(h2[:, 0:Wq2 * Cf], h2[:, Wq2 * Cf:2 * Wq2 * Cf])
        # feat: (N, Cf); AdaptiveAvgPool2d(1) over the remaining 1x1 spatial is identity.

        hid = jnp.maximum(mm(feat, Wfc1_ref[...]) + bfc1_ref[...], 0.0)    # (N, 200)
        pred_ref[...] = softmax(mm(hid, Wfc2p_ref[...]) + bfc2p_ref[...])
        det_ref[...] = softmax(mm(hid, Wfc2d_ref[...]) + bfc2d_ref[...])

        # ---- regularization head: avgpool(ctx) -> fc -> relu -> fc -> softmax
        rfeat = mm(mm(Pn_ref[...], ctx), Sctx_ref[...]) * (1.0 / (H * W))  # (N, Cctx)
        rhid = jnp.maximum(mm(rfeat, Wr1_ref[...]) + br1_ref[...], 0.0)
        reg_ref[...] = softmax(mm(rhid, Wr2_ref[...]) + br2_ref[...])

    return kernel


def build_forward(P, cfg, batch):
    H, W = cfg["img_H"], cfg["img_W"]
    Cimg = cfg["img_channels"]
    dec = cfg["decoder_out_channel"]
    k = cfg["kernel_size"]
    nc = cfg["num_classes"]
    assert H == W, "square images assumed (matches the reference reshape)"
    assert len(set(cfg["hidden_dim"])) == 1
    assert (H - k + 1) % 2 == 0 and ((H - k + 1) // 2 - k + 1) % 2 == 0

    prep = prepare_params(P, cfg, batch)
    args = [prep[name] for name in _ARG_ORDER]
    kern = make_kernel(batch, H, W, dec, k)

    vm = pl.BlockSpec(memory_space=pltpu.MemorySpace.VMEM)
    call = pl.pallas_call(
        kern,
        out_shape=(jax.ShapeDtypeStruct((batch, nc), jnp.float32),
                   jax.ShapeDtypeStruct((batch, 2), jnp.float32),
                   jax.ShapeDtypeStruct((batch, nc), jnp.float32)),
        in_specs=[vm] * (1 + len(args)),
        out_specs=(vm, vm, vm),
    )

    @jax.jit
    def forward(x):  # x: (N, C, H, W) PyTorch NCHW
        x2d = jnp.transpose(x, (0, 2, 3, 1)).reshape(batch * H, W * Cimg)
        return call(x2d, *args)

    return forward


# --------------------------------------------------------------------------
# Pure-JAX/XLA reference of the PyTorch module (for a correctness smoke test).
# --------------------------------------------------------------------------
def reference_forward(x, P, cfg):
    pad = (cfg["kernel_size"] - 1) // 2

    def conv(h, w, b, p):
        y = jax.lax.conv_general_dilated(h, w, (1, 1), [(p, p), (p, p)],
                                         dimension_numbers=("NCHW", "OIHW", "NCHW"))
        return y + b.reshape(1, -1, 1, 1)

    def bn_relu(y, g, be):
        m = jnp.mean(y, axis=(0, 2, 3), keepdims=True)
        v = jnp.mean((y - m) ** 2, axis=(0, 2, 3), keepdims=True)
        return jnp.maximum((y - m) * jax.lax.rsqrt(v + 1e-5) * g.reshape(1, -1, 1, 1)
                           + be.reshape(1, -1, 1, 1), 0.0)

    def pool2(y):
        n, c, hh, ww = y.shape
        return jnp.max(y.reshape(n, c, hh // 2, 2, ww // 2, 2), axis=(3, 5))

    h = x
    for i in range(4):
        h = bn_relu(conv(h, P[f"h{i}_w"], P[f"h{i}_b"], pad), P[f"h{i}_g"], P[f"h{i}_be"])
    ctx = conv(h, P["ctx_w"], P["ctx_b"], pad)
    n = x.shape[0]
    ctx_mean = jnp.mean(ctx, axis=0, keepdims=True)
    inp = jnp.concatenate([jnp.broadcast_to(ctx_mean, (n,) + ctx_mean.shape[1:]), x], axis=1)

    def branch(pre, out_w, out_b):
        h1 = bn_relu(conv(inp, P[f"{pre}_c1_w"], P[f"{pre}_c1_b"], 0),
                     P[f"{pre}_c1_g"], P[f"{pre}_c1_be"])
        h1 = pool2(h1)
        h2 = bn_relu(conv(h1, P[f"{pre}_c2_w"], P[f"{pre}_c2_b"], 0),
                     P[f"{pre}_c2_g"], P[f"{pre}_c2_be"])
        h2 = pool2(h2)
        f = jnp.mean(h2, axis=(2, 3))
        hid = jnp.maximum(f @ P[f"{pre}_fc1_w"].T + P[f"{pre}_fc1_b"], 0.0)
        return jax.nn.softmax(hid @ out_w.T + out_b, axis=1)

    op = branch("pred", P["pred_fc2_w"], P["pred_fc2_b"])
    od = branch("det", P["det_fc2_w"], P["det_fc2_b"])
    rf = jnp.mean(ctx, axis=(2, 3))
    rh = jnp.maximum(rf @ P["reg_fc1_w"].T + P["reg_fc1_b"], 0.0)
    orr = jax.nn.softmax(rh @ P["reg_fc2_w"].T + P["reg_fc2_b"], axis=1)
    return op, od, orr


if __name__ == "__main__":
    cfg = dict(img_channels=4, img_W=16, img_H=16, context_channels=4,
               hidden_dim=(8, 8, 8, 8), kernel_size=5, num_classes=3,
               decoder_out_channel=8)
    key = jax.random.PRNGKey(0)
    kx, kp = jax.random.split(key)
    # PyTorch NCHW input: (batch=2, img_channels=4, H=16, W=16)
    x = jax.random.normal(kx, (2, cfg["img_channels"], cfg["img_H"], cfg["img_W"]),
                          jnp.float32)
    P = init_params(kp, cfg)

    fwd = build_forward(P, cfg, batch=x.shape[0])
    outs = jax.block_until_ready(fwd(x))

    assert outs[0].shape == (2, cfg["num_classes"])   # prediction softmax
    assert outs[1].shape == (2, 2)                    # detection softmax
    assert outs[2].shape == (2, cfg["num_classes"])   # regularization softmax
    assert all(bool(jnp.all(jnp.isfinite(o))) for o in outs)

    # Correctness smoke test against a plain-XLA reference of the module
    # (loose tolerance accommodates MXU f32 pass-decomposition differences).
    refs = jax.block_until_ready(jax.jit(lambda xx: reference_forward(xx, P, cfg))(x))
    for o, r in zip(outs, refs):
        assert o.shape == r.shape
        assert bool(jnp.allclose(o, r, rtol=2e-2, atol=2e-2))

    print("KERNEL_OK")
</pallas_src>

<mosaic_0001>
module attributes {stable_mosaic.version = 11 : i64} {
  func.func @kernel(%arg0: memref<32x64xf32, #tpu.memory_space<vmem>>, %arg1: memref<5x32x32xf32, #tpu.memory_space<vmem>>, %arg2: memref<5x64x128xf32, #tpu.memory_space<vmem>>, %arg3: memref<5x128x128xf32, #tpu.memory_space<vmem>>, %arg4: memref<5x128x128xf32, #tpu.memory_space<vmem>>, %arg5: memref<5x128x128xf32, #tpu.memory_space<vmem>>, %arg6: memref<4x3x128xf32, #tpu.memory_space<vmem>>, %arg7: memref<128x8xf32, #tpu.memory_space<vmem>>, %arg8: memref<8x128xf32, #tpu.memory_space<vmem>>, %arg9: memref<5x128x64xf32, #tpu.memory_space<vmem>>, %arg10: memref<1x64xf32, #tpu.memory_space<vmem>>, %arg11: memref<32x32xf32, #tpu.memory_space<vmem>>, %arg12: memref<2x32xf32, #tpu.memory_space<vmem>>, %arg13: memref<64x4xf32, #tpu.memory_space<vmem>>, %arg14: memref<5x24x32xf32, #tpu.memory_space<vmem>>, %arg15: memref<5x64x192xf32, #tpu.memory_space<vmem>>, %arg16: memref<5x64x192xf32, #tpu.memory_space<vmem>>, %arg17: memref<3x192xf32, #tpu.memory_space<vmem>>, %arg18: memref<192x16xf32, #tpu.memory_space<vmem>>, %arg19: memref<16x192xf32, #tpu.memory_space<vmem>>, %arg20: memref<5x4x12xf32, #tpu.memory_space<vmem>>, %arg21: memref<5x96x32xf32, #tpu.memory_space<vmem>>, %arg22: memref<3x32xf32, #tpu.memory_space<vmem>>, %arg23: memref<32x16xf32, #tpu.memory_space<vmem>>, %arg24: memref<16x32xf32, #tpu.memory_space<vmem>>, %arg25: memref<16x200xf32, #tpu.memory_space<vmem>>, %arg26: memref<1x200xf32, #tpu.memory_space<vmem>>, %arg27: memref<200x3xf32, #tpu.memory_space<vmem>>, %arg28: memref<1x3xf32, #tpu.memory_space<vmem>>, %arg29: memref<200x2xf32, #tpu.memory_space<vmem>>, %arg30: memref<1x2xf32, #tpu.memory_space<vmem>>, %arg31: memref<4x100xf32, #tpu.memory_space<vmem>>, %arg32: memref<1x100xf32, #tpu.memory_space<vmem>>, %arg33: memref<100x3xf32, #tpu.memory_space<vmem>>, %arg34: memref<1x3xf32, #tpu.memory_space<vmem>>, %arg35: memref<2x3xf32, #tpu.memory_space<vmem>>, %arg36: memref<2x2xf32, #tpu.memory_space<vmem>>, %arg37: memref<2x3xf32, #tpu.memory_space<vmem>>) attributes {dimension_semantics = [], scalar_prefetch = 0 : i64, scratch_operands = 0 : i64, tpu.core_type = #tpu.core_type<tc>} {
    %c0 = arith.constant 0 : index
    %c0_0 = arith.constant 0 : index
    %0 = vector.load %arg0[%c0, %c0_0] : memref<32x64xf32, #tpu.memory_space<vmem>>, vector<32x64xf32>
    %c0_1 = arith.constant 0 : index
    %c0_2 = arith.constant 0 : index
    %c0_3 = arith.constant 0 : index
    %1 = vector.load %arg6[%c0_1, %c0_2, %c0_3] : memref<4x3x128xf32, #tpu.memory_space<vmem>>, vector<1x3x128xf32>
    %2 = vector.shape_cast %1 : vector<1x3x128xf32> to vector<3x128xf32>
    %c0_4 = arith.constant 0 : index
    %c0_5 = arith.constant 0 : index
    %c0_6 = arith.constant 0 : index
    %3 = vector.load %arg2[%c0_4, %c0_5, %c0_6] : memref<5x64x128xf32, #tpu.memory_space<vmem>>, vector<1x64x128xf32>
    %4 = vector.shape_cast %3 : vector<1x64x128xf32> to vector<64x128xf32>
    %cst = arith.constant dense<0.000000e+00> : vector<32x128xf32>
    %5 = tpu.matmul %0, %4, %cst {dimension_numbers = #tpu.dot_dimension_numbers<[1], [0], [0], [1], [0, 0, 1, 1], [], []>} : vector<32x64xf32>, vector<64x128xf32>, vector<32x128xf32> -> vector<32x128xf32>
    %c0_7 = arith.constant 0 : index
    %c0_8 = arith.constant 0 : index
    %c0_9 = arith.constant 0 : index
    %6 = vector.load %arg1[%c0_7, %c0_8, %c0_9] : memref<5x32x32xf32, #tpu.memory_space<vmem>>, vector<1x32x32xf32>
    %7 = vector.shape_cast %6 : vector<1x32x32xf32> to vector<32x32xf32>
    %cst_10 = arith.constant dense<0.000000e+00> : vector<32x128xf32>
    %8 = tpu.matmul %7, %5, %cst_10 {dimension_numbers = #tpu.dot_dimension_numbers<[1], [0], [0], [1], [0, 0, 1, 1], [], []>} : vector<32x32xf32>, vector<32x128xf32>, vector<32x128xf32> -> vector<32x128xf32>
    %c1 = arith.constant 1 : index
    %c0_11 = arith.constant 0 : index
    %c0_12 = arith.constant 0 : index
    %9 = vector.load %arg2[%c1, %c0_11, %c0_12] : memref<5x64x128xf32, #tpu.memory_space<vmem>>, vector<1x64x128xf32>
    %10 = vector.shape_cast %9 : vector<1x64x128xf32> to vector<64x128xf32>
    %cst_13 = arith.constant dense<0.000000e+00> : vector<32x128xf32>
    %11 = tpu.matmul %0, %10, %cst_13 {dimension_numbers = #tpu.dot_dimension_numbers<[1], [0], [0], [1], [0, 0, 1, 1], [], []>} : vector<32x64xf32>, vector<64x128xf32>, vector<32x128xf32> -> vector<32x128xf32>
    %c1_14 = arith.constant 1 : index
    %c0_15 = arith.constant 0 : index
    %c0_16 = arith.constant 0 : index
    %12 = vector.load %arg1[%c1_14, %c0_15, %c0_16] : memref<5x32x32xf32, #tpu.memory_space<vmem>>, vector<1x32x32xf32>
    %13 = vector.shape_cast %12 : vector<1x32x32xf32> to vector<32x32xf32>
    %cst_17 = arith.constant dense<0.000000e+00> : vector<32x128xf32>
    %14 = tpu.matmul %13, %11, %cst_17 {dimension_numbers = #tpu.dot_dimension_numbers<[1], [0], [0], [1], [0, 0, 1, 1], [], []>} : vector<32x32xf32>, vector<32x128xf32>, vector<32x128xf32> -> vector<32x128xf32>
    %15 = arith.addf %8, %14 : vector<32x128xf32>
    %c2 = arith.constant 2 : index
    %c0_18 = arith.constant 0 : index
    %c0_19 = arith.constant 0 : index
    %16 = vector.load %arg2[%c2, %c0_18, %c0_19] : memref<5x64x128xf32, #tpu.memory_space<vmem>>, vector<1x64x128xf32>
    %17 = vector.shape_cast %16 : vector<1x64x128xf32> to vector<64x128xf32>
    %cst_20 = arith.constant dense<0.000000e+00> : vector<32x128xf32>
    %18 = tpu.matmul %0, %17, %cst_20 {dimension_numbers = #tpu.dot_dimension_numbers<[1], [0], [0], [1], [0, 0, 1, 1], [], []>} : vector<32x64xf32>, vector<64x128xf32>, vector<32x128xf32> -> vector<32x128xf32>
    %c2_21 = arith.constant 2 : index
    %c0_22 = arith.constant 0 : index
    %c0_23 = arith.constant 0 : index
    %19 = vector.load %arg1[%c2_21, %c0_22, %c0_23] : memref<5x32x32xf32, #tpu.memory_space<vmem>>, vector<1x32x32xf32>
    %20 = vector.shape_cast %19 : vector<1x32x32xf32> to vector<32x32xf32>
    %cst_24 = arith.constant dense<0.000000e+00> : vector<32x128xf32>
    %21 = tpu.matmul %20, %18, %cst_24 {dimension_numbers = #tpu.dot_dimension_numbers<[1], [0], [0], [1], [0, 0, 1, 1], [], []>} : vector<32x32xf32>, vector<32x128xf32>, vector<32x128xf32> -> vector<32x128xf32>
    %22 = arith.addf %15, %21 : vector<32x128xf32>
    %c3 = arith.constant 3 : index
    %c0_25 = arith.constant 0 : index
    %c0_26 = arith.constant 0 : index
    %23 = vector.load %arg2[%c3, %c0_25, %c0_26] : memref<5x64x128xf32, #tpu.memory_space<vmem>>, vector<1x64x128xf32>
    %24 = vector.shape_cast %23 : vector<1x64x128xf32> to vector<64x128xf32>
    %cst_27 = arith.constant dense<0.000000e+00> : vector<32x128xf32>
    %25 = tpu.matmul %0, %24, %cst_27 {dimension_numbers = #tpu.dot_dimension_numbers<[1], [0], [0], [1], [0, 0, 1, 1], [], []>} : vector<32x64xf32>, vector<64x128xf32>, vector<32x128xf32> -> vector<32x128xf32>
    %c3_28 = arith.constant 3 : index
    %c0_29 = arith.constant 0 : index
    %c0_30 = arith.constant 0 : index
    %26 = vector.load %arg1[%c3_28, %c0_29, %c0_30] : memref<5x32x32xf32, #tpu.memory_space<vmem>>, vector<1x32x32xf32>
    %27 = vector.shape_cast %26 : vector<1x32x32xf32> to vector<32x32xf32>
    %cst_31 = arith.constant dense<0.000000e+00> : vector<32x128xf32>
    %28 = tpu.matmul %27, %25, %cst_31 {dimension_numbers = #tpu.dot_dimension_numbers<[1], [0], [0], [1], [0, 0, 1, 1], [], []>} : vector<32x32xf32>, vector<32x128xf32>, vector<32x128xf32> -> vector<32x128xf32>
    %29 = arith.addf %22, %28 : vector<32x128xf32>
    %c4 = arith.constant 4 : index
    %c0_32 = arith.constant 0 : index
    %c0_33 = arith.constant 0 : index
    %30 = vector.load %arg2[%c4, %c0_32, %c0_33] : memref<5x64x128xf32, #tpu.memory_space<vmem>>, vector<1x64x128xf32>
    %31 = vector.shape_cast %30 : vector<1x64x128xf32> to vector<64x128xf32>
    %cst_34 = arith.constant dense<0.000000e+00> : vector<32x128xf32>
    %32 = tpu.matmul %0, %31, %cst_34 {dimension_numbers = #tpu.dot_dimension_numbers<[1], [0], [0], [1], [0, 0, 1, 1], [], []>} : vector<32x64xf32>, vector<64x128xf32>, vector<32x128xf32> -> vector<32x128xf32>
    %c4_35 = arith.constant 4 : index
    %c0_36 = arith.constant 0 : index
    %c0_37 = arith.constant 0 : index
    %33 = vector.load %arg1[%c4_35, %c0_36, %c0_37] : memref<5x32x32xf32, #tpu.memory_space<vmem>>, vector<1x32x32xf32>
    %34 = vector.shape_cast %33 : vector<1x32x32xf32> to vector<32x32xf32>
    %cst_38 = arith.constant dense<0.000000e+00> : vector<32x128xf32>
    %35 = tpu.matmul %34, %32, %cst_38 {dimension_numbers = #tpu.dot_dimension_numbers<[1], [0], [0], [1], [0, 0, 1, 1], [], []>} : vector<32x32xf32>, vector<32x128xf32>, vector<32x128xf32> -> vector<32x128xf32>
    %36 = arith.addf %29, %35 : vector<32x128xf32>
    %c0_39 = arith.constant 0 : index
    %c0_40 = arith.constant 0 : index
    %37 = vector.load %arg7[%c0_39, %c0_40] : memref<128x8xf32, #tpu.memory_space<vmem>>, vector<128x8xf32>
    %c0_41 = arith.constant 0 : index
    %c0_42 = arith.constant 0 : index
    %38 = vector.load %arg8[%c0_41, %c0_42] : memref<8x128xf32, #tpu.memory_space<vmem>>, vector<8x128xf32>
    %39 = vector.extract_strided_slice %2 {offsets = [0, 0], sizes = [1, 128], strides = [1, 1]} : vector<3x128xf32> to vector<1x128xf32>
    %40 = vector.extract_strided_slice %2 {offsets = [1, 0], sizes = [1, 128], strides = [1, 1]} : vector<3x128xf32> to vector<1x128xf32>
    %41 = vector.extract_strided_slice %2 {offsets = [2, 0], sizes = [1, 128], strides = [1, 1]} : vector<3x128xf32> to vector<1x128xf32>
    %42 = vector.broadcast %39 : vector<1x128xf32> to vector<32x128xf32>
    %43 = arith.addf %36, %42 : vector<32x128xf32>
    %cst_43 = arith.constant dense<0.000000e+00> : vector<128xf32>
    %44 = vector.multi_reduction <add>, %43, %cst_43 [0] : vector<32x128xf32> to vector<128xf32>
    %45 = vector.shape_cast %44 : vector<128xf32> to vector<1x128xf32>
    %cst_44 = arith.constant dense<0.000000e+00> : vector<1x8xf32>
    %46 = tpu.matmul %45, %37, %cst_44 {dimension_numbers = #tpu.dot_dimension_numbers<[1], [0], [0], [1], [0, 0, 1, 1], [], []>} : vector<1x128xf32>, vector<128x8xf32>, vector<1x8xf32> -> vector<1x8xf32>
    %47 = arith.mulf %43, %43 : vector<32x128xf32>
    %cst_45 = arith.constant dense<0.000000e+00> : vector<128xf32>
    %48 = vector.multi_reduction <add>, %47, %cst_45 [0] : vector<32x128xf32> to vector<128xf32>
    %49 = vector.shape_cast %48 : vector<128xf32> to vector<1x128xf32>
    %cst_46 = arith.constant dense<0.000000e+00> : vector<1x8xf32>
    %50 = tpu.matmul %49, %37, %cst_46 {dimension_numbers = #tpu.dot_dimension_numbers<[1], [0], [0], [1], [0, 0, 1, 1], [], []>} : vector<1x128xf32>, vector<128x8xf32>, vector<1x8xf32> -> vector<1x8xf32>
    %cst_47 = arith.constant 0.001953125 : f32
    %51 = vector.broadcast %cst_47 : f32 to vector<1x8xf32>
    %52 = arith.mulf %46, %51 : vector<1x8xf32>
    %cst_48 = arith.constant 0.001953125 : f32
    %53 = vector.broadcast %cst_48 : f32 to vector<1x8xf32>
    %54 = arith.mulf %50, %53 : vector<1x8xf32>
    %55 = arith.mulf %52, %52 : vector<1x8xf32>
    %56 = arith.subf %54, %55 : vector<1x8xf32>
    %cst_49 = arith.constant 9.99999974E-6 : f32
    %57 = vector.broadcast %cst_49 : f32 to vector<1x8xf32>
    %58 = arith.addf %56, %57 : vector<1x8xf32>
    %59 = math.rsqrt %58 : vector<1x8xf32>
    %cst_50 = arith.constant dense<0.000000e+00> : vector<1x128xf32>
    %60 = tpu.matmul %52, %38, %cst_50 {dimension_numbers = #tpu.dot_dimension_numbers<[1], [0], [0], [1], [0, 0, 1, 1], [], []>} : vector<1x8xf32>, vector<8x128xf32>, vector<1x128xf32> -> vector<1x128xf32>
    %cst_51 = arith.constant dense<0.000000e+00> : vector<1x128xf32>
    %61 = tpu.matmul %59, %38, %cst_51 {dimension_numbers = #tpu.dot_dimension_numbers<[1], [0], [0], [1], [0, 0, 1, 1], [], []>} : vector<1x8xf32>, vector<8x128xf32>, vector<1x128xf32> -> vector<1x128xf32>
    %62 = vector.broadcast %60 : vector<1x128xf32> to vector<32x128xf32>
    %63 = arith.subf %43, %62 : vector<32x128xf32>
    %64 = vector.broadcast %61 : vector<1x128xf32> to vector<32x128xf32>
    %65 = arith.mulf %63, %64 : vector<32x128xf32>
    %66 = vector.broadcast %40 : vector<1x128xf32> to vector<32x128xf32>
    %67 = arith.mulf %65, %66 : vector<32x128xf32>
    %68 = vector.broadcast %41 : vector<1x128xf32> to vector<32x128xf32>
    %69 = arith.addf %67, %68 : vector<32x128xf32>
    %cst_52 = arith.constant 0.000000e+00 : f32
    %70 = vector.broadcast %cst_52 : f32 to vector<32x128xf32>
    %71 = arith.maximumf %69, %70 : vector<32x128xf32>
    %c1_53 = arith.constant 1 : index
    %c0_54 = arith.constant 0 : index
    %c0_55 = arith.constant 0 : index
    %72 = vector.load %arg6[%c1_53, %c0_54, %c0_55] : memref<4x3x128xf32, #tpu.memory_space<vmem>>, vector<1x3x128xf32>
    %73 = vector.shape_cast %72 : vector<1x3x128xf32> to vector<3x128xf32>
    %c0_56 = arith.constant 0 : index
    %c0_57 = arith.constant 0 : index
    %c0_58 = arith.constant 0 : index
    %74 = vector.load %arg3[%c0_56, %c0_57, %c0_58] : memref<5x128x128xf32, #tpu.memory_space<vmem>>, vector<1x128x128xf32>
    %75 = vector.shape_cast %74 : vector<1x128x128xf32> to vector<128x128xf32>
    %cst_59 = arith.constant dense<0.000000e+00> : vector<32x128xf32>
    %76 = tpu.matmul %71, %75, %cst_59 {dimension_numbers = #tpu.dot_dimension_numbers<[1], [0], [0], [1], [0, 0, 1, 1], [], []>} : vector<32x128xf32>, vector<128x128xf32>, vector<32x128xf32> -> vector<32x128xf32>
    %c0_60 = arith.constant 0 : index
    %c0_61 = arith.constant 0 : index
    %c0_62 = arith.constant 0 : index
    %77 = vector.load %arg1[%c0_60, %c0_61, %c0_62] : memref<5x32x32xf32, #tpu.memory_space<vmem>>, vector<1x32x32xf32>
    %78 = vector.shape_cast %77 : vector<1x32x32xf32> to vector<32x32xf32>
    %cst_63 = arith.constant dense<0.000000e+00> : vector<32x128xf32>
    %79 = tpu.matmul %78, %76, %cst_63 {dimension_numbers = #tpu.dot_dimension_numbers<[1], [0], [0], [1], [0, 0, 1, 1], [], []>} : vector<32x32xf32>, vector<32x128xf32>, vector<32x128xf32> -> vector<32x128xf32>
    %c1_64 = arith.constant 1 : index
    %c0_65 = arith.constant 0 : index
    %c0_66 = arith.constant 0 : index
    %80 = vector.load %arg3[%c1_64, %c0_65, %c0_66] : memref<5x128x128xf32, #tpu.memory_space<vmem>>, vector<1x128x128xf32>
    %81 = vector.shape_cast %80 : vector<1x128x128xf32> to vector<128x128xf32>
    %cst_67 = arith.constant dense<0.000000e+00> : vector<32x128xf32>
    %82 = tpu.matmul %71, %81, %cst_67 {dimension_numbers = #tpu.dot_dimension_numbers<[1], [0], [0], [1], [0, 0, 1, 1], [], []>} : vector<32x128xf32>, vector<128x128xf32>, vector<32x128xf32> -> vector<32x128xf32>
    %c1_68 = arith.constant 1 : index
    %c0_69 = arith.constant 0 : index
    %c0_70 = arith.constant 0 : index
    %83 = vector.load %arg1[%c1_68, %c0_69, %c0_70] : memref<5x32x32xf32, #tpu.memory_space<vmem>>, vector<1x32x32xf32>
    %84 = vector.shape_cast %83 : vector<1x32x32xf32> to vector<32x32xf32>
    %cst_71 = arith.constant dense<0.000000e+00> : vector<32x128xf32>
    %85 = tpu.matmul %84, %82, %cst_71 {dimension_numbers = #tpu.dot_dimension_numbers<[1], [0], [0], [1], [0, 0, 1, 1], [], []>} : vector<32x32xf32>, vector<32x128xf32>, vector<32x128xf32> -> vector<32x128xf32>
    %86 = arith.addf %79, %85 : vector<32x128xf32>
    %c2_72 = arith.constant 2 : index
    %c0_73 = arith.constant 0 : index
    %c0_74 = arith.constant 0 : index
    %87 = vector.load %arg3[%c2_72, %c0_73, %c0_74] : memref<5x128x128xf32, #tpu.memory_space<vmem>>, vector<1x128x128xf32>
    %88 = vector.shape_cast %87 : vector<1x128x128xf32> to vector<128x128xf32>
    %cst_75 = arith.constant dense<0.000000e+00> : vector<32x128xf32>
    %89 = tpu.matmul %71, %88, %cst_75 {dimension_numbers = #tpu.dot_dimension_numbers<[1], [0], [0], [1], [0, 0, 1, 1], [], []>} : vector<32x128xf32>, vector<128x128xf32>, vector<32x128xf32> -> vector<32x128xf32>
    %c2_76 = arith.constant 2 : index
    %c0_77 = arith.constant 0 : index
    %c0_78 = arith.constant 0 : index
    %90 = vector.load %arg1[%c2_76, %c0_77, %c0_78] : memref<5x32x32xf32, #tpu.memory_space<vmem>>, vector<1x32x32xf32>
    %91 = vector.shape_cast %90 : vector<1x32x32xf32> to vector<32x32xf32>
    %cst_79 = arith.constant dense<0.000000e+00> : vector<32x128xf32>
    %92 = tpu.matmul %91, %89, %cst_79 {dimension_numbers = #tpu.dot_dimension_numbers<[1], [0], [0], [1], [0, 0, 1, 1], [], []>} : vector<32x32xf32>, vector<32x128xf32>, vector<32x128xf32> -> vector<32x128xf32>
    %93 = arith.addf %86, %92 : vector<32x128xf32>
    %c3_80 = arith.constant 3 : index
    %c0_81 = arith.constant 0 : index
    %c0_82 = arith.constant 0 : index
    %94 = vector.load %arg3[%c3_80, %c0_81, %c0_82] : memref<5x128x128xf32, #tpu.memory_space<vmem>>, vector<1x128x128xf32>
    %95 = vector.shape_cast %94 : vector<1x128x128xf32> to vector<128x128xf32>
    %cst_83 = arith.constant dense<0.000000e+00> : vector<32x128xf32>
    %96 = tpu.matmul %71, %95, %cst_83 {dimension_numbers = #tpu.dot_dimension_numbers<[1], [0], [0], [1], [0, 0, 1, 1], [], []>} : vector<32x128xf32>, vector<128x128xf32>, vector<32x128xf32> -> vector<32x128xf32>
    %c3_84 = arith.constant 3 : index
    %c0_85 = arith.constant 0 : index
    %c0_86 = arith.constant 0 : index
    %97 = vector.load %arg1[%c3_84, %c0_85, %c0_86] : memref<5x32x32xf32, #tpu.memory_space<vmem>>, vector<1x32x32xf32>
    %98 = vector.shape_cast %97 : vector<1x32x32xf32> to vector<32x32xf32>
    %cst_87 = arith.constant dense<0.000000e+00> : vector<32x128xf32>
    %99 = tpu.matmul %98, %96, %cst_87 {dimension_numbers = #tpu.dot_dimension_numbers<[1], [0], [0], [1], [0, 0, 1, 1], [], []>} : vector<32x32xf32>, vector<32x128xf32>, vector<32x128xf32> -> vector<32x128xf32>
    %100 = arith.addf %93, %99 : vector<32x128xf32>
    %c4_88 = arith.constant 4 : index
    %c0_89 = arith.constant 0 : index
    %c0_90 = arith.constant 0 : index
    %101 = vector.load %arg3[%c4_88, %c0_89, %c0_90] : memref<5x128x128xf32, #tpu.memory_space<vmem>>, vector<1x128x128xf32>
    %102 = vector.shape_cast %101 : vector<1x128x128xf32> to vector<128x128xf32>
    %cst_91 = arith.constant dense<0.000000e+00> : vector<32x128xf32>
    %103 = tpu.matmul %71, %102, %cst_91 {dimension_numbers = #tpu.dot_dimension_numbers<[1], [0], [0], [1], [0, 0, 1, 1], [], []>} : vector<32x128xf32>, vector<128x128xf32>, vector<32x128xf32> -> vector<32x128xf32>
    %c4_92 = arith.constant 4 : index
    %c0_93 = arith.constant 0 : index
    %c0_94 = arith.constant 0 : index
    %104 = vector.load %arg1[%c4_92, %c0_93, %c0_94] : memref<5x32x32xf32, #tpu.memory_space<vmem>>, vector<1x32x32xf32>
    %105 = vector.shape_cast %104 : vector<1x32x32xf32> to vector<32x32xf32>
    %cst_95 = arith.constant dense<0.000000e+00> : vector<32x128xf32>
    %106 = tpu.matmul %105, %103, %cst_95 {dimension_numbers = #tpu.dot_dimension_numbers<[1], [0], [0], [1], [0, 0, 1, 1], [], []>} : vector<32x32xf32>, vector<32x128xf32>, vector<32x128xf32> -> vector<32x128xf32>
    %107 = arith.addf %100, %106 : vector<32x128xf32>
    %c0_96 = arith.constant 0 : index
    %c0_97 = arith.constant 0 : index
    %108 = vector.load %arg7[%c0_96, %c0_97] : memref<128x8xf32, #tpu.memory_space<vmem>>, vector<128x8xf32>
    %c0_98 = arith.constant 0 : index
    %c0_99 = arith.constant 0 : index
    %109 = vector.load %arg8[%c0_98, %c0_99] : memref<8x128xf32, #tpu.memory_space<vmem>>, vector<8x128xf32>
    %110 = vector.extract_strided_slice %73 {offsets = [0, 0], sizes = [1, 128], strides = [1, 1]} : vector<3x128xf32> to vector<1x128xf32>
    %111 = vector.extract_strided_slice %73 {offsets = [1, 0], sizes = [1, 128], strides = [1, 1]} : vector<3x128xf32> to vector<1x128xf32>
    %112 = vector.extract_strided_slice %73 {offsets = [2, 0], sizes = [1, 128], strides = [1, 1]} : vector<3x128xf32> to vector<1x128xf32>
    %113 = vector.broadcast %110 : vector<1x128xf32> to vector<32x128xf32>
    %114 = arith.addf %107, %113 : vector<32x128xf32>
    %cst_100 = arith.constant dense<0.000000e+00> : vector<128xf32>
    %115 = vector.multi_reduction <add>, %114, %cst_100 [0] : vector<32x128xf32> to vector<128xf32>
    %116 = vector.shape_cast %115 : vector<128xf32> to vector<1x128xf32>
    %cst_101 = arith.constant dense<0.000000e+00> : vector<1x8xf32>
    %117 = tpu.matmul %116, %108, %cst_101 {dimension_numbers = #tpu.dot_dimension_numbers<[1], [0], [0], [1], [0, 0, 1, 1], [], []>} : vector<1x128xf32>, vector<128x8xf32>, vector<1x8xf32> -> vector<1x8xf32>
    %118 = arith.mulf %114, %114 : vector<32x128xf32>
    %cst_102 = arith.constant dense<0.000000e+00> : vector<128xf32>
    %119 = vector.multi_reduction <add>, %118, %cst_102 [0] : vector<32x128xf32> to vector<128xf32>
    %120 = vector.shape_cast %119 : vector<128xf32> to vector<1x128xf32>
    %cst_103 = arith.constant dense<0.000000e+00> : vector<1x8xf32>
    %121 = tpu.matmul %120, %108, %cst_103 {dimension_numbers = #tpu.dot_dimension_numbers<[1], [0], [0], [1], [0, 0, 1, 1], [], []>} : vector<1x128xf32>, vector<128x8xf32>, vector<1x8xf32> -> vector<1x8xf32>
    %cst_104 = arith.constant 0.001953125 : f32
    %122 = vector.broadcast %cst_104 : f32 to vector<1x8xf32>
    %123 = arith.mulf %117, %122 : vector<1x8xf32>
    %cst_105 = arith.constant 0.001953125 : f32
    %124 = vector.broadcast %cst_105 : f32 to vector<1x8xf32>
    %125 = arith.mulf %121, %124 : vector<1x8xf32>
    %126 = arith.mulf %123, %123 : vector<1x8xf32>
    %127 = arith.subf %125, %126 : vector<1x8xf32>
    %cst_106 = arith.constant 9.99999974E-6 : f32
    %128 = vector.broadcast %cst_106 : f32 to vector<1x8xf32>
    %129 = arith.addf %127, %128 : vector<1x8xf32>
    %130 = math.rsqrt %129 : vector<1x8xf32>
    %cst_107 = arith.constant dense<0.000000e+00> : vector<1x128xf32>
    %131 = tpu.matmul %123, %109, %cst_107 {dimension_numbers = #tpu.dot_dimension_numbers<[1], [0], [0], [1], [0, 0, 1, 1], [], []>} : vector<1x8xf32>, vector<8x128xf32>, vector<1x128xf32> -> vector<1x128xf32>
    %cst_108 = arith.constant dense<0.000000e+00> : vector<1x128xf32>
    %132 = tpu.matmul %130, %109, %cst_108 {dimension_numbers = #tpu.dot_dimension_numbers<[1], [0], [0], [1], [0, 0, 1, 1], [], []>} : vector<1x8xf32>, vector<8x128xf32>, vector<1x128xf32> -> vector<1x128xf32>
    %133 = vector.broadcast %131 : vector<1x128xf32> to vector<32x128xf32>
    %134 = arith.subf %114, %133 : vector<32x128xf32>
    %135 = vector.broadcast %132 : vector<1x128xf32> to vector<32x128xf32>
    %136 = arith.mulf %134, %135 : vector<32x128xf32>
    %137 = vector.broadcast %111 : vector<1x128xf32> to vector<32x128xf32>
    %138 = arith.mulf %136, %137 : vector<32x128xf32>
    %139 = vector.broadcast %112 : vector<1x128xf32> to vector<32x128xf32>
    %140 = arith.addf %138, %139 : vector<32x128xf32>
    %cst_109 = arith.constant 0.000000e+00 : f32
    %141 = vector.broadcast %cst_109 : f32 to vector<32x128xf32>
    %142 = arith.maximumf %140, %141 : vector<32x128xf32>
    %c2_110 = arith.constant 2 : index
    %c0_111 = arith.constant 0 : index
    %c0_112 = arith.constant 0 : index
    %143 = vector.load %arg6[%c2_110, %c0_111, %c0_112] : memref<4x3x128xf32, #tpu.memory_space<vmem>>, vector<1x3x128xf32>
    %144 = vector.shape_cast %143 : vector<1x3x128xf32> to vector<3x128xf32>
    %c0_113 = arith.constant 0 : index
    %c0_114 = arith.constant 0 : index
    %c0_115 = arith.constant 0 : index
    %145 = vector.load %arg4[%c0_113, %c0_114, %c0_115] : memref<5x128x128xf32, #tpu.memory_space<vmem>>, vector<1x128x128xf32>
    %146 = vector.shape_cast %145 : vector<1x128x128xf32> to vector<128x128xf32>
    %cst_116 = arith.constant dense<0.000000e+00> : vector<32x128xf32>
    %147 = tpu.matmul %142, %146, %cst_116 {dimension_numbers = #tpu.dot_dimension_numbers<[1], [0], [0], [1], [0, 0, 1, 1], [], []>} : vector<32x128xf32>, vector<128x128xf32>, vector<32x128xf32> -> vector<32x128xf32>
    %c0_117 = arith.constant 0 : index
    %c0_118 = arith.constant 0 : index
    %c0_119 = arith.constant 0 : index
    %148 = vector.load %arg1[%c0_117, %c0_118, %c0_119] : memref<5x32x32xf32, #tpu.memory_space<vmem>>, vector<1x32x32xf32>
    %149 = vector.shape_cast %148 : vector<1x32x32xf32> to vector<32x32xf32>
    %cst_120 = arith.constant dense<0.000000e+00> : vector<32x128xf32>
    %150 = tpu.matmul %149, %147, %cst_120 {dimension_numbers = #tpu.dot_dimension_numbers<[1], [0], [0], [1], [0, 0, 1, 1], [], []>} : vector<32x32xf32>, vector<32x128xf32>, vector<32x128xf32> -> vector<32x128xf32>
    %c1_121 = arith.constant 1 : index
    %c0_122 = arith.constant 0 : index
    %c0_123 = arith.constant 0 : index
    %151 = vector.load %arg4[%c1_121, %c0_122, %c0_123] : memref<5x128x128xf32, #tpu.memory_space<vmem>>, vector<1x128x128xf32>
    %152 = vector.shape_cast %151 : vector<1x128x128xf32> to vector<128x128xf32>
    %cst_124 = arith.constant dense<0.000000e+00> : vector<32x128xf32>
    %153 = tpu.matmul %142, %152, %cst_124 {dimension_numbers = #tpu.dot_dimension_numbers<[1], [0], [0], [1], [0, 0, 1, 1], [], []>} : vector<32x128xf32>, vector<128x128xf32>, vector<32x128xf32> -> vector<32x128xf32>
    %c1_125 = arith.constant 1 : index
    %c0_126 = arith.constant 0 : index
    %c0_127 = arith.constant 0 : index
    %154 = vector.load %arg1[%c1_125, %c0_126, %c0_127] : memref<5x32x32xf32, #tpu.memory_space<vmem>>, vector<1x32x32xf32>
    %155 = vector.shape_cast %154 : vector<1x32x32xf32> to vector<32x32xf32>
    %cst_128 = arith.constant dense<0.000000e+00> : vector<32x128xf32>
    %156 = tpu.matmul %155, %153, %cst_128 {dimension_numbers = #tpu.dot_dimension_numbers<[1], [0], [0], [1], [0, 0, 1, 1], [], []>} : vector<32x32xf32>, vector<32x128xf32>, vector<32x128xf32> -> vector<32x128xf32>
    %157 = arith.addf %150, %156 : vector<32x128xf32>
    %c2_129 = arith.constant 2 : index
    %c0_130 = arith.constant 0 : index
    %c0_131 = arith.constant 0 : index
    %158 = vector.load %arg4[%c2_129, %c0_130, %c0_131] : memref<5x128x128xf32, #tpu.memory_space<vmem>>, vector<1x128x128xf32>
    %159 = vector.shape_cast %158 : vector<1x128x128xf32> to vector<128x128xf32>
    %cst_132 = arith.constant dense<0.000000e+00> : vector<32x128xf32>
    %160 = tpu.matmul %142, %159, %cst_132 {dimension_numbers = #tpu.dot_dimension_numbers<[1], [0], [0], [1], [0, 0, 1, 1], [], []>} : vector<32x128xf32>, vector<128x128xf32>, vector<32x128xf32> -> vector<32x128xf32>
    %c2_133 = arith.constant 2 : index
    %c0_134 = arith.constant 0 : index
    %c0_135 = arith.constant 0 : index
    %161 = vector.load %arg1[%c2_133, %c0_134, %c0_135] : memref<5x32x32xf32, #tpu.memory_space<vmem>>, vector<1x32x32xf32>
    %162 = vector.shape_cast %161 : vector<1x32x32xf32> to vector<32x32xf32>
    %cst_136 = arith.constant dense<0.000000e+00> : vector<32x128xf32>
    %163 = tpu.matmul %162, %160, %cst_136 {dimension_numbers = #tpu.dot_dimension_numbers<[1], [0], [0], [1], [0, 0, 1, 1], [], []>} : vector<32x32xf32>, vector<32x128xf32>, vector<32x128xf32> -> vector<32x128xf32>
    %164 = arith.addf %157, %163 : vector<32x128xf32>
    %c3_137 = arith.constant 3 : index
    %c0_138 = arith.constant 0 : index
    %c0_139 = arith.constant 0 : index
    %165 = vector.load %arg4[%c3_137, %c0_138, %c0_139] : memref<5x128x128xf32, #tpu.memory_space<vmem>>, vector<1x128x128xf32>
    %166 = vector.shape_cast %165 : vector<1x128x128xf32> to vector<128x128xf32>
    %cst_140 = arith.constant dense<0.000000e+00> : vector<32x128xf32>
    %167 = tpu.matmul %142, %166, %cst_140 {dimension_numbers = #tpu.dot_dimension_numbers<[1], [0], [0], [1], [0, 0, 1, 1], [], []>} : vector<32x128xf32>, vector<128x128xf32>, vector<32x128xf32> -> vector<32x128xf32>
    %c3_141 = arith.constant 3 : index
    %c0_142 = arith.constant 0 : index
    %c0_143 = arith.constant 0 : index
    %168 = vector.load %arg1[%c3_141, %c0_142, %c0_143] : memref<5x32x32xf32, #tpu.memory_space<vmem>>, vector<1x32x32xf32>
    %169 = vector.shape_cast %168 : vector<1x32x32xf32> to vector<32x32xf32>
    %cst_144 = arith.constant dense<0.000000e+00> : vector<32x128xf32>
    %170 = tpu.matmul %169, %167, %cst_144 {dimension_numbers = #tpu.dot_dimension_numbers<[1], [0], [0], [1], [0, 0, 1, 1], [], []>} : vector<32x32xf32>, vector<32x128xf32>, vector<32x128xf32> -> vector<32x128xf32>
    %171 = arith.addf %164, %170 : vector<32x128xf32>
    %c4_145 = arith.constant 4 : index
    %c0_146 = arith.constant 0 : index
    %c0_147 = arith.constant 0 : index
    %172 = vector.load %arg4[%c4_145, %c0_146, %c0_147] : memref<5x128x128xf32, #tpu.memory_space<vmem>>, vector<1x128x128xf32>
    %173 = vector.shape_cast %172 : vector<1x128x128xf32> to vector<128x128xf32>
    %cst_148 = arith.constant dense<0.000000e+00> : vector<32x128xf32>
    %174 = tpu.matmul %142, %173, %cst_148 {dimension_numbers = #tpu.dot_dimension_numbers<[1], [0], [0], [1], [0, 0, 1, 1], [], []>} : vector<32x128xf32>, vector<128x128xf32>, vector<32x128xf32> -> vector<32x128xf32>
    %c4_149 = arith.constant 4 : index
    %c0_150 = arith.constant 0 : index
    %c0_151 = arith.constant 0 : index
    %175 = vector.load %arg1[%c4_149, %c0_150, %c0_151] : memref<5x32x32xf32, #tpu.memory_space<vmem>>, vector<1x32x32xf32>
    %176 = vector.shape_cast %175 : vector<1x32x32xf32> to vector<32x32xf32>
    %cst_152 = arith.constant dense<0.000000e+00> : vector<32x128xf32>
    %177 = tpu.matmul %176, %174, %cst_152 {dimension_numbers = #tpu.dot_dimension_numbers<[1], [0], [0], [1], [0, 0, 1, 1], [], []>} : vector<32x32xf32>, vector<32x128xf32>, vector<32x128xf32> -> vector<32x128xf32>
    %178 = arith.addf %171, %177 : vector<32x128xf32>
    %c0_153 = arith.constant 0 : index
    %c0_154 = arith.constant 0 : index
    %179 = vector.load %arg7[%c0_153, %c0_154] : memref<128x8xf32, #tpu.memory_space<vmem>>, vector<128x8xf32>
    %c0_155 = arith.constant 0 : index
    %c0_156 = arith.constant 0 : index
    %180 = vector.load %arg8[%c0_155, %c0_156] : memref<8x128xf32, #tpu.memory_space<vmem>>, vector<8x128xf32>
    %181 = vector.extract_strided_slice %144 {offsets = [0, 0], sizes = [1, 128], strides = [1, 1]} : vector<3x128xf32> to vector<1x128xf32>
    %182 = vector.extract_strided_slice %144 {offsets = [1, 0], sizes = [1, 128], strides = [1, 1]} : vector<3x128xf32> to vector<1x128xf32>
    %183 = vector.extract_strided_slice %144 {offsets = [2, 0], sizes = [1, 128], strides = [1, 1]} : vector<3x128xf32> to vector<1x128xf32>
    %184 = vector.broadcast %181 : vector<1x128xf32> to vector<32x128xf32>
    %185 = arith.addf %178, %184 : vector<32x128xf32>
    %cst_157 = arith.constant dense<0.000000e+00> : vector<128xf32>
    %186 = vector.multi_reduction <add>, %185, %cst_157 [0] : vector<32x128xf32> to vector<128xf32>
    %187 = vector.shape_cast %186 : vector<128xf32> to vector<1x128xf32>
    %cst_158 = arith.constant dense<0.000000e+00> : vector<1x8xf32>
    %188 = tpu.matmul %187, %179, %cst_158 {dimension_numbers = #tpu.dot_dimension_numbers<[1], [0], [0], [1], [0, 0, 1, 1], [], []>} : vector<1x128xf32>, vector<128x8xf32>, vector<1x8xf32> -> vector<1x8xf32>
    %189 = arith.mulf %185, %185 : vector<32x128xf32>
    %cst_159 = arith.constant dense<0.000000e+00> : vector<128xf32>
    %190 = vector.multi_reduction <add>, %189, %cst_159 [0] : vector<32x128xf32> to vector<128xf32>
    %191 = vector.shape_cast %190 : vector<128xf32> to vector<1x128xf32>
    %cst_160 = arith.constant dense<0.000000e+00> : vector<1x8xf32>
    %192 = tpu.matmul %191, %179, %cst_160 {dimension_numbers = #tpu.dot_dimension_numbers<[1], [0], [0], [1], [0, 0, 1, 1], [], []>} : vector<1x128xf32>, vector<128x8xf32>, vector<1x8xf32> -> vector<1x8xf32>
    %cst_161 = arith.constant 0.001953125 : f32
    %193 = vector.broadcast %cst_161 : f32 to vector<1x8xf32>
    %194 = arith.mulf %188, %193 : vector<1x8xf32>
    %cst_162 = arith.constant 0.001953125 : f32
    %195 = vector.broadcast %cst_162 : f32 to vector<1x8xf32>
    %196 = arith.mulf %192, %195 : vector<1x8xf32>
    %197 = arith.mulf %194, %194 : vector<1x8xf32>
    %198 = arith.subf %196, %197 : vector<1x8xf32>
    %cst_163 = arith.constant 9.99999974E-6 : f32
    %199 = vector.broadcast %cst_163 : f32 to vector<1x8xf32>
    %200 = arith.addf %198, %199 : vector<1x8xf32>
    %201 = math.rsqrt %200 : vector<1x8xf32>
    %cst_164 = arith.constant dense<0.000000e+00> : vector<1x128xf32>
    %202 = tpu.matmul %194, %180, %cst_164 {dimension_numbers = #tpu.dot_dimension_numbers<[1], [0], [0], [1], [0, 0, 1, 1], [], []>} : vector<1x8xf32>, vector<8x128xf32>, vector<1x128xf32> -> vector<1x128xf32>
    %cst_165 = arith.constant dense<0.000000e+00> : vector<1x128xf32>
    %203 = tpu.matmul %201, %180, %cst_165 {dimension_numbers = #tpu.dot_dimension_numbers<[1], [0], [0], [1], [0, 0, 1, 1], [], []>} : vector<1x8xf32>, vector<8x128xf32>, vector<1x128xf32> -> vector<1x128xf32>
    %204 = vector.broadcast %202 : vector<1x128xf32> to vector<32x128xf32>
    %205 = arith.subf %185, %204 : vector<32x128xf32>
    %206 = vector.broadcast %203 : vector<1x128xf32> to vector<32x128xf32>
    %207 = arith.mulf %205, %206 : vector<32x128xf32>
    %208 = vector.broadcast %182 : vector<1x128xf32> to vector<32x128xf32>
    %209 = arith.mulf %207, %208 : vector<32x128xf32>
    %210 = vector.broadcast %183 : vector<1x128xf32> to vector<32x128xf32>
    %211 = arith.addf %209, %210 : vector<32x128xf32>
    %cst_166 = arith.constant 0.000000e+00 : f32
    %212 = vector.broadcast %cst_166 : f32 to vector<32x128xf32>
    %213 = arith.maximumf %211, %212 : vector<32x128xf32>
    %c3_167 = arith.constant 3 : index
    %c0_168 = arith.constant 0 : index
    %c0_169 = arith.constant 0 : index
    %214 = vector.load %arg6[%c3_167, %c0_168, %c0_169] : memref<4x3x128xf32, #tpu.memory_space<vmem>>, vector<1x3x128xf32>
    %215 = vector.shape_cast %214 : vector<1x3x128xf32> to vector<3x128xf32>
    %c0_170 = arith.constant 0 : index
    %c0_171 = arith.constant 0 : index
    %c0_172 = arith.constant 0 : index
    %216 = vector.load %arg5[%c0_170, %c0_171, %c0_172] : memref<5x128x128xf32, #tpu.memory_space<vmem>>, vector<1x128x128xf32>
    %217 = vector.shape_cast %216 : vector<1x128x128xf32> to vector<128x128xf32>
    %cst_173 = arith.constant dense<0.000000e+00> : vector<32x128xf32>
    %218 = tpu.matmul %213, %217, %cst_173 {dimension_numbers = #tpu.dot_dimension_numbers<[1], [0], [0], [1], [0, 0, 1, 1], [], []>} : vector<32x128xf32>, vector<128x128xf32>, vector<32x128xf32> -> vector<32x128xf32>
    %c0_174 = arith.constant 0 : index
    %c0_175 = arith.constant 0 : index
    %c0_176 = arith.constant 0 : index
    %219 = vector.load %arg1[%c0_174, %c0_175, %c0_176] : memref<5x32x32xf32, #tpu.memory_space<vmem>>, vector<1x32x32xf32>
    %220 = vector.shape_cast %219 : vector<1x32x32xf32> to vector<32x32xf32>
    %cst_177 = arith.constant dense<0.000000e+00> : vector<32x128xf32>
    %221 = tpu.matmul %220, %218, %cst_177 {dimension_numbers = #tpu.dot_dimension_numbers<[1], [0], [0], [1], [0, 0, 1, 1], [], []>} : vector<32x32xf32>, vector<32x128xf32>, vector<32x128xf32> -> vector<32x128xf32>
    %c1_178 = arith.constant 1 : index
    %c0_179 = arith.constant 0 : index
    %c0_180 = arith.constant 0 : index
    %222 = vector.load %arg5[%c1_178, %c0_179, %c0_180] : memref<5x128x128xf32, #tpu.memory_space<vmem>>, vector<1x128x128xf32>
    %223 = vector.shape_cast %222 : vector<1x128x128xf32> to vector<128x128xf32>
    %cst_181 = arith.constant dense<0.000000e+00> : vector<32x128xf32>
    %224 = tpu.matmul %213, %223, %cst_181 {dimension_numbers = #tpu.dot_dimension_numbers<[1], [0], [0], [1], [0, 0, 1, 1], [], []>} : vector<32x128xf32>, vector<128x128xf32>, vector<32x128xf32> -> vector<32x128xf32>
    %c1_182 = arith.constant 1 : index
    %c0_183 = arith.constant 0 : index
    %c0_184 = arith.constant 0 : index
    %225 = vector.load %arg1[%c1_182, %c0_183, %c0_184] : memref<5x32x32xf32, #tpu.memory_space<vmem>>, vector<1x32x32xf32>
    %226 = vector.shape_cast %225 : vector<1x32x32xf32> to vector<32x32xf32>
    %cst_185 = arith.constant dense<0.000000e+00> : vector<32x128xf32>
    %227 = tpu.matmul %226, %224, %cst_185 {dimension_numbers = #tpu.dot_dimension_numbers<[1], [0], [0], [1], [0, 0, 1, 1], [], []>} : vector<32x32xf32>, vector<32x128xf32>, vector<32x128xf32> -> vector<32x128xf32>
    %228 = arith.addf %221, %227 : vector<32x128xf32>
    %c2_186 = arith.constant 2 : index
    %c0_187 = arith.constant 0 : index
    %c0_188 = arith.constant 0 : index
    %229 = vector.load %arg5[%c2_186, %c0_187, %c0_188] : memref<5x128x128xf32, #tpu.memory_space<vmem>>, vector<1x128x128xf32>
    %230 = vector.shape_cast %229 : vector<1x128x128xf32> to vector<128x128xf32>
    %cst_189 = arith.constant dense<0.000000e+00> : vector<32x128xf32>
    %231 = tpu.matmul %213, %230, %cst_189 {dimension_numbers = #tpu.dot_dimension_numbers<[1], [0], [0], [1], [0, 0, 1, 1], [], []>} : vector<32x128xf32>, vector<128x128xf32>, vector<32x128xf32> -> vector<32x128xf32>
    %c2_190 = arith.constant 2 : index
    %c0_191 = arith.constant 0 : index
    %c0_192 = arith.constant 0 : index
    %232 = vector.load %arg1[%c2_190, %c0_191, %c0_192] : memref<5x32x32xf32, #tpu.memory_space<vmem>>, vector<1x32x32xf32>
    %233 = vector.shape_cast %232 : vector<1x32x32xf32> to vector<32x32xf32>
    %cst_193 = arith.constant dense<0.000000e+00> : vector<32x128xf32>
    %234 = tpu.matmul %233, %231, %cst_193 {dimension_numbers = #tpu.dot_dimension_numbers<[1], [0], [0], [1], [0, 0, 1, 1], [], []>} : vector<32x32xf32>, vector<32x128xf32>, vector<32x128xf32> -> vector<32x128xf32>
    %235 = arith.addf %228, %234 : vector<32x128xf32>
    %c3_194 = arith.constant 3 : index
    %c0_195 = arith.constant 0 : index
    %c0_196 = arith.constant 0 : index
    %236 = vector.load %arg5[%c3_194, %c0_195, %c0_196] : memref<5x128x128xf32, #tpu.memory_space<vmem>>, vector<1x128x128xf32>
    %237 = vector.shape_cast %236 : vector<1x128x128xf32> to vector<128x128xf32>
    %cst_197 = arith.constant dense<0.000000e+00> : vector<32x128xf32>
    %238 = tpu.matmul %213, %237, %cst_197 {dimension_numbers = #tpu.dot_dimension_numbers<[1], [0], [0], [1], [0, 0, 1, 1], [], []>} : vector<32x128xf32>, vector<128x128xf32>, vector<32x128xf32> -> vector<32x128xf32>
    %c3_198 = arith.constant 3 : index
    %c0_199 = arith.constant 0 : index
    %c0_200 = arith.constant 0 : index
    %239 = vector.load %arg1[%c3_198, %c0_199, %c0_200] : memref<5x32x32xf32, #tpu.memory_space<vmem>>, vector<1x32x32xf32>
    %240 = vector.shape_cast %239 : vector<1x32x32xf32> to vector<32x32xf32>
    %cst_201 = arith.constant dense<0.000000e+00> : vector<32x128xf32>
    %241 = tpu.matmul %240, %238, %cst_201 {dimension_numbers = #tpu.dot_dimension_numbers<[1], [0], [0], [1], [0, 0, 1, 1], [], []>} : vector<32x32xf32>, vector<32x128xf32>, vector<32x128xf32> -> vector<32x128xf32>
    %242 = arith.addf %235, %241 : vector<32x128xf32>
    %c4_202 = arith.constant 4 : index
    %c0_203 = arith.constant 0 : index
    %c0_204 = arith.constant 0 : index
    %243 = vector.load %arg5[%c4_202, %c0_203, %c0_204] : memref<5x128x128xf32, #tpu.memory_space<vmem>>, vector<1x128x128xf32>
    %244 = vector.shape_cast %243 : vector<1x128x128xf32> to vector<128x128xf32>
    %cst_205 = arith.constant dense<0.000000e+00> : vector<32x128xf32>
    %245 = tpu.matmul %213, %244, %cst_205 {dimension_numbers = #tpu.dot_dimension_numbers<[1], [0], [0], [1], [0, 0, 1, 1], [], []>} : vector<32x128xf32>, vector<128x128xf32>, vector<32x128xf32> -> vector<32x128xf32>
    %c4_206 = arith.constant 4 : index
    %c0_207 = arith.constant 0 : index
    %c0_208 = arith.constant 0 : index
    %246 = vector.load %arg1[%c4_206, %c0_207, %c0_208] : memref<5x32x32xf32, #tpu.memory_space<vmem>>, vector<1x32x32xf32>
    %247 = vector.shape_cast %246 : vector<1x32x32xf32> to vector<32x32xf32>
    %cst_209 = arith.constant dense<0.000000e+00> : vector<32x128xf32>
    %248 = tpu.matmul %247, %245, %cst_209 {dimension_numbers = #tpu.dot_dimension_numbers<[1], [0], [0], [1], [0, 0, 1, 1], [], []>} : vector<32x32xf32>, vector<32x128xf32>, vector<32x128xf32> -> vector<32x128xf32>
    %249 = arith.addf %242, %248 : vector<32x128xf32>
    %c0_210 = arith.constant 0 : index
    %c0_211 = arith.constant 0 : index
    %250 = vector.load %arg7[%c0_210, %c0_211] : memref<128x8xf32, #tpu.memory_space<vmem>>, vector<128x8xf32>
    %c0_212 = arith.constant 0 : index
    %c0_213 = arith.constant 0 : index
    %251 = vector.load %arg8[%c0_212, %c0_213] : memref<8x128xf32, #tpu.memory_space<vmem>>, vector<8x128xf32>
    %252 = vector.extract_strided_slice %215 {offsets = [0, 0], sizes = [1, 128], strides = [1, 1]} : vector<3x128xf32> to vector<1x128xf32>
    %253 = vector.extract_strided_slice %215 {offsets = [1, 0], sizes = [1, 128], strides = [1, 1]} : vector<3x128xf32> to vector<1x128xf32>
    %254 = vector.extract_strided_slice %215 {offsets = [2, 0], sizes = [1, 128], strides = [1, 1]} : vector<3x128xf32> to vector<1x128xf32>
    %255 = vector.broadcast %252 : vector<1x128xf32> to vector<32x128xf32>
    %256 = arith.addf %249, %255 : vector<32x128xf32>
    %cst_214 = arith.constant dense<0.000000e+00> : vector<128xf32>
    %257 = vector.multi_reduction <add>, %256, %cst_214 [0] : vector<32x128xf32> to vector<128xf32>
    %258 = vector.shape_cast %257 : vector<128xf32> to vector<1x128xf32>
    %cst_215 = arith.constant dense<0.000000e+00> : vector<1x8xf32>
    %259 = tpu.matmul %258, %250, %cst_215 {dimension_numbers = #tpu.dot_dimension_numbers<[1], [0], [0], [1], [0, 0, 1, 1], [], []>} : vector<1x128xf32>, vector<128x8xf32>, vector<1x8xf32> -> vector<1x8xf32>
    %260 = arith.mulf %256, %256 : vector<32x128xf32>
    %cst_216 = arith.constant dense<0.000000e+00> : vector<128xf32>
    %261 = vector.multi_reduction <add>, %260, %cst_216 [0] : vector<32x128xf32> to vector<128xf32>
    %262 = vector.shape_cast %261 : vector<128xf32> to vector<1x128xf32>
    %cst_217 = arith.constant dense<0.000000e+00> : vector<1x8xf32>
    %263 = tpu.matmul %262, %250, %cst_217 {dimension_numbers = #tpu.dot_dimension_numbers<[1], [0], [0], [1], [0, 0, 1, 1], [], []>} : vector<1x128xf32>, vector<128x8xf32>, vector<1x8xf32> -> vector<1x8xf32>
    %cst_218 = arith.constant 0.001953125 : f32
    %264 = vector.broadcast %cst_218 : f32 to vector<1x8xf32>
    %265 = arith.mulf %259, %264 : vector<1x8xf32>
    %cst_219 = arith.constant 0.001953125 : f32
    %266 = vector.broadcast %cst_219 : f32 to vector<1x8xf32>
    %267 = arith.mulf %263, %266 : vector<1x8xf32>
    %268 = arith.mulf %265, %265 : vector<1x8xf32>
    %269 = arith.subf %267, %268 : vector<1x8xf32>
    %cst_220 = arith.constant 9.99999974E-6 : f32
    %270 = vector.broadcast %cst_220 : f32 to vector<1x8xf32>
    %271 = arith.addf %269, %270 : vector<1x8xf32>
    %272 = math.rsqrt %271 : vector<1x8xf32>
    %cst_221 = arith.constant dense<0.000000e+00> : vector<1x128xf32>
    %273 = tpu.matmul %265, %251, %cst_221 {dimension_numbers = #tpu.dot_dimension_numbers<[1], [0], [0], [1], [0, 0, 1, 1], [], []>} : vector<1x8xf32>, vector<8x128xf32>, vector<1x128xf32> -> vector<1x128xf32>
    %cst_222 = arith.constant dense<0.000000e+00> : vector<1x128xf32>
    %274 = tpu.matmul %272, %251, %cst_222 {dimension_numbers = #tpu.dot_dimension_numbers<[1], [0], [0], [1], [0, 0, 1, 1], [], []>} : vector<1x8xf32>, vector<8x128xf32>, vector<1x128xf32> -> vector<1x128xf32>
    %275 = vector.broadcast %273 : vector<1x128xf32> to vector<32x128xf32>
    %276 = arith.subf %256, %275 : vector<32x128xf32>
    %277 = vector.broadcast %274 : vector<1x128xf32> to vector<32x128xf32>
    %278 = arith.mulf %276, %277 : vector<32x128xf32>
    %279 = vector.broadcast %253 : vector<1x128xf32> to vector<32x128xf32>
    %280 = arith.mulf %278, %279 : vector<32x128xf32>
    %281 = vector.broadcast %254 : vector<1x128xf32> to vector<32x128xf32>
    %282 = arith.addf %280, %281 : vector<32x128xf32>
    %cst_223 = arith.constant 0.000000e+00 : f32
    %283 = vector.broadcast %cst_223 : f32 to vector<32x128xf32>
    %284 = arith.maximumf %282, %283 : vector<32x128xf32>
    %c0_224 = arith.constant 0 : index
    %c0_225 = arith.constant 0 : index
    %c0_226 = arith.constant 0 : index
    %285 = vector.load %arg9[%c0_224, %c0_225, %c0_226] : memref<5x128x64xf32, #tpu.memory_space<vmem>>, vector<1x128x64xf32>
    %286 = vector.shape_cast %285 : vector<1x128x64xf32> to vector<128x64xf32>
    %cst_227 = arith.constant dense<0.000000e+00> : vector<32x64xf32>
    %287 = tpu.matmul %284, %286, %cst_227 {dimension_numbers = #tpu.dot_dimension_numbers<[1], [0], [0], [1], [0, 0, 1, 1], [], []>} : vector<32x128xf32>, vector<128x64xf32>, vector<32x64xf32> -> vector<32x64xf32>
    %c0_228 = arith.constant 0 : index
    %c0_229 = arith.constant 0 : index
    %c0_230 = arith.constant 0 : index
    %288 = vector.load %arg1[%c0_228, %c0_229, %c0_230] : memref<5x32x32xf32, #tpu.memory_space<vmem>>, vector<1x32x32xf32>
    %289 = vector.shape_cast %288 : vector<1x32x32xf32> to vector<32x32xf32>
    %cst_231 = arith.constant dense<0.000000e+00> : vector<32x64xf32>
    %290 = tpu.matmul %289, %287, %cst_231 {dimension_numbers = #tpu.dot_dimension_numbers<[1], [0], [0], [1], [0, 0, 1, 1], [], []>} : vector<32x32xf32>, vector<32x64xf32>, vector<32x64xf32> -> vector<32x64xf32>
    %c1_232 = arith.constant 1 : index
    %c0_233 = arith.constant 0 : index
    %c0_234 = arith.constant 0 : index
    %291 = vector.load %arg9[%c1_232, %c0_233, %c0_234] : memref<5x128x64xf32, #tpu.memory_space<vmem>>, vector<1x128x64xf32>
    %292 = vector.shape_cast %291 : vector<1x128x64xf32> to vector<128x64xf32>
    %cst_235 = arith.constant dense<0.000000e+00> : vector<32x64xf32>
    %293 = tpu.matmul %284, %292, %cst_235 {dimension_numbers = #tpu.dot_dimension_numbers<[1], [0], [0], [1], [0, 0, 1, 1], [], []>} : vector<32x128xf32>, vector<128x64xf32>, vector<32x64xf32> -> vector<32x64xf32>
    %c1_236 = arith.constant 1 : index
    %c0_237 = arith.constant 0 : index
    %c0_238 = arith.constant 0 : index
    %294 = vector.load %arg1[%c1_236, %c0_237, %c0_238] : memref<5x32x32xf32, #tpu.memory_space<vmem>>, vector<1x32x32xf32>
    %295 = vector.shape_cast %294 : vector<1x32x32xf32> to vector<32x32xf32>
    %cst_239 = arith.constant dense<0.000000e+00> : vector<32x64xf32>
    %296 = tpu.matmul %295, %293, %cst_239 {dimension_numbers = #tpu.dot_dimension_numbers<[1], [0], [0], [1], [0, 0, 1, 1], [], []>} : vector<32x32xf32>, vector<32x64xf32>, vector<32x64xf32> -> vector<32x64xf32>
    %297 = arith.addf %290, %296 : vector<32x64xf32>
    %c2_240 = arith.constant 2 : index
    %c0_241 = arith.constant 0 : index
    %c0_242 = arith.constant 0 : index
    %298 = vector.load %arg9[%c2_240, %c0_241, %c0_242] : memref<5x128x64xf32, #tpu.memory_space<vmem>>, vector<1x128x64xf32>
    %299 = vector.shape_cast %298 : vector<1x128x64xf32> to vector<128x64xf32>
    %cst_243 = arith.constant dense<0.000000e+00> : vector<32x64xf32>
    %300 = tpu.matmul %284, %299, %cst_243 {dimension_numbers = #tpu.dot_dimension_numbers<[1], [0], [0], [1], [0, 0, 1, 1], [], []>} : vector<32x128xf32>, vector<128x64xf32>, vector<32x64xf32> -> vector<32x64xf32>
    %c2_244 = arith.constant 2 : index
    %c0_245 = arith.constant 0 : index
    %c0_246 = arith.constant 0 : index
    %301 = vector.load %arg1[%c2_244, %c0_245, %c0_246] : memref<5x32x32xf32, #tpu.memory_space<vmem>>, vector<1x32x32xf32>
    %302 = vector.shape_cast %301 : vector<1x32x32xf32> to vector<32x32xf32>
    %cst_247 = arith.constant dense<0.000000e+00> : vector<32x64xf32>
    %303 = tpu.matmul %302, %300, %cst_247 {dimension_numbers = #tpu.dot_dimension_numbers<[1], [0], [0], [1], [0, 0, 1, 1], [], []>} : vector<32x32xf32>, vector<32x64xf32>, vector<32x64xf32> -> vector<32x64xf32>
    %304 = arith.addf %297, %303 : vector<32x64xf32>
    %c3_248 = arith.constant 3 : index
    %c0_249 = arith.constant 0 : index
    %c0_250 = arith.constant 0 : index
    %305 = vector.load %arg9[%c3_248, %c0_249, %c0_250] : memref<5x128x64xf32, #tpu.memory_space<vmem>>, vector<1x128x64xf32>
    %306 = vector.shape_cast %305 : vector<1x128x64xf32> to vector<128x64xf32>
    %cst_251 = arith.constant dense<0.000000e+00> : vector<32x64xf32>
    %307 = tpu.matmul %284, %306, %cst_251 {dimension_numbers = #tpu.dot_dimension_numbers<[1], [0], [0], [1], [0, 0, 1, 1], [], []>} : vector<32x128xf32>, vector<128x64xf32>, vector<32x64xf32> -> vector<32x64xf32>
    %c3_252 = arith.constant 3 : index
    %c0_253 = arith.constant 0 : index
    %c0_254 = arith.constant 0 : index
    %308 = vector.load %arg1[%c3_252, %c0_253, %c0_254] : memref<5x32x32xf32, #tpu.memory_space<vmem>>, vector<1x32x32xf32>
    %309 = vector.shape_cast %308 : vector<1x32x32xf32> to vector<32x32xf32>
    %cst_255 = arith.constant dense<0.000000e+00> : vector<32x64xf32>
    %310 = tpu.matmul %309, %307, %cst_255 {dimension_numbers = #tpu.dot_dimension_numbers<[1], [0], [0], [1], [0, 0, 1, 1], [], []>} : vector<32x32xf32>, vector<32x64xf32>, vector<32x64xf32> -> vector<32x64xf32>
    %311 = arith.addf %304, %310 : vector<32x64xf32>
    %c4_256 = arith.constant 4 : index
    %c0_257 = arith.constant 0 : index
    %c0_258 = arith.constant 0 : index
    %312 = vector.load %arg9[%c4_256, %c0_257, %c0_258] : memref<5x128x64xf32, #tpu.memory_space<vmem>>, vector<1x128x64xf32>
    %313 = vector.shape_cast %312 : vector<1x128x64xf32> to vector<128x64xf32>
    %cst_259 = arith.constant dense<0.000000e+00> : vector<32x64xf32>
    %314 = tpu.matmul %284, %313, %cst_259 {dimension_numbers = #tpu.dot_dimension_numbers<[1], [0], [0], [1], [0, 0, 1, 1], [], []>} : vector<32x128xf32>, vector<128x64xf32>, vector<32x64xf32> -> vector<32x64xf32>
    %c4_260 = arith.constant 4 : index
    %c0_261 = arith.constant 0 : index
    %c0_262 = arith.constant 0 : index
    %315 = vector.load %arg1[%c4_260, %c0_261, %c0_262] : memref<5x32x32xf32, #tpu.memory_space<vmem>>, vector<1x32x32xf32>
    %316 = vector.shape_cast %315 : vector<1x32x32xf32> to vector<32x32xf32>
    %cst_263 = arith.constant dense<0.000000e+00> : vector<32x64xf32>
    %317 = tpu.matmul %316, %314, %cst_263 {dimension_numbers = #tpu.dot_dimension_numbers<[1], [0], [0], [1], [0, 0, 1, 1], [], []>} : vector<32x32xf32>, vector<32x64xf32>, vector<32x64xf32> -> vector<32x64xf32>
    %318 = arith.addf %311, %317 : vector<32x64xf32>
    %c0_264 = arith.constant 0 : index
    %c0_265 = arith.constant 0 : index
    %319 = vector.load %arg10[%c0_264, %c0_265] : memref<1x64xf32, #tpu.memory_space<vmem>>, vector<1x64xf32>
    %320 = vector.broadcast %319 : vector<1x64xf32> to vector<32x64xf32>
    %321 = arith.addf %318, %320 : vector<32x64xf32>
    %c0_266 = arith.constant 0 : index
    %c0_267 = arith.constant 0 : index
    %322 = vector.load %arg11[%c0_266, %c0_267] : memref<32x32xf32, #tpu.memory_space<vmem>>, vector<32x32xf32>
    %cst_268 = arith.constant dense<0.000000e+00> : vector<32x64xf32>
    %323 = tpu.matmul %322, %321, %cst_268 {dimension_numbers = #tpu.dot_dimension_numbers<[1], [0], [0], [1], [0, 0, 1, 1], [], []>} : vector<32x32xf32>, vector<32x64xf32>, vector<32x64xf32> -> vector<32x64xf32>
    %c0_269 = arith.constant 0 : index
    %c0_270 = arith.constant 0 : index
    %324 = vector.load %arg17[%c0_269, %c0_270] : memref<3x192xf32, #tpu.memory_space<vmem>>, vector<3x192xf32>
    %c0_271 = arith.constant 0 : index
    %c0_272 = arith.constant 0 : index
    %c0_273 = arith.constant 0 : index
    %325 = vector.load %arg15[%c0_271, %c0_272, %c0_273] : memref<5x64x192xf32, #tpu.memory_space<vmem>>, vector<1x64x192xf32>
    %326 = vector.shape_cast %325 : vector<1x64x192xf32> to vector<64x192xf32>
    %cst_274 = arith.constant dense<0.000000e+00> : vector<32x192xf32>
    %327 = tpu.matmul %323, %326, %cst_274 {dimension_numbers = #tpu.dot_dimension_numbers<[1], [0], [0], [1], [0, 0, 1, 1], [], []>} : vector<32x64xf32>, vector<64x192xf32>, vector<32x192xf32> -> vector<32x192xf32>
    %c0_275 = arith.constant 0 : index
    %c0_276 = arith.constant 0 : index
    %c0_277 = arith.constant 0 : index
    %328 = vector.load %arg16[%c0_275, %c0_276, %c0_277] : memref<5x64x192xf32, #tpu.memory_space<vmem>>, vector<1x64x192xf32>
    %329 = vector.shape_cast %328 : vector<1x64x192xf32> to vector<64x192xf32>
    %cst_278 = arith.constant dense<0.000000e+00> : vector<32x192xf32>
    %330 = tpu.matmul %0, %329, %cst_278 {dimension_numbers = #tpu.dot_dimension_numbers<[1], [0], [0], [1], [0, 0, 1, 1], [], []>} : vector<32x64xf32>, vector<64x192xf32>, vector<32x192xf32> -> vector<32x192xf32>
    %331 = arith.addf %327, %330 : vector<32x192xf32>
    %c0_279 = arith.constant 0 : index
    %c0_280 = arith.constant 0 : index
    %c0_281 = arith.constant 0 : index
    %332 = vector.load %arg14[%c0_279, %c0_280, %c0_281] : memref<5x24x32xf32, #tpu.memory_space<vmem>>, vector<1x24x32xf32>
    %333 = vector.shape_cast %332 : vector<1x24x32xf32> to vector<24x32xf32>
    %cst_282 = arith.constant dense<0.000000e+00> : vector<24x192xf32>
    %334 = tpu.matmul %333, %331, %cst_282 {dimension_numbers = #tpu.dot_dimension_numbers<[1], [0], [0], [1], [0, 0, 1, 1], [], []>} : vector<24x32xf32>, vector<32x192xf32>, vector<24x192xf32> -> vector<24x192xf32>
    %c1_283 = arith.constant 1 : index
    %c0_284 = arith.constant 0 : index
    %c0_285 = arith.constant 0 : index
    %335 = vector.load %arg15[%c1_283, %c0_284, %c0_285] : memref<5x64x192xf32, #tpu.memory_space<vmem>>, vector<1x64x192xf32>
    %336 = vector.shape_cast %335 : vector<1x64x192xf32> to vector<64x192xf32>
    %cst_286 = arith.constant dense<0.000000e+00> : vector<32x192xf32>
    %337 = tpu.matmul %323, %336, %cst_286 {dimension_numbers = #tpu.dot_dimension_numbers<[1], [0], [0], [1], [0, 0, 1, 1], [], []>} : vector<32x64xf32>, vector<64x192xf32>, vector<32x192xf32> -> vector<32x192xf32>
    %c1_287 = arith.constant 1 : index
    %c0_288 = arith.constant 0 : index
    %c0_289 = arith.constant 0 : index
    %338 = vector.load %arg16[%c1_287, %c0_288, %c0_289] : memref<5x64x192xf32, #tpu.memory_space<vmem>>, vector<1x64x192xf32>
    %339 = vector.shape_cast %338 : vector<1x64x192xf32> to vector<64x192xf32>
    %cst_290 = arith.constant dense<0.000000e+00> : vector<32x192xf32>
    %340 = tpu.matmul %0, %339, %cst_290 {dimension_numbers = #tpu.dot_dimension_numbers<[1], [0], [0], [1], [0, 0, 1, 1], [], []>} : vector<32x64xf32>, vector<64x192xf32>, vector<32x192xf32> -> vector<32x192xf32>
    %341 = arith.addf %337, %340 : vector<32x192xf32>
    %c1_291 = arith.constant 1 : index
    %c0_292 = arith.constant 0 : index
    %c0_293 = arith.constant 0 : index
    %342 = vector.load %arg14[%c1_291, %c0_292, %c0_293] : memref<5x24x32xf32, #tpu.memory_space<vmem>>, vector<1x24x32xf32>
    %343 = vector.shape_cast %342 : vector<1x24x32xf32> to vector<24x32xf32>
    %cst_294 = arith.constant dense<0.000000e+00> : vector<24x192xf32>
    %344 = tpu.matmul %343, %341, %cst_294 {dimension_numbers = #tpu.dot_dimension_numbers<[1], [0], [0], [1], [0, 0, 1, 1], [], []>} : vector<24x32xf32>, vector<32x192xf32>, vector<24x192xf32> -> vector<24x192xf32>
    %345 = arith.addf %334, %344 : vector<24x192xf32>
    %c2_295 = arith.constant 2 : index
    %c0_296 = arith.constant 0 : index
    %c0_297 = arith.constant 0 : index
    %346 = vector.load %arg15[%c2_295, %c0_296, %c0_297] : memref<5x64x192xf32, #tpu.memory_space<vmem>>, vector<1x64x192xf32>
    %347 = vector.shape_cast %346 : vector<1x64x192xf32> to vector<64x192xf32>
    %cst_298 = arith.constant dense<0.000000e+00> : vector<32x192xf32>
    %348 = tpu.matmul %323, %347, %cst_298 {dimension_numbers = #tpu.dot_dimension_numbers<[1], [0], [0], [1], [0, 0, 1, 1], [], []>} : vector<32x64xf32>, vector<64x192xf32>, vector<32x192xf32> -> vector<32x192xf32>
    %c2_299 = arith.constant 2 : index
    %c0_300 = arith.constant 0 : index
    %c0_301 = arith.constant 0 : index
    %349 = vector.load %arg16[%c2_299, %c0_300, %c0_301] : memref<5x64x192xf32, #tpu.memory_space<vmem>>, vector<1x64x192xf32>
    %350 = vector.shape_cast %349 : vector<1x64x192xf32> to vector<64x192xf32>
    %cst_302 = arith.constant dense<0.000000e+00> : vector<32x192xf32>
    %351 = tpu.matmul %0, %350, %cst_302 {dimension_numbers = #tpu.dot_dimension_numbers<[1], [0], [0], [1], [0, 0, 1, 1], [], []>} : vector<32x64xf32>, vector<64x192xf32>, vector<32x192xf32> -> vector<32x192xf32>
    %352 = arith.addf %348, %351 : vector<32x192xf32>
    %c2_303 = arith.constant 2 : index
    %c0_304 = arith.constant 0 : index
    %c0_305 = arith.constant 0 : index
    %353 = vector.load %arg14[%c2_303, %c0_304, %c0_305] : memref<5x24x32xf32, #tpu.memory_space<vmem>>, vector<1x24x32xf32>
    %354 = vector.shape_cast %353 : vector<1x24x32xf32> to vector<24x32xf32>
    %cst_306 = arith.constant dense<0.000000e+00> : vector<24x192xf32>
    %355 = tpu.matmul %354, %352, %cst_306 {dimension_numbers = #tpu.dot_dimension_numbers<[1], [0], [0], [1], [0, 0, 1, 1], [], []>} : vector<24x32xf32>, vector<32x192xf32>, vector<24x192xf32> -> vector<24x192xf32>
    %356 = arith.addf %345, %355 : vector<24x192xf32>
    %c3_307 = arith.constant 3 : index
    %c0_308 = arith.constant 0 : index
    %c0_309 = arith.constant 0 : index
    %357 = vector.load %arg15[%c3_307, %c0_308, %c0_309] : memref<5x64x192xf32, #tpu.memory_space<vmem>>, vector<1x64x192xf32>
    %358 = vector.shape_cast %357 : vector<1x64x192xf32> to vector<64x192xf32>
    %cst_310 = arith.constant dense<0.000000e+00> : vector<32x192xf32>
    %359 = tpu.matmul %323, %358, %cst_310 {dimension_numbers = #tpu.dot_dimension_numbers<[1], [0], [0], [1], [0, 0, 1, 1], [], []>} : vector<32x64xf32>, vector<64x192xf32>, vector<32x192xf32> -> vector<32x192xf32>
    %c3_311 = arith.constant 3 : index
    %c0_312 = arith.constant 0 : index
    %c0_313 = arith.constant 0 : index
    %360 = vector.load %arg16[%c3_311, %c0_312, %c0_313] : memref<5x64x192xf32, #tpu.memory_space<vmem>>, vector<1x64x192xf32>
    %361 = vector.shape_cast %360 : vector<1x64x192xf32> to vector<64x192xf32>
    %cst_314 = arith.constant dense<0.000000e+00> : vector<32x192xf32>
    %362 = tpu.matmul %0, %361, %cst_314 {dimension_numbers = #tpu.dot_dimension_numbers<[1], [0], [0], [1], [0, 0, 1, 1], [], []>} : vector<32x64xf32>, vector<64x192xf32>, vector<32x192xf32> -> vector<32x192xf32>
    %363 = arith.addf %359, %362 : vector<32x192xf32>
    %c3_315 = arith.constant 3 : index
    %c0_316 = arith.constant 0 : index
    %c0_317 = arith.constant 0 : index
    %364 = vector.load %arg14[%c3_315, %c0_316, %c0_317] : memref<5x24x32xf32, #tpu.memory_space<vmem>>, vector<1x24x32xf32>
    %365 = vector.shape_cast %364 : vector<1x24x32xf32> to vector<24x32xf32>
    %cst_318 = arith.constant dense<0.000000e+00> : vector<24x192xf32>
    %366 = tpu.matmul %365, %363, %cst_318 {dimension_numbers = #tpu.dot_dimension_numbers<[1], [0], [0], [1], [0, 0, 1, 1], [], []>} : vector<24x32xf32>, vector<32x192xf32>, vector<24x192xf32> -> vector<24x192xf32>
    %367 = arith.addf %356, %366 : vector<24x192xf32>
    %c4_319 = arith.constant 4 : index
    %c0_320 = arith.constant 0 : index
    %c0_321 = arith.constant 0 : index
    %368 = vector.load %arg15[%c4_319, %c0_320, %c0_321] : memref<5x64x192xf32, #tpu.memory_space<vmem>>, vector<1x64x192xf32>
    %369 = vector.shape_cast %368 : vector<1x64x192xf32> to vector<64x192xf32>
    %cst_322 = arith.constant dense<0.000000e+00> : vector<32x192xf32>
    %370 = tpu.matmul %323, %369, %cst_322 {dimension_numbers = #tpu.dot_dimension_numbers<[1], [0], [0], [1], [0, 0, 1, 1], [], []>} : vector<32x64xf32>, vector<64x192xf32>, vector<32x192xf32> -> vector<32x192xf32>
    %c4_323 = arith.constant 4 : index
    %c0_324 = arith.constant 0 : index
    %c0_325 = arith.constant 0 : index
    %371 = vector.load %arg16[%c4_323, %c0_324, %c0_325] : memref<5x64x192xf32, #tpu.memory_space<vmem>>, vector<1x64x192xf32>
    %372 = vector.shape_cast %371 : vector<1x64x192xf32> to vector<64x192xf32>
    %cst_326 = arith.constant dense<0.000000e+00> : vector<32x192xf32>
    %373 = tpu.matmul %0, %372, %cst_326 {dimension_numbers = #tpu.dot_dimension_numbers<[1], [0], [0], [1], [0, 0, 1, 1], [], []>} : vector<32x64xf32>, vector<64x192xf32>, vector<32x192xf32> -> vector<32x192xf32>
    %374 = arith.addf %370, %373 : vector<32x192xf32>
    %c4_327 = arith.constant 4 : index
    %c0_328 = arith.constant 0 : index
    %c0_329 = arith.constant 0 : index
    %375 = vector.load %arg14[%c4_327, %c0_328, %c0_329] : memref<5x24x32xf32, #tpu.memory_space<vmem>>, vector<1x24x32xf32>
    %376 = vector.shape_cast %375 : vector<1x24x32xf32> to vector<24x32xf32>
    %cst_330 = arith.constant dense<0.000000e+00> : vector<24x192xf32>
    %377 = tpu.matmul %376, %374, %cst_330 {dimension_numbers = #tpu.dot_dimension_numbers<[1], [0], [0], [1], [0, 0, 1, 1], [], []>} : vector<24x32xf32>, vector<32x192xf32>, vector<24x192xf32> -> vector<24x192xf32>
    %378 = arith.addf %367, %377 : vector<24x192xf32>
    %c0_331 = arith.constant 0 : index
    %c0_332 = arith.constant 0 : index
    %379 = vector.load %arg18[%c0_331, %c0_332] : memref<192x16xf32, #tpu.memory_space<vmem>>, vector<192x16xf32>
    %c0_333 = arith.constant 0 : index
    %c0_334 = arith.constant 0 : index
    %380 = vector.load %arg19[%c0_333, %c0_334] : memref<16x192xf32, #tpu.memory_space<vmem>>, vector<16x192xf32>
    %381 = vector.extract_strided_slice %324 {offsets = [0, 0], sizes = [1, 192], strides = [1, 1]} : vector<3x192xf32> to vector<1x192xf32>
    %382 = vector.extract_strided_slice %324 {offsets = [1, 0], sizes = [1, 192], strides = [1, 1]} : vector<3x192xf32> to vector<1x192xf32>
    %383 = vector.extract_strided_slice %324 {offsets = [2, 0], sizes = [1, 192], strides = [1, 1]} : vector<3x192xf32> to vector<1x192xf32>
    %384 = vector.broadcast %381 : vector<1x192xf32> to vector<24x192xf32>
    %385 = arith.addf %378, %384 : vector<24x192xf32>
    %cst_335 = arith.constant dense<0.000000e+00> : vector<192xf32>
    %386 = vector.multi_reduction <add>, %385, %cst_335 [0] : vector<24x192xf32> to vector<192xf32>
    %387 = vector.shape_cast %386 : vector<192xf32> to vector<1x192xf32>
    %cst_336 = arith.constant dense<0.000000e+00> : vector<1x16xf32>
    %388 = tpu.matmul %387, %379, %cst_336 {dimension_numbers = #tpu.dot_dimension_numbers<[1], [0], [0], [1], [0, 0, 1, 1], [], []>} : vector<1x192xf32>, vector<192x16xf32>, vector<1x16xf32> -> vector<1x16xf32>
    %389 = arith.mulf %385, %385 : vector<24x192xf32>
    %cst_337 = arith.constant dense<0.000000e+00> : vector<192xf32>
    %390 = vector.multi_reduction <add>, %389, %cst_337 [0] : vector<24x192xf32> to vector<192xf32>
    %391 = vector.shape_cast %390 : vector<192xf32> to vector<1x192xf32>
    %cst_338 = arith.constant dense<0.000000e+00> : vector<1x16xf32>
    %392 = tpu.matmul %391, %379, %cst_338 {dimension_numbers = #tpu.dot_dimension_numbers<[1], [0], [0], [1], [0, 0, 1, 1], [], []>} : vector<1x192xf32>, vector<192x16xf32>, vector<1x16xf32> -> vector<1x16xf32>
    %cst_339 = arith.constant 0.00347222225 : f32
    %393 = vector.broadcast %cst_339 : f32 to vector<1x16xf32>
    %394 = arith.mulf %388, %393 : vector<1x16xf32>
    %cst_340 = arith.constant 0.00347222225 : f32
    %395 = vector.broadcast %cst_340 : f32 to vector<1x16xf32>
    %396 = arith.mulf %392, %395 : vector<1x16xf32>
    %397 = arith.mulf %394, %394 : vector<1x16xf32>
    %398 = arith.subf %396, %397 : vector<1x16xf32>
    %cst_341 = arith.constant 9.99999974E-6 : f32
    %399 = vector.broadcast %cst_341 : f32 to vector<1x16xf32>
    %400 = arith.addf %398, %399 : vector<1x16xf32>
    %401 = math.rsqrt %400 : vector<1x16xf32>
    %cst_342 = arith.constant dense<0.000000e+00> : vector<1x192xf32>
    %402 = tpu.matmul %394, %380, %cst_342 {dimension_numbers = #tpu.dot_dimension_numbers<[1], [0], [0], [1], [0, 0, 1, 1], [], []>} : vector<1x16xf32>, vector<16x192xf32>, vector<1x192xf32> -> vector<1x192xf32>
    %cst_343 = arith.constant dense<0.000000e+00> : vector<1x192xf32>
    %403 = tpu.matmul %401, %380, %cst_343 {dimension_numbers = #tpu.dot_dimension_numbers<[1], [0], [0], [1], [0, 0, 1, 1], [], []>} : vector<1x16xf32>, vector<16x192xf32>, vector<1x192xf32> -> vector<1x192xf32>
    %404 = vector.broadcast %402 : vector<1x192xf32> to vector<24x192xf32>
    %405 = arith.subf %385, %404 : vector<24x192xf32>
    %406 = vector.broadcast %403 : vector<1x192xf32> to vector<24x192xf32>
    %407 = arith.mulf %405, %406 : vector<24x192xf32>
    %408 = vector.broadcast %382 : vector<1x192xf32> to vector<24x192xf32>
    %409 = arith.mulf %407, %408 : vector<24x192xf32>
    %410 = vector.broadcast %383 : vector<1x192xf32> to vector<24x192xf32>
    %411 = arith.addf %409, %410 : vector<24x192xf32>
    %cst_344 = arith.constant 0.000000e+00 : f32
    %412 = vector.broadcast %cst_344 : f32 to vector<24x192xf32>
    %413 = arith.maximumf %411, %412 : vector<24x192xf32>
    %414 = vector.extract_strided_slice %413 {offsets = [0, 0], sizes = [12, 192], strides = [1, 1]} : vector<24x192xf32> to vector<12x192xf32>
    %415 = vector.extract_strided_slice %413 {offsets = [12, 0], sizes = [12, 192], strides = [1, 1]} : vector<24x192xf32> to vector<12x192xf32>
    %416 = arith.maximumf %414, %415 : vector<12x192xf32>
    %417 = vector.extract_strided_slice %416 {offsets = [0, 0], sizes = [12, 96], strides = [1, 1]} : vector<12x192xf32> to vector<12x96xf32>
    %418 = vector.extract_strided_slice %416 {offsets = [0, 96], sizes = [12, 96], strides = [1, 1]} : vector<12x192xf32> to vector<12x96xf32>
    %419 = arith.maximumf %417, %418 : vector<12x96xf32>
    %c0_345 = arith.constant 0 : index
    %c0_346 = arith.constant 0 : index
    %420 = vector.load %arg22[%c0_345, %c0_346] : memref<3x32xf32, #tpu.memory_space<vmem>>, vector<3x32xf32>
    %c0_347 = arith.constant 0 : index
    %c0_348 = arith.constant 0 : index
    %c0_349 = arith.constant 0 : index
    %421 = vector.load %arg21[%c0_347, %c0_348, %c0_349] : memref<5x96x32xf32, #tpu.memory_space<vmem>>, vector<1x96x32xf32>
    %422 = vector.shape_cast %421 : vector<1x96x32xf32> to vector<96x32xf32>
    %cst_350 = arith.constant dense<0.000000e+00> : vector<12x32xf32>
    %423 = tpu.matmul %419, %422, %cst_350 {dimension_numbers = #tpu.dot_dimension_numbers<[1], [0], [0], [1], [0, 0, 1, 1], [], []>} : vector<12x96xf32>, vector<96x32xf32>, vector<12x32xf32> -> vector<12x32xf32>
    %c0_351 = arith.constant 0 : index
    %c0_352 = arith.constant 0 : index
    %c0_353 = arith.constant 0 : index
    %424 = vector.load %arg20[%c0_351, %c0_352, %c0_353] : memref<5x4x12xf32, #tpu.memory_space<vmem>>, vector<1x4x12xf32>
    %425 = vector.shape_cast %424 : vector<1x4x12xf32> to vector<4x12xf32>
    %cst_354 = arith.constant dense<0.000000e+00> : vector<4x32xf32>
    %426 = tpu.matmul %425, %423, %cst_354 {dimension_numbers = #tpu.dot_dimension_numbers<[1], [0], [0], [1], [0, 0, 1, 1], [], []>} : vector<4x12xf32>, vector<12x32xf32>, vector<4x32xf32> -> vector<4x32xf32>
    %c1_355 = arith.constant 1 : index
    %c0_356 = arith.constant 0 : index
    %c0_357 = arith.constant 0 : index
    %427 = vector.load %arg21[%c1_355, %c0_356, %c0_357] : memref<5x96x32xf32, #tpu.memory_space<vmem>>, vector<1x96x32xf32>
    %428 = vector.shape_cast %427 : vector<1x96x32xf32> to vector<96x32xf32>
    %cst_358 = arith.constant dense<0.000000e+00> : vector<12x32xf32>
    %429 = tpu.matmul %419, %428, %cst_358 {dimension_numbers = #tpu.dot_dimension_numbers<[1], [0], [0], [1], [0, 0, 1, 1], [], []>} : vector<12x96xf32>, vector<96x32xf32>, vector<12x32xf32> -> vector<12x32xf32>
    %c1_359 = arith.constant 1 : index
    %c0_360 = arith.constant 0 : index
    %c0_361 = arith.constant 0 : index
    %430 = vector.load %arg20[%c1_359, %c0_360, %c0_361] : memref<5x4x12xf32, #tpu.memory_space<vmem>>, vector<1x4x12xf32>
    %431 = vector.shape_cast %430 : vector<1x4x12xf32> to vector<4x12xf32>
    %cst_362 = arith.constant dense<0.000000e+00> : vector<4x32xf32>
    %432 = tpu.matmul %431, %429, %cst_362 {dimension_numbers = #tpu.dot_dimension_numbers<[1], [0], [0], [1], [0, 0, 1, 1], [], []>} : vector<4x12xf32>, vector<12x32xf32>, vector<4x32xf32> -> vector<4x32xf32>
    %433 = arith.addf %426, %432 : vector<4x32xf32>
    %c2_363 = arith.constant 2 : index
    %c0_364 = arith.constant 0 : index
    %c0_365 = arith.constant 0 : index
    %434 = vector.load %arg21[%c2_363, %c0_364, %c0_365] : memref<5x96x32xf32, #tpu.memory_space<vmem>>, vector<1x96x32xf32>
    %435 = vector.shape_cast %434 : vector<1x96x32xf32> to vector<96x32xf32>
    %cst_366 = arith.constant dense<0.000000e+00> : vector<12x32xf32>
    %436 = tpu.matmul %419, %435, %cst_366 {dimension_numbers = #tpu.dot_dimension_numbers<[1], [0], [0], [1], [0, 0, 1, 1], [], []>} : vector<12x96xf32>, vector<96x32xf32>, vector<12x32xf32> -> vector<12x32xf32>
    %c2_367 = arith.constant 2 : index
    %c0_368 = arith.constant 0 : index
    %c0_369 = arith.constant 0 : index
    %437 = vector.load %arg20[%c2_367, %c0_368, %c0_369] : memref<5x4x12xf32, #tpu.memory_space<vmem>>, vector<1x4x12xf32>
    %438 = vector.shape_cast %437 : vector<1x4x12xf32> to vector<4x12xf32>
    %cst_370 = arith.constant dense<0.000000e+00> : vector<4x32xf32>
    %439 = tpu.matmul %438, %436, %cst_370 {dimension_numbers = #tpu.dot_dimension_numbers<[1], [0], [0], [1], [0, 0, 1, 1], [], []>} : vector<4x12xf32>, vector<12x32xf32>, vector<4x32xf32> -> vector<4x32xf32>
    %440 = arith.addf %433, %439 : vector<4x32xf32>
    %c3_371 = arith.constant 3 : index
    %c0_372 = arith.constant 0 : index
    %c0_373 = arith.constant 0 : index
    %441 = vector.load %arg21[%c3_371, %c0_372, %c0_373] : memref<5x96x32xf32, #tpu.memory_space<vmem>>, vector<1x96x32xf32>
    %442 = vector.shape_cast %441 : vector<1x96x32xf32> to vector<96x32xf32>
    %cst_374 = arith.constant dense<0.000000e+00> : vector<12x32xf32>
    %443 = tpu.matmul %419, %442, %cst_374 {dimension_numbers = #tpu.dot_dimension_numbers<[1], [0], [0], [1], [0, 0, 1, 1], [], []>} : vector<12x96xf32>, vector<96x32xf32>, vector<12x32xf32> -> vector<12x32xf32>
    %c3_375 = arith.constant 3 : index
    %c0_376 = arith.constant 0 : index
    %c0_377 = arith.constant 0 : index
    %444 = vector.load %arg20[%c3_375, %c0_376, %c0_377] : memref<5x4x12xf32, #tpu.memory_space<vmem>>, vector<1x4x12xf32>
    %445 = vector.shape_cast %444 : vector<1x4x12xf32> to vector<4x12xf32>
    %cst_378 = arith.constant dense<0.000000e+00> : vector<4x32xf32>
    %446 = tpu.matmul %445, %443, %cst_378 {dimension_numbers = #tpu.dot_dimension_numbers<[1], [0], [0], [1], [0, 0, 1, 1], [], []>} : vector<4x12xf32>, vector<12x32xf32>, vector<4x32xf32> -> vector<4x32xf32>
    %447 = arith.addf %440, %446 : vector<4x32xf32>
    %c4_379 = arith.constant 4 : index
    %c0_380 = arith.constant 0 : index
    %c0_381 = arith.constant 0 : index
    %448 = vector.load %arg21[%c4_379, %c0_380, %c0_381] : memref<5x96x32xf32, #tpu.memory_space<vmem>>, vector<1x96x32xf32>
    %449 = vector.shape_cast %448 : vector<1x96x32xf32> to vector<96x32xf32>
    %cst_382 = arith.constant dense<0.000000e+00> : vector<12x32xf32>
    %450 = tpu.matmul %419, %449, %cst_382 {dimension_numbers = #tpu.dot_dimension_numbers<[1], [0], [0], [1], [0, 0, 1, 1], [], []>} : vector<12x96xf32>, vector<96x32xf32>, vector<12x32xf32> -> vector<12x32xf32>
    %c4_383 = arith.constant 4 : index
    %c0_384 = arith.constant 0 : index
    %c0_385 = arith.constant 0 : index
    %451 = vector.load %arg20[%c4_383, %c0_384, %c0_385] : memref<5x4x12xf32, #tpu.memory_space<vmem>>, vector<1x4x12xf32>
    %452 = vector.shape_cast %451 : vector<1x4x12xf32> to vector<4x12xf32>
    %cst_386 = arith.constant dense<0.000000e+00> : vector<4x32xf32>
    %453 = tpu.matmul %452, %450, %cst_386 {dimension_numbers = #tpu.dot_dimension_numbers<[1], [0], [0], [1], [0, 0, 1, 1], [], []>} : vector<4x12xf32>, vector<12x32xf32>, vector<4x32xf32> -> vector<4x32xf32>
    %454 = arith.addf %447, %453 : vector<4x32xf32>
    %c0_387 = arith.constant 0 : index
    %c0_388 = arith.constant 0 : index
    %455 = vector.load %arg23[%c0_387, %c0_388] : memref<32x16xf32, #tpu.memory_space<vmem>>, vector<32x16xf32>
    %c0_389 = arith.constant 0 : index
    %c0_390 = arith.constant 0 : index
    %456 = vector.load %arg24[%c0_389, %c0_390] : memref<16x32xf32, #tpu.memory_space<vmem>>, vector<16x32xf32>
    %457 = vector.extract_strided_slice %420 {offsets = [0, 0], sizes = [1, 32], strides = [1, 1]} : vector<3x32xf32> to vector<1x32xf32>
    %458 = vector.extract_strided_slice %420 {offsets = [1, 0], sizes = [1, 32], strides = [1, 1]} : vector<3x32xf32> to vector<1x32xf32>
    %459 = vector.extract_strided_slice %420 {offsets = [2, 0], sizes = [1, 32], strides = [1, 1]} : vector<3x32xf32> to vector<1x32xf32>
    %460 = vector.broadcast %457 : vector<1x32xf32> to vector<4x32xf32>
    %461 = arith.addf %454, %460 : vector<4x32xf32>
    %cst_391 = arith.constant dense<0.000000e+00> : vector<32xf32>
    %462 = vector.multi_reduction <add>, %461, %cst_391 [0] : vector<4x32xf32> to vector<32xf32>
    %463 = vector.shape_cast %462 : vector<32xf32> to vector<1x32xf32>
    %cst_392 = arith.constant dense<0.000000e+00> : vector<1x16xf32>
    %464 = tpu.matmul %463, %455, %cst_392 {dimension_numbers = #tpu.dot_dimension_numbers<[1], [0], [0], [1], [0, 0, 1, 1], [], []>} : vector<1x32xf32>, vector<32x16xf32>, vector<1x16xf32> -> vector<1x16xf32>
    %465 = arith.mulf %461, %461 : vector<4x32xf32>
    %cst_393 = arith.constant dense<0.000000e+00> : vector<32xf32>
    %466 = vector.multi_reduction <add>, %465, %cst_393 [0] : vector<4x32xf32> to vector<32xf32>
    %467 = vector.shape_cast %466 : vector<32xf32> to vector<1x32xf32>
    %cst_394 = arith.constant dense<0.000000e+00> : vector<1x16xf32>
    %468 = tpu.matmul %467, %455, %cst_394 {dimension_numbers = #tpu.dot_dimension_numbers<[1], [0], [0], [1], [0, 0, 1, 1], [], []>} : vector<1x32xf32>, vector<32x16xf32>, vector<1x16xf32> -> vector<1x16xf32>
    %cst_395 = arith.constant 1.250000e-01 : f32
    %469 = vector.broadcast %cst_395 : f32 to vector<1x16xf32>
    %470 = arith.mulf %464, %469 : vector<1x16xf32>
    %cst_396 = arith.constant 1.250000e-01 : f32
    %471 = vector.broadcast %cst_396 : f32 to vector<1x16xf32>
    %472 = arith.mulf %468, %471 : vector<1x16xf32>
    %473 = arith.mulf %470, %470 : vector<1x16xf32>
    %474 = arith.subf %472, %473 : vector<1x16xf32>
    %cst_397 = arith.constant 9.99999974E-6 : f32
    %475 = vector.broadcast %cst_397 : f32 to vector<1x16xf32>
    %476 = arith.addf %474, %475 : vector<1x16xf32>
    %477 = math.rsqrt %476 : vector<1x16xf32>
    %cst_398 = arith.constant dense<0.000000e+00> : vector<1x32xf32>
    %478 = tpu.matmul %470, %456, %cst_398 {dimension_numbers = #tpu.dot_dimension_numbers<[1], [0], [0], [1], [0, 0, 1, 1], [], []>} : vector<1x16xf32>, vector<16x32xf32>, vector<1x32xf32> -> vector<1x32xf32>
    %cst_399 = arith.constant dense<0.000000e+00> : vector<1x32xf32>
    %479 = tpu.matmul %477, %456, %cst_399 {dimension_numbers = #tpu.dot_dimension_numbers<[1], [0], [0], [1], [0, 0, 1, 1], [], []>} : vector<1x16xf32>, vector<16x32xf32>, vector<1x32xf32> -> vector<1x32xf32>
    %480 = vector.broadcast %478 : vector<1x32xf32> to vector<4x32xf32>
    %481 = arith.subf %461, %480 : vector<4x32xf32>
    %482 = vector.broadcast %479 : vector<1x32xf32> to vector<4x32xf32>
    %483 = arith.mulf %481, %482 : vector<4x32xf32>
    %484 = vector.broadcast %458 : vector<1x32xf32> to vector<4x32xf32>
    %485 = arith.mulf %483, %484 : vector<4x32xf32>
    %486 = vector.broadcast %459 : vector<1x32xf32> to vector<4x32xf32>
    %487 = arith.addf %485, %486 : vector<4x32xf32>
    %cst_400 = arith.constant 0.000000e+00 : f32
    %488 = vector.broadcast %cst_400 : f32 to vector<4x32xf32>
    %489 = arith.maximumf %487, %488 : vector<4x32xf32>
    %490 = vector.extract_strided_slice %489 {offsets = [0, 0], sizes = [2, 32], strides = [1, 1]} : vector<4x32xf32> to vector<2x32xf32>
    %491 = vector.extract_strided_slice %489 {offsets = [2, 0], sizes = [2, 32], strides = [1, 1]} : vector<4x32xf32> to vector<2x32xf32>
    %492 = arith.maximumf %490, %491 : vector<2x32xf32>
    %493 = vector.extract_strided_slice %492 {offsets = [0, 0], sizes = [2, 16], strides = [1, 1]} : vector<2x32xf32> to vector<2x16xf32>
    %494 = vector.extract_strided_slice %492 {offsets = [0, 16], sizes = [2, 16], strides = [1, 1]} : vector<2x32xf32> to vector<2x16xf32>
    %495 = arith.maximumf %493, %494 : vector<2x16xf32>
    %c0_401 = arith.constant 0 : index
    %c0_402 = arith.constant 0 : index
    %496 = vector.load %arg25[%c0_401, %c0_402] : memref<16x200xf32, #tpu.memory_space<vmem>>, vector<16x200xf32>
    %cst_403 = arith.constant dense<0.000000e+00> : vector<2x200xf32>
    %497 = tpu.matmul %495, %496, %cst_403 {dimension_numbers = #tpu.dot_dimension_numbers<[1], [0], [0], [1], [0, 0, 1, 1], [], []>} : vector<2x16xf32>, vector<16x200xf32>, vector<2x200xf32> -> vector<2x200xf32>
    %c0_404 = arith.constant 0 : index
    %c0_405 = arith.constant 0 : index
    %498 = vector.load %arg26[%c0_404, %c0_405] : memref<1x200xf32, #tpu.memory_space<vmem>>, vector<1x200xf32>
    %499 = vector.broadcast %498 : vector<1x200xf32> to vector<2x200xf32>
    %500 = arith.addf %497, %499 : vector<2x200xf32>
    %cst_406 = arith.constant 0.000000e+00 : f32
    %501 = vector.broadcast %cst_406 : f32 to vector<2x200xf32>
    %502 = arith.maximumf %500, %501 : vector<2x200xf32>
    %c0_407 = arith.constant 0 : index
    %c0_408 = arith.constant 0 : index
    %503 = vector.load %arg27[%c0_407, %c0_408] : memref<200x3xf32, #tpu.memory_space<vmem>>, vector<200x3xf32>
    %cst_409 = arith.constant dense<0.000000e+00> : vector<2x3xf32>
    %504 = tpu.matmul %502, %503, %cst_409 {dimension_numbers = #tpu.dot_dimension_numbers<[1], [0], [0], [1], [0, 0, 1, 1], [], []>} : vector<2x200xf32>, vector<200x3xf32>, vector<2x3xf32> -> vector<2x3xf32>
    %c0_410 = arith.constant 0 : index
    %c0_411 = arith.constant 0 : index
    %505 = vector.load %arg28[%c0_410, %c0_411] : memref<1x3xf32, #tpu.memory_space<vmem>>, vector<1x3xf32>
    %506 = vector.broadcast %505 : vector<1x3xf32> to vector<2x3xf32>
    %507 = arith.addf %504, %506 : vector<2x3xf32>
    %cst_412 = arith.constant dense<0xFF800000> : vector<2xf32>
    %508 = vector.multi_reduction <maximumf>, %507, %cst_412 [1] : vector<2x3xf32> to vector<2xf32>
    %509 = vector.shape_cast %508 : vector<2xf32> to vector<2x1xf32>
    %510 = vector.broadcast %509 : vector<2x1xf32> to vector<2x3xf32>
    %511 = arith.subf %507, %510 : vector<2x3xf32>
    %512 = math.exp %511 : vector<2x3xf32>
    %cst_413 = arith.constant dense<0.000000e+00> : vector<2xf32>
    %513 = vector.multi_reduction <add>, %512, %cst_413 [1] : vector<2x3xf32> to vector<2xf32>
    %514 = vector.shape_cast %513 : vector<2xf32> to vector<2x1xf32>
    %515 = vector.broadcast %514 : vector<2x1xf32> to vector<2x3xf32>
    %516 = arith.divf %512, %515 : vector<2x3xf32>
    %c0_414 = arith.constant 0 : index
    %c0_415 = arith.constant 0 : index
    %517 = vector.load %arg35[%c0_414, %c0_415] : memref<2x3xf32, #tpu.memory_space<vmem>>, vector<2x3xf32>
    tpu.vector_store %arg35[%c0_414, %c0_415], %516 {strides = array<i32>} : memref<2x3xf32, #tpu.memory_space<vmem>>, vector<2x3xf32>,
    %c0_416 = arith.constant 0 : index
    %c0_417 = arith.constant 0 : index
    %518 = vector.load %arg29[%c0_416, %c0_417] : memref<200x2xf32, #tpu.memory_space<vmem>>, vector<200x2xf32>
    %cst_418 = arith.constant dense<0.000000e+00> : vector<2x2xf32>
    %519 = tpu.matmul %502, %518, %cst_418 {dimension_numbers = #tpu.dot_dimension_numbers<[1], [0], [0], [1], [0, 0, 1, 1], [], []>} : vector<2x200xf32>, vector<200x2xf32>, vector<2x2xf32> -> vector<2x2xf32>
    %c0_419 = arith.constant 0 : index
    %c0_420 = arith.constant 0 : index
    %520 = vector.load %arg30[%c0_419, %c0_420] : memref<1x2xf32, #tpu.memory_space<vmem>>, vector<1x2xf32>
    %521 = vector.broadcast %520 : vector<1x2xf32> to vector<2x2xf32>
    %522 = arith.addf %519, %521 : vector<2x2xf32>
    %cst_421 = arith.constant dense<0xFF800000> : vector<2xf32>
    %523 = vector.multi_reduction <maximumf>, %522, %cst_421 [1] : vector<2x2xf32> to vector<2xf32>
    %524 = vector.shape_cast %523 : vector<2xf32> to vector<2x1xf32>
    %525 = vector.broadcast %524 : vector<2x1xf32> to vector<2x2xf32>
    %526 = arith.subf %522, %525 : vector<2x2xf32>
    %527 = math.exp %526 : vector<2x2xf32>
    %cst_422 = arith.constant dense<0.000000e+00> : vector<2xf32>
    %528 = vector.multi_reduction <add>, %527, %cst_422 [1] : vector<2x2xf32> to vector<2xf32>
    %529 = vector.shape_cast %528 : vector<2xf32> to vector<2x1xf32>
    %530 = vector.broadcast %529 : vector<2x1xf32> to vector<2x2xf32>
    %531 = arith.divf %527, %530 : vector<2x2xf32>
    %c0_423 = arith.constant 0 : index
    %c0_424 = arith.constant 0 : index
    %532 = vector.load %arg36[%c0_423, %c0_424] : memref<2x2xf32, #tpu.memory_space<vmem>>, vector<2x2xf32>
    tpu.vector_store %arg36[%c0_423, %c0_424], %531 {strides = array<i32>} : memref<2x2xf32, #tpu.memory_space<vmem>>, vector<2x2xf32>,
    %c0_425 = arith.constant 0 : index
    %c0_426 = arith.constant 0 : index
    %533 = vector.load %arg12[%c0_425, %c0_426] : memref<2x32xf32, #tpu.memory_space<vmem>>, vector<2x32xf32>
    %cst_427 = arith.constant dense<0.000000e+00> : vector<2x64xf32>
    %534 = tpu.matmul %533, %321, %cst_427 {dimension_numbers = #tpu.dot_dimension_numbers<[1], [0], [0], [1], [0, 0, 1, 1], [], []>} : vector<2x32xf32>, vector<32x64xf32>, vector<2x64xf32> -> vector<2x64xf32>
    %c0_428 = arith.constant 0 : index
    %c0_429 = arith.constant 0 : index
    %535 = vector.load %arg13[%c0_428, %c0_429] : memref<64x4xf32, #tpu.memory_space<vmem>>, vector<64x4xf32>
    %cst_430 = arith.constant dense<0.000000e+00> : vector<2x4xf32>
    %536 = tpu.matmul %534, %535, %cst_430 {dimension_numbers = #tpu.dot_dimension_numbers<[1], [0], [0], [1], [0, 0, 1, 1], [], []>} : vector<2x64xf32>, vector<64x4xf32>, vector<2x4xf32> -> vector<2x4xf32>
    %cst_431 = arith.constant 3.906250e-03 : f32
    %537 = vector.broadcast %cst_431 : f32 to vector<2x4xf32>
    %538 = arith.mulf %536, %537 : vector<2x4xf32>
    %c0_432 = arith.constant 0 : index
    %c0_433 = arith.constant 0 : index
    %539 = vector.load %arg31[%c0_432, %c0_433] : memref<4x100xf32, #tpu.memory_space<vmem>>, vector<4x100xf32>
    %cst_434 = arith.constant dense<0.000000e+00> : vector<2x100xf32>
    %540 = tpu.matmul %538, %539, %cst_434 {dimension_numbers = #tpu.dot_dimension_numbers<[1], [0], [0], [1], [0, 0, 1, 1], [], []>} : vector<2x4xf32>, vector<4x100xf32>, vector<2x100xf32> -> vector<2x100xf32>
    %c0_435 = arith.constant 0 : index
    %c0_436 = arith.constant 0 : index
    %541 = vector.load %arg32[%c0_435, %c0_436] : memref<1x100xf32, #tpu.memory_space<vmem>>, vector<1x100xf32>
    %542 = vector.broadcast %541 : vector<1x100xf32> to vector<2x100xf32>
    %543 = arith.addf %540, %542 : vector<2x100xf32>
    %cst_437 = arith.constant 0.000000e+00 : f32
    %544 = vector.broadcast %cst_437 : f32 to vector<2x100xf32>
    %545 = arith.maximumf %543, %544 : vector<2x100xf32>
    %c0_438 = arith.constant 0 : index
    %c0_439 = arith.constant 0 : index
    %546 = vector.load %arg33[%c0_438, %c0_439] : memref<100x3xf32, #tpu.memory_space<vmem>>, vector<100x3xf32>
    %cst_440 = arith.constant dense<0.000000e+00> : vector<2x3xf32>
    %547 = tpu.matmul %545, %546, %cst_440 {dimension_numbers = #tpu.dot_dimension_numbers<[1], [0], [0], [1], [0, 0, 1, 1], [], []>} : vector<2x100xf32>, vector<100x3xf32>, vector<2x3xf32> -> vector<2x3xf32>
    %c0_441 = arith.constant 0 : index
    %c0_442 = arith.constant 0 : index
    %548 = vector.load %arg34[%c0_441, %c0_442] : memref<1x3xf32, #tpu.memory_space<vmem>>, vector<1x3xf32>
    %549 = vector.broadcast %548 : vector<1x3xf32> to vector<2x3xf32>
    %550 = arith.addf %547, %549 : vector<2x3xf32>
    %cst_443 = arith.constant dense<0xFF800000> : vector<2xf32>
    %551 = vector.multi_reduction <maximumf>, %550, %cst_443 [1] : vector<2x3xf32> to vector<2xf32>
    %552 = vector.shape_cast %551 : vector<2xf32> to vector<2x1xf32>
    %553 = vector.broadcast %552 : vector<2x1xf32> to vector<2x3xf32>
    %554 = arith.subf %550, %553 : vector<2x3xf32>
    %555 = math.exp %554 : vector<2x3xf32>
    %cst_444 = arith.constant dense<0.000000e+00> : vector<2xf32>
    %556 = vector.multi_reduction <add>, %555, %cst_444 [1] : vector<2x3xf32> to vector<2xf32>
    %557 = vector.shape_cast %556 : vector<2xf32> to vector<2x1xf32>
    %558 = vector.broadcast %557 : vector<2x1xf32> to vector<2x3xf32>
    %559 = arith.divf %555, %558 : vector<2x3xf32>
    %c0_445 = arith.constant 0 : index
    %c0_446 = arith.constant 0 : index
    %560 = vector.load %arg37[%c0_445, %c0_446] : memref<2x3xf32, #tpu.memory_space<vmem>>, vector<2x3xf32>
    tpu.vector_store %arg37[%c0_445, %c0_446], %559 {strides = array<i32>} : memref<2x3xf32, #tpu.memory_space<vmem>>, vector<2x3xf32>,
    return
  }
}

</mosaic_0001>

<bundles_post_ra>
// kernel: forward.1
= control target key start
LH: loop header
LB: loop body
LE: loop exit
PB: predicated region body
PF: predicated region fallthrough
CT: control target
= control target key end

     0   :  { %s14787_s6 = smov 1   ;;  %s14788_s10 = smov 2   ;;  %s16796_s0 = inlined_call_operand.smem [shape: u32[38], index: -1, kind: input, shape index: {}] }
   0x1   :  { %s14871_s5 = sld [smem:[%s16796_s0]]   ;;  %s14789_s14 = smov 3  }
   0x2   :  { %s14876_s9 = sld [smem:[%s16796_s0 + %s14787_s6]]   ;;  %s14790_s18 = smov 4  }
   0x3   :  { %s14881_s13 = sld [smem:[%s16796_s0 + %s14788_s10]]   ;;  %s14791_s22 = smov 5  }
   0x4   :  { %s14886_s17 = sld [smem:[%s16796_s0 + %s14789_s14]]   ;;  %s14792_s26 = smov 6  }
   0x5   :  { %s14891_s21 = sld [smem:[%s16796_s0 + %s14790_s18]]   ;;  %s14793_s30 = smov 7  }
   0x6   :  { %s14896_s25 = sld [smem:[%s16796_s0 + %s14791_s22]]   ;;  %s14794_s4 = smov 8  }
   0x7   :  { %16800 = sst [smem:[#allocation63_spill]] %s14871_s5  ;;  %s14795_s10 = smov 9  }
   0x8   :  { %s14901_s29 = sld [smem:[%s16796_s0 + %s14792_s26]]   ;;  %s14796_s15 = smov 10  }
   0x9   :  { %s14906_s3 = sld [smem:[%s16796_s0 + %s14793_s30]]   ;;  %s14797_s20 = smov 11  }
   0xa   :  { %s14911_s8 = sld [smem:[%s16796_s0 + %s14794_s4]]   ;;  %s14798_s26 = smov 12  }
   0xb   :  { %s14916_s14 = sld [smem:[%s16796_s0 + %s14795_s10]]   ;;  %s14799_s1 = smov 13  }
   0xc   :  { %16801 = sst [smem:[#allocation64_spill]] %s14896_s25  ;;  %s14800_s7 = smov 14  }
   0xd   :  { %s14921_s19 = sld [smem:[%s16796_s0 + %s14796_s15]]   ;;  %s14801_s15 = smov 15  }
   0xe   :  { %s14926_s24 = sld [smem:[%s16796_s0 + %s14797_s20]]   ;;  %s14802_s22 = smov 16  }
   0xf   :  { %16802 = sst [smem:[#allocation65_spill]] %s14906_s3  ;;  %s14803_s28 = smov 17  }
  0x10   :  { %s14931_s30 = sld [smem:[%s16796_s0 + %s14798_s26]]  }
  0x11   :  { %16803 = sst [smem:[#allocation66_spill]] %s14916_s14 }
  0x12   :  { %s14936_s6 = sld [smem:[%s16796_s0 + %s14799_s1]]  }
  0x13   :  { %s14941_s12 = sld [smem:[%s16796_s0 + %s14800_s7]]   ;;  %s14804_s7 = smov 18  }
  0x14   :  { %16804 = sst [smem:[#allocation67_spill]] %s14926_s24 }
  0x15   :  { %s14946_s20 = sld [smem:[%s16796_s0 + %s14801_s15]]   ;;  %s14805_s15 = smov 19  }
  0x16   :  { %s14951_s27 = sld [smem:[%s16796_s0 + %s14802_s22]]   ;;  %s14806_s22 = smov 20  }
  0x17   :  { %s14956_s4 = sld [smem:[%s16796_s0 + %s14803_s28]]   ;;  %s14807_s28 = smov 21  }
  0x18   :  { %16805 = sst [smem:[#allocation68_spill]] %s14936_s6 }
  0x19   :  { %s14961_s5 = sld [smem:[%s16796_s0 + %s14804_s7]]   ;;  %s14808_s7 = smov 22  }
  0x1a   :  { %s14971_s6 = sld [smem:[%s16796_s0 + %s14806_s22]]   ;;  %s14810_s22 = smov 24  }
  0x1b   :  { %16806 = sst [smem:[#allocation69_spill]] %s14946_s20 }
  0x1c   :  { %s14966_s20 = sld [smem:[%s16796_s0 + %s14805_s15]]   ;;  %s14809_s15 = smov 23  }
  0x1d   :  { %16807 = sst [smem:[#allocation70_spill]] %s14956_s4 }
  0x1e   :  { %s14976_s4 = sld [smem:[%s16796_s0 + %s14807_s28]]   ;;  %s14811_s28 = smov 25  }
  0x1f   :  { %s14981_s24 = sld [smem:[%s16796_s0 + %s14808_s7]]   ;;  %s14812_s7 = smov 26  }
  0x20   :  { %s14991_s14 = sld [smem:[%s16796_s0 + %s14810_s22]]   ;;  %s14814_s22 = smov 28  }
  0x22   :  { %16808 = sst [smem:[#allocation71_spill]] %s14966_s20 }
  0x23   :  { %s14986_s20 = sld [smem:[%s16796_s0 + %s14809_s15]]   ;;  %s14813_s15 = smov 27  }
  0x24   :  { %16809 = sst [smem:[#allocation72_spill]] %s14976_s4 }
  0x25   :  { %16810 = sst [smem:[#allocation73_spill]] %s14981_s24 }
  0x26   :  { %16811 = sst [smem:[#allocation74_spill]] %s14991_s14 }
  0x27   :  { %s14996_s4 = sld [smem:[%s16796_s0 + %s14811_s28]]   ;;  %s14815_s28 = smov 29  }
  0x28   :  { %s15001_s24 = sld [smem:[%s16796_s0 + %s14812_s7]]   ;;  %s14816_s7 = smov 30  }
  0x29   :  { %s15006_s3 = sld [smem:[%s16796_s0 + %s14813_s15]]   ;;  %s14817_s15 = smov 31  }
  0x2a   :  { %s15011_s14 = sld [smem:[%s16796_s0 + %s14814_s22]]   ;;  %s14818_s22 = smov 32  }
  0x2b   :  { %s15016_s25 = sld [smem:[%s16796_s0 + %s14815_s28]]   ;;  %s14819_s28 = smov 33  }
  0x2e   :  { %16812 = sst [smem:[#allocation75_spill]] %s15001_s24 }
  0x2f   :  { %16813 = sst [smem:[#allocation76_spill]] %s15006_s3 }
  0x30   :  { %16814 = sst [smem:[#allocation77_spill]] %s15011_s14 }
  0x31   :  { %16815 = sst [smem:[#allocation78_spill]] %s15016_s25 }
  0x32   :  { %s15021_s24 = sld [smem:[%s16796_s0 + %s14816_s7]]   ;;  %s14820_s7 = smov 34  }
  0x33   :  { %s15026_s3 = sld [smem:[%s16796_s0 + %s14817_s15]]   ;;  %s14821_s15 = smov 35  }
  0x34   :  { %s15031_s14 = sld [smem:[%s16796_s0 + %s14818_s22]]   ;;  %s14822_s22 = smov 36  }
  0x35   :  { %s15036_s25 = sld [smem:[%s16796_s0 + %s14819_s28]]   ;;  %s14823_s28 = smov 37  }
  0x38   :  { %16816 = sst [smem:[#allocation79_spill]] %s15021_s24 }
  0x39   :  { %16817 = sst [smem:[#allocation80_spill]] %s15026_s3 }
  0x3a   :  { %16818 = sst [smem:[#allocation81_spill]] %s15031_s14 }
  0x3b   :  { %16819 = sst [smem:[#allocation82_spill]] %s15036_s25 }
  0x3c   :  { %s15041_s24 = sld [smem:[%s16796_s0 + %s14820_s7]]  }
  0x3d   :  { %s15046_s3 = sld [smem:[%s16796_s0 + %s14821_s15]]  }
  0x3e   :  { %s15051_s14 = sld [smem:[%s16796_s0 + %s14822_s22]]  }
  0x3f   :  { %s15056_s25 = sld [smem:[%s16796_s0 + %s14823_s28]]  }
  0x40   :  { %81 = vsyncpa [#allocation3], 0 }
  0x41   :  { %82 = vsyncpa [#allocation6], 0 }
  0x42   :  { %83 = vsyncpa [#allocation9], 0 }
  0x43   :  { %84 = vsyncpa [#allocation12], 0 }
  0x44   :  { %85 = vsyncpa [#allocation15], 0 }
  0x45   :  { %86 = vsyncpa [#allocation18], 0 }
  0x46   :  { %87 = vsyncpa [#allocation21], 0 }
  0x47   :  { %88 = vsyncpa [#allocation24], 0 }
  0x48   :  { %89 = vsyncpa [#allocation27], 0 }
  0x49   :  { %90 = vsyncpa [#allocation30], 0 }
  0x4a   :  { %91 = vsyncpa [#allocation33], 0 }
  0x4b   :  { %92 = vsyncpa [#allocation36], 0 }
  0x4c   :  { %93 = vsyncpa [#allocation39], 0 }
  0x4d   :  { %94 = vsyncpa [#allocation42], 0 }
  0x4e   :  { %95 = vsyncpa [#allocation4], 0 }
  0x4f   :  { %96 = vsyncpa [#allocation45], 0  ;;  %s14824_s7 = smov [#allocation5]   ;;  %s14825_s0 = smov [#allocation8]  }
  0x50   :  { %s116_s10 = sshll.u32 %s14824_s7, 4  ;;  %s140_s11 = sshll.u32 %s14825_s0, 4  ;;  %s117_s10 = int_to_ptr.vmem [resolvable:$true] %s116_s10  ;;  %s141_s11 = int_to_ptr.vmem [resolvable:$true] %s140_s11 }
  0x51   :  { %s14183_s15 = scalar_lea.vmem %s117_s10, 5120  ;;  %p14188_p1 = scmp.lt.s32.totalorder %s117_s10, %s117_s10 }
  0x52   :  { %p14184_p0 = scmp.ne.s32.totalorder %s117_s10, %s14183_s15  ;;  %p14189_p2 = scmp.lt.s32.totalorder %s14183_s15, %s14183_s15 }
  0x54   :  { %p14190_p3 = por %p14189_p2, %p14188_p1 }
  0x56   :  { %p14191_p4 = pnand %p14190_p3, %p14184_p0 }
  0x58   :  { %14194 = shalt.err (!%p14191_p4)
}
  0x59   :  { %s14826_s16 = smov 128   ;;  %s14827_s18 = smov 8  }
  0x5a   :  { %122 = dma.hbm_to_vmem [thread:$0]  %s14881_s13, 5120, %s117_s10, [#allocation6], %s14826_s16, %s14826_s16, %s14827_s18  }
  0x5b   :  { %s14203_s22 = scalar_lea.vmem %s141_s11, 10240  ;;  %p14208_p6 = scmp.lt.s32.totalorder %s141_s11, %s141_s11 }
  0x5c   :  { %p14204_p5 = scmp.ne.s32.totalorder %s141_s11, %s14203_s22  ;;  %p14209_p7 = scmp.lt.s32.totalorder %s14203_s22, %s14203_s22 }
  0x5e   :  { %p14210_p8 = por %p14209_p7, %p14208_p6 }
  0x60   :  { %p14211_p9 = pnand %p14210_p8, %p14204_p5 }
  0x62   :  { %14214 = shalt.err (!%p14211_p9)
}
  0x63   :  { %146 = dma.hbm_to_vmem [thread:$0]  %s14891_s21, 10240, %s141_s11, [#allocation9], %s14826_s16, %s14826_s16, %s14827_s18  }
  0x64   :  { %s14828_s23 = smov [#allocation11]  }
  0x65   :  { %s164_s26 = sshll.u32 %s14828_s23, 4  ;;  %s165_s26 = int_to_ptr.vmem [resolvable:$true] %s164_s26 }
  0x66   :  { %s14223_s28 = scalar_lea.vmem %s165_s26, 256  ;;  %p14228_p11 = scmp.lt.s32.totalorder %s165_s26, %s165_s26 }
  0x67   :  { %p14224_p10 = scmp.ne.s32.totalorder %s165_s26, %s14223_s28  ;;  %p14229_p12 = scmp.lt.s32.totalorder %s14223_s28, %s14223_s28 }
  0x69   :  { %p14230_p13 = por %p14229_p12, %p14228_p11 }
  0x6b   :  { %p14231_p0 = pnand %p14230_p13, %p14224_p10 }
  0x6d   :  { %14234 = shalt.err (!%p14231_p0)
}
  0x6e   :  { %s14829_s13 = smov 64   ;;  %s14830_s1 = smov 4  }
  0x6f   :  { %170 = dma.hbm_to_vmem [thread:$0]  %s14901_s29, 256, %s165_s26, [#allocation12], %s14829_s13, %s14829_s13, %s14830_s1  }
  0x70   :  { %s14831_s2 = smov [#allocation14]   ;;  %s14832_s21 = smov [#allocation17]  }
  0x71   :  { %s189_s7 = sshll.u32 %s14831_s2, 4  ;;  %s211_s10 = sshll.u32 %s14832_s21, 4  ;;  %s190_s7 = int_to_ptr.vmem [resolvable:$true] %s189_s7  ;;  %s212_s10 = int_to_ptr.vmem [resolvable:$true] %s211_s10 }
  0x72   :  { %s14243_s0 = scalar_lea.vmem %s190_s7, 128  ;;  %p14248_p2 = scmp.lt.s32.totalorder %s190_s7, %s190_s7 }
  0x73   :  { %p14244_p1 = scmp.ne.s32.totalorder %s190_s7, %s14243_s0  ;;  %p14249_p3 = scmp.lt.s32.totalorder %s14243_s0, %s14243_s0 }
  0x75   :  { %p14250_p4 = por %p14249_p3, %p14248_p2 }
  0x77   :  { %p14251_p5 = pnand %p14250_p4, %p14244_p1 }
  0x79   :  { %14254 = shalt.err (!%p14251_p5)
}
  0x7a   :  { %192 = dma.hbm_to_vmem [thread:$0]  %s14911_s8, 128, %s190_s7, [#allocation15]  }
  0x7b   :  { %s14263_s11 = scalar_lea.vmem %s212_s10, 16  ;;  %s14267_s15 = scalar_lea.vmem %s212_s10, 32 }
  0x7c   :  { %p14264_p6 = scmp.ne.s32.totalorder %s212_s10, %s14263_s11  ;;  %p14268_p7 = scmp.lt.s32.totalorder %s212_s10, %s212_s10 }
  0x7d   :  { %p14269_p8 = scmp.lt.s32.totalorder %s14267_s15, %s14263_s11 }
  0x7f   :  { %p14270_p9 = por %p14269_p8, %p14268_p7 }
  0x81   :  { %p14271_p10 = pnand %p14270_p9, %p14264_p6 }
  0x83   :  { %14274 = shalt.err (!%p14271_p10)
}
  0x84   :  { %214 = dma.hbm_to_vmem [thread:$0]  %s14921_s19, 16, %s212_s10, [#allocation18]  }
  0x85   :  { %s14833_s29 = smov [#allocation20]   ;;  %s14834_s23 = smov [#allocation23]  }
  0x86   :  { %s233_s22 = sshll.u32 %s14833_s29, 4  ;;  %s254_s26 = sshll.u32 %s14834_s23, 4  ;;  %s234_s22 = int_to_ptr.vmem [resolvable:$true] %s233_s22  ;;  %s255_s26 = int_to_ptr.vmem [resolvable:$true] %s254_s26 }
  0x87   :  { %s14283_s28 = scalar_lea.vmem %s234_s22, 32  ;;  %p14288_p12 = scmp.lt.s32.totalorder %s234_s22, %s234_s22 }
  0x88   :  { %p14284_p11 = scmp.ne.s32.totalorder %s234_s22, %s14283_s28  ;;  %p14289_p13 = scmp.lt.s32.totalorder %s14283_s28, %s14283_s28 }
  0x8a   :  { %p14290_p0 = por %p14289_p13, %p14288_p12 }
  0x8c   :  { %p14291_p1 = pnand %p14290_p0, %p14284_p11 }
  0x8e   :  { %14294 = shalt.err (!%p14291_p1)
}
  0x8f   :  { %236 = dma.hbm_to_vmem [thread:$0]  %s14931_s30, 32, %s234_s22, [#allocation21]  }
  0x90   :  { %s14303_s8 = scalar_lea.vmem %s255_s26, 1920  ;;  %p14308_p3 = scmp.lt.s32.totalorder %s255_s26, %s255_s26 }
  0x91   :  { %p14304_p2 = scmp.ne.s32.totalorder %s255_s26, %s14303_s8  ;;  %p14309_p4 = scmp.lt.s32.totalorder %s14303_s8, %s14303_s8 }
  0x93   :  { %p14310_p5 = por %p14309_p4, %p14308_p3 }
  0x95   :  { %p14311_p6 = pnand %p14310_p5, %p14304_p2 }
  0x97   :  { %14314 = shalt.err (!%p14311_p6)
}
  0x98   :  { %260 = dma.hbm_to_vmem [thread:$0]  %s14941_s12, 1920, %s255_s26, [#allocation24], %s14826_s16, %s14826_s16, %s14827_s18  }
  0x99   :  { %s14835_s19 = smov [#allocation26]   ;;  %s14836_s7 = smov [#allocation29]  }
  0x9a   :  { %s278_s2 = sshll.u32 %s14835_s19, 4  ;;  %s300_s21 = sshll.u32 %s14836_s7, 4  ;;  %s279_s2 = int_to_ptr.vmem [resolvable:$true] %s278_s2  ;;  %s301_s21 = int_to_ptr.vmem [resolvable:$true] %s300_s21 }
  0x9b   :  { %s14323_s10 = scalar_lea.vmem %s279_s2, 10240  ;;  %p14328_p8 = scmp.lt.s32.totalorder %s279_s2, %s279_s2 }
  0x9c   :  { %p14324_p7 = scmp.ne.s32.totalorder %s279_s2, %s14323_s10  ;;  %p14329_p9 = scmp.lt.s32.totalorder %s14323_s10, %s14323_s10 }
  0x9e   :  { %p14330_p10 = por %p14329_p9, %p14328_p8 }
  0xa0   :  { %p14331_p11 = pnand %p14330_p10, %p14324_p7 }
  0xa2   :  { %14334 = shalt.err (!%p14331_p11)
}
  0xa3   :  { %s14837_s30 = smov 256   ;;  %s14838_s0 = smov 16  }
  0xa4   :  { %284 = dma.hbm_to_vmem [thread:$0]  %s14951_s27, 10240, %s279_s2, [#allocation27], %s14837_s30, %s14837_s30, %s14838_s0  }
  0xa5   :  { %s14343_s12 = scalar_lea.vmem %s301_s21, 3072  ;;  %p14348_p13 = scmp.lt.s32.totalorder %s301_s21, %s301_s21 }
  0xa6   :  { %p14344_p12 = scmp.ne.s32.totalorder %s301_s21, %s14343_s12  ;;  %p14349_p0 = scmp.lt.s32.totalorder %s14343_s12, %s14343_s12 }
  0xa8   :  { %p14350_p1 = por %p14349_p0, %p14348_p13 }
  0xaa   :  { %p14351_p2 = pnand %p14350_p1, %p14344_p12 }
  0xac   :  { %14354 = shalt.err (!%p14351_p2)
}
  0xad   :  { %306 = dma.hbm_to_vmem [thread:$0]  %s14961_s5, 3072, %s301_s21, [#allocation30], %s14826_s16, %s14826_s16, %s14827_s18  }
  0xae   :  { %s14839_s11 = smov [#allocation32]   ;;  %s14840_s29 = smov [#allocation35]  }
  0xaf   :  { %s324_s15 = sshll.u32 %s14839_s11, 4  ;;  %s348_s22 = sshll.u32 %s14840_s29, 4  ;;  %s325_s15 = int_to_ptr.vmem [resolvable:$true] %s324_s15  ;;  %s349_s22 = int_to_ptr.vmem [resolvable:$true] %s348_s22 }
  0xb0   :  { %s14363_s23 = scalar_lea.vmem %s325_s15, 320  ;;  %p14368_p4 = scmp.lt.s32.totalorder %s325_s15, %s325_s15 }
  0xb1   :  { %p14364_p3 = scmp.ne.s32.totalorder %s325_s15, %s14363_s23  ;;  %p14369_p5 = scmp.lt.s32.totalorder %s14363_s23, %s14363_s23 }
  0xb3   :  { %p14370_p6 = por %p14369_p5, %p14368_p4 }
  0xb5   :  { %p14371_p7 = pnand %p14370_p6, %p14364_p3 }
  0xb7   :  { %14374 = shalt.err (!%p14371_p7)
}
  0xb8   :  { %330 = dma.hbm_to_vmem [thread:$0]  %s14971_s6, 320, %s325_s15, [#allocation33], %s14829_s13, %s14829_s13, %s14830_s1  }
  0xb9   :  { %s14383_s27 = scalar_lea.vmem %s349_s22, 512  ;;  %p14388_p9 = scmp.lt.s32.totalorder %s349_s22, %s349_s22 }
  0xba   :  { %p14384_p8 = scmp.ne.s32.totalorder %s349_s22, %s14383_s27  ;;  %p14389_p10 = scmp.lt.s32.totalorder %s14383_s27, %s14383_s27 }
  0xbc   :  { %p14390_p11 = por %p14389_p10, %p14388_p9 }
  0xbe   :  { %p14391_p12 = pnand %p14390_p11, %p14384_p8 }
  0xc0   :  { %14394 = shalt.err (!%p14391_p12)
}
  0xc1   :  { %354 = dma.hbm_to_vmem [thread:$0]  %s14986_s20, 512, %s349_s22, [#allocation36], %s14826_s16, %s14826_s16, %s14827_s18  }
  0xc2   :  { %s14841_s5 = smov [#allocation38]   ;;  %s14842_s28 = smov [#allocation2]  }
  0xc3   :  { %s372_s26 = sshll.u32 %s14841_s5, 4  ;;  %s104_s8 = sshll.u32 %s14842_s28, 4  ;;  %s373_s26 = int_to_ptr.vmem [resolvable:$true] %s372_s26  ;;  %s105_s8 = int_to_ptr.vmem [resolvable:$true] %s104_s8 }
  0xc4   :  { %s14403_s19 = scalar_lea.vmem %s373_s26, 512  ;;  %p14408_p0 = scmp.lt.s32.totalorder %s373_s26, %s373_s26 }
  0xc5   :  { %p14404_p13 = scmp.ne.s32.totalorder %s373_s26, %s14403_s19  ;;  %p14409_p1 = scmp.lt.s32.totalorder %s14403_s19, %s14403_s19 }
  0xc7   :  { %p14410_p2 = por %p14409_p1, %p14408_p0 }
  0xc9   :  { %p14411_p3 = pnand %p14410_p2, %p14404_p13 }
  0xcb   :  { %14414 = shalt.err (!%p14411_p3)
}
  0xcc   :  { %378 = dma.hbm_to_vmem [thread:$0]  %s14996_s4, 512, %s373_s26, [#allocation39], %s14837_s30, %s14837_s30, %s14838_s0  }
  0xcd   :  { %s14423_s6 = scalar_lea.vmem %s105_s8, 2560  ;;  %p14428_p5 = scmp.lt.s32.totalorder %s105_s8, %s105_s8 }
  0xce   :  { %p14424_p4 = scmp.ne.s32.totalorder %s105_s8, %s14423_s6  ;;  %p14429_p6 = scmp.lt.s32.totalorder %s14423_s6, %s14423_s6 }
  0xd0   :  { %p14430_p7 = por %p14429_p6, %p14428_p5 }
  0xd2   :  { %p14431_p8 = pnand %p14430_p7, %p14424_p4 }
  0xd4   :  { %14434 = shalt.err (!%p14431_p8)
}
  0xd5   :  { %110 = dma.hbm_to_vmem [thread:$0]  %s14876_s9, 2560, %s105_s8, [#allocation3], %s14826_s16, %s14826_s16, %s14827_s18  }
  0xd6   :  { %s14843_s20 = smov [#allocation7]   ;;  %s14844_s1 = smov [#allocation10]  }
  0xd7   :  { %s128_s13 = sshll.u32 %s14843_s20, 4  ;;  %s152_s2 = sshll.u32 %s14844_s1, 4  ;;  %s129_s13 = int_to_ptr.vmem [resolvable:$true] %s128_s13  ;;  %s153_s2 = int_to_ptr.vmem [resolvable:$true] %s152_s2 }
  0xd8   :  { %s14443_s7 = scalar_lea.vmem %s129_s13, 10240  ;;  %p14448_p10 = scmp.lt.s32.totalorder %s129_s13, %s129_s13 }
  0xd9   :  { %p14444_p9 = scmp.ne.s32.totalorder %s129_s13, %s14443_s7  ;;  %p14449_p11 = scmp.lt.s32.totalorder %s14443_s7, %s14443_s7 }
  0xdb   :  { %p14450_p12 = por %p14449_p11, %p14448_p10 }
  0xdd   :  { %p14451_p13 = pnand %p14450_p12, %p14444_p9 }
  0xdf   :  { %14454 = shalt.err (!%p14451_p13)
}
  0xe0   :  { %134 = dma.hbm_to_vmem [thread:$0]  %s14886_s17, 10240, %s129_s13, [#allocation6], %s14826_s16, %s14826_s16, %s14827_s18  }
  0xe1   :  { %s14463_s4 = scalar_lea.vmem %s153_s2, 10240  ;;  %p14468_p1 = scmp.lt.s32.totalorder %s153_s2, %s153_s2 }
  0xe2   :  { %p14464_p0 = scmp.ne.s32.totalorder %s153_s2, %s14463_s4  ;;  %p14469_p2 = scmp.lt.s32.totalorder %s14463_s4, %s14463_s4 }
  0xe4   :  { %p14470_p3 = por %p14469_p2, %p14468_p1 }
  0xe6   :  { %p14471_p4 = pnand %p14470_p3, %p14464_p0 }
  0xe8   :  { %14474 = shalt.err (!%p14471_p4)
}
  0xe9   :  { %s16820_s9 = sld [smem:[#allocation64_spill]]  ;;  %s14845_s21 = smov [#allocation13]  }
  0xea   :  { %s176_s10 = sshll.u32 %s14845_s21, 4  ;;  %s14846_s12 = smov [#allocation16]   ;;  %s177_s10 = int_to_ptr.vmem [resolvable:$true] %s176_s10 }
  0xeb   :  { %s198_s11 = sshll.u32 %s14846_s12, 4  ;;  %s14483_s15 = scalar_lea.vmem %s177_s10, 2048  ;;  %s199_s11 = int_to_ptr.vmem [resolvable:$true] %s198_s11 }
  0xec   :  { %p14484_p5 = scmp.ne.s32.totalorder %s177_s10, %s14483_s15  ;;  %p14488_p6 = scmp.lt.s32.totalorder %s177_s10, %s177_s10 }
  0xed   :  { %p14489_p7 = scmp.lt.s32.totalorder %s14483_s15, %s14483_s15 }
  0xef   :  { %158 = dma.hbm_to_vmem [thread:$0]  %s16820_s9, 10240, %s153_s2, [#allocation9], %s14826_s16, %s14826_s16, %s14827_s18  }
  0xf0   :  { %p14490_p8 = por %p14489_p7, %p14488_p6 }
  0xf2   :  { %p14491_p9 = pnand %p14490_p8, %p14484_p5 }
  0xf4   :  { %14494 = shalt.err (!%p14491_p9)
}
  0xf5   :  { %s16821_s17 = sld [smem:[#allocation65_spill]]  ;;  %s14503_s29 = scalar_lea.vmem %s199_s11, 10240 }
  0xf6   :  { %p14504_p10 = scmp.ne.s32.totalorder %s199_s11, %s14503_s29  ;;  %p14508_p11 = scmp.lt.s32.totalorder %s199_s11, %s199_s11 }
  0xf7   :  { %p14509_p12 = scmp.lt.s32.totalorder %s14503_s29, %s14503_s29 }
  0xf9   :  { %p14510_p13 = por %p14509_p12, %p14508_p11 }
  0xfb   :  { %182 = dma.hbm_to_vmem [thread:$0]  %s16821_s17, 2048, %s177_s10, [#allocation12], %s14826_s16, %s14826_s16, %s14827_s18  }
  0xfc   :  { %p14511_p0 = pnand %p14510_p13, %p14504_p10 }
  0xfe   :  { %14514 = shalt.err (!%p14511_p0)
}
  0xff   :  { %s16822_s22 = sld [smem:[#allocation66_spill]]  ;;  %s14847_s23 = smov [#allocation19]  }
 0x100   :  { %s220_s27 = sshll.u32 %s14847_s23, 4  ;;  %s14848_s5 = smov [#allocation22]   ;;  %s221_s27 = int_to_ptr.vmem [resolvable:$true] %s220_s27 }
 0x101   :  { %s242_s26 = sshll.u32 %s14848_s5, 4  ;;  %s14523_s28 = scalar_lea.vmem %s221_s27, 512  ;;  %s243_s26 = int_to_ptr.vmem [resolvable:$true] %s242_s26 }
 0x102   :  { %p14524_p1 = scmp.ne.s32.totalorder %s221_s27, %s14523_s28  ;;  %p14528_p2 = scmp.lt.s32.totalorder %s221_s27, %s221_s27 }
 0x103   :  { %p14529_p3 = scmp.lt.s32.totalorder %s14523_s28, %s14523_s28 }
 0x105   :  { %204 = dma.hbm_to_vmem [thread:$0]  %s16822_s22, 10240, %s199_s11, [#allocation15], %s14826_s16, %s14826_s16, %s14827_s18  }
 0x106   :  { %p14530_p4 = por %p14529_p3, %p14528_p2 }
 0x108   :  { %p14531_p5 = pnand %p14530_p4, %p14524_p1 }
 0x10a   :  { %14534 = shalt.err (!%p14531_p5)
}
 0x10b   :  { %s16823_s8 = sld [smem:[#allocation67_spill]]  ;;  %s14543_s19 = scalar_lea.vmem %s243_s26, 1024 }
 0x10c   :  { %p14544_p6 = scmp.ne.s32.totalorder %s243_s26, %s14543_s19  ;;  %p14548_p7 = scmp.lt.s32.totalorder %s243_s26, %s243_s26 }
 0x10d   :  { %p14549_p8 = scmp.lt.s32.totalorder %s14543_s19, %s14543_s19 }
 0x10f   :  { %p14550_p9 = por %p14549_p8, %p14548_p7 }
 0x111   :  { %226 = dma.hbm_to_vmem [thread:$0]  %s16823_s8, 512, %s221_s27, [#allocation18], %s14826_s16, %s14826_s16, %s14827_s18  }
 0x112   :  { %p14551_p10 = pnand %p14550_p9, %p14544_p6 }
 0x114   :  { %14554 = shalt.err (!%p14551_p10)
}
 0x115   :  { %s16824_s6 = sld [smem:[#allocation68_spill]]  ;;  %s14849_s20 = smov [#allocation25]  }
 0x116   :  { %s266_s13 = sshll.u32 %s14849_s20, 4  ;;  %s14850_s1 = smov [#allocation28]   ;;  %s267_s13 = int_to_ptr.vmem [resolvable:$true] %s266_s13 }
 0x117   :  { %s291_s2 = sshll.u32 %s14850_s1, 4  ;;  %s14563_s7 = scalar_lea.vmem %s267_s13, 10240  ;;  %s292_s2 = int_to_ptr.vmem [resolvable:$true] %s291_s2 }
 0x118   :  { %p14564_p11 = scmp.ne.s32.totalorder %s267_s13, %s14563_s7  ;;  %p14568_p12 = scmp.lt.s32.totalorder %s267_s13, %s267_s13 }
 0x119   :  { %p14569_p13 = scmp.lt.s32.totalorder %s14563_s7, %s14563_s7 }
 0x11b   :  { %248 = dma.hbm_to_vmem [thread:$0]  %s16824_s6, 1024, %s243_s26, [#allocation21], %s14826_s16, %s14826_s16, %s14827_s18  }
 0x11c   :  { %p14570_p0 = por %p14569_p13, %p14568_p12 }
 0x11e   :  { %p14571_p1 = pnand %p14570_p0, %p14564_p11 }
 0x120   :  { %14574 = shalt.err (!%p14571_p1)
}
 0x121   :  { %s16825_s4 = sld [smem:[#allocation69_spill]]  ;;  %s14583_s9 = scalar_lea.vmem %s292_s2, 128 }
 0x122   :  { %p14584_p2 = scmp.ne.s32.totalorder %s292_s2, %s14583_s9  ;;  %p14588_p3 = scmp.lt.s32.totalorder %s292_s2, %s292_s2 }
 0x123   :  { %p14589_p4 = scmp.lt.s32.totalorder %s14583_s9, %s14583_s9 }
 0x125   :  { %p14590_p5 = por %p14589_p4, %p14588_p3 }
 0x127   :  { %272 = dma.hbm_to_vmem [thread:$0]  %s16825_s4, 10240, %s267_s13, [#allocation24], %s14837_s30, %s14837_s30, %s14838_s0  }
 0x128   :  { %p14591_p6 = pnand %p14590_p5, %p14584_p2 }
 0x12a   :  { %14594 = shalt.err (!%p14591_p6)
}
 0x12b   :  { %s16826_s21 = sld [smem:[#allocation70_spill]]  ;;  %s14851_s10 = smov [#allocation31]  }
 0x12c   :  { %s312_s12 = sshll.u32 %s14851_s10, 4  ;;  %s14852_s11 = smov [#allocation34]   ;;  %s313_s12 = int_to_ptr.vmem [resolvable:$true] %s312_s12 }
 0x12d   :  { %s339_s15 = sshll.u32 %s14852_s11, 4  ;;  %s14603_s17 = scalar_lea.vmem %s313_s12, 512  ;;  %s340_s15 = int_to_ptr.vmem [resolvable:$true] %s339_s15 }
 0x12e   :  { %p14604_p7 = scmp.ne.s32.totalorder %s313_s12, %s14603_s17  ;;  %p14608_p8 = scmp.lt.s32.totalorder %s313_s12, %s313_s12 }
 0x12f   :  { %p14609_p9 = scmp.lt.s32.totalorder %s14603_s17, %s14603_s17 }
 0x131   :  { %294 = dma.hbm_to_vmem [thread:$0]  %s16826_s21, 128, %s292_s2, [#allocation27]  }
 0x132   :  { %p14610_p10 = por %p14609_p9, %p14608_p8 }
 0x134   :  { %p14611_p11 = pnand %p14610_p10, %p14604_p7 }
 0x136   :  { %14614 = shalt.err (!%p14611_p11)
}
 0x137   :  { %s16827_s29 = sld [smem:[#allocation71_spill]]  ;;  %s14623_s22 = scalar_lea.vmem %s340_s15, 64 }
 0x138   :  { %p14624_p12 = scmp.ne.s32.totalorder %s340_s15, %s14623_s22  ;;  %p14628_p13 = scmp.lt.s32.totalorder %s340_s15, %s340_s15 }
 0x139   :  { %p14629_p0 = scmp.lt.s32.totalorder %s14623_s22, %s14623_s22 }
 0x13b   :  { %p14630_p1 = por %p14629_p0, %p14628_p13 }
 0x13d   :  { %318 = dma.hbm_to_vmem [thread:$0]  %s16827_s29, 512, %s313_s12, [#allocation30], %s14837_s30, %s14837_s30, %s14838_s0  }
 0x13e   :  { %p14631_p2 = pnand %p14630_p1, %p14624_p12 }
 0x140   :  { %14634 = shalt.err (!%p14631_p2)
}
 0x141   :  { %s16828_s23 = sld [smem:[#allocation73_spill]]  ;;  %s14853_s27 = smov [#allocation37]  }
 0x142   :  { %s360_s5 = sshll.u32 %s14853_s27, 4  ;;  %s14854_s26 = smov [#allocation40]   ;;  %s361_s5 = int_to_ptr.vmem [resolvable:$true] %s360_s5 }
 0x143   :  { %s386_s28 = sshll.u32 %s14854_s26, 4  ;;  %s14643_s8 = scalar_lea.vmem %s361_s5, 256  ;;  %s387_s28 = int_to_ptr.vmem [resolvable:$true] %s386_s28 }
 0x144   :  { %p14644_p3 = scmp.ne.s32.totalorder %s361_s5, %s14643_s8  ;;  %p14648_p4 = scmp.lt.s32.totalorder %s361_s5, %s361_s5 }
 0x145   :  { %p14649_p5 = scmp.lt.s32.totalorder %s14643_s8, %s14643_s8 }
 0x147   :  { %342 = dma.hbm_to_vmem [thread:$0]  %s16828_s23, 64, %s340_s15, [#allocation33]  }
 0x148   :  { %p14650_p6 = por %p14649_p5, %p14648_p4 }
 0x14a   :  { %p14651_p7 = pnand %p14650_p6, %p14644_p3 }
 0x14c   :  { %14654 = shalt.err (!%p14651_p7)
}
 0x14d   :  { %s16829_s30 = sld [smem:[#allocation74_spill]]  ;;  %s14663_s0 = scalar_lea.vmem %s387_s28, 3200 }
 0x14e   :  { %p14664_p8 = scmp.ne.s32.totalorder %s387_s28, %s14663_s0  ;;  %p14668_p9 = scmp.lt.s32.totalorder %s387_s28, %s387_s28 }
 0x14f   :  { %p14669_p10 = scmp.lt.s32.totalorder %s14663_s0, %s14663_s0 }
 0x151   :  { %p14670_p11 = por %p14669_p10, %p14668_p9 }
 0x153   :  { %366 = dma.hbm_to_vmem [thread:$0]  %s16829_s30, 256, %s361_s5, [#allocation36], %s14826_s16, %s14826_s16, %s14827_s18  }
 0x154   :  { %p14671_p12 = pnand %p14670_p11, %p14664_p8 }
 0x156   :  { %14674 = shalt.err (!%p14671_p12)
}
 0x157   :  { %s16830_s19 = sld [smem:[#allocation76_spill]]  ;;  %s14855_s6 = smov [#allocation41]  }
 0x158   :  { %s400_s20 = sshll.u32 %s14855_s6, 4  ;;  %s401_s20 = int_to_ptr.vmem [resolvable:$true] %s400_s20 }
 0x159   :  { %s14683_s13 = scalar_lea.vmem %s401_s20, 3200  ;;  %p14688_p0 = scmp.lt.s32.totalorder %s401_s20, %s401_s20 }
 0x15a   :  { %p14684_p13 = scmp.ne.s32.totalorder %s401_s20, %s14683_s13  ;;  %p14689_p1 = scmp.lt.s32.totalorder %s14683_s13, %s14683_s13 }
 0x15c   :  { %p14690_p2 = por %p14689_p1, %p14688_p0 }
 0x15d   :  { %392 = dma.hbm_to_vmem [thread:$0]  %s16830_s19, 3200, %s387_s28, [#allocation39], %s14826_s16, %s14826_s16, %s14827_s18  }
 0x15e   :  { %p14691_p3 = pnand %p14690_p2, %p14684_p13 }
 0x160   :  { %14694 = shalt.err (!%p14691_p3)
}
 0x161   :  { %s16831_s1 = sld [smem:[#allocation78_spill]] }
 0x167   :  { %406 = dma.hbm_to_vmem [thread:$0]  %s16831_s1, 3200, %s401_s20, [#allocation42], %s14826_s16, %s14826_s16, %s14827_s18  }
 0x168   :  { %14755 = dma.done.wait [#allocation3], 2560  }
 0x169   :  { %14756 = vsyncadd [#allocation3], 4294964736 }
 0x16a   :  { %14757 = dma.done.wait [#allocation6], 15360  }
 0x16b   :  { %14758 = vsyncadd [#allocation6], 4294951936 }
 0x16c   :  { %14759 = dma.done.wait [#allocation9], 20480  }
 0x16d   :  { %14760 = vsyncadd [#allocation9], 4294946816 }
 0x16e   :  { %14761 = dma.done.wait [#allocation12], 2304  }
 0x16f   :  { %14762 = vsyncadd [#allocation12], 4294964992 }
 0x170   :  { %14763 = dma.done.wait [#allocation15], 10368  }
 0x171   :  { %14764 = vsyncadd [#allocation15], 4294956928 }
 0x172   :  { %14765 = dma.done.wait [#allocation18], 528  }
 0x173   :  { %14766 = vsyncadd [#allocation18], 4294966768 }
 0x174   :  { %14767 = dma.done.wait [#allocation21], 1056  }
 0x175   :  { %14768 = vsyncadd [#allocation21], 4294966240 }
 0x176   :  { %14769 = dma.done.wait [#allocation24], 12160  }
 0x177   :  { %14770 = vsyncadd [#allocation24], 4294955136 }
 0x178   :  { %14771 = dma.done.wait [#allocation27], 10368  }
 0x179   :  { %14772 = vsyncadd [#allocation27], 4294956928 }
 0x17a   :  { %14773 = dma.done.wait [#allocation30], 3584  }
 0x17b   :  { %14774 = vsyncadd [#allocation30], 4294963712 }
 0x17c   :  { %14775 = dma.done.wait [#allocation33], 384  }
 0x17d   :  { %14776 = vsyncadd [#allocation33], 4294966912 }
 0x17e   :  { %14777 = dma.done.wait [#allocation36], 768  }
 0x17f   :  { %14778 = vsyncadd [#allocation36], 4294966528 }
 0x180   :  { %14779 = dma.done.wait [#allocation39], 3712  }
 0x181   :  { %14780 = vsyncadd [#allocation39], 4294963584 }
 0x182   :  { %14781 = dma.done.wait [#allocation42], 3200  }
 0x183   :  { %14782 = vsyncadd [#allocation42], 4294964096  ;;  %v618_v0 = vld [vmem:[#allocation5 + $0x78] sm:$0xff]  ;;  %v617_v1 = vld [vmem:[#allocation5 + $0x70] sm:$0xff]  ;;  %s16832_s16 = sld [smem:[#allocation63_spill]]  ;;  %vm508_vm0 = vcmask 523264  }
 0x184   :  { %12155 = vmatprep.subr.mxu1 %v618_v0  ;;  %v507_v2 = vld [vmem:[#allocation5 + $0x38] sm:$0xff]  ;;  %v506_v3 = vld [vmem:[#allocation5 + $0x30] sm:$0xff]  ;;  %v616_v4 = vld [vmem:[#allocation5 + $0x68] sm:$0xff]  ;;  %vm709_vm1 = vcmask 261120   ;;  %vm14857_vm2 = vmmov 0   ;;  %vm1697_vm3 = vcmask 64512  }
 0x185   :  { %12156 = vmatpush3.msra.mxu1 %v618_v0  ;;  %12133 = vmatprep.subr.mxu0 %v507_v2  ;;  %v505_v5 = vld [vmem:[#allocation5 + $0x28] sm:$0xff]  ;;  %v615_v6 = vld [vmem:[#allocation5 + $0x60] sm:$0xff]  ;;  %v614_v8 = vld [vmem:[#allocation5 + $0x58] sm:$0xff]  ;;  %s16833_s18 = sld [smem:[#allocation72_spill]]  ;;  %vm8673_vm4 = vcmask 130048   ;;  %vm8908_vm5 = vcmask 1043456  }
 0x186   :  { %12157 = vmatprep.subr.mxu1 %v617_v1  ;;  %12134 = vmatpush3.msra.mxu0 %v507_v2  ;;  %v504_v7 = vld [vmem:[#allocation5 + $0x20] sm:$0xff]  ;;  %v503_v9 = vld [vmem:[#allocation5 + $0x18] sm:$0xff]  ;;  %v613_v10 = vld [vmem:[#allocation5 + $0x50] sm:$0xff]  ;;  %s14858_s2 = smov 32   ;;  %vm8954_vm6 = vcmask 785408   ;;  %vm9127_vm7 = vcmask 97280  }
 0x187   :  { %12158 = vmatpush3.msra.mxu1 %v617_v1  ;;  %12135 = vmatprep.subr.mxu0 %v506_v3  ;;  %v612_v12 = vld [vmem:[#allocation5 + $0x48] sm:$0xff]  ;;  %v502_v13 = vld [vmem:[#allocation5 + $0x10] sm:$0xff]  ;;  %v611_v14 = vld [vmem:[#allocation5 + $0x40] sm:$0xff]  ;;  %vm9792_vm8 = vcmask 257024   ;;  %s14859_s7 = smov 112   ;;  %s16834_s4 = sld [smem:[#allocation75_spill]] }
 0x188   :  { %12159 = vmatprep.subr.mxu1 %v616_v4  ;;  %12136 = vmatpush3.msra.mxu0 %v506_v3  ;;  %v501_v15 = vld [vmem:[#allocation5 + $0x8] sm:$0xff]  ;;  %v500_v17 = vld [vmem:[#allocation5] sm:$0xff]  ;;  %v15181_v29 = vld [vmem:[#allocation2 + $0x30] sm:$0xff]  ;;  %vm10260_vm9 = vcmask 588800   ;;  %s16835_s9 = sld [smem:[#allocation77_spill]]  ;;  %vm10449_vm10 = vcmask 9216  }
 0x189   :  { %12160 = vmatpush3.msra.mxu1 %v616_v4  ;;  %12137 = vmatprep.subr.mxu0 %v505_v5  ;;  %v15148_v11 = vld [vmem:[%s16832_s16] sm:$0xff]  ;;  %v15153_v16 = vld [vmem:[%s16832_s16 + $0x8] sm:$0xff]  ;;  %v15156_v18 = vld [vmem:[%s16832_s16 + $0x10] sm:$0xff]  ;;  %s16836_s21 = sld [smem:[#allocation79_spill]]  ;;  %vm10334_vm11 = vcmask 17408   ;;  %vm10626_vm12 = vcmask 31744  }
 0x18a   :  { %12161 = vmatprep.subr.mxu1 %v615_v6  ;;  %12138 = vmatpush3.msra.mxu0 %v505_v5  ;;  %v15163_v19 = vld [vmem:[%s16832_s16 + $0x18] sm:$0xff]  ;;  %v15175_v20 = vld [vmem:[#allocation2 + $0x20] sm:$0xff]  ;;  %v15179_v28 = vld [vmem:[#allocation2 + $0x28] sm:$0xff]  ;;  %s16837_s10 = sld [smem:[#allocation80_spill]]  ;;  %vm10724_vm13 = vcmask 818176   ;;  %s14861_s17 = smov [#allocation43]  }
 0x18b   :  { %12162 = vmatpush3.msra.mxu1 %v615_v6  ;;  %12139 = vmatprep.subr.mxu0 %v504_v7  ;;  %v15187_v31 = vld [vmem:[#allocation2 + $0x38] sm:$0xff]  ;;  %v15189_v32 = vld [vmem:[#allocation2] sm:$0xff]  ;;  %v15195_v33 = vld [vmem:[#allocation2 + $0x8] sm:$0xff]  ;;  %s16838_s12 = sld [smem:[#allocation82_spill]]  ;;  %s10819_s29 = sshll.u32 %s14861_s17, 4  ;;  %s10820_s29 = int_to_ptr.vmem [resolvable:$true] %s10819_s29 }
 0x18c   :  { %12163 = vmatprep.subr.mxu1 %v614_v8  ;;  %12140 = vmatpush3.msra.mxu0 %v504_v7  ;;  %v912_v34 = vld [vmem:[#allocation5 + $0xb8] sm:$0xff]  ;;  %v15197_v35 = vld [vmem:[#allocation2 + $0x10] sm:$0xff]  ;;  %v910_v38 = vld [vmem:[#allocation5 + $0xa8] sm:$0xff]  ;;  %s16839_s11 = sld [smem:[#allocation81_spill]] }
 0x18d   :  { %12164 = vmatpush3.msra.mxu1 %v614_v8  ;;  %12141 = vmatprep.subr.mxu0 %v503_v9  ;;  %v911_v36 = vld [vmem:[#allocation5 + $0xb0] sm:$0xff]  ;;  %v15203_v37 = vld [vmem:[#allocation2 + $0x18] sm:$0xff]  ;;  %v909_v39 = vld [vmem:[#allocation5 + $0xa0] sm:$0xff] }
 0x18e   :  { %12165 = vmatprep.subr.mxu1 %v613_v10  ;;  %12142 = vmatpush3.msra.mxu0 %v503_v9  ;;  %v908_v40 = vld [vmem:[#allocation5 + $0x98] sm:$0xff]  ;;  %v907_v41 = vld [vmem:[#allocation5 + $0x90] sm:$0xff]  ;;  %v906_v42 = vld [vmem:[#allocation5 + $0x88] sm:$0xff] }
 0x18f   :  { %12166 = vmatpush3.msra.mxu1 %v613_v10  ;;  %12171 = vmatprep.mubr.msk.f32.mxu1 %vm508_vm0, %v15148_v11  ;;  %v905_v43 = vld [vmem:[#allocation5 + $0x80] sm:$0xff]  ;;  %v15227_v59 = vld [vmem:[#allocation2 + $0x48] sm:$0xff]  ;;  %v1112_v60 = vld [vmem:[#allocation5 + $0xf8] sm:$0xff] }
 0x190   :  { %12167 = vmatprep.subr.mxu1 %v612_v12  ;;  %12143 = vmatprep.subr.mxu0 %v502_v13  ;;  %v15215_v44 = vld [vmem:[#allocation2 + $0x40] sm:$0xff]  ;;  %v15229_v61 = vld [vmem:[#allocation2 + $0x50] sm:$0xff]  ;;  %v15235_v63 = vld [vmem:[#allocation2 + $0x58] sm:$0xff] }
 0x191   :  { %12168 = vmatpush3.msra.mxu1 %v612_v12  ;;  %12144 = vmatpush3.msra.mxu0 %v502_v13  ;;  %v1111_v62 = vld [vmem:[#allocation5 + $0xf0] sm:$0xff]  ;;  %v1110_v0 = vld [vmem:[#allocation5 + $0xe8] sm:$0xff]  ;;  %v1109_v1 = vld [vmem:[#allocation5 + $0xe0] sm:$0xff] }
 0x192   :  { %12169 = vmatprep.subr.mxu1 %v611_v14  ;;  %12145 = vmatprep.subr.mxu0 %v501_v15  ;;  %v1108_v2 = vld [vmem:[#allocation5 + $0xd8] sm:$0xff]  ;;  %v1107_v3 = vld [vmem:[#allocation5 + $0xd0] sm:$0xff]  ;;  %v1106_v4 = vld [vmem:[#allocation5 + $0xc8] sm:$0xff] }
 0x193   :  { %12170 = vmatpush3.msra.mxu1 %v611_v14  ;;  %12146 = vmatpush3.msra.mxu0 %v501_v15  ;;  %v1105_v5 = vld [vmem:[#allocation5 + $0xc0] sm:$0xff] }
 0x194   :  { %12172 = vmatmul.mubr.msk.f32.vlgmr.msra.gmra.mxu1 %vm508_vm0, %v15153_v16  ;;  %12147 = vmatprep.subr.mxu0 %v500_v17  ;;  %v15247_v6 = vld [vmem:[#allocation2 + $0x60] sm:$0xff] }
 0x195   :  { %12174 = vmatprep.mubr.msk.f32.mxu1 %vm508_vm0, %v15156_v18  ;;  %12148 = vmatpush3.msra.mxu0 %v500_v17 }
 0x196   :  { %12149 = vmatprep.mubr.msk.f32.mxu0 %vm508_vm0, %v15148_v11 }
 0x197   :  { %12150 = vmatmul.mubr.msk.f32.vlgmr.msra.gmra.mxu0 %vm508_vm0, %v15153_v16 }
 0x198   :  { %12175 = vmatmul.mubr.msk.f32.gmra.mxu1 %vm508_vm0, %v15163_v19  ;;  %12152 = vmatprep.mubr.msk.f32.mxu0 %vm508_vm0, %v15156_v18 }
 0x199   :  { %12235 = vmatprep.mubr.msk.f32.mxu1 %vm709_vm1, %v15215_v44 }
 0x19b   :  { %12153 = vmatmul.mubr.msk.f32.gmra.mxu0 %vm508_vm0, %v15163_v19 }
 0x19c   :  { %12185 = vmatprep.mubr.msk.f32.mxu0 %vm709_vm1, %v15175_v20 }
 0x254   :  { %v12173_v21 = vpop.f32.mrf.mxu1 }
 0x256   :  { %v685_v22 = vpop.f32.mrf.mxu1 }
 0x257   :  { %v12151_v23 = vpop.f32.mrf.mxu0 }
 0x258   :  { %v12176_v24 = vpop.f32.mrf.mxu1 }
 0x259   :  { %12177 = vmatprep.subr.mxu0 %v12176_v24  ;;  %v587_v26 = vpop.f32.mrf.mxu0 }
 0x25a   :  { %v695_v25 = vpop.f32.mrf.mxu1  ;;  %12178 = vmatpush3.msra.mxu0 %v12176_v24  ;;  %v1201_v24 = vld [vmem:[#allocation2 + $0x70] sm:$0xff] }
 0x25b   :  { %12179 = vmatprep.subr.mxu0 %v695_v25  ;;  %v12154_v27 = vpop.f32.mrf.mxu0 }
 0x25c   :  { %12180 = vmatpush3.msra.mxu0 %v695_v25  ;;  %v1311_v25 = vld [vmem:[#allocation5 + $0x130] sm:$0xff] }
 0x25d   :  { %12181 = vmatprep.subr.mxu0 %v12173_v21  ;;  %v597_v30 = vpop.f32.mrf.mxu0 }
 0x25e   :  { %12182 = vmatpush3.msra.mxu0 %v12173_v21 }
 0x25f   :  { %12183 = vmatprep.subr.mxu0 %v685_v22 }
 0x260   :  { %12184 = vmatpush3.msra.mxu0 %v685_v22  ;;  %v1200_v22 = vld [vmem:[#allocation2 + $0x68] sm:$0xff] }
 0x261   :  { %12186 = vmatmul.mubr.msk.f32.vlgmr.msra.gmra.mxu0 %vm709_vm1, %v15179_v28  ;;  %12191 = vmatprep.subr.mxu0 %v12154_v27 }
 0x262   :  { %12192 = vmatpush3.msra.mxu0 %v12154_v27  ;;  %12188 = vmatprep.mubr.msk.f32.mxu0 %vm709_vm1, %v15181_v29  ;;  %v1310_v27 = vld [vmem:[#allocation5 + $0x128] sm:$0xff] }
 0x263   :  { %12193 = vmatprep.subr.mxu0 %v597_v30 }
 0x264   :  { %12194 = vmatpush3.msra.mxu0 %v597_v30  ;;  %v1309_v30 = vld [vmem:[#allocation5 + $0x120] sm:$0xff] }
 0x265   :  { %12189 = vmatmul.mubr.msk.f32.gmra.mxu0 %vm709_vm1, %v15187_v31  ;;  %12195 = vmatprep.subr.mxu0 %v12151_v23 }
 0x266   :  { %12196 = vmatpush3.msra.mxu0 %v12151_v23  ;;  %12199 = vmatprep.mubr.msk.f32.mxu0 %vm709_vm1, %v15189_v32  ;;  %v1312_v23 = vld [vmem:[#allocation5 + $0x138] sm:$0xff] }
 0x267   :  { %12197 = vmatprep.subr.mxu0 %v587_v26 }
 0x268   :  { %12198 = vmatpush3.msra.mxu0 %v587_v26  ;;  %v1202_v26 = vld [vmem:[#allocation2 + $0x78] sm:$0xff] }
 0x269   :  { %12200 = vmatmul.mubr.msk.f32.vlgmr.msra.gmra.mxu0 %vm709_vm1, %v15195_v33  ;;  %12205 = vmatprep.subr.mxu0 %v912_v34 }
 0x26a   :  { %12206 = vmatpush3.msra.mxu0 %v912_v34  ;;  %12202 = vmatprep.mubr.msk.f32.mxu0 %vm709_vm1, %v15197_v35  ;;  %v1308_v34 = vld [vmem:[#allocation5 + $0x118] sm:$0xff] }
 0x26b   :  { %12207 = vmatprep.subr.mxu0 %v911_v36 }
 0x26c   :  { %12208 = vmatpush3.msra.mxu0 %v911_v36  ;;  %v1307_v36 = vld [vmem:[#allocation5 + $0x110] sm:$0xff] }
 0x26d   :  { %12203 = vmatmul.mubr.msk.f32.gmra.mxu0 %vm709_vm1, %v15203_v37  ;;  %12209 = vmatprep.subr.mxu0 %v910_v38 }
 0x26e   :  { %12210 = vmatpush3.msra.mxu0 %v910_v38  ;;  %12221 = vmatprep.mubr.msk.f32.mxu0 %vm508_vm0, %v15148_v11  ;;  %v1306_v38 = vld [vmem:[#allocation5 + $0x108] sm:$0xff] }
 0x26f   :  { %12211 = vmatprep.subr.mxu0 %v909_v39 }
 0x270   :  { %12212 = vmatpush3.msra.mxu0 %v909_v39  ;;  %v1305_v39 = vld [vmem:[#allocation5 + $0x100] sm:$0xff] }
 0x271   :  { %12213 = vmatprep.subr.mxu0 %v908_v40 }
 0x272   :  { %12214 = vmatpush3.msra.mxu0 %v908_v40  ;;  %v1519_v40 = vld [vmem:[#allocation13 + $0x78] sm:$0xff] }
 0x273   :  { %12215 = vmatprep.subr.mxu0 %v907_v41 }
 0x274   :  { %12216 = vmatpush3.msra.mxu0 %v907_v41  ;;  %v14856_v41 = vmov 0.0  }
 0x275   :  { %12217 = vmatprep.subr.mxu0 %v906_v42 }
 0x276   :  { %12218 = vmatpush3.msra.mxu0 %v906_v42  ;;  %v1518_v42 = vld [vmem:[#allocation13 + $0x70] sm:$0xff] }
 0x277   :  { %12219 = vmatprep.subr.mxu0 %v905_v43 }
 0x278   :  { %12220 = vmatpush3.msra.mxu0 %v905_v43 }
 0x279   :  { %12222 = vmatmul.mubr.msk.f32.vlgmr.msra.gmra.mxu0 %vm508_vm0, %v15153_v16 }
 0x27a   :  { %12224 = vmatprep.mubr.msk.f32.mxu0 %vm508_vm0, %v15156_v18 }
 0x27d   :  { %12225 = vmatmul.mubr.msk.f32.gmra.mxu0 %vm508_vm0, %v15163_v19 }
 0x27e   :  { %12271 = vmatprep.mubr.msk.f32.mxu0 %vm709_vm1, %v15247_v6 }
 0x321   :  { %v12187_v45 = vpop.f32.mrf.mxu0 }
 0x323   :  { %v15219_v46 = vpop.f32.mrf.mxu0 }
 0x325   :  { %v12190_v47 = vpop.f32.mrf.mxu0 }
 0x327   :  { %v15221_v48 = vpop.f32.mrf.mxu0 }
 0x329   :  { %v12201_v49 = vpop.f32.mrf.mxu0 }
 0x32a   :  { %v891_v50 = vadd.f32 %v12201_v49, %v12187_v45 }
 0x32b   :  { %v15223_v51 = vpop.f32.mrf.mxu0 }
 0x32d   :  { %v12204_v52 = vpop.f32.mrf.mxu0 }
 0x32e   :  { %v901_v53 = vadd.f32 %v12204_v52, %v12190_v47 }
 0x32f   :  { %v15225_v54 = vpop.f32.mrf.mxu0 }
 0x339   :  { %v12223_v55 = vpop.f32.mrf.mxu0 }
 0x33b   :  { %v979_v56 = vpop.f32.mrf.mxu0 }
 0x33d   :  { %v12226_v57 = vpop.f32.mrf.mxu0 }
 0x33e   :  { %12227 = vmatprep.subr.mxu1 %v12226_v57 }
 0x33f   :  { %v989_v58 = vpop.f32.mrf.mxu0  ;;  %12228 = vmatpush3.msra.mxu1 %v12226_v57  ;;  %v1402_v57 = vld [vmem:[#allocation2 + $0x98] sm:$0xff] }
 0x340   :  { %12229 = vmatprep.subr.mxu1 %v989_v58 }
 0x341   :  { %12230 = vmatpush3.msra.mxu1 %v989_v58  ;;  %v1517_v58 = vld [vmem:[#allocation13 + $0x68] sm:$0xff] }
 0x342   :  { %12231 = vmatprep.subr.mxu1 %v12223_v55 }
 0x343   :  { %12232 = vmatpush3.msra.mxu1 %v12223_v55  ;;  %v1400_v55 = vld [vmem:[#allocation2 + $0x88] sm:$0xff] }
 0x344   :  { %12233 = vmatprep.subr.mxu1 %v979_v56 }
 0x345   :  { %12234 = vmatpush3.msra.mxu1 %v979_v56  ;;  %v1401_v56 = vld [vmem:[#allocation2 + $0x90] sm:$0xff] }
 0x346   :  { %12236 = vmatmul.mubr.msk.f32.vlgmr.msra.gmra.mxu1 %vm709_vm1, %v15227_v59  ;;  %12241 = vmatprep.subr.mxu1 %v1112_v60 }
 0x347   :  { %12242 = vmatpush3.msra.mxu1 %v1112_v60  ;;  %12238 = vmatprep.mubr.msk.f32.mxu1 %vm709_vm1, %v15229_v61  ;;  %v1516_v60 = vld [vmem:[#allocation13 + $0x60] sm:$0xff] }
 0x348   :  { %12243 = vmatprep.subr.mxu1 %v1111_v62 }
 0x349   :  { %12244 = vmatpush3.msra.mxu1 %v1111_v62  ;;  %v15290_v62 = vld [vmem:[#allocation13 + $0x58] sm:$0xff] }
 0x34a   :  { %12239 = vmatmul.mubr.msk.f32.gmra.mxu1 %vm709_vm1, %v15235_v63  ;;  %12245 = vmatprep.subr.mxu1 %v1110_v0 }
 0x34b   :  { %12246 = vmatpush3.msra.mxu1 %v1110_v0  ;;  %12257 = vmatprep.mubr.msk.f32.mxu1 %vm508_vm0, %v15148_v11  ;;  %v15296_v0 = vld [vmem:[#allocation13 + $0x50] sm:$0xff] }
 0x34c   :  { %12247 = vmatprep.subr.mxu1 %v1109_v1 }
 0x34d   :  { %12248 = vmatpush3.msra.mxu1 %v1109_v1  ;;  %v15302_v1 = vld [vmem:[#allocation13 + $0x48] sm:$0xff] }
 0x34e   :  { %12249 = vmatprep.subr.mxu1 %v1108_v2 }
 0x34f   :  { %12250 = vmatpush3.msra.mxu1 %v1108_v2  ;;  %v15308_v2 = vld [vmem:[#allocation13 + $0x40] sm:$0xff] }
 0x350   :  { %12251 = vmatprep.subr.mxu1 %v1107_v3 }
 0x351   :  { %12252 = vmatpush3.msra.mxu1 %v1107_v3  ;;  %v15314_v3 = vld [vmem:[#allocation13 + $0x38] sm:$0xff] }
 0x352   :  { %12253 = vmatprep.subr.mxu1 %v1106_v4 }
 0x353   :  { %12254 = vmatpush3.msra.mxu1 %v1106_v4  ;;  %v15320_v4 = vld [vmem:[#allocation13 + $0x30] sm:$0xff] }
 0x354   :  { %12255 = vmatprep.subr.mxu1 %v1105_v5 }
 0x355   :  { %12256 = vmatpush3.msra.mxu1 %v1105_v5  ;;  %v15326_v5 = vld [vmem:[#allocation13 + $0x28] sm:$0xff] }
 0x356   :  { %12258 = vmatmul.mubr.msk.f32.vlgmr.msra.gmra.mxu1 %vm508_vm0, %v15153_v16 }
 0x357   :  { %12260 = vmatprep.mubr.msk.f32.mxu1 %vm508_vm0, %v15156_v18 }
 0x35a   :  { %12261 = vmatmul.mubr.msk.f32.gmra.mxu1 %vm508_vm0, %v15163_v19 }
 0x406   :  { %v12237_v7 = vpop.f32.mrf.mxu1 }
 0x407   :  { %v1101_v8 = vadd.f32 %v12237_v7, %v891_v50  ;;  %v15332_v7 = vld [vmem:[#allocation13 + $0x20] sm:$0xff] }
 0x408   :  { %v15251_v9 = vpop.f32.mrf.mxu1 }
 0x40a   :  { %v12240_v10 = vpop.f32.mrf.mxu1 }
 0x40b   :  { %v1103_v12 = vadd.f32 %v12240_v10, %v901_v53  ;;  %v15341_v10 = vld [vmem:[#allocation13 + $0x10] sm:$0xff] }
 0x40c   :  { %v15253_v13 = vpop.f32.mrf.mxu1 }
 0x416   :  { %v12259_v14 = vpop.f32.mrf.mxu1 }
 0x418   :  { %v1179_v15 = vpop.f32.mrf.mxu1 }
 0x41a   :  { %v12262_v17 = vpop.f32.mrf.mxu1 }
 0x41b   :  { %12263 = vmatprep.subr.mxu0 %v12262_v17 }
 0x41c   :  { %v1189_v21 = vpop.f32.mrf.mxu1  ;;  %12264 = vmatpush3.msra.mxu0 %v12262_v17 }
 0x41d   :  { %12265 = vmatprep.subr.mxu0 %v1189_v21 }
 0x41e   :  { %12266 = vmatpush3.msra.mxu0 %v1189_v21  ;;  %v886_v21 = vadd.f32 %v15223_v51, %v15219_v46 }
 0x41f   :  { %12267 = vmatprep.subr.mxu0 %v12259_v14 }
 0x420   :  { %12268 = vmatpush3.msra.mxu0 %v12259_v14  ;;  %v15353_v14 = vld [vmem:[#allocation13] sm:$0xff] }
 0x421   :  { %12269 = vmatprep.subr.mxu0 %v1179_v15 }
 0x422   :  { %12270 = vmatpush3.msra.mxu0 %v1179_v15  ;;  %v1521_v15 = vlaneseq }
 0x423   :  { %12272 = vmatmul.mubr.msk.f32.vlgmr.msra.gmra.mxu0 %vm709_vm1, %v1200_v22  ;;  %12277 = vmatprep.subr.mxu0 %v1312_v23 }
 0x424   :  { %12278 = vmatpush3.msra.mxu0 %v1312_v23  ;;  %12274 = vmatprep.mubr.msk.f32.mxu0 %vm709_vm1, %v1201_v24  ;;  %v15366_v17 = vshrl.u32 %v1521_v15, 7  ;;  %v15373_v23 = vld [vmem:[#allocation11] sm:$0x7]  ;;  %v1100_v24 = vadd.f32 %v15251_v9, %v886_v21 }
 0x425   :  { %12279 = vmatprep.subr.mxu0 %v1311_v25 }
 0x426   :  { %12280 = vmatpush3.msra.mxu0 %v1311_v25  ;;  %v15371_v22 = vsub.s32 0, %v15366_v17 }
 0x427   :  { %12275 = vmatmul.mubr.msk.f32.gmra.mxu0 %vm709_vm1, %v1202_v26  ;;  %12281 = vmatprep.subr.mxu0 %v1310_v27  ;;  %v896_v26 = vadd.f32 %v15225_v54, %v15221_v48 }
 0x428   :  { %12282 = vmatpush3.msra.mxu0 %v1310_v27  ;;  %12293 = vmatprep.mubr.msk.f32.mxu0 %vm508_vm0, %v15148_v11  ;;  %v15266_v11 = vld [vmem:[#allocation2 + $0x80] sm:$0xff] }
 0x429   :  { %12283 = vmatprep.subr.mxu0 %v1309_v30  ;;  %12307 = vmatprep.mubr.msk.f32.mxu1 %vm709_vm1, %v15266_v11  ;;  %v1102_v46 = vadd.f32 %v15253_v13, %v896_v26 }
 0x42a   :  { %12284 = vmatpush3.msra.mxu0 %v1309_v30 }
 0x42b   :  { %12285 = vmatprep.subr.mxu0 %v1308_v34 }
 0x42c   :  { %12286 = vmatpush3.msra.mxu0 %v1308_v34  ;;  %v1524_v34 = vrot.slane %v15373_v23, %v15371_v22 }
 0x42d   :  { %12287 = vmatprep.subr.mxu0 %v1307_v36 }
 0x42e   :  { %12288 = vmatpush3.msra.mxu0 %v1307_v36 }
 0x42f   :  { %12289 = vmatprep.subr.mxu0 %v1306_v38 }
 0x430   :  { %12290 = vmatpush3.msra.mxu0 %v1306_v38 }
 0x431   :  { %12291 = vmatprep.subr.mxu0 %v1305_v39 }
 0x432   :  { %12292 = vmatpush3.msra.mxu0 %v1305_v39 }
 0x433   :  { %12294 = vmatmul.mubr.msk.f32.vlgmr.msra.gmra.mxu0 %vm508_vm0, %v15153_v16  ;;  %12348 = vmatprep.subr.mxu0 %v14856_v41 }
 0x434   :  { %12296 = vmatprep.mubr.msk.f32.mxu0 %vm508_vm0, %v15156_v18  ;;  %12349 = vmatpush3.msra.mxu0 %v1519_v40 }
 0x435   :  { %12350 = vmatprep.subr.mxu0 %v14856_v41 }
 0x436   :  { %12351 = vmatpush3.msra.mxu0 %v1518_v42 }
 0x437   :  { %12297 = vmatmul.mubr.msk.f32.gmra.mxu0 %vm508_vm0, %v15163_v19  ;;  %12352 = vmatprep.subr.mxu0 %v14856_v41 }
 0x438   :  { %12353 = vmatpush3.msra.mxu0 %v1517_v58  ;;  %12380 = vmatprep.mubr.msk.f32.mxu0 %vm14857_vm2, %v14856_v41 }
 0x439   :  { %12354 = vmatprep.subr.mxu0 %v14856_v41 }
 0x43a   :  { %12355 = vmatpush3.msra.mxu0 %v1516_v60 }
 0x43b   :  { %12356 = vmatprep.subr.mxu0 %v14856_v41 }
 0x43c   :  { %12357 = vmatpush3.msra.mxu0 %v15290_v62 }
 0x43d   :  { %12358 = vmatprep.subr.mxu0 %v14856_v41 }
 0x43e   :  { %12359 = vmatpush3.msra.mxu0 %v15296_v0 }
 0x43f   :  { %12360 = vmatprep.subr.mxu0 %v14856_v41 }
 0x440   :  { %12361 = vmatpush3.msra.mxu0 %v15302_v1 }
 0x441   :  { %12362 = vmatprep.subr.mxu0 %v14856_v41 }
 0x442   :  { %12363 = vmatpush3.msra.mxu0 %v15308_v2 }
 0x443   :  { %12364 = vmatprep.subr.mxu0 %v14856_v41 }
 0x444   :  { %12365 = vmatpush3.msra.mxu0 %v15314_v3 }
 0x445   :  { %12366 = vmatprep.subr.mxu0 %v14856_v41 }
 0x446   :  { %12367 = vmatpush3.msra.mxu0 %v15320_v4 }
 0x447   :  { %12368 = vmatprep.subr.mxu0 %v14856_v41 }
 0x448   :  { %12369 = vmatpush3.msra.mxu0 %v15326_v5 }
 0x449   :  { %12370 = vmatprep.subr.mxu0 %v14856_v41 }
 0x44a   :  { %12371 = vmatpush3.msra.mxu0 %v15332_v7 }
 0x44b   :  { %12372 = vmatprep.subr.mxu0 %v14856_v41 }
 0x4e3   :  { %v12273_v16 = vpop.f32.mrf.mxu0 }
 0x4e4   :  { %v15273_v18 = vadd.f32 %v12273_v16, %v1101_v8  ;;  %v15338_v8 = vld [vmem:[#allocation13 + $0x18] sm:$0xff] }
 0x4e5   :  { %v15275_v19 = vpop.f32.mrf.mxu0  ;;  %12373 = vmatpush3.msra.mxu0 %v15338_v8 }
 0x4e6   :  { %12374 = vmatprep.subr.mxu0 %v14856_v41  ;;  %v1300_v27 = vadd.f32 %v15275_v19, %v1100_v24 }
 0x4e7   :  { %v12276_v43 = vpop.f32.mrf.mxu0  ;;  %12375 = vmatpush3.msra.mxu0 %v15341_v10 }
 0x4e8   :  { %v15277_v45 = vadd.f32 %v12276_v43, %v1103_v12  ;;  %v15347_v12 = vld [vmem:[#allocation13 + $0x8] sm:$0xff]  ;;  %12376 = vmatprep.subr.mxu0 %v14856_v41 }
 0x4e9   :  { %v15279_v47 = vpop.f32.mrf.mxu0  ;;  %12377 = vmatpush3.msra.mxu0 %v15347_v12 }
 0x4ea   :  { %12378 = vmatprep.subr.mxu0 %v14856_v41  ;;  %v1302_v39 = vadd.f32 %v15279_v47, %v1102_v46 }
 0x4eb   :  { %12379 = vmatpush3.msra.mxu0 %v15353_v14 }
 0x4f3   :  { %v12295_v49 = vpop.f32.mrf.mxu0 }
 0x4f5   :  { %v1379_v50 = vpop.f32.mrf.mxu0 }
 0x4f7   :  { %v12298_v52 = vpop.f32.mrf.mxu0 }
 0x4f8   :  { %12299 = vmatprep.subr.mxu1 %v12298_v52 }
 0x4f9   :  { %v1389_v53 = vpop.f32.mrf.mxu0  ;;  %12300 = vmatpush3.msra.mxu1 %v12298_v52 }
 0x4fa   :  { %12301 = vmatprep.subr.mxu1 %v1389_v53 }
 0x4fb   :  { %12302 = vmatpush3.msra.mxu1 %v1389_v53 }
 0x4fc   :  { %12303 = vmatprep.subr.mxu1 %v12295_v49 }
 0x4fd   :  { %12304 = vmatpush3.msra.mxu1 %v12295_v49 }
 0x4fe   :  { %12305 = vmatprep.subr.mxu1 %v1379_v50 }
 0x4ff   :  { %12306 = vmatpush3.msra.mxu1 %v1379_v50 }
 0x500   :  { %12308 = vmatmul.mubr.msk.f32.vlgmr.msra.gmra.mxu1 %vm709_vm1, %v1400_v55  ;;  %12313 = vmatprep.subr.mxu1 %v14856_v41 }
 0x501   :  { %12310 = vmatprep.mubr.msk.f32.mxu1 %vm709_vm1, %v1401_v56  ;;  %12314 = vmatpush3.msra.mxu1 %v1519_v40 }
 0x502   :  { %12315 = vmatprep.subr.mxu1 %v14856_v41 }
 0x503   :  { %12316 = vmatpush3.msra.mxu1 %v1518_v42 }
 0x504   :  { %12311 = vmatmul.mubr.msk.f32.gmra.mxu1 %vm709_vm1, %v1402_v57  ;;  %12317 = vmatprep.subr.mxu1 %v14856_v41 }
 0x505   :  { %12318 = vmatpush3.msra.mxu1 %v1517_v58  ;;  %12345 = vmatprep.mubr.msk.f32.mxu1 %vm14857_vm2, %v14856_v41 }
 0x506   :  { %12319 = vmatprep.subr.mxu1 %v14856_v41 }
 0x507   :  { %12320 = vmatpush3.msra.mxu1 %v1516_v60 }
 0x508   :  { %12321 = vmatprep.subr.mxu1 %v14856_v41 }
 0x509   :  { %12322 = vmatpush3.msra.mxu1 %v15290_v62 }
 0x50a   :  { %12323 = vmatprep.subr.mxu1 %v14856_v41 }
 0x50b   :  { %12324 = vmatpush3.msra.mxu1 %v15296_v0 }
 0x50c   :  { %12325 = vmatprep.subr.mxu1 %v14856_v41 }
 0x50d   :  { %12326 = vmatpush3.msra.mxu1 %v15302_v1 }
 0x50e   :  { %12327 = vmatprep.subr.mxu1 %v14856_v41 }
 0x50f   :  { %12328 = vmatpush3.msra.mxu1 %v15308_v2 }
 0x510   :  { %12329 = vmatprep.subr.mxu1 %v14856_v41 }
 0x511   :  { %12330 = vmatpush3.msra.mxu1 %v15314_v3 }
 0x512   :  { %12331 = vmatprep.subr.mxu1 %v14856_v41 }
 0x513   :  { %12332 = vmatpush3.msra.mxu1 %v15320_v4 }
 0x514   :  { %12333 = vmatprep.subr.mxu1 %v14856_v41 }
 0x515   :  { %12334 = vmatpush3.msra.mxu1 %v15326_v5 }
 0x516   :  { %12335 = vmatprep.subr.mxu1 %v14856_v41 }
 0x517   :  { %12336 = vmatpush3.msra.mxu1 %v15332_v7 }
 0x518   :  { %12337 = vmatprep.subr.mxu1 %v14856_v41 }
 0x519   :  { %12338 = vmatpush3.msra.mxu1 %v15338_v8 }
 0x51a   :  { %12339 = vmatprep.subr.mxu1 %v14856_v41 }
 0x51b   :  { %12340 = vmatpush3.msra.mxu1 %v15341_v10 }
 0x51c   :  { %12341 = vmatprep.subr.mxu1 %v14856_v41 }
 0x51d   :  { %12342 = vmatpush3.msra.mxu1 %v15347_v12 }
 0x51e   :  { %12343 = vmatprep.subr.mxu1 %v14856_v41 }
 0x51f   :  { %12344 = vmatpush3.msra.mxu1 %v15353_v14 }
 0x520   :  { %12383 = vmatprep.subr.mxu1 %v14856_v41 }
 0x5c0   :  { %v12309_v25 = vpop.f32.mrf.mxu1 }
 0x5c1   :  { %v1501_v30 = vadd.f32 %v12309_v25, %v15273_v18 }
 0x5c2   :  { %v1481_v36 = vpop.f32.mrf.mxu1 }
 0x5c3   :  { %v1500_v51 = vadd.f32 %v1481_v36, %v1300_v27  ;;  %v15384_v40 = vadd.f32 %v1524_v34, %v1501_v30  ;;  %v1520_v36 = vld [vmem:[#allocation14] sm:$0xff] }
 0x5c4   :  { %v12312_v38 = vpop.f32.mrf.mxu1 }
 0x5c5   :  { %v15386_v9 = vadd.f32 %v1524_v34, %v1500_v51  ;;  %v1503_v48 = vadd.f32 %v12312_v38, %v15277_v45  ;;  %v1609_v18 = vmul.f32 %v15384_v40, %v15384_v40 }
 0x5c6   :  { %v1491_v54 = vpop.f32.mrf.mxu1 }
 0x5c7   :  { %v1608_v42 = vmul.f32 %v15386_v9, %v15386_v9  ;;  %v1502_v16 = vadd.f32 %v1491_v54, %v1302_v39  ;;  %v1529_v13 = vadd.f32 %v15384_v40, %v15386_v9  ;;  %v15395_v19 = vadd.f32 %v1524_v34, %v1503_v48 }
 0x5c9   :  { %v15397_v43 = vadd.f32 %v1524_v34, %v1502_v16  ;;  %v1612_v47 = vadd.f32 %v1609_v18, %v1608_v42  ;;  %v1611_v50 = vmul.f32 %v15395_v19, %v15395_v19 }
 0x5cb   :  { %v1530_v49 = vadd.f32 %v1529_v13, %v15397_v43  ;;  %v1610_v45 = vmul.f32 %v15397_v43, %v15397_v43 }
 0x5cd   :  { %v1531_v52 = vadd.f32 %v1530_v49, %v15395_v19  ;;  %v1613_v53 = vadd.f32 %v1612_v47, %v1610_v45  ;;  %v1897_v47 = vld [vmem:[#allocation7 + $0x78] sm:$0xff]  ;;  %v1896_v45 = vld [vmem:[#allocation7 + $0x70] sm:$0xff] }
 0x5ce   :  { %v1999_v49 = vld [vmem:[#allocation7 + $0xf8] sm:$0xff]  ;;  %12393 = vmatprep.subr.mxu0 %v1897_v47 }
 0x5cf   :  { %v1532_v55 = vrot.slane %v1531_v52, 4  ;;  %v1614_v56 = vadd.f32 %v1613_v53, %v1611_v50  ;;  %v1998_v50 = vld [vmem:[#allocation7 + $0xf0] sm:$0xff]  ;;  %v1997_v53 = vld [vmem:[#allocation7 + $0xe8] sm:$0xff] }
 0x5d1   :  { %v1533_v57 = vadd.f32 %v1532_v55, %v1531_v52  ;;  %v1615_v58 = vrot.slane %v1614_v56, 4  ;;  %v1895_v52 = vld [vmem:[#allocation7 + $0x68] sm:$0xff]  ;;  %v1894_v55 = vld [vmem:[#allocation7 + $0x60] sm:$0xff] }
 0x5d3   :  { %v1534_v60 = vrot.slane %v1533_v57, 2  ;;  %v1616_v15 = vadd.f32 %v1615_v58, %v1614_v56  ;;  %v1996_v56 = vld [vmem:[#allocation7 + $0xe0] sm:$0xff]  ;;  %v1995_v58 = vld [vmem:[#allocation7 + $0xd8] sm:$0xff] }
 0x5d5   :  { %v1535_v21 = vadd.f32 %v1534_v60, %v1533_v57  ;;  %v1617_v24 = vrot.slane %v1616_v15, 2  ;;  %v1893_v57 = vld [vmem:[#allocation7 + $0x58] sm:$0xff]  ;;  %v1892_v60 = vld [vmem:[#allocation7 + $0x50] sm:$0xff] }
 0x5d7   :  { %v1536_v25 = vrot.slane %v1535_v21, 1  ;;  %v1618_v26 = vadd.f32 %v1617_v24, %v1616_v15  ;;  %v1994_v15 = vld [vmem:[#allocation7 + $0xd0] sm:$0xff]  ;;  %v1993_v24 = vld [vmem:[#allocation7 + $0xc8] sm:$0xff] }
 0x5d9   :  { %v1537_v27 = vadd.f32 %v1536_v25, %v1535_v21  ;;  %v1619_v30 = vrot.slane %v1618_v26, 1  ;;  %v1891_v21 = vld [vmem:[#allocation7 + $0x48] sm:$0xff]  ;;  %v1890_v25 = vld [vmem:[#allocation7 + $0x40] sm:$0xff] }
 0x5db   :  { %12346 = vmatmul.mubr.f32.vlgmr.msra.gmra.mxu1 %v1537_v27  ;;  %v1620_v34 = vadd.f32 %v1619_v30, %v1618_v26  ;;  %v1992_v26 = vld [vmem:[#allocation7 + $0xc0] sm:$0xff]  ;;  %v1889_v27 = vld [vmem:[#allocation7 + $0x38] sm:$0xff] }
 0x5dc   :  { %12385 = vmatprep.mubr.msk.f32.mxu1 %vm14857_vm2, %v14856_v41  ;;  %12384 = vmatpush3.msra.mxu1 %v1520_v36  ;;  %v1991_v30 = vld [vmem:[#allocation7 + $0xb8] sm:$0xff] }
 0x5dd   :  { %12381 = vmatmul.mubr.f32.vlgmr.msra.gmra.mxu0 %v1620_v34  ;;  %12388 = vmatprep.subr.mxu1 %v14856_v41  ;;  %v1888_v34 = vld [vmem:[#allocation7 + $0x30] sm:$0xff] }
 0x5de   :  { %12394 = vmatpush3.msra.mxu0 %v1897_v47  ;;  %v1882_v47 = vld [vmem:[#allocation7] sm:$0xff] }
 0x5df   :  { %12395 = vmatprep.subr.mxu0 %v1896_v45 }
 0x5e0   :  { %12396 = vmatpush3.msra.mxu0 %v1896_v45 }
 0x5e1   :  { %12397 = vmatprep.subr.mxu0 %v1895_v52 }
 0x5e2   :  { %12398 = vmatpush3.msra.mxu0 %v1895_v52  ;;  %v15413_v52 = vsub.s32 1, %v15366_v17 }
 0x5e3   :  { %12399 = vmatprep.subr.mxu0 %v1894_v55 }
 0x5e4   :  { %12400 = vmatpush3.msra.mxu0 %v1894_v55  ;;  %v15417_v55 = vsub.s32 2, %v15366_v17 }
 0x5e5   :  { %12401 = vmatprep.subr.mxu0 %v1893_v57 }
 0x5e6   :  { %12402 = vmatpush3.msra.mxu0 %v1893_v57 }
 0x5e7   :  { %12403 = vmatprep.subr.mxu0 %v1892_v60 }
 0x5e8   :  { %12404 = vmatpush3.msra.mxu0 %v1892_v60 }
 0x5e9   :  { %12405 = vmatprep.subr.mxu0 %v1891_v21 }
 0x5ea   :  { %12406 = vmatpush3.msra.mxu0 %v1891_v21 }
 0x5eb   :  { %12407 = vmatprep.subr.mxu0 %v1890_v25 }
 0x5ec   :  { %12408 = vmatpush3.msra.mxu0 %v1890_v25  ;;  %v1871_v25 = vrot.slane %v15373_v23, %v15417_v55 }
 0x5ed   :  { %12409 = vmatprep.subr.mxu0 %v1889_v27 }
 0x5ee   :  { %12410 = vmatpush3.msra.mxu0 %v1889_v27 }
 0x5ef   :  { %12411 = vmatprep.subr.mxu0 %v1888_v34 }
 0x5f0   :  { %12412 = vmatpush3.msra.mxu0 %v1888_v34 }
 0x69b   :  { %v1604_v46 = vpop.f32.mrf.mxu1 }
 0x69c   :  { %v1691_v51 = vmul.f32 0.001953125, %v1604_v46  ;;  %v1887_v46 = vld [vmem:[#allocation7 + $0x28] sm:$0xff] }
 0x69d   :  { %v12347_v38 = vpop.f32.mrf.mxu1  ;;  %v1687_v39 = vpop.f32.mrf.mxu0  ;;  %12413 = vmatprep.subr.mxu0 %v1887_v46 }
 0x69e   :  { %v1693_v48 = vmul.f32 %v1691_v51, %v1691_v51  ;;  %v1692_v54 = vmul.f32 0.001953125, %v1687_v39  ;;  %12386 = vmatmul.mubr.msk.f32.vlgmr.msra.gmra.mxu1 %vm1697_vm3, %v1691_v51  ;;  %v1989_v51 = vld [vmem:[#allocation7 + $0xa8] sm:$0xff]  ;;  %12414 = vmatpush3.msra.mxu0 %v1887_v46  ;;  %v1886_v38 = vld [vmem:[#allocation7 + $0x20] sm:$0xff] }
 0x69f   :  { %v12382_v42 = vpop.f32.mrf.mxu0  ;;  %12389 = vmatpush3.msra.mxu1 %v1520_v36  ;;  %12390 = vmatprep.mubr.msk.f32.mxu1 %vm14857_vm2, %v14856_v41  ;;  %v1990_v36 = vld [vmem:[#allocation7 + $0xb0] sm:$0xff]  ;;  %v1988_v39 = vld [vmem:[#allocation7 + $0xa0] sm:$0xff] }
 0x6a0   :  { %v1694_v16 = vsub.f32 %v1692_v54, %v1693_v48  ;;  %12431 = vmatprep.subr.mxu1 %v1999_v49  ;;  %12415 = vmatprep.subr.mxu0 %v1886_v38  ;;  %v1885_v48 = vld [vmem:[#allocation7 + $0x18] sm:$0xff]  ;;  %v1884_v42 = vld [vmem:[#allocation7 + $0x10] sm:$0xff] }
 0x6a1   :  { %12416 = vmatpush3.msra.mxu0 %v1886_v38  ;;  %v1987_v54 = vld [vmem:[#allocation7 + $0x98] sm:$0xff] }
 0x6a2   :  { %v1695_v18 = vadd.f32 1e-05, %v1694_v16  ;;  %12417 = vmatprep.subr.mxu0 %v1885_v48  ;;  %v1986_v16 = vld [vmem:[#allocation7 + $0x90] sm:$0xff] }
 0x6a3   :  { %12418 = vmatpush3.msra.mxu0 %v1885_v48 }
 0x6a4   :  { %14033 = vrsqrt.f32 %v1695_v18  ;;  %v1883_v18 = vld [vmem:[#allocation7 + $0x8] sm:$0xff]  ;;  %12419 = vmatprep.subr.mxu0 %v1884_v42 }
 0x6a5   :  { %12420 = vmatpush3.msra.mxu0 %v1884_v42 }
 0x6a6   :  { %12421 = vmatprep.subr.mxu0 %v1883_v18 }
 0x6a7   :  { %12422 = vmatpush3.msra.mxu0 %v1883_v18 }
 0x6a8   :  { %12423 = vmatprep.subr.mxu0 %v1882_v47 }
 0x6a9   :  { %12424 = vmatpush3.msra.mxu0 %v1882_v47 }
 0x6b1   :  { %v14034_v13 = vpop.eup %14033 }
 0x6b2   :  { %12391 = vmatmul.mubr.msk.f32.vlgmr.msra.gmra.mxu1 %vm1697_vm3, %v14034_v13  ;;  %v1985_v13 = vld [vmem:[#allocation7 + $0x88] sm:$0xff] }
 0x6b3   :  { %12432 = vmatpush3.msra.mxu1 %v1999_v49  ;;  %v1984_v49 = vld [vmem:[#allocation7 + $0x80] sm:$0xff] }
 0x6b4   :  { %12433 = vmatprep.subr.mxu1 %v1998_v50 }
 0x6b5   :  { %12434 = vmatpush3.msra.mxu1 %v1998_v50 }
 0x6b6   :  { %12435 = vmatprep.subr.mxu1 %v1997_v53 }
 0x6b7   :  { %12436 = vmatpush3.msra.mxu1 %v1997_v53 }
 0x6b8   :  { %12437 = vmatprep.subr.mxu1 %v1996_v56 }
 0x6b9   :  { %12438 = vmatpush3.msra.mxu1 %v1996_v56  ;;  %v1863_v56 = vrot.slane %v15373_v23, %v15413_v52 }
 0x6ba   :  { %12439 = vmatprep.subr.mxu1 %v1995_v58 }
 0x6bb   :  { %12440 = vmatpush3.msra.mxu1 %v1995_v58 }
 0x6bc   :  { %12441 = vmatprep.subr.mxu1 %v1994_v15 }
 0x6bd   :  { %12442 = vmatpush3.msra.mxu1 %v1994_v15 }
 0x6be   :  { %12443 = vmatprep.subr.mxu1 %v1993_v24 }
 0x6bf   :  { %12444 = vmatpush3.msra.mxu1 %v1993_v24 }
 0x6c0   :  { %12445 = vmatprep.subr.mxu1 %v1992_v26 }
 0x6c1   :  { %12446 = vmatpush3.msra.mxu1 %v1992_v26 }
 0x6c2   :  { %12447 = vmatprep.subr.mxu1 %v1991_v30 }
 0x6c3   :  { %12448 = vmatpush3.msra.mxu1 %v1991_v30 }
 0x6c4   :  { %12449 = vmatprep.subr.mxu1 %v1990_v36 }
 0x6c5   :  { %12450 = vmatpush3.msra.mxu1 %v1990_v36 }
 0x6c6   :  { %12451 = vmatprep.subr.mxu1 %v1989_v51 }
 0x6c7   :  { %12452 = vmatpush3.msra.mxu1 %v1989_v51 }
 0x6c8   :  { %12453 = vmatprep.subr.mxu1 %v1988_v39 }
 0x6c9   :  { %12454 = vmatpush3.msra.mxu1 %v1988_v39 }
 0x6ca   :  { %12455 = vmatprep.subr.mxu1 %v1987_v54 }
 0x6cb   :  { %12456 = vmatpush3.msra.mxu1 %v1987_v54 }
 0x6cc   :  { %12457 = vmatprep.subr.mxu1 %v1986_v16 }
 0x6cd   :  { %12458 = vmatpush3.msra.mxu1 %v1986_v16 }
 0x6ce   :  { %12459 = vmatprep.subr.mxu1 %v1985_v13 }
 0x6cf   :  { %12460 = vmatpush3.msra.mxu1 %v1985_v13 }
 0x6d0   :  { %12461 = vmatprep.subr.mxu1 %v1984_v49 }
 0x6d1   :  { %12462 = vmatpush3.msra.mxu1 %v1984_v49 }
 0x75e   :  { %v1767_v45 = vpop.f32.mrf.mxu1 }
 0x75f   :  { %v1847_v53 = vrot.slane %v1767_v45, %v15371_v22 }
 0x760   :  { %v12387_v50 = vpop.f32.mrf.mxu1 }
 0x761   :  { %v1848_v57 = vsub.f32 %v15386_v9, %v1847_v53  ;;  %v1849_v60 = vsub.f32 %v15384_v40, %v1847_v53  ;;  %v1850_v15 = vsub.f32 %v15397_v43, %v1847_v53  ;;  %v1851_v21 = vsub.f32 %v15395_v19, %v1847_v53 }
 0x772   :  { %v1840_v58 = vpop.f32.mrf.mxu1 }
 0x773   :  { %v1855_v24 = vrot.slane %v1840_v58, %v15371_v22  ;;  %v2261_v58 = vld [vmem:[#allocation7 + $0x128] sm:$0xff] }
 0x774   :  { %v12392_v26 = vpop.f32.mrf.mxu1 }
 0x775   :  { %v1856_v27 = vmul.f32 %v1855_v24, %v1848_v57  ;;  %v1857_v30 = vmul.f32 %v1855_v24, %v1849_v60  ;;  %v1858_v34 = vmul.f32 %v1855_v24, %v1850_v15  ;;  %v1859_v36 = vmul.f32 %v1855_v24, %v1851_v21  ;;  %v2268_v57 = vld [vmem:[#allocation7 + $0x160] sm:$0xff]  ;;  %v2259_v60 = vld [vmem:[#allocation7 + $0x118] sm:$0xff]  ;;  %v2258_v15 = vld [vmem:[#allocation7 + $0x110] sm:$0xff] }
 0x776   :  { %v2257_v21 = vld [vmem:[#allocation7 + $0x108] sm:$0xff]  ;;  %v2256_v24 = vld [vmem:[#allocation7 + $0x100] sm:$0xff] }
 0x777   :  { %v1864_v46 = vmul.f32 %v1863_v56, %v1856_v27  ;;  %v1865_v51 = vmul.f32 %v1863_v56, %v1857_v30  ;;  %v1866_v9 = vmul.f32 %v1863_v56, %v1858_v34  ;;  %v1867_v38 = vmul.f32 %v1863_v56, %v1859_v36  ;;  %v2269_v56 = vld [vmem:[#allocation7 + $0x168] sm:$0xff] }
 0x779   :  { %v1872_v39 = vadd.f32 %v1871_v25, %v1864_v46  ;;  %v1873_v40 = vadd.f32 %v1871_v25, %v1865_v51  ;;  %v1874_v48 = vadd.f32 %v1871_v25, %v1866_v9  ;;  %v1875_v54 = vadd.f32 %v1871_v25, %v1867_v38 }
 0x77b   :  { %v15428_v43 = vmax.f32 %v1872_v39, 0.0  ;;  %v15430_v19 = vmax.f32 %v1873_v40, 0.0  ;;  %v15434_v23 = vmax.f32 %v1874_v48, 0.0  ;;  %v15440_v42 = vmax.f32 %v1875_v54, 0.0  ;;  %v2461_v54 = vld [vmem:[#allocation7 + $0x1f0] sm:$0xff] }
 0x77d   :  { %12425 = vmatprep.mubr.f32.mxu0 %v15428_v43  ;;  %12463 = vmatprep.mubr.f32.mxu1 %v15428_v43 }
 0x77e   :  { %12426 = vmatmul.mubr.f32.vlgmr.msra.gmra.mxu0 %v15430_v19  ;;  %12464 = vmatmul.mubr.f32.vlgmr.msra.gmra.mxu1 %v15430_v19 }
 0x77f   :  { %12428 = vmatprep.mubr.f32.mxu0 %v15434_v23  ;;  %12466 = vmatprep.mubr.f32.mxu1 %v15434_v23 }
 0x782   :  { %12429 = vmatmul.mubr.f32.gmra.mxu0 %v15440_v42  ;;  %12467 = vmatmul.mubr.f32.gmra.mxu1 %v15440_v42 }
 0x783   :  { %12477 = vmatprep.mubr.msk.f32.mxu0 %vm709_vm1, %v15175_v20  ;;  %12491 = vmatprep.mubr.msk.f32.mxu1 %vm709_vm1, %v15189_v32  ;;  %v2271_v20 = vld [vmem:[#allocation7 + $0x178] sm:$0xff]  ;;  %v2270_v32 = vld [vmem:[#allocation7 + $0x170] sm:$0xff] }
 0x83e   :  { %v12427_v16 = vpop.f32.mrf.mxu0  ;;  %v12465_v18 = vpop.f32.mrf.mxu1 }
 0x840   :  { %v1964_v13 = vpop.f32.mrf.mxu0  ;;  %v2066_v47 = vpop.f32.mrf.mxu1 }
 0x842   :  { %v12430_v49 = vpop.f32.mrf.mxu0  ;;  %v12468_v45 = vpop.f32.mrf.mxu1 }
 0x843   :  { %12469 = vmatprep.subr.mxu0 %v12468_v45  ;;  %12483 = vmatprep.subr.mxu1 %v12430_v49 }
 0x844   :  { %v1974_v50 = vpop.f32.mrf.mxu0  ;;  %v2076_v53 = vpop.f32.mrf.mxu1  ;;  %12470 = vmatpush3.msra.mxu0 %v12468_v45  ;;  %12484 = vmatpush3.msra.mxu1 %v12430_v49  ;;  %v2454_v49 = vld [vmem:[#allocation7 + $0x1b8] sm:$0xff]  ;;  %v2452_v45 = vld [vmem:[#allocation7 + $0x1a8] sm:$0xff] }
 0x845   :  { %12471 = vmatprep.subr.mxu0 %v2076_v53  ;;  %12485 = vmatprep.subr.mxu1 %v1974_v50 }
 0x846   :  { %12472 = vmatpush3.msra.mxu0 %v2076_v53  ;;  %12486 = vmatpush3.msra.mxu1 %v1974_v50  ;;  %v2451_v50 = vld [vmem:[#allocation7 + $0x1a0] sm:$0xff]  ;;  %v2450_v53 = vld [vmem:[#allocation7 + $0x198] sm:$0xff] }
 0x847   :  { %12473 = vmatprep.subr.mxu0 %v12465_v18  ;;  %12487 = vmatprep.subr.mxu1 %v12427_v16 }
 0x848   :  { %12474 = vmatpush3.msra.mxu0 %v12465_v18  ;;  %12488 = vmatpush3.msra.mxu1 %v12427_v16  ;;  %v2460_v16 = vld [vmem:[#allocation7 + $0x1e8] sm:$0xff]  ;;  %v2459_v18 = vld [vmem:[#allocation7 + $0x1e0] sm:$0xff] }
 0x849   :  { %12475 = vmatprep.subr.mxu0 %v2066_v47  ;;  %12489 = vmatprep.subr.mxu1 %v1964_v13 }
 0x84a   :  { %12476 = vmatpush3.msra.mxu0 %v2066_v47  ;;  %12490 = vmatpush3.msra.mxu1 %v1964_v13  ;;  %v2458_v13 = vld [vmem:[#allocation7 + $0x1d8] sm:$0xff]  ;;  %v2456_v47 = vld [vmem:[#allocation7 + $0x1c8] sm:$0xff] }
 0x84b   :  { %12478 = vmatmul.mubr.msk.f32.vlgmr.msra.gmra.mxu0 %vm709_vm1, %v15179_v28  ;;  %12492 = vmatmul.mubr.msk.f32.vlgmr.msra.gmra.mxu1 %vm709_vm1, %v15195_v33  ;;  %v2267_v28 = vld [vmem:[#allocation7 + $0x158] sm:$0xff]  ;;  %v2265_v33 = vld [vmem:[#allocation7 + $0x148] sm:$0xff] }
 0x84c   :  { %12497 = vmatprep.subr.mxu0 %v2271_v20  ;;  %12480 = vmatprep.mubr.msk.f32.mxu0 %vm709_vm1, %v15181_v29  ;;  %v2266_v29 = vld [vmem:[#allocation7 + $0x150] sm:$0xff] }
 0x84d   :  { %12498 = vmatpush3.msra.mxu0 %v2271_v20  ;;  %12494 = vmatprep.mubr.msk.f32.mxu1 %vm709_vm1, %v15197_v35  ;;  %v2264_v35 = vld [vmem:[#allocation7 + $0x140] sm:$0xff]  ;;  %v2449_v20 = vld [vmem:[#allocation7 + $0x190] sm:$0xff] }
 0x84e   :  { %12499 = vmatprep.subr.mxu0 %v2270_v32 }
 0x84f   :  { %12500 = vmatpush3.msra.mxu0 %v2270_v32  ;;  %12495 = vmatmul.mubr.msk.f32.gmra.mxu1 %vm709_vm1, %v15203_v37  ;;  %v2262_v37 = vld [vmem:[#allocation7 + $0x130] sm:$0xff]  ;;  %v2448_v32 = vld [vmem:[#allocation7 + $0x188] sm:$0xff] }
 0x850   :  { %12481 = vmatmul.mubr.msk.f32.gmra.mxu0 %vm709_vm1, %v15187_v31  ;;  %12501 = vmatprep.subr.mxu0 %v2269_v56  ;;  %v2263_v31 = vld [vmem:[#allocation7 + $0x138] sm:$0xff] }
 0x851   :  { %12502 = vmatpush3.msra.mxu0 %v2269_v56  ;;  %12529 = vmatprep.mubr.f32.mxu0 %v15428_v43  ;;  %v2447_v56 = vld [vmem:[#allocation7 + $0x180] sm:$0xff] }
 0x852   :  { %12503 = vmatprep.subr.mxu0 %v2268_v57  ;;  %12543 = vmatprep.mubr.msk.f32.mxu1 %vm709_vm1, %v15215_v44  ;;  %v2260_v44 = vld [vmem:[#allocation7 + $0x120] sm:$0xff] }
 0x853   :  { %12504 = vmatpush3.msra.mxu0 %v2268_v57 }
 0x854   :  { %12505 = vmatprep.subr.mxu0 %v2267_v28 }
 0x855   :  { %12506 = vmatpush3.msra.mxu0 %v2267_v28 }
 0x856   :  { %12507 = vmatprep.subr.mxu0 %v2266_v29 }
 0x857   :  { %12508 = vmatpush3.msra.mxu0 %v2266_v29 }
 0x858   :  { %12509 = vmatprep.subr.mxu0 %v2265_v33 }
 0x859   :  { %12510 = vmatpush3.msra.mxu0 %v2265_v33 }
 0x85a   :  { %12511 = vmatprep.subr.mxu0 %v2264_v35 }
 0x85b   :  { %12512 = vmatpush3.msra.mxu0 %v2264_v35 }
 0x85c   :  { %12513 = vmatprep.subr.mxu0 %v2263_v31 }
 0x85d   :  { %12514 = vmatpush3.msra.mxu0 %v2263_v31 }
 0x85e   :  { %12515 = vmatprep.subr.mxu0 %v2262_v37 }
 0x85f   :  { %12516 = vmatpush3.msra.mxu0 %v2262_v37 }
 0x860   :  { %12517 = vmatprep.subr.mxu0 %v2261_v58 }
 0x861   :  { %12518 = vmatpush3.msra.mxu0 %v2261_v58 }
 0x862   :  { %12519 = vmatprep.subr.mxu0 %v2260_v44 }
 0x863   :  { %12520 = vmatpush3.msra.mxu0 %v2260_v44 }
 0x864   :  { %12521 = vmatprep.subr.mxu0 %v2259_v60 }
 0x865   :  { %12522 = vmatpush3.msra.mxu0 %v2259_v60 }
 0x866   :  { %12523 = vmatprep.subr.mxu0 %v2258_v15 }
 0x867   :  { %12524 = vmatpush3.msra.mxu0 %v2258_v15 }
 0x868   :  { %12525 = vmatprep.subr.mxu0 %v2257_v21 }
 0x869   :  { %12526 = vmatpush3.msra.mxu0 %v2257_v21  ;;  %v2652_v21 = vld [vmem:[#allocation7 + $0x270] sm:$0xff] }
 0x86a   :  { %12527 = vmatprep.subr.mxu0 %v2256_v24 }
 0x86b   :  { %12528 = vmatpush3.msra.mxu0 %v2256_v24  ;;  %v14057_v24 = vld [vmem:[#allocation2 + $0x68] sm:$0xff] }
 0x86c   :  { %12530 = vmatmul.mubr.f32.vlgmr.msra.gmra.mxu0 %v15430_v19 }
 0x86d   :  { %12532 = vmatprep.mubr.f32.mxu0 %v15434_v23 }
 0x870   :  { %12533 = vmatmul.mubr.f32.gmra.mxu0 %v15440_v42 }
 0x871   :  { %12595 = vmatprep.mubr.msk.f32.mxu0 %vm709_vm1, %v15247_v6  ;;  %v2462_v6 = vld [vmem:[#allocation7 + $0x1f8] sm:$0xff] }
 0x90b   :  { %v12479_v25 = vpop.f32.mrf.mxu0  ;;  %v12493_v26 = vpop.f32.mrf.mxu1 }
 0x90c   :  { %v15468_v27 = vadd.f32 %v12493_v26, %v12479_v25  ;;  %v14058_v25 = vld [vmem:[#allocation2 + $0x70] sm:$0xff]  ;;  %v2651_v26 = vld [vmem:[#allocation7 + $0x268] sm:$0xff] }
 0x90d   :  { %v15470_v30 = vpop.f32.mrf.mxu0  ;;  %v15472_v34 = vpop.f32.mrf.mxu1 }
 0x90f   :  { %v12496_v46 = vpop.f32.mrf.mxu1 }
 0x910   :  { %v12482_v36 = vpop.f32.mrf.mxu0 }
 0x911   :  { %v15474_v51 = vadd.f32 %v12496_v46, %v12482_v36  ;;  %v15490_v57 = vpop.f32.mrf.mxu1  ;;  %v14059_v36 = vld [vmem:[#allocation2 + $0x78] sm:$0xff] }
 0x912   :  { %v15476_v9 = vpop.f32.mrf.mxu0  ;;  %v2649_v46 = vld [vmem:[#allocation7 + $0x258] sm:$0xff] }
 0x92c   :  { %v12531_v38 = vpop.f32.mrf.mxu0 }
 0x92e   :  { %v2338_v39 = vpop.f32.mrf.mxu0 }
 0x930   :  { %v12534_v40 = vpop.f32.mrf.mxu0 }
 0x931   :  { %12535 = vmatprep.subr.mxu1 %v12534_v40 }
 0x932   :  { %v2348_v48 = vpop.f32.mrf.mxu0  ;;  %12536 = vmatpush3.msra.mxu1 %v12534_v40  ;;  %v2645_v40 = vld [vmem:[#allocation7 + $0x238] sm:$0xff] }
 0x933   :  { %12537 = vmatprep.subr.mxu1 %v2348_v48 }
 0x934   :  { %12538 = vmatpush3.msra.mxu1 %v2348_v48  ;;  %v2644_v48 = vld [vmem:[#allocation7 + $0x230] sm:$0xff] }
 0x935   :  { %12539 = vmatprep.subr.mxu1 %v12531_v38 }
 0x936   :  { %12540 = vmatpush3.msra.mxu1 %v12531_v38  ;;  %v2647_v38 = vld [vmem:[#allocation7 + $0x248] sm:$0xff] }
 0x937   :  { %12541 = vmatprep.subr.mxu1 %v2338_v39 }
 0x938   :  { %12542 = vmatpush3.msra.mxu1 %v2338_v39  ;;  %v2646_v39 = vld [vmem:[#allocation7 + $0x240] sm:$0xff] }
 0x939   :  { %12544 = vmatmul.mubr.msk.f32.vlgmr.msra.gmra.mxu1 %vm709_vm1, %v15227_v59  ;;  %12549 = vmatprep.subr.mxu1 %v2462_v6  ;;  %v2457_v59 = vld [vmem:[#allocation7 + $0x1d0] sm:$0xff] }
 0x93a   :  { %12550 = vmatpush3.msra.mxu1 %v2462_v6  ;;  %12546 = vmatprep.mubr.msk.f32.mxu1 %vm709_vm1, %v15229_v61  ;;  %v2455_v61 = vld [vmem:[#allocation7 + $0x1c0] sm:$0xff]  ;;  %v2643_v6 = vld [vmem:[#allocation7 + $0x228] sm:$0xff] }
 0x93b   :  { %12551 = vmatprep.subr.mxu1 %v2461_v54 }
 0x93c   :  { %12552 = vmatpush3.msra.mxu1 %v2461_v54  ;;  %v2641_v54 = vld [vmem:[#allocation7 + $0x218] sm:$0xff] }
 0x93d   :  { %12547 = vmatmul.mubr.msk.f32.gmra.mxu1 %vm709_vm1, %v15235_v63  ;;  %12553 = vmatprep.subr.mxu1 %v2460_v16  ;;  %v2453_v63 = vld [vmem:[#allocation7 + $0x1b0] sm:$0xff] }
 0x93e   :  { %12554 = vmatpush3.msra.mxu1 %v2460_v16  ;;  %12581 = vmatprep.mubr.f32.mxu1 %v15428_v43  ;;  %v2640_v16 = vld [vmem:[#allocation7 + $0x210] sm:$0xff] }
 0x93f   :  { %12555 = vmatprep.subr.mxu1 %v2459_v18 }
 0x940   :  { %12556 = vmatpush3.msra.mxu1 %v2459_v18  ;;  %v2639_v18 = vld [vmem:[#allocation7 + $0x208] sm:$0xff] }
 0x941   :  { %12557 = vmatprep.subr.mxu1 %v2458_v13 }
 0x942   :  { %12558 = vmatpush3.msra.mxu1 %v2458_v13  ;;  %v2638_v13 = vld [vmem:[#allocation7 + $0x200] sm:$0xff] }
 0x943   :  { %12559 = vmatprep.subr.mxu1 %v2457_v59 }
 0x944   :  { %12560 = vmatpush3.msra.mxu1 %v2457_v59  ;;  %v14060_v59 = vld [vmem:[#allocation13 + $0x78] sm:$0xff] }
 0x945   :  { %12561 = vmatprep.subr.mxu1 %v2456_v47 }
 0x946   :  { %12562 = vmatpush3.msra.mxu1 %v2456_v47  ;;  %v14061_v47 = vld [vmem:[#allocation13 + $0x70] sm:$0xff] }
 0x947   :  { %12563 = vmatprep.subr.mxu1 %v2455_v61 }
 0x948   :  { %12564 = vmatpush3.msra.mxu1 %v2455_v61  ;;  %v14062_v61 = vld [vmem:[#allocation13 + $0x68] sm:$0xff] }
 0x949   :  { %12565 = vmatprep.subr.mxu1 %v2454_v49 }
 0x94a   :  { %12566 = vmatpush3.msra.mxu1 %v2454_v49  ;;  %v15563_v49 = vld [vmem:[#allocation13 + $0x50] sm:$0xff] }
 0x94b   :  { %12567 = vmatprep.subr.mxu1 %v2453_v63 }
 0x94c   :  { %12568 = vmatpush3.msra.mxu1 %v2453_v63  ;;  %v15567_v63 = vld [vmem:[#allocation13 + $0x48] sm:$0xff] }
 0x94d   :  { %12569 = vmatprep.subr.mxu1 %v2452_v45 }
 0x94e   :  { %12570 = vmatpush3.msra.mxu1 %v2452_v45  ;;  %v15571_v45 = vld [vmem:[#allocation13 + $0x40] sm:$0xff] }
 0x94f   :  { %12571 = vmatprep.subr.mxu1 %v2451_v50 }
 0x950   :  { %12572 = vmatpush3.msra.mxu1 %v2451_v50  ;;  %v15575_v50 = vld [vmem:[#allocation13 + $0x38] sm:$0xff] }
 0x951   :  { %12573 = vmatprep.subr.mxu1 %v2450_v53 }
 0x952   :  { %12574 = vmatpush3.msra.mxu1 %v2450_v53  ;;  %v15579_v53 = vld [vmem:[#allocation13 + $0x30] sm:$0xff] }
 0x953   :  { %12575 = vmatprep.subr.mxu1 %v2449_v20 }
 0x954   :  { %12576 = vmatpush3.msra.mxu1 %v2449_v20  ;;  %v15583_v20 = vld [vmem:[#allocation13 + $0x28] sm:$0xff] }
 0x955   :  { %12577 = vmatprep.subr.mxu1 %v2448_v32 }
 0x956   :  { %12578 = vmatpush3.msra.mxu1 %v2448_v32  ;;  %v15587_v32 = vld [vmem:[#allocation13 + $0x20] sm:$0xff] }
 0x957   :  { %12579 = vmatprep.subr.mxu1 %v2447_v56 }
 0x958   :  { %12580 = vmatpush3.msra.mxu1 %v2447_v56  ;;  %v15591_v56 = vld [vmem:[#allocation13 + $0x18] sm:$0xff] }
 0x959   :  { %12582 = vmatmul.mubr.f32.vlgmr.msra.gmra.mxu1 %v15430_v19 }
 0x95a   :  { %12584 = vmatprep.mubr.f32.mxu1 %v15434_v23 }
 0x95d   :  { %12585 = vmatmul.mubr.f32.gmra.mxu1 %v15440_v42 }
 0x95e   :  { %12647 = vmatprep.mubr.msk.f32.mxu1 %vm709_vm1, %v15266_v11  ;;  %v2653_v11 = vld [vmem:[#allocation7 + $0x278] sm:$0xff] }
 0x9f9   :  { %v12545_v28 = vpop.f32.mrf.mxu1 }
 0x9fa   :  { %v15493_v29 = vadd.f32 %v12545_v28, %v15468_v27  ;;  %v2650_v27 = vld [vmem:[#allocation7 + $0x260] sm:$0xff] }
 0x9fb   :  { %v15495_v33 = vpop.f32.mrf.mxu1  ;;  %v15595_v28 = vld [vmem:[#allocation13 + $0x10] sm:$0xff] }
 0x9fd   :  { %v12548_v35 = vpop.f32.mrf.mxu1 }
 0x9fe   :  { %v15498_v31 = vadd.f32 %v12548_v35, %v15474_v51  ;;  %v2648_v51 = vld [vmem:[#allocation7 + $0x250] sm:$0xff] }
 0x9ff   :  { %v15500_v37 = vpop.f32.mrf.mxu1  ;;  %v15603_v35 = vld [vmem:[#allocation13] sm:$0xff] }
 0xa19   :  { %v12583_v58 = vpop.f32.mrf.mxu1 }
 0xa1b   :  { %v2529_v44 = vpop.f32.mrf.mxu1 }
 0xa1d   :  { %v12586_v60 = vpop.f32.mrf.mxu1 }
 0xa1e   :  { %12587 = vmatprep.subr.mxu0 %v12586_v60 }
 0xa1f   :  { %v2539_v15 = vpop.f32.mrf.mxu1  ;;  %12588 = vmatpush3.msra.mxu0 %v12586_v60 }
 0xa20   :  { %12589 = vmatprep.subr.mxu0 %v2539_v15 }
 0xa21   :  { %12590 = vmatpush3.msra.mxu0 %v2539_v15  ;;  %v2247_v15 = vadd.f32 %v15490_v57, %v15476_v9 }
 0xa22   :  { %12591 = vmatprep.subr.mxu0 %v12583_v58 }
 0xa23   :  { %12592 = vmatpush3.msra.mxu0 %v12583_v58  ;;  %v15609_v58 = vld [vmem:[#allocation11 + $0x4] sm:$0x7] }
 0xa24   :  { %12593 = vmatprep.subr.mxu0 %v2529_v44 }
 0xa25   :  { %12594 = vmatpush3.msra.mxu0 %v2529_v44 }
 0xa26   :  { %12596 = vmatmul.mubr.msk.f32.vlgmr.msra.gmra.mxu0 %vm709_vm1, %v14057_v24  ;;  %12601 = vmatprep.subr.mxu0 %v2653_v11  ;;  %v2831_v24 = vrot.slane %v15609_v58, %v15371_v22 }
 0xa27   :  { %12602 = vmatpush3.msra.mxu0 %v2653_v11  ;;  %12598 = vmatprep.mubr.msk.f32.mxu0 %vm709_vm1, %v14058_v25 }
 0xa28   :  { %12603 = vmatprep.subr.mxu0 %v2652_v21 }
 0xa29   :  { %12604 = vmatpush3.msra.mxu0 %v2652_v21 }
 0xa2a   :  { %12599 = vmatmul.mubr.msk.f32.gmra.mxu0 %vm709_vm1, %v14059_v36  ;;  %12605 = vmatprep.subr.mxu0 %v2651_v26 }
 0xa2b   :  { %12606 = vmatpush3.msra.mxu0 %v2651_v26  ;;  %12633 = vmatprep.mubr.f32.mxu0 %v15428_v43  ;;  %v2642_v43 = vld [vmem:[#allocation7 + $0x220] sm:$0xff]  ;;  %v2444_v26 = vadd.f32 %v15500_v37, %v2247_v15 }
 0xa2c   :  { %12607 = vmatprep.subr.mxu0 %v2650_v27 }
 0xa2d   :  { %12608 = vmatpush3.msra.mxu0 %v2650_v27 }
 0xa2e   :  { %12609 = vmatprep.subr.mxu0 %v2649_v46 }
 0xa2f   :  { %12610 = vmatpush3.msra.mxu0 %v2649_v46 }
 0xa30   :  { %12611 = vmatprep.subr.mxu0 %v2648_v51 }
 0xa31   :  { %12612 = vmatpush3.msra.mxu0 %v2648_v51 }
 0xa32   :  { %12613 = vmatprep.subr.mxu0 %v2647_v38 }
 0xa33   :  { %12614 = vmatpush3.msra.mxu0 %v2647_v38 }
 0xa34   :  { %12615 = vmatprep.subr.mxu0 %v2646_v39 }
 0xa35   :  { %12616 = vmatpush3.msra.mxu0 %v2646_v39 }
 0xa36   :  { %12617 = vmatprep.subr.mxu0 %v2645_v40 }
 0xa37   :  { %12618 = vmatpush3.msra.mxu0 %v2645_v40 }
 0xa38   :  { %12619 = vmatprep.subr.mxu0 %v2644_v48 }
 0xa39   :  { %12620 = vmatpush3.msra.mxu0 %v2644_v48 }
 0xa3a   :  { %12621 = vmatprep.subr.mxu0 %v2643_v6 }
 0xa3b   :  { %12622 = vmatpush3.msra.mxu0 %v2643_v6 }
 0xa3c   :  { %12623 = vmatprep.subr.mxu0 %v2642_v43 }
 0xa3d   :  { %12624 = vmatpush3.msra.mxu0 %v2642_v43 }
 0xa3e   :  { %12625 = vmatprep.subr.mxu0 %v2641_v54 }
 0xa3f   :  { %12626 = vmatpush3.msra.mxu0 %v2641_v54 }
 0xa40   :  { %12627 = vmatprep.subr.mxu0 %v2640_v16 }
 0xa41   :  { %12628 = vmatpush3.msra.mxu0 %v2640_v16 }
 0xa42   :  { %12629 = vmatprep.subr.mxu0 %v2639_v18 }
 0xa43   :  { %12630 = vmatpush3.msra.mxu0 %v2639_v18 }
 0xa44   :  { %12631 = vmatprep.subr.mxu0 %v2638_v13 }
 0xa45   :  { %12632 = vmatpush3.msra.mxu0 %v2638_v13 }
 0xa46   :  { %12634 = vmatmul.mubr.f32.vlgmr.msra.gmra.mxu0 %v15430_v19  ;;  %12688 = vmatprep.subr.mxu0 %v14856_v41  ;;  %v14063_v19 = vld [vmem:[#allocation13 + $0x60] sm:$0xff] }
 0xa47   :  { %12636 = vmatprep.mubr.f32.mxu0 %v15434_v23  ;;  %12689 = vmatpush3.msra.mxu0 %v14060_v59  ;;  %v14066_v23 = vld [vmem:[#allocation2 + $0x98] sm:$0xff] }
 0xa48   :  { %12690 = vmatprep.subr.mxu0 %v14856_v41 }
 0xa49   :  { %12691 = vmatpush3.msra.mxu0 %v14061_v47 }
 0xa4a   :  { %12637 = vmatmul.mubr.f32.gmra.mxu0 %v15440_v42  ;;  %12692 = vmatprep.subr.mxu0 %v14856_v41  ;;  %v15559_v42 = vld [vmem:[#allocation13 + $0x58] sm:$0xff] }
 0xa4b   :  { %12693 = vmatpush3.msra.mxu0 %v14062_v61  ;;  %12720 = vmatprep.mubr.msk.f32.mxu0 %vm14857_vm2, %v14856_v41 }
 0xa4c   :  { %12694 = vmatprep.subr.mxu0 %v14856_v41 }
 0xa4d   :  { %12695 = vmatpush3.msra.mxu0 %v14063_v19 }
 0xa4e   :  { %12696 = vmatprep.subr.mxu0 %v14856_v41 }
 0xa4f   :  { %12697 = vmatpush3.msra.mxu0 %v15290_v62 }
 0xa50   :  { %12698 = vmatprep.subr.mxu0 %v14856_v41 }
 0xa51   :  { %12699 = vmatpush3.msra.mxu0 %v15296_v0 }
 0xa52   :  { %12700 = vmatprep.subr.mxu0 %v14856_v41 }
 0xa53   :  { %12701 = vmatpush3.msra.mxu0 %v15302_v1 }
 0xa54   :  { %12702 = vmatprep.subr.mxu0 %v14856_v41 }
 0xa55   :  { %12703 = vmatpush3.msra.mxu0 %v15308_v2 }
 0xa56   :  { %12704 = vmatprep.subr.mxu0 %v14856_v41 }
 0xa57   :  { %12705 = vmatpush3.msra.mxu0 %v15314_v3 }
 0xa58   :  { %12706 = vmatprep.subr.mxu0 %v14856_v41 }
 0xa59   :  { %12707 = vmatpush3.msra.mxu0 %v15320_v4 }
 0xa5a   :  { %12708 = vmatprep.subr.mxu0 %v14856_v41 }
 0xa5b   :  { %12709 = vmatpush3.msra.mxu0 %v15326_v5 }
 0xa5c   :  { %12710 = vmatprep.subr.mxu0 %v14856_v41 }
 0xa5d   :  { %12711 = vmatpush3.msra.mxu0 %v15332_v7 }
 0xa5e   :  { %12712 = vmatprep.subr.mxu0 %v14856_v41 }
 0xa5f   :  { %12713 = vmatpush3.msra.mxu0 %v15338_v8 }
 0xa60   :  { %12714 = vmatprep.subr.mxu0 %v14856_v41 }
 0xa61   :  { %12715 = vmatpush3.msra.mxu0 %v15341_v10 }
 0xa62   :  { %12716 = vmatprep.subr.mxu0 %v14856_v41 }
 0xa63   :  { %12717 = vmatpush3.msra.mxu0 %v15347_v12  ;;  %v14064_v12 = vld [vmem:[#allocation2 + $0x88] sm:$0xff] }
 0xa64   :  { %12718 = vmatprep.subr.mxu0 %v14856_v41 }
 0xa65   :  { %12719 = vmatpush3.msra.mxu0 %v15353_v14  ;;  %v14065_v14 = vld [vmem:[#allocation2 + $0x90] sm:$0xff] }
 0xae6   :  { %v12597_v62 = vpop.f32.mrf.mxu0 }
 0xae7   :  { %v15540_v0 = vadd.f32 %v12597_v62, %v15493_v29  ;;  %v15599_v29 = vld [vmem:[#allocation13 + $0x8] sm:$0xff] }
 0xae8   :  { %v15542_v1 = vpop.f32.mrf.mxu0 }
 0xaea   :  { %v12600_v2 = vpop.f32.mrf.mxu0 }
 0xaeb   :  { %v15545_v3 = vadd.f32 %v12600_v2, %v15498_v31  ;;  %v2237_v31 = vadd.f32 %v15472_v34, %v15470_v30 }
 0xaec   :  { %v15547_v4 = vpop.f32.mrf.mxu0 }
 0xaed   :  { %v2442_v44 = vadd.f32 %v15495_v33, %v2237_v31  ;;  %v2635_v34 = vadd.f32 %v15547_v4, %v2444_v26  ;;  %v3304_v26 = vld [vmem:[#allocation8 + $0xf0] sm:$0xff] }
 0xaef   :  { %v2633_v11 = vadd.f32 %v15542_v1, %v2442_v44 }
 0xb06   :  { %v12635_v5 = vpop.f32.mrf.mxu0 }
 0xb08   :  { %v2720_v7 = vpop.f32.mrf.mxu0 }
 0xb0a   :  { %v12638_v8 = vpop.f32.mrf.mxu0 }
 0xb0b   :  { %12639 = vmatprep.subr.mxu1 %v12638_v8 }
 0xb0c   :  { %v2730_v10 = vpop.f32.mrf.mxu0  ;;  %12640 = vmatpush3.msra.mxu1 %v12638_v8  ;;  %v14079_v8 = vld [vmem:[#allocation14] sm:$0xff] }
 0xb0d   :  { %12641 = vmatprep.subr.mxu1 %v2730_v10 }
 0xb0e   :  { %12642 = vmatpush3.msra.mxu1 %v2730_v10  ;;  %v3305_v10 = vld [vmem:[#allocation8 + $0xf8] sm:$0xff] }
 0xb0f   :  { %12643 = vmatprep.subr.mxu1 %v12635_v5  ;;  %12771 = vmatprep.subr.mxu0 %v3305_v10 }
 0xb10   :  { %12644 = vmatpush3.msra.mxu1 %v12635_v5 }
 0xb11   :  { %12645 = vmatprep.subr.mxu1 %v2720_v7 }
 0xb12   :  { %12646 = vmatpush3.msra.mxu1 %v2720_v7 }
 0xb13   :  { %12648 = vmatmul.mubr.msk.f32.vlgmr.msra.gmra.mxu1 %vm709_vm1, %v14064_v12  ;;  %12653 = vmatprep.subr.mxu1 %v14856_v41 }
 0xb14   :  { %12650 = vmatprep.mubr.msk.f32.mxu1 %vm709_vm1, %v14065_v14  ;;  %12654 = vmatpush3.msra.mxu1 %v14060_v59 }
 0xb15   :  { %12655 = vmatprep.subr.mxu1 %v14856_v41 }
 0xb16   :  { %12656 = vmatpush3.msra.mxu1 %v14061_v47 }
 0xb17   :  { %12651 = vmatmul.mubr.msk.f32.gmra.mxu1 %vm709_vm1, %v14066_v23  ;;  %12657 = vmatprep.subr.mxu1 %v14856_v41 }
 0xb18   :  { %12658 = vmatpush3.msra.mxu1 %v14062_v61  ;;  %12685 = vmatprep.mubr.msk.f32.mxu1 %vm14857_vm2, %v14856_v41 }
 0xb19   :  { %12659 = vmatprep.subr.mxu1 %v14856_v41 }
 0xb1a   :  { %12660 = vmatpush3.msra.mxu1 %v14063_v19 }
 0xb1b   :  { %12661 = vmatprep.subr.mxu1 %v14856_v41 }
 0xb1c   :  { %12662 = vmatpush3.msra.mxu1 %v15559_v42 }
 0xb1d   :  { %12663 = vmatprep.subr.mxu1 %v14856_v41 }
 0xb1e   :  { %12664 = vmatpush3.msra.mxu1 %v15563_v49 }
 0xb1f   :  { %12665 = vmatprep.subr.mxu1 %v14856_v41 }
 0xb20   :  { %12666 = vmatpush3.msra.mxu1 %v15567_v63 }
 0xb21   :  { %12667 = vmatprep.subr.mxu1 %v14856_v41 }
 0xb22   :  { %12668 = vmatpush3.msra.mxu1 %v15571_v45 }
 0xb23   :  { %12669 = vmatprep.subr.mxu1 %v14856_v41 }
 0xb24   :  { %12670 = vmatpush3.msra.mxu1 %v15575_v50 }
 0xb25   :  { %12671 = vmatprep.subr.mxu1 %v14856_v41 }
 0xb26   :  { %12672 = vmatpush3.msra.mxu1 %v15579_v53 }
 0xb27   :  { %12673 = vmatprep.subr.mxu1 %v14856_v41 }
 0xb28   :  { %12674 = vmatpush3.msra.mxu1 %v15583_v20 }
 0xb29   :  { %12675 = vmatprep.subr.mxu1 %v14856_v41 }
 0xb2a   :  { %12676 = vmatpush3.msra.mxu1 %v15587_v32 }
 0xb2b   :  { %12677 = vmatprep.subr.mxu1 %v14856_v41 }
 0xb2c   :  { %12678 = vmatpush3.msra.mxu1 %v15591_v56 }
 0xb2d   :  { %12679 = vmatprep.subr.mxu1 %v14856_v41 }
 0xb2e   :  { %12680 = vmatpush3.msra.mxu1 %v15595_v28 }
 0xb2f   :  { %12681 = vmatprep.subr.mxu1 %v14856_v41 }
 0xb30   :  { %12682 = vmatpush3.msra.mxu1 %v15599_v29 }
 0xb31   :  { %12683 = vmatprep.subr.mxu1 %v14856_v41 }
 0xb32   :  { %12684 = vmatpush3.msra.mxu1 %v15603_v35 }
 0xb33   :  { %12723 = vmatprep.subr.mxu1 %v14856_v41 }
 0xbd3   :  { %v12649_v60 = vpop.f32.mrf.mxu1 }
 0xbd4   :  { %v2825_v21 = vadd.f32 %v12649_v60, %v15540_v0 }
 0xbd5   :  { %v2805_v25 = vpop.f32.mrf.mxu1 }
 0xbd6   :  { %v2824_v27 = vadd.f32 %v2805_v25, %v2633_v11  ;;  %v15620_v36 = vadd.f32 %v2831_v24, %v2825_v21  ;;  %v3203_v25 = vld [vmem:[#allocation8 + $0x78] sm:$0xff] }
 0xbd7   :  { %v12652_v30 = vpop.f32.mrf.mxu1 }
 0xbd8   :  { %v15622_v33 = vadd.f32 %v2831_v24, %v2824_v27  ;;  %v2827_v9 = vadd.f32 %v12652_v30, %v15545_v3  ;;  %v2916_v38 = vmul.f32 %v15620_v36, %v15620_v36  ;;  %v3202_v27 = vld [vmem:[#allocation8 + $0x70] sm:$0xff]  ;;  %v3303_v30 = vld [vmem:[#allocation8 + $0xe8] sm:$0xff] }
 0xbd9   :  { %v2815_v57 = vpop.f32.mrf.mxu1 }
 0xbda   :  { %v2915_v46 = vmul.f32 %v15622_v33, %v15622_v33  ;;  %v2826_v51 = vadd.f32 %v2815_v57, %v2635_v34  ;;  %v2836_v37 = vadd.f32 %v15620_v36, %v15622_v33  ;;  %v15631_v39 = vadd.f32 %v2831_v24, %v2827_v9  ;;  %v3201_v34 = vld [vmem:[#allocation8 + $0x68] sm:$0xff]  ;;  %v3302_v9 = vld [vmem:[#allocation8 + $0xe0] sm:$0xff] }
 0xbdb   :  { %v3200_v57 = vld [vmem:[#allocation8 + $0x60] sm:$0xff] }
 0xbdc   :  { %v15633_v40 = vadd.f32 %v2831_v24, %v2826_v51  ;;  %v2919_v48 = vadd.f32 %v2916_v38, %v2915_v46  ;;  %v2918_v54 = vmul.f32 %v15631_v39, %v15631_v39  ;;  %v3301_v46 = vld [vmem:[#allocation8 + $0xd8] sm:$0xff]  ;;  %v3300_v38 = vld [vmem:[#allocation8 + $0xd0] sm:$0xff] }
 0xbdd   :  { %v3199_v51 = vld [vmem:[#allocation8 + $0x58] sm:$0xff] }
 0xbde   :  { %v2837_v6 = vadd.f32 %v2836_v37, %v15633_v40  ;;  %v2917_v43 = vmul.f32 %v15633_v40, %v15633_v40  ;;  %v3198_v37 = vld [vmem:[#allocation8 + $0x50] sm:$0xff] }
 0xbe0   :  { %v2838_v16 = vadd.f32 %v2837_v6, %v15631_v39  ;;  %v2920_v18 = vadd.f32 %v2919_v48, %v2917_v43  ;;  %v3299_v48 = vld [vmem:[#allocation8 + $0xc8] sm:$0xff]  ;;  %v3298_v43 = vld [vmem:[#allocation8 + $0xc0] sm:$0xff] }
 0xbe1   :  { %v3197_v6 = vld [vmem:[#allocation8 + $0x48] sm:$0xff] }
 0xbe2   :  { %v2839_v13 = vrot.slane %v2838_v16, 4  ;;  %v2921_v59 = vadd.f32 %v2920_v18, %v2918_v54  ;;  %v3196_v54 = vld [vmem:[#allocation8 + $0x40] sm:$0xff]  ;;  %v3195_v18 = vld [vmem:[#allocation8 + $0x38] sm:$0xff] }
 0xbe4   :  { %v2840_v47 = vadd.f32 %v2839_v13, %v2838_v16  ;;  %v2922_v61 = vrot.slane %v2921_v59, 4  ;;  %v3297_v16 = vld [vmem:[#allocation8 + $0xb8] sm:$0xff]  ;;  %v3296_v13 = vld [vmem:[#allocation8 + $0xb0] sm:$0xff] }
 0xbe6   :  { %v2841_v19 = vrot.slane %v2840_v47, 2  ;;  %v2923_v62 = vadd.f32 %v2922_v61, %v2921_v59  ;;  %v3194_v59 = vld [vmem:[#allocation8 + $0x30] sm:$0xff]  ;;  %v3193_v61 = vld [vmem:[#allocation8 + $0x28] sm:$0xff] }
 0xbe8   :  { %v2842_v0 = vadd.f32 %v2841_v19, %v2840_v47  ;;  %v2924_v1 = vrot.slane %v2923_v62, 2  ;;  %v3295_v47 = vld [vmem:[#allocation8 + $0xa8] sm:$0xff]  ;;  %v3294_v19 = vld [vmem:[#allocation8 + $0xa0] sm:$0xff] }
 0xbea   :  { %v2843_v2 = vrot.slane %v2842_v0, 1  ;;  %v2925_v3 = vadd.f32 %v2924_v1, %v2923_v62  ;;  %v3192_v62 = vld [vmem:[#allocation8 + $0x20] sm:$0xff]  ;;  %v3191_v1 = vld [vmem:[#allocation8 + $0x18] sm:$0xff] }
 0xbec   :  { %v2844_v4 = vadd.f32 %v2843_v2, %v2842_v0  ;;  %v2926_v5 = vrot.slane %v2925_v3, 1  ;;  %v3293_v0 = vld [vmem:[#allocation8 + $0x98] sm:$0xff]  ;;  %v3292_v2 = vld [vmem:[#allocation8 + $0x90] sm:$0xff] }
 0xbee   :  { %12686 = vmatmul.mubr.f32.vlgmr.msra.gmra.mxu1 %v2844_v4  ;;  %v2927_v7 = vadd.f32 %v2926_v5, %v2925_v3  ;;  %v3190_v3 = vld [vmem:[#allocation8 + $0x10] sm:$0xff]  ;;  %v3291_v4 = vld [vmem:[#allocation8 + $0x88] sm:$0xff] }
 0xbef   :  { %12724 = vmatpush3.msra.mxu1 %v14079_v8  ;;  %12725 = vmatprep.mubr.msk.f32.mxu1 %vm14857_vm2, %v14856_v41  ;;  %v3189_v5 = vld [vmem:[#allocation8 + $0x8] sm:$0xff] }
 0xbf0   :  { %12721 = vmatmul.mubr.f32.vlgmr.msra.gmra.mxu0 %v2927_v7  ;;  %12728 = vmatprep.subr.mxu1 %v14856_v41  ;;  %v3290_v7 = vld [vmem:[#allocation8 + $0x80] sm:$0xff] }
 0xbf1   :  { %12772 = vmatpush3.msra.mxu0 %v3305_v10  ;;  %v3577_v10 = vld [vmem:[#allocation8 + $0x178] sm:$0xff] }
 0xbf2   :  { %12773 = vmatprep.subr.mxu0 %v3304_v26 }
 0xbf3   :  { %12774 = vmatpush3.msra.mxu0 %v3304_v26 }
 0xbf4   :  { %12775 = vmatprep.subr.mxu0 %v3303_v30 }
 0xbf5   :  { %12776 = vmatpush3.msra.mxu0 %v3303_v30 }
 0xbf6   :  { %12777 = vmatprep.subr.mxu0 %v3302_v9 }
 0xbf7   :  { %12778 = vmatpush3.msra.mxu0 %v3302_v9 }
 0xbf8   :  { %12779 = vmatprep.subr.mxu0 %v3301_v46 }
 0xbf9   :  { %12780 = vmatpush3.msra.mxu0 %v3301_v46 }
 0xbfa   :  { %12781 = vmatprep.subr.mxu0 %v3300_v38 }
 0xbfb   :  { %12782 = vmatpush3.msra.mxu0 %v3300_v38 }
 0xbfc   :  { %12783 = vmatprep.subr.mxu0 %v3299_v48 }
 0xbfd   :  { %12784 = vmatpush3.msra.mxu0 %v3299_v48 }
 0xbfe   :  { %12785 = vmatprep.subr.mxu0 %v3298_v43 }
 0xbff   :  { %12786 = vmatpush3.msra.mxu0 %v3298_v43  ;;  %v3575_v43 = vld [vmem:[#allocation8 + $0x168] sm:$0xff] }
 0xc00   :  { %12787 = vmatprep.subr.mxu0 %v3297_v16 }
 0xc01   :  { %12788 = vmatpush3.msra.mxu0 %v3297_v16  ;;  %v3574_v16 = vld [vmem:[#allocation8 + $0x160] sm:$0xff] }
 0xc02   :  { %12789 = vmatprep.subr.mxu0 %v3296_v13 }
 0xc03   :  { %12790 = vmatpush3.msra.mxu0 %v3296_v13  ;;  %v3573_v13 = vld [vmem:[#allocation8 + $0x158] sm:$0xff] }
 0xc04   :  { %12791 = vmatprep.subr.mxu0 %v3295_v47 }
 0xc05   :  { %12792 = vmatpush3.msra.mxu0 %v3295_v47  ;;  %v3571_v47 = vld [vmem:[#allocation8 + $0x148] sm:$0xff] }
 0xc06   :  { %12793 = vmatprep.subr.mxu0 %v3294_v19 }
 0xc07   :  { %12794 = vmatpush3.msra.mxu0 %v3294_v19  ;;  %v3569_v19 = vld [vmem:[#allocation8 + $0x138] sm:$0xff] }
 0xc08   :  { %12795 = vmatprep.subr.mxu0 %v3293_v0 }
 0xc09   :  { %12796 = vmatpush3.msra.mxu0 %v3293_v0  ;;  %v3567_v0 = vld [vmem:[#allocation8 + $0x128] sm:$0xff] }
 0xc0a   :  { %12797 = vmatprep.subr.mxu0 %v3292_v2 }
 0xc0b   :  { %12798 = vmatpush3.msra.mxu0 %v3292_v2  ;;  %v3565_v2 = vld [vmem:[#allocation8 + $0x118] sm:$0xff] }
 0xc0c   :  { %12799 = vmatprep.subr.mxu0 %v3291_v4 }
 0xc0d   :  { %12800 = vmatpush3.msra.mxu0 %v3291_v4  ;;  %v3563_v4 = vld [vmem:[#allocation8 + $0x108] sm:$0xff] }
 0xc0e   :  { %12801 = vmatprep.subr.mxu0 %v3290_v7 }
 0xc0f   :  { %12802 = vmatpush3.msra.mxu0 %v3290_v7  ;;  %v14081_v7 = vld [vmem:[#allocation2 + $0x60] sm:$0xff] }
 0xc10   :  { %12837 = vmatprep.subr.mxu0 %v3577_v10 }
 0xcae   :  { %v2911_v12 = vpop.f32.mrf.mxu1 }
 0xcaf   :  { %v2998_v14 = vmul.f32 0.001953125, %v2911_v12 }
 0xcb0   :  { %v12687_v23 = vpop.f32.mrf.mxu1  ;;  %v2994_v31 = vpop.f32.mrf.mxu0 }
 0xcb1   :  { %v3000_v44 = vmul.f32 %v2998_v14, %v2998_v14  ;;  %v2999_v60 = vmul.f32 0.001953125, %v2994_v31  ;;  %12726 = vmatmul.mubr.msk.f32.vlgmr.msra.gmra.mxu1 %vm1697_vm3, %v2998_v14  ;;  %v3169_v31 = vrot.slane %v15609_v58, %v15413_v52 }
 0xcb2   :  { %v12722_v15 = vpop.f32.mrf.mxu0  ;;  %12729 = vmatpush3.msra.mxu1 %v14079_v8  ;;  %12730 = vmatprep.mubr.msk.f32.mxu1 %vm14857_vm2, %v14856_v41  ;;  %v3188_v8 = vld [vmem:[#allocation8] sm:$0xff] }
 0xcb3   :  { %v3001_v11 = vsub.f32 %v2999_v60, %v3000_v44  ;;  %12733 = vmatprep.subr.mxu1 %v3203_v25 }
 0xcb5   :  { %v3002_v21 = vadd.f32 1e-05, %v3001_v11 }
 0xcb7   :  { %14035 = vrsqrt.f32 %v3002_v21 }
 0xcc4   :  { %v14036_v24 = vpop.eup %14035 }
 0xcc5   :  { %12731 = vmatmul.mubr.msk.f32.vlgmr.msra.gmra.mxu1 %vm1697_vm3, %v14036_v24 }
 0xcc6   :  { %12734 = vmatpush3.msra.mxu1 %v3203_v25  ;;  %v3177_v25 = vrot.slane %v15609_v58, %v15417_v55 }
 0xcc7   :  { %12735 = vmatprep.subr.mxu1 %v3202_v27 }
 0xcc8   :  { %12736 = vmatpush3.msra.mxu1 %v3202_v27 }
 0xcc9   :  { %12737 = vmatprep.subr.mxu1 %v3201_v34 }
 0xcca   :  { %12738 = vmatpush3.msra.mxu1 %v3201_v34 }
 0xccb   :  { %12739 = vmatprep.subr.mxu1 %v3200_v57 }
 0xccc   :  { %12740 = vmatpush3.msra.mxu1 %v3200_v57 }
 0xccd   :  { %12741 = vmatprep.subr.mxu1 %v3199_v51 }
 0xcce   :  { %12742 = vmatpush3.msra.mxu1 %v3199_v51 }
 0xccf   :  { %12743 = vmatprep.subr.mxu1 %v3198_v37 }
 0xcd0   :  { %12744 = vmatpush3.msra.mxu1 %v3198_v37 }
 0xcd1   :  { %12745 = vmatprep.subr.mxu1 %v3197_v6 }
 0xcd2   :  { %12746 = vmatpush3.msra.mxu1 %v3197_v6  ;;  %v3576_v6 = vld [vmem:[#allocation8 + $0x170] sm:$0xff] }
 0xcd3   :  { %12747 = vmatprep.subr.mxu1 %v3196_v54 }
 0xcd4   :  { %12748 = vmatpush3.msra.mxu1 %v3196_v54 }
 0xcd5   :  { %12749 = vmatprep.subr.mxu1 %v3195_v18 }
 0xcd6   :  { %12750 = vmatpush3.msra.mxu1 %v3195_v18  ;;  %v14080_v18 = vld [vmem:[#allocation2 + $0x20] sm:$0xff] }
 0xcd7   :  { %12751 = vmatprep.subr.mxu1 %v3194_v59 }
 0xcd8   :  { %12752 = vmatpush3.msra.mxu1 %v3194_v59  ;;  %v3572_v59 = vld [vmem:[#allocation8 + $0x150] sm:$0xff] }
 0xcd9   :  { %12753 = vmatprep.subr.mxu1 %v3193_v61 }
 0xcda   :  { %12754 = vmatpush3.msra.mxu1 %v3193_v61  ;;  %v3570_v61 = vld [vmem:[#allocation8 + $0x140] sm:$0xff] }
 0xcdb   :  { %12755 = vmatprep.subr.mxu1 %v3192_v62 }
 0xcdc   :  { %12756 = vmatpush3.msra.mxu1 %v3192_v62  ;;  %v3568_v62 = vld [vmem:[#allocation8 + $0x130] sm:$0xff] }
 0xcdd   :  { %12757 = vmatprep.subr.mxu1 %v3191_v1 }
 0xcde   :  { %12758 = vmatpush3.msra.mxu1 %v3191_v1  ;;  %v3566_v1 = vld [vmem:[#allocation8 + $0x120] sm:$0xff] }
 0xcdf   :  { %12759 = vmatprep.subr.mxu1 %v3190_v3 }
 0xce0   :  { %12760 = vmatpush3.msra.mxu1 %v3190_v3  ;;  %v3564_v3 = vld [vmem:[#allocation8 + $0x110] sm:$0xff] }
 0xce1   :  { %12761 = vmatprep.subr.mxu1 %v3189_v5 }
 0xce2   :  { %12762 = vmatpush3.msra.mxu1 %v3189_v5  ;;  %v3562_v5 = vld [vmem:[#allocation8 + $0x100] sm:$0xff] }
 0xce3   :  { %12763 = vmatprep.subr.mxu1 %v3188_v8 }
 0xce4   :  { %12764 = vmatpush3.msra.mxu1 %v3188_v8 }
 0xd71   :  { %v3073_v12 = vpop.f32.mrf.mxu1 }
 0xd72   :  { %v3153_v23 = vrot.slane %v3073_v12, %v15371_v22 }
 0xd73   :  { %v12727_v14 = vpop.f32.mrf.mxu1 }
 0xd74   :  { %v3154_v44 = vsub.f32 %v15622_v33, %v3153_v23  ;;  %v3155_v15 = vsub.f32 %v15620_v36, %v3153_v23  ;;  %v3156_v11 = vsub.f32 %v15633_v40, %v3153_v23  ;;  %v3157_v21 = vsub.f32 %v15631_v39, %v3153_v23 }
 0xd85   :  { %v3146_v60 = vpop.f32.mrf.mxu1 }
 0xd86   :  { %v3161_v24 = vrot.slane %v3146_v60, %v15371_v22  ;;  %v14082_v60 = vld [vmem:[#allocation2 + $0x28] sm:$0xff] }
 0xd87   :  { %v12732_v26 = vpop.f32.mrf.mxu1 }
 0xd88   :  { %v3162_v27 = vmul.f32 %v3161_v24, %v3154_v44  ;;  %v3163_v30 = vmul.f32 %v3161_v24, %v3155_v15  ;;  %v3164_v34 = vmul.f32 %v3161_v24, %v3156_v11  ;;  %v3165_v9 = vmul.f32 %v3161_v24, %v3157_v21  ;;  %v14083_v11 = vld [vmem:[#allocation2 + $0x30] sm:$0xff]  ;;  %v14084_v21 = vld [vmem:[#allocation2 + $0x38] sm:$0xff]  ;;  %v14085_v24 = vld [vmem:[#allocation2] sm:$0xff] }
 0xd89   :  { %v14087_v26 = vld [vmem:[#allocation2 + $0x10] sm:$0xff] }
 0xd8a   :  { %v3170_v57 = vmul.f32 %v3169_v31, %v3162_v27  ;;  %v3171_v46 = vmul.f32 %v3169_v31, %v3163_v30  ;;  %v3172_v33 = vmul.f32 %v3169_v31, %v3164_v34  ;;  %v3173_v51 = vmul.f32 %v3169_v31, %v3165_v9  ;;  %v14088_v27 = vld [vmem:[#allocation2 + $0x18] sm:$0xff]  ;;  %v14089_v30 = vld [vmem:[#allocation2 + $0x40] sm:$0xff] }
 0xd8c   :  { %v3178_v38 = vadd.f32 %v3177_v25, %v3170_v57  ;;  %v3179_v36 = vadd.f32 %v3177_v25, %v3171_v46  ;;  %v3180_v37 = vadd.f32 %v3177_v25, %v3172_v33  ;;  %v3181_v48 = vadd.f32 %v3177_v25, %v3173_v51  ;;  %v14086_v25 = vld [vmem:[#allocation2 + $0x8] sm:$0xff]  ;;  %v3768_v33 = vld [vmem:[#allocation8 + $0x1f8] sm:$0xff]  ;;  %v3767_v51 = vld [vmem:[#allocation8 + $0x1f0] sm:$0xff] }
 0xd8e   :  { %v15658_v40 = vmax.f32 %v3178_v38, 0.0  ;;  %v15660_v39 = vmax.f32 %v3179_v36, 0.0  ;;  %v15664_v58 = vmax.f32 %v3180_v37, 0.0  ;;  %v15670_v54 = vmax.f32 %v3181_v48, 0.0  ;;  %v14090_v38 = vld [vmem:[#allocation2 + $0x48] sm:$0xff]  ;;  %v14091_v36 = vld [vmem:[#allocation2 + $0x50] sm:$0xff] }
 0xd8f   :  { %v3766_v37 = vld [vmem:[#allocation8 + $0x1e8] sm:$0xff]  ;;  %v3765_v48 = vld [vmem:[#allocation8 + $0x1e0] sm:$0xff] }
 0xd90   :  { %12765 = vmatprep.mubr.f32.mxu1 %v15658_v40  ;;  %12803 = vmatprep.mubr.f32.mxu0 %v15658_v40 }
 0xd91   :  { %12766 = vmatmul.mubr.f32.vlgmr.msra.gmra.mxu1 %v15660_v39  ;;  %12804 = vmatmul.mubr.f32.vlgmr.msra.gmra.mxu0 %v15660_v39 }
 0xd92   :  { %12838 = vmatpush3.msra.mxu0 %v3577_v10  ;;  %12768 = vmatprep.mubr.f32.mxu1 %v15664_v58 }
 0xd93   :  { %12806 = vmatprep.mubr.f32.mxu0 %v15664_v58  ;;  %12839 = vmatprep.subr.mxu0 %v3576_v6 }
 0xd94   :  { %12840 = vmatpush3.msra.mxu0 %v3576_v6  ;;  %v14092_v6 = vld [vmem:[#allocation2 + $0x58] sm:$0xff] }
 0xd95   :  { %12841 = vmatprep.subr.mxu0 %v3575_v43  ;;  %12769 = vmatmul.mubr.f32.gmra.mxu1 %v15670_v54 }
 0xd96   :  { %12807 = vmatmul.mubr.f32.gmra.mxu0 %v15670_v54  ;;  %12817 = vmatprep.mubr.msk.f32.mxu1 %vm709_vm1, %v14080_v18  ;;  %v3762_v18 = vld [vmem:[#allocation8 + $0x1c8] sm:$0xff] }
 0xd97   :  { %12842 = vmatpush3.msra.mxu0 %v3575_v43  ;;  %12869 = vmatprep.mubr.f32.mxu0 %v15658_v40  ;;  %v3764_v43 = vld [vmem:[#allocation8 + $0x1d8] sm:$0xff] }
 0xd98   :  { %12843 = vmatprep.subr.mxu0 %v3574_v16 }
 0xd99   :  { %12844 = vmatpush3.msra.mxu0 %v3574_v16  ;;  %v3763_v16 = vld [vmem:[#allocation8 + $0x1d0] sm:$0xff] }
 0xd9a   :  { %12845 = vmatprep.subr.mxu0 %v3573_v13 }
 0xd9b   :  { %12846 = vmatpush3.msra.mxu0 %v3573_v13  ;;  %v3761_v13 = vld [vmem:[#allocation8 + $0x1c0] sm:$0xff] }
 0xd9c   :  { %12847 = vmatprep.subr.mxu0 %v3572_v59 }
 0xd9d   :  { %12848 = vmatpush3.msra.mxu0 %v3572_v59  ;;  %v3760_v59 = vld [vmem:[#allocation8 + $0x1b8] sm:$0xff] }
 0xd9e   :  { %12849 = vmatprep.subr.mxu0 %v3571_v47 }
 0xd9f   :  { %12850 = vmatpush3.msra.mxu0 %v3571_v47  ;;  %v3759_v47 = vld [vmem:[#allocation8 + $0x1b0] sm:$0xff] }
 0xda0   :  { %12851 = vmatprep.subr.mxu0 %v3570_v61 }
 0xda1   :  { %12852 = vmatpush3.msra.mxu0 %v3570_v61  ;;  %v3758_v61 = vld [vmem:[#allocation8 + $0x1a8] sm:$0xff] }
 0xda2   :  { %12853 = vmatprep.subr.mxu0 %v3569_v19 }
 0xda3   :  { %12854 = vmatpush3.msra.mxu0 %v3569_v19  ;;  %v3757_v19 = vld [vmem:[#allocation8 + $0x1a0] sm:$0xff] }
 0xda4   :  { %12855 = vmatprep.subr.mxu0 %v3568_v62 }
 0xda5   :  { %12856 = vmatpush3.msra.mxu0 %v3568_v62  ;;  %v3756_v62 = vld [vmem:[#allocation8 + $0x198] sm:$0xff] }
 0xda6   :  { %12857 = vmatprep.subr.mxu0 %v3567_v0 }
 0xda7   :  { %12858 = vmatpush3.msra.mxu0 %v3567_v0  ;;  %v3755_v0 = vld [vmem:[#allocation8 + $0x190] sm:$0xff] }
 0xda8   :  { %12859 = vmatprep.subr.mxu0 %v3566_v1 }
 0xda9   :  { %12860 = vmatpush3.msra.mxu0 %v3566_v1  ;;  %v3754_v1 = vld [vmem:[#allocation8 + $0x188] sm:$0xff] }
 0xdaa   :  { %12861 = vmatprep.subr.mxu0 %v3565_v2 }
 0xdab   :  { %12862 = vmatpush3.msra.mxu0 %v3565_v2  ;;  %v3753_v2 = vld [vmem:[#allocation8 + $0x180] sm:$0xff] }
 0xdac   :  { %12863 = vmatprep.subr.mxu0 %v3564_v3 }
 0xdad   :  { %12864 = vmatpush3.msra.mxu0 %v3564_v3  ;;  %v14093_v3 = vld [vmem:[#allocation2 + $0x80] sm:$0xff] }
 0xdae   :  { %12865 = vmatprep.subr.mxu0 %v3563_v4 }
 0xdaf   :  { %12866 = vmatpush3.msra.mxu0 %v3563_v4 }
 0xdb0   :  { %12867 = vmatprep.subr.mxu0 %v3562_v5 }
 0xdb1   :  { %12868 = vmatpush3.msra.mxu0 %v3562_v5 }
 0xdb2   :  { %12870 = vmatmul.mubr.f32.vlgmr.msra.gmra.mxu0 %v15660_v39 }
 0xdb3   :  { %12872 = vmatprep.mubr.f32.mxu0 %v15664_v58 }
 0xdb6   :  { %12873 = vmatmul.mubr.f32.gmra.mxu0 %v15670_v54 }
 0xdb7   :  { %12935 = vmatprep.mubr.msk.f32.mxu0 %vm709_vm1, %v14081_v7 }
 0xe51   :  { %v12805_v8 = vpop.f32.mrf.mxu0  ;;  %v12767_v12 = vpop.f32.mrf.mxu1 }
 0xe53   :  { %v3372_v10 = vpop.f32.mrf.mxu0  ;;  %v3270_v23 = vpop.f32.mrf.mxu1 }
 0xe55   :  { %v12770_v44 = vpop.f32.mrf.mxu1 }
 0xe56   :  { %v12808_v14 = vpop.f32.mrf.mxu0 }
 0xe57   :  { %12809 = vmatprep.subr.mxu1 %v12808_v14  ;;  %v3280_v15 = vpop.f32.mrf.mxu1 }
 0xe58   :  { %v3382_v31 = vpop.f32.mrf.mxu0  ;;  %12810 = vmatpush3.msra.mxu1 %v12808_v14 }
 0xe59   :  { %12811 = vmatprep.subr.mxu1 %v3382_v31 }
 0xe5a   :  { %12812 = vmatpush3.msra.mxu1 %v3382_v31 }
 0xe5b   :  { %12813 = vmatprep.subr.mxu1 %v12805_v8 }
 0xe5c   :  { %12814 = vmatpush3.msra.mxu1 %v12805_v8 }
 0xe5d   :  { %12815 = vmatprep.subr.mxu1 %v3372_v10 }
 0xe5e   :  { %12816 = vmatpush3.msra.mxu1 %v3372_v10 }
 0xe5f   :  { %12823 = vmatprep.subr.mxu1 %v12770_v44  ;;  %12818 = vmatmul.mubr.msk.f32.vlgmr.msra.gmra.mxu1 %vm709_vm1, %v14082_v60 }
 0xe60   :  { %12824 = vmatpush3.msra.mxu1 %v12770_v44  ;;  %12820 = vmatprep.mubr.msk.f32.mxu1 %vm709_vm1, %v14083_v11 }
 0xe61   :  { %12825 = vmatprep.subr.mxu1 %v3280_v15 }
 0xe62   :  { %12826 = vmatpush3.msra.mxu1 %v3280_v15 }
 0xe63   :  { %12827 = vmatprep.subr.mxu1 %v12767_v12  ;;  %12821 = vmatmul.mubr.msk.f32.gmra.mxu1 %vm709_vm1, %v14084_v21 }
 0xe64   :  { %12828 = vmatpush3.msra.mxu1 %v12767_v12  ;;  %12831 = vmatprep.mubr.msk.f32.mxu1 %vm709_vm1, %v14085_v24 }
 0xe65   :  { %12829 = vmatprep.subr.mxu1 %v3270_v23 }
 0xe66   :  { %12830 = vmatpush3.msra.mxu1 %v3270_v23 }
 0xe67   :  { %12832 = vmatmul.mubr.msk.f32.vlgmr.msra.gmra.mxu1 %vm709_vm1, %v14086_v25 }
 0xe68   :  { %12834 = vmatprep.mubr.msk.f32.mxu1 %vm709_vm1, %v14087_v26 }
 0xe6b   :  { %12835 = vmatmul.mubr.msk.f32.gmra.mxu1 %vm709_vm1, %v14088_v27 }
 0xe6c   :  { %12883 = vmatprep.mubr.msk.f32.mxu1 %vm709_vm1, %v14089_v30 }
 0xe72   :  { %v12871_v34 = vpop.f32.mrf.mxu0 }
 0xe74   :  { %v3644_v9 = vpop.f32.mrf.mxu0 }
 0xe76   :  { %v12874_v57 = vpop.f32.mrf.mxu0 }
 0xe77   :  { %12875 = vmatprep.subr.mxu1 %v12874_v57 }
 0xe78   :  { %v3654_v46 = vpop.f32.mrf.mxu0  ;;  %12876 = vmatpush3.msra.mxu1 %v12874_v57  ;;  %v3958_v57 = vld [vmem:[#allocation8 + $0x270] sm:$0xff] }
 0xe79   :  { %12877 = vmatprep.subr.mxu1 %v3654_v46 }
 0xe7a   :  { %12878 = vmatpush3.msra.mxu1 %v3654_v46  ;;  %v14094_v46 = vld [vmem:[#allocation2 + $0x68] sm:$0xff] }
 0xe7b   :  { %12879 = vmatprep.subr.mxu1 %v12871_v34 }
 0xe7c   :  { %12880 = vmatpush3.msra.mxu1 %v12871_v34 }
 0xe7d   :  { %12881 = vmatprep.subr.mxu1 %v3644_v9 }
 0xe7e   :  { %12882 = vmatpush3.msra.mxu1 %v3644_v9  ;;  %v3959_v9 = vld [vmem:[#allocation8 + $0x278] sm:$0xff] }
 0xe7f   :  { %12884 = vmatmul.mubr.msk.f32.vlgmr.msra.gmra.mxu1 %vm709_vm1, %v14090_v38  ;;  %12889 = vmatprep.subr.mxu1 %v3768_v33  ;;  %v3956_v38 = vld [vmem:[#allocation8 + $0x260] sm:$0xff] }
 0xe80   :  { %12890 = vmatpush3.msra.mxu1 %v3768_v33  ;;  %12886 = vmatprep.mubr.msk.f32.mxu1 %vm709_vm1, %v14091_v36  ;;  %v14095_v33 = vld [vmem:[#allocation2 + $0x70] sm:$0xff]  ;;  %v14096_v36 = vld [vmem:[#allocation2 + $0x78] sm:$0xff] }
 0xe81   :  { %12891 = vmatprep.subr.mxu1 %v3767_v51 }
 0xe82   :  { %12892 = vmatpush3.msra.mxu1 %v3767_v51  ;;  %v3957_v51 = vld [vmem:[#allocation8 + $0x268] sm:$0xff] }
 0xe83   :  { %12887 = vmatmul.mubr.msk.f32.gmra.mxu1 %vm709_vm1, %v14092_v6  ;;  %12893 = vmatprep.subr.mxu1 %v3766_v37  ;;  %v3953_v6 = vld [vmem:[#allocation8 + $0x248] sm:$0xff] }
 0xe84   :  { %12894 = vmatpush3.msra.mxu1 %v3766_v37  ;;  %12921 = vmatprep.mubr.f32.mxu1 %v15658_v40  ;;  %v3955_v37 = vld [vmem:[#allocation8 + $0x258] sm:$0xff] }
 0xe85   :  { %12895 = vmatprep.subr.mxu1 %v3765_v48 }
 0xe86   :  { %12896 = vmatpush3.msra.mxu1 %v3765_v48  ;;  %v3954_v48 = vld [vmem:[#allocation8 + $0x250] sm:$0xff] }
 0xe87   :  { %12897 = vmatprep.subr.mxu1 %v3764_v43 }
 0xe88   :  { %12898 = vmatpush3.msra.mxu1 %v3764_v43  ;;  %v3952_v43 = vld [vmem:[#allocation8 + $0x240] sm:$0xff] }
 0xe89   :  { %12899 = vmatprep.subr.mxu1 %v3763_v16 }
 0xe8a   :  { %12900 = vmatpush3.msra.mxu1 %v3763_v16  ;;  %v3951_v16 = vld [vmem:[#allocation8 + $0x238] sm:$0xff] }
 0xe8b   :  { %12901 = vmatprep.subr.mxu1 %v3762_v18 }
 0xe8c   :  { %12902 = vmatpush3.msra.mxu1 %v3762_v18  ;;  %v3950_v18 = vld [vmem:[#allocation8 + $0x230] sm:$0xff] }
 0xe8d   :  { %12903 = vmatprep.subr.mxu1 %v3761_v13 }
 0xe8e   :  { %12904 = vmatpush3.msra.mxu1 %v3761_v13  ;;  %v3949_v13 = vld [vmem:[#allocation8 + $0x228] sm:$0xff] }
 0xe8f   :  { %12905 = vmatprep.subr.mxu1 %v3760_v59 }
 0xe90   :  { %12906 = vmatpush3.msra.mxu1 %v3760_v59  ;;  %v3947_v59 = vld [vmem:[#allocation8 + $0x218] sm:$0xff] }
 0xe91   :  { %12907 = vmatprep.subr.mxu1 %v3759_v47 }
 0xe92   :  { %12908 = vmatpush3.msra.mxu1 %v3759_v47  ;;  %v3946_v47 = vld [vmem:[#allocation8 + $0x210] sm:$0xff] }
 0xe93   :  { %12909 = vmatprep.subr.mxu1 %v3758_v61 }
 0xe94   :  { %12910 = vmatpush3.msra.mxu1 %v3758_v61  ;;  %v3945_v61 = vld [vmem:[#allocation8 + $0x208] sm:$0xff] }
 0xe95   :  { %12911 = vmatprep.subr.mxu1 %v3757_v19 }
 0xe96   :  { %12912 = vmatpush3.msra.mxu1 %v3757_v19  ;;  %v3944_v19 = vld [vmem:[#allocation8 + $0x200] sm:$0xff] }
 0xe97   :  { %12913 = vmatprep.subr.mxu1 %v3756_v62 }
 0xe98   :  { %12914 = vmatpush3.msra.mxu1 %v3756_v62  ;;  %v14097_v62 = vld [vmem:[#allocation13 + $0x78] sm:$0xff] }
 0xe99   :  { %12915 = vmatprep.subr.mxu1 %v3755_v0 }
 0xe9a   :  { %12916 = vmatpush3.msra.mxu1 %v3755_v0  ;;  %v14098_v0 = vld [vmem:[#allocation13 + $0x70] sm:$0xff] }
 0xe9b   :  { %12917 = vmatprep.subr.mxu1 %v3754_v1 }
 0xe9c   :  { %12918 = vmatpush3.msra.mxu1 %v3754_v1  ;;  %v14099_v1 = vld [vmem:[#allocation13 + $0x68] sm:$0xff] }
 0xe9d   :  { %12919 = vmatprep.subr.mxu1 %v3753_v2 }
 0xe9e   :  { %12920 = vmatpush3.msra.mxu1 %v3753_v2  ;;  %v15773_v2 = vld [vmem:[#allocation13 + $0x50] sm:$0xff] }
 0xe9f   :  { %12922 = vmatmul.mubr.f32.vlgmr.msra.gmra.mxu1 %v15660_v39 }
 0xea0   :  { %12924 = vmatprep.mubr.f32.mxu1 %v15664_v58 }
 0xea3   :  { %12925 = vmatmul.mubr.f32.gmra.mxu1 %v15670_v54 }
 0xea4   :  { %12987 = vmatprep.mubr.msk.f32.mxu1 %vm709_vm1, %v14093_v3  ;;  %v15777_v3 = vld [vmem:[#allocation13 + $0x48] sm:$0xff] }
 0xf1f   :  { %v12819_v4 = vpop.f32.mrf.mxu1 }
 0xf21   :  { %v15696_v5 = vpop.f32.mrf.mxu1 }
 0xf23   :  { %v12822_v7 = vpop.f32.mrf.mxu1 }
 0xf25   :  { %v15698_v8 = vpop.f32.mrf.mxu1 }
 0xf27   :  { %v12833_v10 = vpop.f32.mrf.mxu1 }
 0xf28   :  { %v3548_v12 = vadd.f32 %v12833_v10, %v12819_v4  ;;  %v15781_v4 = vld [vmem:[#allocation13 + $0x40] sm:$0xff]  ;;  %v15789_v10 = vld [vmem:[#allocation13 + $0x30] sm:$0xff] }
 0xf29   :  { %v15700_v14 = vpop.f32.mrf.mxu1 }
 0xf2b   :  { %v12836_v23 = vpop.f32.mrf.mxu1 }
 0xf2c   :  { %v3558_v31 = vadd.f32 %v12836_v23, %v12822_v7  ;;  %v15785_v7 = vld [vmem:[#allocation13 + $0x38] sm:$0xff]  ;;  %v15797_v23 = vld [vmem:[#allocation13 + $0x20] sm:$0xff] }
 0xf2d   :  { %v15702_v44 = vpop.f32.mrf.mxu1 }
 0xf3f   :  { %v12885_v60 = vpop.f32.mrf.mxu1 }
 0xf40   :  { %v15704_v15 = vadd.f32 %v12885_v60, %v3548_v12  ;;  %v15793_v12 = vld [vmem:[#allocation13 + $0x28] sm:$0xff]  ;;  %v15805_v60 = vld [vmem:[#allocation13 + $0x10] sm:$0xff] }
 0xf41   :  { %v15706_v11 = vpop.f32.mrf.mxu1 }
 0xf43   :  { %v12888_v21 = vpop.f32.mrf.mxu1 }
 0xf44   :  { %v15708_v24 = vadd.f32 %v12888_v21, %v3558_v31  ;;  %v15801_v31 = vld [vmem:[#allocation13 + $0x18] sm:$0xff]  ;;  %v15813_v21 = vld [vmem:[#allocation13] sm:$0xff] }
 0xf45   :  { %v15710_v25 = vpop.f32.mrf.mxu1 }
 0xf5f   :  { %v12923_v26 = vpop.f32.mrf.mxu1 }
 0xf61   :  { %v3835_v27 = vpop.f32.mrf.mxu1 }
 0xf63   :  { %v12926_v30 = vpop.f32.mrf.mxu1 }
 0xf64   :  { %12927 = vmatprep.subr.mxu0 %v12926_v30 }
 0xf65   :  { %v3845_v34 = vpop.f32.mrf.mxu1  ;;  %12928 = vmatpush3.msra.mxu0 %v12926_v30 }
 0xf66   :  { %12929 = vmatprep.subr.mxu0 %v3845_v34 }
 0xf67   :  { %12930 = vmatpush3.msra.mxu0 %v3845_v34  ;;  %v3553_v34 = vadd.f32 %v15702_v44, %v15698_v8 }
 0xf68   :  { %12931 = vmatprep.subr.mxu0 %v12923_v26 }
 0xf69   :  { %12932 = vmatpush3.msra.mxu0 %v12923_v26  ;;  %v15819_v26 = vld [vmem:[#allocation11 + $0x8] sm:$0x7] }
 0xf6a   :  { %12933 = vmatprep.subr.mxu0 %v3835_v27 }
 0xf6b   :  { %12934 = vmatpush3.msra.mxu0 %v3835_v27 }
 0xf6c   :  { %12936 = vmatmul.mubr.msk.f32.vlgmr.msra.gmra.mxu0 %vm709_vm1, %v14094_v46  ;;  %12941 = vmatprep.subr.mxu0 %v3959_v9  ;;  %v4137_v46 = vrot.slane %v15819_v26, %v15371_v22 }
 0xf6d   :  { %12942 = vmatpush3.msra.mxu0 %v3959_v9  ;;  %12938 = vmatprep.mubr.msk.f32.mxu0 %vm709_vm1, %v14095_v33 }
 0xf6e   :  { %12943 = vmatprep.subr.mxu0 %v3958_v57 }
 0xf6f   :  { %12944 = vmatpush3.msra.mxu0 %v3958_v57 }
 0xf70   :  { %12939 = vmatmul.mubr.msk.f32.gmra.mxu0 %vm709_vm1, %v14096_v36  ;;  %12945 = vmatprep.subr.mxu0 %v3957_v51 }
 0xf71   :  { %12946 = vmatpush3.msra.mxu0 %v3957_v51  ;;  %12973 = vmatprep.mubr.f32.mxu0 %v15658_v40  ;;  %v3948_v40 = vld [vmem:[#allocation8 + $0x220] sm:$0xff]  ;;  %v3750_v51 = vadd.f32 %v15710_v25, %v3553_v34 }
 0xf72   :  { %12947 = vmatprep.subr.mxu0 %v3956_v38 }
 0xf73   :  { %12948 = vmatpush3.msra.mxu0 %v3956_v38 }
 0xf74   :  { %12949 = vmatprep.subr.mxu0 %v3955_v37 }
 0xf75   :  { %12950 = vmatpush3.msra.mxu0 %v3955_v37 }
 0xf76   :  { %12951 = vmatprep.subr.mxu0 %v3954_v48 }
 0xf77   :  { %12952 = vmatpush3.msra.mxu0 %v3954_v48 }
 0xf78   :  { %12953 = vmatprep.subr.mxu0 %v3953_v6 }
 0xf79   :  { %12954 = vmatpush3.msra.mxu0 %v3953_v6 }
 0xf7a   :  { %12955 = vmatprep.subr.mxu0 %v3952_v43 }
 0xf7b   :  { %12956 = vmatpush3.msra.mxu0 %v3952_v43 }
 0xf7c   :  { %12957 = vmatprep.subr.mxu0 %v3951_v16 }
 0xf7d   :  { %12958 = vmatpush3.msra.mxu0 %v3951_v16 }
 0xf7e   :  { %12959 = vmatprep.subr.mxu0 %v3950_v18 }
 0xf7f   :  { %12960 = vmatpush3.msra.mxu0 %v3950_v18 }
 0xf80   :  { %12961 = vmatprep.subr.mxu0 %v3949_v13 }
 0xf81   :  { %12962 = vmatpush3.msra.mxu0 %v3949_v13 }
 0xf82   :  { %12963 = vmatprep.subr.mxu0 %v3948_v40 }
 0xf83   :  { %12964 = vmatpush3.msra.mxu0 %v3948_v40 }
 0xf84   :  { %12965 = vmatprep.subr.mxu0 %v3947_v59 }
 0xf85   :  { %12966 = vmatpush3.msra.mxu0 %v3947_v59 }
 0xf86   :  { %12967 = vmatprep.subr.mxu0 %v3946_v47 }
 0xf87   :  { %12968 = vmatpush3.msra.mxu0 %v3946_v47 }
 0xf88   :  { %12969 = vmatprep.subr.mxu0 %v3945_v61 }
 0xf89   :  { %12970 = vmatpush3.msra.mxu0 %v3945_v61 }
 0xf8a   :  { %12971 = vmatprep.subr.mxu0 %v3944_v19 }
 0xf8b   :  { %12972 = vmatpush3.msra.mxu0 %v3944_v19 }
 0xf8c   :  { %12974 = vmatmul.mubr.f32.vlgmr.msra.gmra.mxu0 %v15660_v39  ;;  %13028 = vmatprep.subr.mxu0 %v14856_v41  ;;  %v14100_v39 = vld [vmem:[#allocation13 + $0x60] sm:$0xff] }
 0xf8d   :  { %12976 = vmatprep.mubr.f32.mxu0 %v15664_v58  ;;  %13029 = vmatpush3.msra.mxu0 %v14097_v62  ;;  %v14103_v58 = vld [vmem:[#allocation2 + $0x98] sm:$0xff] }
 0xf8e   :  { %13030 = vmatprep.subr.mxu0 %v14856_v41 }
 0xf8f   :  { %13031 = vmatpush3.msra.mxu0 %v14098_v0 }
 0xf90   :  { %12977 = vmatmul.mubr.f32.gmra.mxu0 %v15670_v54  ;;  %13032 = vmatprep.subr.mxu0 %v14856_v41  ;;  %v15769_v54 = vld [vmem:[#allocation13 + $0x58] sm:$0xff] }
 0xf91   :  { %13033 = vmatpush3.msra.mxu0 %v14099_v1  ;;  %13060 = vmatprep.mubr.msk.f32.mxu0 %vm14857_vm2, %v14856_v41 }
 0xf92   :  { %13034 = vmatprep.subr.mxu0 %v14856_v41 }
 0xf93   :  { %13035 = vmatpush3.msra.mxu0 %v14100_v39 }
 0xf94   :  { %13036 = vmatprep.subr.mxu0 %v14856_v41 }
 0xf95   :  { %13037 = vmatpush3.msra.mxu0 %v15559_v42 }
 0xf96   :  { %13038 = vmatprep.subr.mxu0 %v14856_v41 }
 0xf97   :  { %13039 = vmatpush3.msra.mxu0 %v15563_v49 }
 0xf98   :  { %13040 = vmatprep.subr.mxu0 %v14856_v41 }
 0xf99   :  { %13041 = vmatpush3.msra.mxu0 %v15567_v63 }
 0xf9a   :  { %13042 = vmatprep.subr.mxu0 %v14856_v41 }
 0xf9b   :  { %13043 = vmatpush3.msra.mxu0 %v15571_v45 }
 0xf9c   :  { %13044 = vmatprep.subr.mxu0 %v14856_v41 }
 0xf9d   :  { %13045 = vmatpush3.msra.mxu0 %v15575_v50 }
 0xf9e   :  { %13046 = vmatprep.subr.mxu0 %v14856_v41 }
 0xf9f   :  { %13047 = vmatpush3.msra.mxu0 %v15579_v53 }
 0xfa0   :  { %13048 = vmatprep.subr.mxu0 %v14856_v41 }
 0xfa1   :  { %13049 = vmatpush3.msra.mxu0 %v15583_v20 }
 0xfa2   :  { %13050 = vmatprep.subr.mxu0 %v14856_v41 }
 0xfa3   :  { %13051 = vmatpush3.msra.mxu0 %v15587_v32 }
 0xfa4   :  { %13052 = vmatprep.subr.mxu0 %v14856_v41 }
 0xfa5   :  { %13053 = vmatpush3.msra.mxu0 %v15591_v56 }
 0xfa6   :  { %13054 = vmatprep.subr.mxu0 %v14856_v41 }
 0xfa7   :  { %13055 = vmatpush3.msra.mxu0 %v15595_v28 }
 0xfa8   :  { %13056 = vmatprep.subr.mxu0 %v14856_v41 }
 0xfa9   :  { %13057 = vmatpush3.msra.mxu0 %v15599_v29  ;;  %v14101_v29 = vld [vmem:[#allocation2 + $0x88] sm:$0xff] }
 0xfaa   :  { %13058 = vmatprep.subr.mxu0 %v14856_v41 }
 0xfab   :  { %13059 = vmatpush3.msra.mxu0 %v15603_v35  ;;  %v14102_v35 = vld [vmem:[#allocation2 + $0x90] sm:$0xff] }
0x102c   :  { %v12937_v42 = vpop.f32.mrf.mxu0 }
0x102d   :  { %v15750_v49 = vadd.f32 %v12937_v42, %v15704_v15  ;;  %v15809_v15 = vld [vmem:[#allocation13 + $0x8] sm:$0xff] }
0x102e   :  { %v15752_v63 = vpop.f32.mrf.mxu0 }
0x1030   :  { %v12940_v45 = vpop.f32.mrf.mxu0 }
0x1031   :  { %v15755_v50 = vadd.f32 %v12940_v45, %v15708_v24  ;;  %v3543_v24 = vadd.f32 %v15700_v14, %v15696_v5 }
0x1032   :  { %v15757_v53 = vpop.f32.mrf.mxu0 }
0x1033   :  { %v3748_v27 = vadd.f32 %v15706_v11, %v3543_v24  ;;  %v3941_v14 = vadd.f32 %v15757_v53, %v3750_v51  ;;  %v4610_v51 = vld [vmem:[#allocation10 + $0xf0] sm:$0xff] }
0x1035   :  { %v3939_v9 = vadd.f32 %v15752_v63, %v3748_v27 }
0x104c   :  { %v12975_v20 = vpop.f32.mrf.mxu0 }
0x104e   :  { %v4026_v32 = vpop.f32.mrf.mxu0 }
0x1050   :  { %v12978_v56 = vpop.f32.mrf.mxu0 }
0x1051   :  { %12979 = vmatprep.subr.mxu1 %v12978_v56 }
0x1052   :  { %v4036_v28 = vpop.f32.mrf.mxu0  ;;  %12980 = vmatpush3.msra.mxu1 %v12978_v56  ;;  %v14116_v56 = vld [vmem:[#allocation14] sm:$0xff] }
0x1053   :  { %12981 = vmatprep.subr.mxu1 %v4036_v28 }
0x1054   :  { %12982 = vmatpush3.msra.mxu1 %v4036_v28  ;;  %v4611_v28 = vld [vmem:[#allocation10 + $0xf8] sm:$0xff] }
0x1055   :  { %12983 = vmatprep.subr.mxu1 %v12975_v20  ;;  %13111 = vmatprep.subr.mxu0 %v4611_v28 }
0x1056   :  { %12984 = vmatpush3.msra.mxu1 %v12975_v20 }
0x1057   :  { %12985 = vmatprep.subr.mxu1 %v4026_v32 }
0x1058   :  { %12986 = vmatpush3.msra.mxu1 %v4026_v32 }
0x1059   :  { %12988 = vmatmul.mubr.msk.f32.vlgmr.msra.gmra.mxu1 %vm709_vm1, %v14101_v29  ;;  %12993 = vmatprep.subr.mxu1 %v14856_v41 }
0x105a   :  { %12990 = vmatprep.mubr.msk.f32.mxu1 %vm709_vm1, %v14102_v35  ;;  %12994 = vmatpush3.msra.mxu1 %v14097_v62 }
0x105b   :  { %12995 = vmatprep.subr.mxu1 %v14856_v41 }
0x105c   :  { %12996 = vmatpush3.msra.mxu1 %v14098_v0 }
0x105d   :  { %12991 = vmatmul.mubr.msk.f32.gmra.mxu1 %vm709_vm1, %v14103_v58  ;;  %12997 = vmatprep.subr.mxu1 %v14856_v41 }
0x105e   :  { %12998 = vmatpush3.msra.mxu1 %v14099_v1  ;;  %13025 = vmatprep.mubr.msk.f32.mxu1 %vm14857_vm2, %v14856_v41 }
0x105f   :  { %12999 = vmatprep.subr.mxu1 %v14856_v41 }
0x1060   :  { %13000 = vmatpush3.msra.mxu1 %v14100_v39 }
0x1061   :  { %13001 = vmatprep.subr.mxu1 %v14856_v41 }
0x1062   :  { %13002 = vmatpush3.msra.mxu1 %v15769_v54 }
0x1063   :  { %13003 = vmatprep.subr.mxu1 %v14856_v41 }
0x1064   :  { %13004 = vmatpush3.msra.mxu1 %v15773_v2 }
0x1065   :  { %13005 = vmatprep.subr.mxu1 %v14856_v41 }
0x1066   :  { %13006 = vmatpush3.msra.mxu1 %v15777_v3 }
0x1067   :  { %13007 = vmatprep.subr.mxu1 %v14856_v41 }
0x1068   :  { %13008 = vmatpush3.msra.mxu1 %v15781_v4 }
0x1069   :  { %13009 = vmatprep.subr.mxu1 %v14856_v41 }
0x106a   :  { %13010 = vmatpush3.msra.mxu1 %v15785_v7 }
0x106b   :  { %13011 = vmatprep.subr.mxu1 %v14856_v41 }
0x106c   :  { %13012 = vmatpush3.msra.mxu1 %v15789_v10 }
0x106d   :  { %13013 = vmatprep.subr.mxu1 %v14856_v41 }
0x106e   :  { %13014 = vmatpush3.msra.mxu1 %v15793_v12 }
0x106f   :  { %13015 = vmatprep.subr.mxu1 %v14856_v41 }
0x1070   :  { %13016 = vmatpush3.msra.mxu1 %v15797_v23 }
0x1071   :  { %13017 = vmatprep.subr.mxu1 %v14856_v41 }
0x1072   :  { %13018 = vmatpush3.msra.mxu1 %v15801_v31 }
0x1073   :  { %13019 = vmatprep.subr.mxu1 %v14856_v41 }
0x1074   :  { %13020 = vmatpush3.msra.mxu1 %v15805_v60 }
0x1075   :  { %13021 = vmatprep.subr.mxu1 %v14856_v41 }
0x1076   :  { %13022 = vmatpush3.msra.mxu1 %v15809_v15 }
0x1077   :  { %13023 = vmatprep.subr.mxu1 %v14856_v41 }
0x1078   :  { %13024 = vmatpush3.msra.mxu1 %v15813_v21 }
0x1079   :  { %13063 = vmatprep.subr.mxu1 %v14856_v41 }
0x1119   :  { %v12989_v30 = vpop.f32.mrf.mxu1 }
0x111a   :  { %v4131_v57 = vadd.f32 %v12989_v30, %v15750_v49 }
0x111b   :  { %v4111_v33 = vpop.f32.mrf.mxu1 }
0x111c   :  { %v4130_v38 = vadd.f32 %v4111_v33, %v3939_v9  ;;  %v15830_v36 = vadd.f32 %v4137_v46, %v4131_v57  ;;  %v4509_v33 = vld [vmem:[#allocation10 + $0x78] sm:$0xff] }
0x111d   :  { %v12992_v5 = vpop.f32.mrf.mxu1 }
0x111e   :  { %v15832_v11 = vadd.f32 %v4137_v46, %v4130_v38  ;;  %v4133_v8 = vadd.f32 %v12992_v5, %v15755_v50  ;;  %v4222_v6 = vmul.f32 %v15830_v36, %v15830_v36  ;;  %v4508_v38 = vld [vmem:[#allocation10 + $0x70] sm:$0xff]  ;;  %v4609_v5 = vld [vmem:[#allocation10 + $0xe8] sm:$0xff] }
0x111f   :  { %v4121_v44 = vpop.f32.mrf.mxu1 }
0x1120   :  { %v4221_v37 = vmul.f32 %v15832_v11, %v15832_v11  ;;  %v4132_v48 = vadd.f32 %v4121_v44, %v3941_v14  ;;  %v4142_v25 = vadd.f32 %v15830_v36, %v15832_v11  ;;  %v15841_v43 = vadd.f32 %v4137_v46, %v4133_v8  ;;  %v4507_v14 = vld [vmem:[#allocation10 + $0x68] sm:$0xff]  ;;  %v4608_v8 = vld [vmem:[#allocation10 + $0xe0] sm:$0xff] }
0x1121   :  { %v4506_v44 = vld [vmem:[#allocation10 + $0x60] sm:$0xff] }
0x1122   :  { %v15843_v16 = vadd.f32 %v4137_v46, %v4132_v48  ;;  %v4225_v18 = vadd.f32 %v4222_v6, %v4221_v37  ;;  %v4224_v59 = vmul.f32 %v15841_v43, %v15841_v43  ;;  %v4607_v37 = vld [vmem:[#allocation10 + $0xd8] sm:$0xff]  ;;  %v4606_v6 = vld [vmem:[#allocation10 + $0xd0] sm:$0xff] }
0x1123   :  { %v4505_v48 = vld [vmem:[#allocation10 + $0x58] sm:$0xff] }
0x1124   :  { %v4143_v13 = vadd.f32 %v4142_v25, %v15843_v16  ;;  %v4223_v40 = vmul.f32 %v15843_v16, %v15843_v16  ;;  %v4504_v25 = vld [vmem:[#allocation10 + $0x50] sm:$0xff] }
0x1126   :  { %v4144_v47 = vadd.f32 %v4143_v13, %v15841_v43  ;;  %v4226_v61 = vadd.f32 %v4225_v18, %v4223_v40  ;;  %v4605_v18 = vld [vmem:[#allocation10 + $0xc8] sm:$0xff]  ;;  %v4604_v40 = vld [vmem:[#allocation10 + $0xc0] sm:$0xff] }
0x1127   :  { %v4503_v13 = vld [vmem:[#allocation10 + $0x48] sm:$0xff] }
0x1128   :  { %v4145_v19 = vrot.slane %v4144_v47, 4  ;;  %v4227_v62 = vadd.f32 %v4226_v61, %v4224_v59  ;;  %v4502_v59 = vld [vmem:[#allocation10 + $0x40] sm:$0xff]  ;;  %v4501_v61 = vld [vmem:[#allocation10 + $0x38] sm:$0xff] }
0x112a   :  { %v4146_v0 = vadd.f32 %v4145_v19, %v4144_v47  ;;  %v4228_v1 = vrot.slane %v4227_v62, 4  ;;  %v4603_v47 = vld [vmem:[#allocation10 + $0xb8] sm:$0xff]  ;;  %v4602_v19 = vld [vmem:[#allocation10 + $0xb0] sm:$0xff] }
0x112c   :  { %v4147_v39 = vrot.slane %v4146_v0, 2  ;;  %v4229_v42 = vadd.f32 %v4228_v1, %v4227_v62  ;;  %v4500_v62 = vld [vmem:[#allocation10 + $0x30] sm:$0xff]  ;;  %v4499_v1 = vld [vmem:[#allocation10 + $0x28] sm:$0xff] }
0x112e   :  { %v4148_v49 = vadd.f32 %v4147_v39, %v4146_v0  ;;  %v4230_v63 = vrot.slane %v4229_v42, 2  ;;  %v4601_v0 = vld [vmem:[#allocation10 + $0xa8] sm:$0xff]  ;;  %v4600_v39 = vld [vmem:[#allocation10 + $0xa0] sm:$0xff] }
0x1130   :  { %v4149_v45 = vrot.slane %v4148_v49, 1  ;;  %v4231_v50 = vadd.f32 %v4230_v63, %v4229_v42  ;;  %v4498_v42 = vld [vmem:[#allocation10 + $0x20] sm:$0xff]  ;;  %v4497_v63 = vld [vmem:[#allocation10 + $0x18] sm:$0xff] }
0x1132   :  { %v4150_v53 = vadd.f32 %v4149_v45, %v4148_v49  ;;  %v4232_v20 = vrot.slane %v4231_v50, 1  ;;  %v4599_v49 = vld [vmem:[#allocation10 + $0x98] sm:$0xff]  ;;  %v4598_v45 = vld [vmem:[#allocation10 + $0x90] sm:$0xff] }
0x1134   :  { %13026 = vmatmul.mubr.f32.vlgmr.msra.gmra.mxu1 %v4150_v53  ;;  %v4233_v32 = vadd.f32 %v4232_v20, %v4231_v50  ;;  %v4496_v50 = vld [vmem:[#allocation10 + $0x10] sm:$0xff]  ;;  %v4597_v53 = vld [vmem:[#allocation10 + $0x88] sm:$0xff] }
0x1135   :  { %13064 = vmatpush3.msra.mxu1 %v14116_v56  ;;  %13065 = vmatprep.mubr.msk.f32.mxu1 %vm14857_vm2, %v14856_v41  ;;  %v4495_v20 = vld [vmem:[#allocation10 + $0x8] sm:$0xff] }
0x1136   :  { %13061 = vmatmul.mubr.f32.vlgmr.msra.gmra.mxu0 %v4233_v32  ;;  %13068 = vmatprep.subr.mxu1 %v14856_v41  ;;  %v4596_v32 = vld [vmem:[#allocation10 + $0x80] sm:$0xff] }
0x1137   :  { %13112 = vmatpush3.msra.mxu0 %v4611_v28  ;;  %v4883_v28 = vld [vmem:[#allocation10 + $0x178] sm:$0xff] }
0x1138   :  { %13113 = vmatprep.subr.mxu0 %v4610_v51 }
0x1139   :  { %13114 = vmatpush3.msra.mxu0 %v4610_v51 }
0x113a   :  { %13115 = vmatprep.subr.mxu0 %v4609_v5 }
0x113b   :  { %13116 = vmatpush3.msra.mxu0 %v4609_v5 }
0x113c   :  { %13117 = vmatprep.subr.mxu0 %v4608_v8 }
0x113d   :  { %13118 = vmatpush3.msra.mxu0 %v4608_v8 }
0x113e   :  { %13119 = vmatprep.subr.mxu0 %v4607_v37 }
0x113f   :  { %13120 = vmatpush3.msra.mxu0 %v4607_v37 }
0x1140   :  { %13121 = vmatprep.subr.mxu0 %v4606_v6 }
0x1141   :  { %13122 = vmatpush3.msra.mxu0 %v4606_v6 }
0x1142   :  { %13123 = vmatprep.subr.mxu0 %v4605_v18 }
0x1143   :  { %13124 = vmatpush3.msra.mxu0 %v4605_v18 }
0x1144   :  { %13125 = vmatprep.subr.mxu0 %v4604_v40 }
0x1145   :  { %13126 = vmatpush3.msra.mxu0 %v4604_v40  ;;  %v4881_v40 = vld [vmem:[#allocation10 + $0x168] sm:$0xff] }
0x1146   :  { %13127 = vmatprep.subr.mxu0 %v4603_v47 }
0x1147   :  { %13128 = vmatpush3.msra.mxu0 %v4603_v47  ;;  %v4880_v47 = vld [vmem:[#allocation10 + $0x160] sm:$0xff] }
0x1148   :  { %13129 = vmatprep.subr.mxu0 %v4602_v19 }
0x1149   :  { %13130 = vmatpush3.msra.mxu0 %v4602_v19  ;;  %v4879_v19 = vld [vmem:[#allocation10 + $0x158] sm:$0xff] }
0x114a   :  { %13131 = vmatprep.subr.mxu0 %v4601_v0 }
0x114b   :  { %13132 = vmatpush3.msra.mxu0 %v4601_v0  ;;  %v4877_v0 = vld [vmem:[#allocation10 + $0x148] sm:$0xff] }
0x114c   :  { %13133 = vmatprep.subr.mxu0 %v4600_v39 }
0x114d   :  { %13134 = vmatpush3.msra.mxu0 %v4600_v39  ;;  %v4875_v39 = vld [vmem:[#allocation10 + $0x138] sm:$0xff] }
0x114e   :  { %13135 = vmatprep.subr.mxu0 %v4599_v49 }
0x114f   :  { %13136 = vmatpush3.msra.mxu0 %v4599_v49  ;;  %v4873_v49 = vld [vmem:[#allocation10 + $0x128] sm:$0xff] }
0x1150   :  { %13137 = vmatprep.subr.mxu0 %v4598_v45 }
0x1151   :  { %13138 = vmatpush3.msra.mxu0 %v4598_v45  ;;  %v4871_v45 = vld [vmem:[#allocation10 + $0x118] sm:$0xff] }
0x1152   :  { %13139 = vmatprep.subr.mxu0 %v4597_v53 }
0x1153   :  { %13140 = vmatpush3.msra.mxu0 %v4597_v53  ;;  %v4869_v53 = vld [vmem:[#allocation10 + $0x108] sm:$0xff] }
0x1154   :  { %13141 = vmatprep.subr.mxu0 %v4596_v32 }
0x1155   :  { %13142 = vmatpush3.msra.mxu0 %v4596_v32  ;;  %v14118_v32 = vld [vmem:[#allocation2 + $0x60] sm:$0xff] }
0x1156   :  { %13177 = vmatprep.subr.mxu0 %v4883_v28 }
0x11f4   :  { %v4217_v29 = vpop.f32.mrf.mxu1 }
0x11f5   :  { %v4304_v35 = vmul.f32 0.001953125, %v4217_v29 }
0x11f6   :  { %v13027_v58 = vpop.f32.mrf.mxu1  ;;  %v4300_v24 = vpop.f32.mrf.mxu0 }
0x11f7   :  { %v4306_v27 = vmul.f32 %v4304_v35, %v4304_v35  ;;  %v4305_v30 = vmul.f32 0.001953125, %v4300_v24  ;;  %13066 = vmatmul.mubr.msk.f32.vlgmr.msra.gmra.mxu1 %vm1697_vm3, %v4304_v35  ;;  %v4475_v24 = vrot.slane %v15819_v26, %v15413_v52 }
0x11f8   :  { %v13062_v34 = vpop.f32.mrf.mxu0  ;;  %13069 = vmatpush3.msra.mxu1 %v14116_v56  ;;  %13070 = vmatprep.mubr.msk.f32.mxu1 %vm14857_vm2, %v14856_v41  ;;  %v4494_v56 = vld [vmem:[#allocation10] sm:$0xff] }
0x11f9   :  { %v4307_v9 = vsub.f32 %v4305_v30, %v4306_v27  ;;  %13073 = vmatprep.subr.mxu1 %v4509_v33 }
0x11fb   :  { %v4308_v57 = vadd.f32 1e-05, %v4307_v9 }
0x11fd   :  { %14037 = vrsqrt.f32 %v4308_v57 }
0x120a   :  { %v14038_v46 = vpop.eup %14037 }
0x120b   :  { %13071 = vmatmul.mubr.msk.f32.vlgmr.msra.gmra.mxu1 %vm1697_vm3, %v14038_v46 }
0x120c   :  { %13074 = vmatpush3.msra.mxu1 %v4509_v33  ;;  %v4483_v33 = vrot.slane %v15819_v26, %v15417_v55 }
0x120d   :  { %13075 = vmatprep.subr.mxu1 %v4508_v38 }
0x120e   :  { %13076 = vmatpush3.msra.mxu1 %v4508_v38 }
0x120f   :  { %13077 = vmatprep.subr.mxu1 %v4507_v14 }
0x1210   :  { %13078 = vmatpush3.msra.mxu1 %v4507_v14 }
0x1211   :  { %13079 = vmatprep.subr.mxu1 %v4506_v44 }
0x1212   :  { %13080 = vmatpush3.msra.mxu1 %v4506_v44 }
0x1213   :  { %13081 = vmatprep.subr.mxu1 %v4505_v48 }
0x1214   :  { %13082 = vmatpush3.msra.mxu1 %v4505_v48 }
0x1215   :  { %13083 = vmatprep.subr.mxu1 %v4504_v25 }
0x1216   :  { %13084 = vmatpush3.msra.mxu1 %v4504_v25 }
0x1217   :  { %13085 = vmatprep.subr.mxu1 %v4503_v13 }
0x1218   :  { %13086 = vmatpush3.msra.mxu1 %v4503_v13  ;;  %v4882_v13 = vld [vmem:[#allocation10 + $0x170] sm:$0xff] }
0x1219   :  { %13087 = vmatprep.subr.mxu1 %v4502_v59 }
0x121a   :  { %13088 = vmatpush3.msra.mxu1 %v4502_v59 }
0x121b   :  { %13089 = vmatprep.subr.mxu1 %v4501_v61 }
0x121c   :  { %13090 = vmatpush3.msra.mxu1 %v4501_v61  ;;  %v14117_v61 = vld [vmem:[#allocation2 + $0x20] sm:$0xff] }
0x121d   :  { %13091 = vmatprep.subr.mxu1 %v4500_v62 }
0x121e   :  { %13092 = vmatpush3.msra.mxu1 %v4500_v62  ;;  %v4878_v62 = vld [vmem:[#allocation10 + $0x150] sm:$0xff] }
0x121f   :  { %13093 = vmatprep.subr.mxu1 %v4499_v1 }
0x1220   :  { %13094 = vmatpush3.msra.mxu1 %v4499_v1  ;;  %v4876_v1 = vld [vmem:[#allocation10 + $0x140] sm:$0xff] }
0x1221   :  { %13095 = vmatprep.subr.mxu1 %v4498_v42 }
0x1222   :  { %13096 = vmatpush3.msra.mxu1 %v4498_v42  ;;  %v4874_v42 = vld [vmem:[#allocation10 + $0x130] sm:$0xff] }
0x1223   :  { %13097 = vmatprep.subr.mxu1 %v4497_v63 }
0x1224   :  { %13098 = vmatpush3.msra.mxu1 %v4497_v63  ;;  %v4872_v63 = vld [vmem:[#allocation10 + $0x120] sm:$0xff] }
0x1225   :  { %13099 = vmatprep.subr.mxu1 %v4496_v50 }
0x1226   :  { %13100 = vmatpush3.msra.mxu1 %v4496_v50  ;;  %v4870_v50 = vld [vmem:[#allocation10 + $0x110] sm:$0xff] }
0x1227   :  { %13101 = vmatprep.subr.mxu1 %v4495_v20 }
0x1228   :  { %13102 = vmatpush3.msra.mxu1 %v4495_v20  ;;  %v4868_v20 = vld [vmem:[#allocation10 + $0x100] sm:$0xff] }
0x1229   :  { %13103 = vmatprep.subr.mxu1 %v4494_v56 }
0x122a   :  { %13104 = vmatpush3.msra.mxu1 %v4494_v56 }
0x12b7   :  { %v4379_v29 = vpop.f32.mrf.mxu1 }
0x12b8   :  { %v4459_v58 = vrot.slane %v4379_v29, %v15371_v22 }
0x12b9   :  { %v13067_v35 = vpop.f32.mrf.mxu1 }
0x12ba   :  { %v4460_v27 = vsub.f32 %v15832_v11, %v4459_v58  ;;  %v4461_v34 = vsub.f32 %v15830_v36, %v4459_v58  ;;  %v4462_v9 = vsub.f32 %v15843_v16, %v4459_v58  ;;  %v4463_v57 = vsub.f32 %v15841_v43, %v4459_v58 }
0x12cb   :  { %v4452_v30 = vpop.f32.mrf.mxu1 }
0x12cc   :  { %v4467_v46 = vrot.slane %v4452_v30, %v15371_v22  ;;  %v14119_v30 = vld [vmem:[#allocation2 + $0x28] sm:$0xff] }
0x12cd   :  { %v13072_v51 = vpop.f32.mrf.mxu1 }
0x12ce   :  { %v4468_v38 = vmul.f32 %v4467_v46, %v4460_v27  ;;  %v4469_v5 = vmul.f32 %v4467_v46, %v4461_v34  ;;  %v4470_v14 = vmul.f32 %v4467_v46, %v4462_v9  ;;  %v4471_v8 = vmul.f32 %v4467_v46, %v4463_v57  ;;  %v14120_v9 = vld [vmem:[#allocation2 + $0x30] sm:$0xff]  ;;  %v14121_v57 = vld [vmem:[#allocation2 + $0x38] sm:$0xff]  ;;  %v14122_v46 = vld [vmem:[#allocation2] sm:$0xff] }
0x12cf   :  { %v14124_v51 = vld [vmem:[#allocation2 + $0x10] sm:$0xff] }
0x12d0   :  { %v4476_v44 = vmul.f32 %v4475_v24, %v4468_v38  ;;  %v4477_v37 = vmul.f32 %v4475_v24, %v4469_v5  ;;  %v4478_v11 = vmul.f32 %v4475_v24, %v4470_v14  ;;  %v4479_v48 = vmul.f32 %v4475_v24, %v4471_v8  ;;  %v14125_v38 = vld [vmem:[#allocation2 + $0x18] sm:$0xff]  ;;  %v14126_v5 = vld [vmem:[#allocation2 + $0x40] sm:$0xff] }
0x12d2   :  { %v4484_v6 = vadd.f32 %v4483_v33, %v4476_v44  ;;  %v4485_v36 = vadd.f32 %v4483_v33, %v4477_v37  ;;  %v4486_v25 = vadd.f32 %v4483_v33, %v4478_v11  ;;  %v4487_v18 = vadd.f32 %v4483_v33, %v4479_v48  ;;  %v14123_v33 = vld [vmem:[#allocation2 + $0x8] sm:$0xff]  ;;  %v5074_v11 = vld [vmem:[#allocation10 + $0x1f8] sm:$0xff]  ;;  %v5073_v48 = vld [vmem:[#allocation10 + $0x1f0] sm:$0xff] }
0x12d4   :  { %v15868_v16 = vmax.f32 %v4484_v6, 0.0  ;;  %v15870_v43 = vmax.f32 %v4485_v36, 0.0  ;;  %v15874_v26 = vmax.f32 %v4486_v25, 0.0  ;;  %v15880_v59 = vmax.f32 %v4487_v18, 0.0  ;;  %v14127_v6 = vld [vmem:[#allocation2 + $0x48] sm:$0xff]  ;;  %v14128_v36 = vld [vmem:[#allocation2 + $0x50] sm:$0xff] }
0x12d5   :  { %v5072_v25 = vld [vmem:[#allocation10 + $0x1e8] sm:$0xff]  ;;  %v5071_v18 = vld [vmem:[#allocation10 + $0x1e0] sm:$0xff] }
0x12d6   :  { %13105 = vmatprep.mubr.f32.mxu1 %v15868_v16  ;;  %13143 = vmatprep.mubr.f32.mxu0 %v15868_v16 }
0x12d7   :  { %13106 = vmatmul.mubr.f32.vlgmr.msra.gmra.mxu1 %v15870_v43  ;;  %13144 = vmatmul.mubr.f32.vlgmr.msra.gmra.mxu0 %v15870_v43 }
0x12d8   :  { %13178 = vmatpush3.msra.mxu0 %v4883_v28  ;;  %13108 = vmatprep.mubr.f32.mxu1 %v15874_v26 }
0x12d9   :  { %13146 = vmatprep.mubr.f32.mxu0 %v15874_v26  ;;  %13179 = vmatprep.subr.mxu0 %v4882_v13 }
0x12da   :  { %13180 = vmatpush3.msra.mxu0 %v4882_v13  ;;  %v14129_v13 = vld [vmem:[#allocation2 + $0x58] sm:$0xff] }
0x12db   :  { %13181 = vmatprep.subr.mxu0 %v4881_v40  ;;  %13109 = vmatmul.mubr.f32.gmra.mxu1 %v15880_v59 }
0x12dc   :  { %13147 = vmatmul.mubr.f32.gmra.mxu0 %v15880_v59  ;;  %13157 = vmatprep.mubr.msk.f32.mxu1 %vm709_vm1, %v14117_v61  ;;  %v5068_v61 = vld [vmem:[#allocation10 + $0x1c8] sm:$0xff] }
0x12dd   :  { %13182 = vmatpush3.msra.mxu0 %v4881_v40  ;;  %13209 = vmatprep.mubr.f32.mxu0 %v15868_v16  ;;  %v5070_v40 = vld [vmem:[#allocation10 + $0x1d8] sm:$0xff] }
0x12de   :  { %13183 = vmatprep.subr.mxu0 %v4880_v47 }
0x12df   :  { %13184 = vmatpush3.msra.mxu0 %v4880_v47  ;;  %v5069_v47 = vld [vmem:[#allocation10 + $0x1d0] sm:$0xff] }
0x12e0   :  { %13185 = vmatprep.subr.mxu0 %v4879_v19 }
0x12e1   :  { %13186 = vmatpush3.msra.mxu0 %v4879_v19  ;;  %v5067_v19 = vld [vmem:[#allocation10 + $0x1c0] sm:$0xff] }
0x12e2   :  { %13187 = vmatprep.subr.mxu0 %v4878_v62 }
0x12e3   :  { %13188 = vmatpush3.msra.mxu0 %v4878_v62  ;;  %v5066_v62 = vld [vmem:[#allocation10 + $0x1b8] sm:$0xff] }
0x12e4   :  { %13189 = vmatprep.subr.mxu0 %v4877_v0 }
0x12e5   :  { %13190 = vmatpush3.msra.mxu0 %v4877_v0  ;;  %v5065_v0 = vld [vmem:[#allocation10 + $0x1b0] sm:$0xff] }
0x12e6   :  { %13191 = vmatprep.subr.mxu0 %v4876_v1 }
0x12e7   :  { %13192 = vmatpush3.msra.mxu0 %v4876_v1  ;;  %v5064_v1 = vld [vmem:[#allocation10 + $0x1a8] sm:$0xff] }
0x12e8   :  { %13193 = vmatprep.subr.mxu0 %v4875_v39 }
0x12e9   :  { %13194 = vmatpush3.msra.mxu0 %v4875_v39  ;;  %v5063_v39 = vld [vmem:[#allocation10 + $0x1a0] sm:$0xff] }
0x12ea   :  { %13195 = vmatprep.subr.mxu0 %v4874_v42 }
0x12eb   :  { %13196 = vmatpush3.msra.mxu0 %v4874_v42  ;;  %v5062_v42 = vld [vmem:[#allocation10 + $0x198] sm:$0xff] }
0x12ec   :  { %13197 = vmatprep.subr.mxu0 %v4873_v49 }
0x12ed   :  { %13198 = vmatpush3.msra.mxu0 %v4873_v49  ;;  %v5061_v49 = vld [vmem:[#allocation10 + $0x190] sm:$0xff] }
0x12ee   :  { %13199 = vmatprep.subr.mxu0 %v4872_v63 }
0x12ef   :  { %13200 = vmatpush3.msra.mxu0 %v4872_v63  ;;  %v5060_v63 = vld [vmem:[#allocation10 + $0x188] sm:$0xff] }
0x12f0   :  { %13201 = vmatprep.subr.mxu0 %v4871_v45 }
0x12f1   :  { %13202 = vmatpush3.msra.mxu0 %v4871_v45  ;;  %v5059_v45 = vld [vmem:[#allocation10 + $0x180] sm:$0xff] }
0x12f2   :  { %13203 = vmatprep.subr.mxu0 %v4870_v50 }
0x12f3   :  { %13204 = vmatpush3.msra.mxu0 %v4870_v50  ;;  %v14130_v50 = vld [vmem:[#allocation2 + $0x80] sm:$0xff] }
0x12f4   :  { %13205 = vmatprep.subr.mxu0 %v4869_v53 }
0x12f5   :  { %13206 = vmatpush3.msra.mxu0 %v4869_v53 }
0x12f6   :  { %13207 = vmatprep.subr.mxu0 %v4868_v20 }
0x12f7   :  { %13208 = vmatpush3.msra.mxu0 %v4868_v20 }
0x12f8   :  { %13210 = vmatmul.mubr.f32.vlgmr.msra.gmra.mxu0 %v15870_v43 }
0x12f9   :  { %13212 = vmatprep.mubr.f32.mxu0 %v15874_v26 }
0x12fc   :  { %13213 = vmatmul.mubr.f32.gmra.mxu0 %v15880_v59 }
0x12fd   :  { %13275 = vmatprep.mubr.msk.f32.mxu0 %vm709_vm1, %v14118_v32 }
0x1397   :  { %v13145_v56 = vpop.f32.mrf.mxu0  ;;  %v13107_v29 = vpop.f32.mrf.mxu1 }
0x1399   :  { %v4678_v28 = vpop.f32.mrf.mxu0  ;;  %v4576_v58 = vpop.f32.mrf.mxu1 }
0x139b   :  { %v13110_v27 = vpop.f32.mrf.mxu1 }
0x139c   :  { %v13148_v35 = vpop.f32.mrf.mxu0 }
0x139d   :  { %13149 = vmatprep.subr.mxu1 %v13148_v35  ;;  %v4586_v34 = vpop.f32.mrf.mxu1 }
0x139e   :  { %v4688_v24 = vpop.f32.mrf.mxu0  ;;  %13150 = vmatpush3.msra.mxu1 %v13148_v35 }
0x139f   :  { %13151 = vmatprep.subr.mxu1 %v4688_v24 }
0x13a0   :  { %13152 = vmatpush3.msra.mxu1 %v4688_v24 }
0x13a1   :  { %13153 = vmatprep.subr.mxu1 %v13145_v56 }
0x13a2   :  { %13154 = vmatpush3.msra.mxu1 %v13145_v56 }
0x13a3   :  { %13155 = vmatprep.subr.mxu1 %v4678_v28 }
0x13a4   :  { %13156 = vmatpush3.msra.mxu1 %v4678_v28 }
0x13a5   :  { %13163 = vmatprep.subr.mxu1 %v13110_v27  ;;  %13158 = vmatmul.mubr.msk.f32.vlgmr.msra.gmra.mxu1 %vm709_vm1, %v14119_v30 }
0x13a6   :  { %13164 = vmatpush3.msra.mxu1 %v13110_v27  ;;  %13160 = vmatprep.mubr.msk.f32.mxu1 %vm709_vm1, %v14120_v9 }
0x13a7   :  { %13165 = vmatprep.subr.mxu1 %v4586_v34 }
0x13a8   :  { %13166 = vmatpush3.msra.mxu1 %v4586_v34 }
0x13a9   :  { %13167 = vmatprep.subr.mxu1 %v13107_v29  ;;  %13161 = vmatmul.mubr.msk.f32.gmra.mxu1 %vm709_vm1, %v14121_v57 }
0x13aa   :  { %13168 = vmatpush3.msra.mxu1 %v13107_v29  ;;  %13171 = vmatprep.mubr.msk.f32.mxu1 %vm709_vm1, %v14122_v46 }
0x13ab   :  { %13169 = vmatprep.subr.mxu1 %v4576_v58 }
0x13ac   :  { %13170 = vmatpush3.msra.mxu1 %v4576_v58 }
0x13ad   :  { %13172 = vmatmul.mubr.msk.f32.vlgmr.msra.gmra.mxu1 %vm709_vm1, %v14123_v33 }
0x13ae   :  { %13174 = vmatprep.mubr.msk.f32.mxu1 %vm709_vm1, %v14124_v51 }
0x13b1   :  { %13175 = vmatmul.mubr.msk.f32.gmra.mxu1 %vm709_vm1, %v14125_v38 }
0x13b2   :  { %13223 = vmatprep.mubr.msk.f32.mxu1 %vm709_vm1, %v14126_v5 }
0x13b8   :  { %v13211_v14 = vpop.f32.mrf.mxu0 }
0x13ba   :  { %v4950_v8 = vpop.f32.mrf.mxu0 }
0x13bc   :  { %v13214_v44 = vpop.f32.mrf.mxu0 }
0x13bd   :  { %13215 = vmatprep.subr.mxu1 %v13214_v44 }
0x13be   :  { %v4960_v37 = vpop.f32.mrf.mxu0  ;;  %13216 = vmatpush3.msra.mxu1 %v13214_v44  ;;  %v5264_v44 = vld [vmem:[#allocation10 + $0x270] sm:$0xff] }
0x13bf   :  { %13217 = vmatprep.subr.mxu1 %v4960_v37 }
0x13c0   :  { %13218 = vmatpush3.msra.mxu1 %v4960_v37  ;;  %v14131_v37 = vld [vmem:[#allocation2 + $0x68] sm:$0xff] }
0x13c1   :  { %13219 = vmatprep.subr.mxu1 %v13211_v14 }
0x13c2   :  { %13220 = vmatpush3.msra.mxu1 %v13211_v14 }
0x13c3   :  { %13221 = vmatprep.subr.mxu1 %v4950_v8 }
0x13c4   :  { %13222 = vmatpush3.msra.mxu1 %v4950_v8  ;;  %v5265_v8 = vld [vmem:[#allocation10 + $0x278] sm:$0xff] }
0x13c5   :  { %13224 = vmatmul.mubr.msk.f32.vlgmr.msra.gmra.mxu1 %vm709_vm1, %v14127_v6  ;;  %13229 = vmatprep.subr.mxu1 %v5074_v11  ;;  %v5262_v6 = vld [vmem:[#allocation10 + $0x260] sm:$0xff] }
0x13c6   :  { %13230 = vmatpush3.msra.mxu1 %v5074_v11  ;;  %13226 = vmatprep.mubr.msk.f32.mxu1 %vm709_vm1, %v14128_v36  ;;  %v14132_v11 = vld [vmem:[#allocation2 + $0x70] sm:$0xff]  ;;  %v14133_v36 = vld [vmem:[#allocation2 + $0x78] sm:$0xff] }
0x13c7   :  { %13231 = vmatprep.subr.mxu1 %v5073_v48 }
0x13c8   :  { %13232 = vmatpush3.msra.mxu1 %v5073_v48  ;;  %v5263_v48 = vld [vmem:[#allocation10 + $0x268] sm:$0xff] }
0x13c9   :  { %13227 = vmatmul.mubr.msk.f32.gmra.mxu1 %vm709_vm1, %v14129_v13  ;;  %13233 = vmatprep.subr.mxu1 %v5072_v25  ;;  %v5259_v13 = vld [vmem:[#allocation10 + $0x248] sm:$0xff] }
0x13ca   :  { %13234 = vmatpush3.msra.mxu1 %v5072_v25  ;;  %13261 = vmatprep.mubr.f32.mxu1 %v15868_v16  ;;  %v5261_v25 = vld [vmem:[#allocation10 + $0x258] sm:$0xff] }
0x13cb   :  { %13235 = vmatprep.subr.mxu1 %v5071_v18 }
0x13cc   :  { %13236 = vmatpush3.msra.mxu1 %v5071_v18  ;;  %v5260_v18 = vld [vmem:[#allocation10 + $0x250] sm:$0xff] }
0x13cd   :  { %13237 = vmatprep.subr.mxu1 %v5070_v40 }
0x13ce   :  { %13238 = vmatpush3.msra.mxu1 %v5070_v40  ;;  %v5258_v40 = vld [vmem:[#allocation10 + $0x240] sm:$0xff] }
0x13cf   :  { %13239 = vmatprep.subr.mxu1 %v5069_v47 }
0x13d0   :  { %13240 = vmatpush3.msra.mxu1 %v5069_v47  ;;  %v5257_v47 = vld [vmem:[#allocation10 + $0x238] sm:$0xff] }
0x13d1   :  { %13241 = vmatprep.subr.mxu1 %v5068_v61 }
0x13d2   :  { %13242 = vmatpush3.msra.mxu1 %v5068_v61  ;;  %v5256_v61 = vld [vmem:[#allocation10 + $0x230] sm:$0xff] }
0x13d3   :  { %13243 = vmatprep.subr.mxu1 %v5067_v19 }
0x13d4   :  { %13244 = vmatpush3.msra.mxu1 %v5067_v19  ;;  %v5255_v19 = vld [vmem:[#allocation10 + $0x228] sm:$0xff] }
0x13d5   :  { %13245 = vmatprep.subr.mxu1 %v5066_v62 }
0x13d6   :  { %13246 = vmatpush3.msra.mxu1 %v5066_v62  ;;  %v5253_v62 = vld [vmem:[#allocation10 + $0x218] sm:$0xff] }
0x13d7   :  { %13247 = vmatprep.subr.mxu1 %v5065_v0 }
0x13d8   :  { %13248 = vmatpush3.msra.mxu1 %v5065_v0  ;;  %v5252_v0 = vld [vmem:[#allocation10 + $0x210] sm:$0xff] }
0x13d9   :  { %13249 = vmatprep.subr.mxu1 %v5064_v1 }
0x13da   :  { %13250 = vmatpush3.msra.mxu1 %v5064_v1  ;;  %v5251_v1 = vld [vmem:[#allocation10 + $0x208] sm:$0xff] }
0x13db   :  { %13251 = vmatprep.subr.mxu1 %v5063_v39 }
0x13dc   :  { %13252 = vmatpush3.msra.mxu1 %v5063_v39  ;;  %v5250_v39 = vld [vmem:[#allocation10 + $0x200] sm:$0xff] }
0x13dd   :  { %13253 = vmatprep.subr.mxu1 %v5062_v42 }
0x13de   :  { %13254 = vmatpush3.msra.mxu1 %v5062_v42  ;;  %v14134_v42 = vld [vmem:[#allocation13 + $0x78] sm:$0xff] }
0x13df   :  { %13255 = vmatprep.subr.mxu1 %v5061_v49 }
0x13e0   :  { %13256 = vmatpush3.msra.mxu1 %v5061_v49  ;;  %v14135_v49 = vld [vmem:[#allocation13 + $0x70] sm:$0xff] }
0x13e1   :  { %13257 = vmatprep.subr.mxu1 %v5060_v63 }
0x13e2   :  { %13258 = vmatpush3.msra.mxu1 %v5060_v63  ;;  %v14136_v63 = vld [vmem:[#allocation13 + $0x68] sm:$0xff] }
0x13e3   :  { %13259 = vmatprep.subr.mxu1 %v5059_v45 }
0x13e4   :  { %13260 = vmatpush3.msra.mxu1 %v5059_v45  ;;  %v14142_v45 = vld [vmem:[#allocation13 + $0x50] sm:$0xff] }
0x13e5   :  { %13262 = vmatmul.mubr.f32.vlgmr.msra.gmra.mxu1 %v15870_v43 }
0x13e6   :  { %13264 = vmatprep.mubr.f32.mxu1 %v15874_v26 }
0x13e9   :  { %13265 = vmatmul.mubr.f32.gmra.mxu1 %v15880_v59 }
0x13ea   :  { %13327 = vmatprep.mubr.msk.f32.mxu1 %vm709_vm1, %v14130_v50  ;;  %v14143_v50 = vld [vmem:[#allocation13 + $0x48] sm:$0xff] }
0x1465   :  { %v13159_v53 = vpop.f32.mrf.mxu1 }
0x1467   :  { %v15906_v20 = vpop.f32.mrf.mxu1 }
0x1469   :  { %v13162_v32 = vpop.f32.mrf.mxu1 }
0x146b   :  { %v15908_v56 = vpop.f32.mrf.mxu1 }
0x146d   :  { %v13173_v28 = vpop.f32.mrf.mxu1 }
0x146e   :  { %v4854_v29 = vadd.f32 %v13173_v28, %v13159_v53  ;;  %v14144_v53 = vld [vmem:[#allocation13 + $0x40] sm:$0xff]  ;;  %v14146_v28 = vld [vmem:[#allocation13 + $0x30] sm:$0xff] }
0x146f   :  { %v15910_v35 = vpop.f32.mrf.mxu1 }
0x1471   :  { %v13176_v58 = vpop.f32.mrf.mxu1 }
0x1472   :  { %v4864_v24 = vadd.f32 %v13176_v58, %v13162_v32  ;;  %v14145_v32 = vld [vmem:[#allocation13 + $0x38] sm:$0xff]  ;;  %v14148_v58 = vld [vmem:[#allocation13 + $0x20] sm:$0xff] }
0x1473   :  { %v15912_v27 = vpop.f32.mrf.mxu1 }
0x1485   :  { %v13225_v30 = vpop.f32.mrf.mxu1 }
0x1486   :  { %v15914_v34 = vadd.f32 %v13225_v30, %v4854_v29  ;;  %v14147_v29 = vld [vmem:[#allocation13 + $0x28] sm:$0xff]  ;;  %v14150_v30 = vld [vmem:[#allocation13 + $0x10] sm:$0xff] }
0x1487   :  { %v15916_v9 = vpop.f32.mrf.mxu1 }
0x1489   :  { %v13228_v57 = vpop.f32.mrf.mxu1 }
0x148a   :  { %v15918_v46 = vadd.f32 %v13228_v57, %v4864_v24  ;;  %v14149_v24 = vld [vmem:[#allocation13 + $0x18] sm:$0xff]  ;;  %v14152_v57 = vld [vmem:[#allocation13] sm:$0xff] }
0x148b   :  { %v15920_v33 = vpop.f32.mrf.mxu1 }
0x14a5   :  { %v13263_v51 = vpop.f32.mrf.mxu1 }
0x14a7   :  { %v5141_v38 = vpop.f32.mrf.mxu1 }
0x14a9   :  { %v13266_v5 = vpop.f32.mrf.mxu1 }
0x14aa   :  { %13267 = vmatprep.subr.mxu0 %v13266_v5 }
0x14ab   :  { %v5151_v14 = vpop.f32.mrf.mxu1  ;;  %13268 = vmatpush3.msra.mxu0 %v13266_v5 }
0x14ac   :  { %13269 = vmatprep.subr.mxu0 %v5151_v14 }
0x14ad   :  { %13270 = vmatpush3.msra.mxu0 %v5151_v14  ;;  %v4859_v14 = vadd.f32 %v15912_v27, %v15908_v56 }
0x14ae   :  { %13271 = vmatprep.subr.mxu0 %v13263_v51 }
0x14af   :  { %13272 = vmatpush3.msra.mxu0 %v13263_v51  ;;  %v16002_v51 = vld [vmem:[#allocation11 + $0xc] sm:$0x7] }
0x14b0   :  { %13273 = vmatprep.subr.mxu0 %v5141_v38 }
0x14b1   :  { %13274 = vmatpush3.msra.mxu0 %v5141_v38 }
0x14b2   :  { %13276 = vmatmul.mubr.msk.f32.vlgmr.msra.gmra.mxu0 %vm709_vm1, %v14131_v37  ;;  %13281 = vmatprep.subr.mxu0 %v5265_v8  ;;  %v5443_v37 = vrot.slane %v16002_v51, %v15371_v22 }
0x14b3   :  { %13282 = vmatpush3.msra.mxu0 %v5265_v8  ;;  %13278 = vmatprep.mubr.msk.f32.mxu0 %vm709_vm1, %v14132_v11 }
0x14b4   :  { %13283 = vmatprep.subr.mxu0 %v5264_v44 }
0x14b5   :  { %13284 = vmatpush3.msra.mxu0 %v5264_v44 }
0x14b6   :  { %13279 = vmatmul.mubr.msk.f32.gmra.mxu0 %vm709_vm1, %v14133_v36  ;;  %13285 = vmatprep.subr.mxu0 %v5263_v48 }
0x14b7   :  { %13286 = vmatpush3.msra.mxu0 %v5263_v48  ;;  %13313 = vmatprep.mubr.f32.mxu0 %v15868_v16  ;;  %v5254_v16 = vld [vmem:[#allocation10 + $0x220] sm:$0xff]  ;;  %v5056_v48 = vadd.f32 %v15920_v33, %v4859_v14  ;;  %v5912_v14 = vld [vmem:[#allocation16 + $0xe0] sm:$0xff] }
0x14b8   :  { %13287 = vmatprep.subr.mxu0 %v5262_v6 }
0x14b9   :  { %13288 = vmatpush3.msra.mxu0 %v5262_v6 }
0x14ba   :  { %13289 = vmatprep.subr.mxu0 %v5261_v25 }
0x14bb   :  { %13290 = vmatpush3.msra.mxu0 %v5261_v25 }
0x14bc   :  { %13291 = vmatprep.subr.mxu0 %v5260_v18 }
0x14bd   :  { %13292 = vmatpush3.msra.mxu0 %v5260_v18 }
0x14be   :  { %13293 = vmatprep.subr.mxu0 %v5259_v13 }
0x14bf   :  { %13294 = vmatpush3.msra.mxu0 %v5259_v13 }
0x14c0   :  { %13295 = vmatprep.subr.mxu0 %v5258_v40 }
0x14c1   :  { %13296 = vmatpush3.msra.mxu0 %v5258_v40 }
0x14c2   :  { %13297 = vmatprep.subr.mxu0 %v5257_v47 }
0x14c3   :  { %13298 = vmatpush3.msra.mxu0 %v5257_v47 }
0x14c4   :  { %13299 = vmatprep.subr.mxu0 %v5256_v61 }
0x14c5   :  { %13300 = vmatpush3.msra.mxu0 %v5256_v61 }
0x14c6   :  { %13301 = vmatprep.subr.mxu0 %v5255_v19 }
0x14c7   :  { %13302 = vmatpush3.msra.mxu0 %v5255_v19 }
0x14c8   :  { %13303 = vmatprep.subr.mxu0 %v5254_v16 }
0x14c9   :  { %13304 = vmatpush3.msra.mxu0 %v5254_v16 }
0x14ca   :  { %13305 = vmatprep.subr.mxu0 %v5253_v62 }
0x14cb   :  { %13306 = vmatpush3.msra.mxu0 %v5253_v62 }
0x14cc   :  { %13307 = vmatprep.subr.mxu0 %v5252_v0 }
0x14cd   :  { %13308 = vmatpush3.msra.mxu0 %v5252_v0 }
0x14ce   :  { %13309 = vmatprep.subr.mxu0 %v5251_v1 }
0x14cf   :  { %13310 = vmatpush3.msra.mxu0 %v5251_v1 }
0x14d0   :  { %13311 = vmatprep.subr.mxu0 %v5250_v39 }
0x14d1   :  { %13312 = vmatpush3.msra.mxu0 %v5250_v39 }
0x14d2   :  { %13314 = vmatmul.mubr.f32.vlgmr.msra.gmra.mxu0 %v15870_v43  ;;  %13368 = vmatprep.subr.mxu0 %v14856_v41  ;;  %v14137_v43 = vld [vmem:[#allocation13 + $0x60] sm:$0xff] }
0x14d3   :  { %13316 = vmatprep.mubr.f32.mxu0 %v15874_v26  ;;  %13369 = vmatpush3.msra.mxu0 %v14134_v42  ;;  %v15979_v26 = vld [vmem:[#allocation2 + $0x98] sm:$0xff] }
0x14d4   :  { %13370 = vmatprep.subr.mxu0 %v14856_v41 }
0x14d5   :  { %13371 = vmatpush3.msra.mxu0 %v14135_v49 }
0x14d6   :  { %13317 = vmatmul.mubr.f32.gmra.mxu0 %v15880_v59  ;;  %13372 = vmatprep.subr.mxu0 %v14856_v41  ;;  %v14141_v59 = vld [vmem:[#allocation13 + $0x58] sm:$0xff] }
0x14d7   :  { %13373 = vmatpush3.msra.mxu0 %v14136_v63  ;;  %13400 = vmatprep.mubr.msk.f32.mxu0 %vm14857_vm2, %v14856_v41 }
0x14d8   :  { %13374 = vmatprep.subr.mxu0 %v14856_v41 }
0x14d9   :  { %13375 = vmatpush3.msra.mxu0 %v14137_v43 }
0x14da   :  { %13376 = vmatprep.subr.mxu0 %v14856_v41 }
0x14db   :  { %13377 = vmatpush3.msra.mxu0 %v15769_v54 }
0x14dc   :  { %13378 = vmatprep.subr.mxu0 %v14856_v41 }
0x14dd   :  { %13379 = vmatpush3.msra.mxu0 %v15773_v2 }
0x14de   :  { %13380 = vmatprep.subr.mxu0 %v14856_v41 }
0x14df   :  { %13381 = vmatpush3.msra.mxu0 %v15777_v3 }
0x14e0   :  { %13382 = vmatprep.subr.mxu0 %v14856_v41 }
0x14e1   :  { %13383 = vmatpush3.msra.mxu0 %v15781_v4 }
0x14e2   :  { %13384 = vmatprep.subr.mxu0 %v14856_v41 }
0x14e3   :  { %13385 = vmatpush3.msra.mxu0 %v15785_v7 }
0x14e4   :  { %13386 = vmatprep.subr.mxu0 %v14856_v41 }
0x14e5   :  { %13387 = vmatpush3.msra.mxu0 %v15789_v10 }
0x14e6   :  { %13388 = vmatprep.subr.mxu0 %v14856_v41 }
0x14e7   :  { %13389 = vmatpush3.msra.mxu0 %v15793_v12 }
0x14e8   :  { %13390 = vmatprep.subr.mxu0 %v14856_v41 }
0x14e9   :  { %13391 = vmatpush3.msra.mxu0 %v15797_v23 }
0x14ea   :  { %13392 = vmatprep.subr.mxu0 %v14856_v41 }
0x14eb   :  { %13393 = vmatpush3.msra.mxu0 %v15801_v31 }
0x14ec   :  { %13394 = vmatprep.subr.mxu0 %v14856_v41 }
0x14ed   :  { %13395 = vmatpush3.msra.mxu0 %v15805_v60 }
0x14ee   :  { %13396 = vmatprep.subr.mxu0 %v14856_v41 }
0x14ef   :  { %13397 = vmatpush3.msra.mxu0 %v15809_v15  ;;  %v15969_v15 = vld [vmem:[#allocation2 + $0x88] sm:$0xff] }
0x14f0   :  { %13398 = vmatprep.subr.mxu0 %v14856_v41 }
0x14f1   :  { %13399 = vmatpush3.msra.mxu0 %v15813_v21  ;;  %v15974_v21 = vld [vmem:[#allocation2 + $0x90] sm:$0xff] }
0x1572   :  { %v13277_v54 = vpop.f32.mrf.mxu0 }
0x1573   :  { %v15960_v2 = vadd.f32 %v13277_v54, %v15914_v34  ;;  %v14151_v34 = vld [vmem:[#allocation13 + $0x8] sm:$0xff] }
0x1574   :  { %v15962_v3 = vpop.f32.mrf.mxu0 }
0x1576   :  { %v13280_v4 = vpop.f32.mrf.mxu0 }
0x1577   :  { %v15965_v7 = vadd.f32 %v13280_v4, %v15918_v46  ;;  %v4849_v46 = vadd.f32 %v15910_v35, %v15906_v20 }
0x1578   :  { %v15967_v10 = vpop.f32.mrf.mxu0 }
0x1579   :  { %v5054_v38 = vadd.f32 %v15916_v9, %v4849_v46  ;;  %v5247_v35 = vadd.f32 %v15967_v10, %v5056_v48  ;;  %v5812_v46 = vld [vmem:[#allocation16 + $0x70] sm:$0xff] }
0x157a   :  { %v5808_v48 = vld [vmem:[#allocation16 + $0x50] sm:$0xff] }
0x157b   :  { %v5245_v8 = vadd.f32 %v15962_v3, %v5054_v38  ;;  %v5913_v38 = vld [vmem:[#allocation16 + $0xe8] sm:$0xff] }
0x1592   :  { %v13315_v12 = vpop.f32.mrf.mxu0 }
0x1594   :  { %v5332_v23 = vpop.f32.mrf.mxu0 }
0x1596   :  { %v13318_v31 = vpop.f32.mrf.mxu0 }
0x1597   :  { %13319 = vmatprep.subr.mxu1 %v13318_v31 }
0x1598   :  { %v5342_v60 = vpop.f32.mrf.mxu0  ;;  %13320 = vmatpush3.msra.mxu1 %v13318_v31  ;;  %v14153_v31 = vld [vmem:[#allocation14] sm:$0xff] }
0x1599   :  { %13321 = vmatprep.subr.mxu1 %v5342_v60 }
0x159a   :  { %13322 = vmatpush3.msra.mxu1 %v5342_v60  ;;  %v5915_v60 = vld [vmem:[#allocation16 + $0xf8] sm:$0xff] }
0x159b   :  { %13323 = vmatprep.subr.mxu1 %v13315_v12  ;;  %13451 = vmatprep.subr.mxu0 %v5915_v60 }
0x159c   :  { %13324 = vmatpush3.msra.mxu1 %v13315_v12 }
0x159d   :  { %13325 = vmatprep.subr.mxu1 %v5332_v23 }
0x159e   :  { %13326 = vmatpush3.msra.mxu1 %v5332_v23 }
0x159f   :  { %13328 = vmatmul.mubr.msk.f32.vlgmr.msra.gmra.mxu1 %vm709_vm1, %v15969_v15  ;;  %13333 = vmatprep.subr.mxu1 %v14856_v41 }
0x15a0   :  { %13330 = vmatprep.mubr.msk.f32.mxu1 %vm709_vm1, %v15974_v21  ;;  %13334 = vmatpush3.msra.mxu1 %v14134_v42 }
0x15a1   :  { %13335 = vmatprep.subr.mxu1 %v14856_v41 }
0x15a2   :  { %13336 = vmatpush3.msra.mxu1 %v14135_v49 }
0x15a3   :  { %13331 = vmatmul.mubr.msk.f32.gmra.mxu1 %vm709_vm1, %v15979_v26  ;;  %13337 = vmatprep.subr.mxu1 %v14856_v41 }
0x15a4   :  { %13338 = vmatpush3.msra.mxu1 %v14136_v63  ;;  %13365 = vmatprep.mubr.msk.f32.mxu1 %vm14857_vm2, %v14856_v41 }
0x15a5   :  { %13339 = vmatprep.subr.mxu1 %v14856_v41 }
0x15a6   :  { %13340 = vmatpush3.msra.mxu1 %v14137_v43 }
0x15a7   :  { %13341 = vmatprep.subr.mxu1 %v14856_v41 }
0x15a8   :  { %13342 = vmatpush3.msra.mxu1 %v14141_v59 }
0x15a9   :  { %13343 = vmatprep.subr.mxu1 %v14856_v41 }
0x15aa   :  { %13344 = vmatpush3.msra.mxu1 %v14142_v45 }
0x15ab   :  { %13345 = vmatprep.subr.mxu1 %v14856_v41 }
0x15ac   :  { %13346 = vmatpush3.msra.mxu1 %v14143_v50 }
0x15ad   :  { %13347 = vmatprep.subr.mxu1 %v14856_v41 }
0x15ae   :  { %13348 = vmatpush3.msra.mxu1 %v14144_v53 }
0x15af   :  { %13349 = vmatprep.subr.mxu1 %v14856_v41 }
0x15b0   :  { %13350 = vmatpush3.msra.mxu1 %v14145_v32 }
0x15b1   :  { %13351 = vmatprep.subr.mxu1 %v14856_v41 }
0x15b2   :  { %13352 = vmatpush3.msra.mxu1 %v14146_v28 }
0x15b3   :  { %13353 = vmatprep.subr.mxu1 %v14856_v41 }
0x15b4   :  { %13354 = vmatpush3.msra.mxu1 %v14147_v29 }
0x15b5   :  { %13355 = vmatprep.subr.mxu1 %v14856_v41 }
0x15b6   :  { %13356 = vmatpush3.msra.mxu1 %v14148_v58 }
0x15b7   :  { %13357 = vmatprep.subr.mxu1 %v14856_v41 }
0x15b8   :  { %13358 = vmatpush3.msra.mxu1 %v14149_v24 }
0x15b9   :  { %13359 = vmatprep.subr.mxu1 %v14856_v41 }
0x15ba   :  { %13360 = vmatpush3.msra.mxu1 %v14150_v30 }
0x15bb   :  { %13361 = vmatprep.subr.mxu1 %v14856_v41 }
0x15bc   :  { %13362 = vmatpush3.msra.mxu1 %v14151_v34  ;;  %v5813_v34 = vld [vmem:[#allocation16 + $0x78] sm:$0xff] }
0x15bd   :  { %13363 = vmatprep.subr.mxu1 %v14856_v41 }
0x15be   :  { %13364 = vmatpush3.msra.mxu1 %v14152_v57  ;;  %v5914_v57 = vld [vmem:[#allocation16 + $0xf0] sm:$0xff] }
0x15bf   :  { %13403 = vmatprep.subr.mxu1 %v14856_v41 }
0x165f   :  { %v13329_v5 = vpop.f32.mrf.mxu1 }
0x1660   :  { %v5437_v44 = vadd.f32 %v13329_v5, %v15960_v2  ;;  %v5811_v5 = vld [vmem:[#allocation16 + $0x68] sm:$0xff] }
0x1661   :  { %v5417_v11 = vpop.f32.mrf.mxu1 }
0x1662   :  { %v5436_v6 = vadd.f32 %v5417_v11, %v5245_v8  ;;  %v16013_v36 = vadd.f32 %v5443_v37, %v5437_v44  ;;  %v5810_v8 = vld [vmem:[#allocation16 + $0x60] sm:$0xff]  ;;  %v5911_v44 = vld [vmem:[#allocation16 + $0xd8] sm:$0xff]  ;;  %v5910_v11 = vld [vmem:[#allocation16 + $0xd0] sm:$0xff] }
0x1663   :  { %v13332_v20 = vpop.f32.mrf.mxu1 }
0x1664   :  { %v16015_v9 = vadd.f32 %v5443_v37, %v5436_v6  ;;  %v5439_v56 = vadd.f32 %v13332_v20, %v15965_v7  ;;  %v5528_v13 = vmul.f32 %v16013_v36, %v16013_v36  ;;  %v5909_v6 = vld [vmem:[#allocation16 + $0xc8] sm:$0xff] }
0x1665   :  { %v5427_v27 = vpop.f32.mrf.mxu1  ;;  %v5807_v20 = vld [vmem:[#allocation16 + $0x48] sm:$0xff] }
0x1666   :  { %v5527_v25 = vmul.f32 %v16015_v9, %v16015_v9  ;;  %v5438_v18 = vadd.f32 %v5427_v27, %v5247_v35  ;;  %v5448_v33 = vadd.f32 %v16013_v36, %v16015_v9  ;;  %v16024_v40 = vadd.f32 %v5443_v37, %v5439_v56  ;;  %v5908_v35 = vld [vmem:[#allocation16 + $0xc0] sm:$0xff]  ;;  %v5907_v27 = vld [vmem:[#allocation16 + $0xb8] sm:$0xff] }
0x1667   :  { %v5806_v56 = vld [vmem:[#allocation16 + $0x40] sm:$0xff] }
0x1668   :  { %v16026_v47 = vadd.f32 %v5443_v37, %v5438_v18  ;;  %v5531_v61 = vadd.f32 %v5528_v13, %v5527_v25  ;;  %v5530_v62 = vmul.f32 %v16024_v40, %v16024_v40  ;;  %v5809_v37 = vld [vmem:[#allocation16 + $0x58] sm:$0xff]  ;;  %v5906_v18 = vld [vmem:[#allocation16 + $0xb0] sm:$0xff] }
0x1669   :  { %v5805_v25 = vld [vmem:[#allocation16 + $0x38] sm:$0xff]  ;;  %v5804_v13 = vld [vmem:[#allocation16 + $0x30] sm:$0xff] }
0x166a   :  { %v5449_v19 = vadd.f32 %v5448_v33, %v16026_v47  ;;  %v5529_v16 = vmul.f32 %v16026_v47, %v16026_v47  ;;  %v5905_v33 = vld [vmem:[#allocation16 + $0xa8] sm:$0xff] }
0x166c   :  { %v5450_v0 = vadd.f32 %v5449_v19, %v16024_v40  ;;  %v5532_v1 = vadd.f32 %v5531_v61, %v5529_v16  ;;  %v5803_v61 = vld [vmem:[#allocation16 + $0x28] sm:$0xff]  ;;  %v5904_v19 = vld [vmem:[#allocation16 + $0xa0] sm:$0xff] }
0x166d   :  { %v5802_v16 = vld [vmem:[#allocation16 + $0x20] sm:$0xff] }
0x166e   :  { %v5451_v39 = vrot.slane %v5450_v0, 4  ;;  %v5533_v42 = vadd.f32 %v5532_v1, %v5530_v62  ;;  %v5903_v62 = vld [vmem:[#allocation16 + $0x98] sm:$0xff]  ;;  %v5902_v1 = vld [vmem:[#allocation16 + $0x90] sm:$0xff] }
0x1670   :  { %v5452_v49 = vadd.f32 %v5451_v39, %v5450_v0  ;;  %v5534_v63 = vrot.slane %v5533_v42, 4  ;;  %v5801_v0 = vld [vmem:[#allocation16 + $0x18] sm:$0xff]  ;;  %v5800_v39 = vld [vmem:[#allocation16 + $0x10] sm:$0xff] }
0x1672   :  { %v5453_v43 = vrot.slane %v5452_v49, 2  ;;  %v5535_v54 = vadd.f32 %v5534_v63, %v5533_v42  ;;  %v5901_v42 = vld [vmem:[#allocation16 + $0x88] sm:$0xff]  ;;  %v5900_v63 = vld [vmem:[#allocation16 + $0x80] sm:$0xff] }
0x1674   :  { %v5454_v2 = vadd.f32 %v5453_v43, %v5452_v49  ;;  %v5536_v3 = vrot.slane %v5535_v54, 2  ;;  %v5799_v49 = vld [vmem:[#allocation16 + $0x8] sm:$0xff]  ;;  %v5798_v43 = vld [vmem:[#allocation16] sm:$0xff] }
0x1676   :  { %v5455_v4 = vrot.slane %v5454_v2, 1  ;;  %v5537_v7 = vadd.f32 %v5536_v3, %v5535_v54  ;;  %v6187_v54 = vld [vmem:[#allocation16 + $0x178] sm:$0xff] }
0x1678   :  { %v5456_v10 = vadd.f32 %v5455_v4, %v5454_v2  ;;  %v5538_v12 = vrot.slane %v5537_v7, 1 }
0x167a   :  { %13366 = vmatmul.mubr.f32.vlgmr.msra.gmra.mxu1 %v5456_v10  ;;  %v5539_v23 = vadd.f32 %v5538_v12, %v5537_v7  ;;  %v5781_v7 = vrot.slane %v16002_v51, %v15413_v52 }
0x167b   :  { %13404 = vmatpush3.msra.mxu1 %v14153_v31  ;;  %13405 = vmatprep.mubr.msk.f32.mxu1 %vm14857_vm2, %v14856_v41 }
0x167c   :  { %13401 = vmatmul.mubr.f32.vlgmr.msra.gmra.mxu0 %v5539_v23  ;;  %13408 = vmatprep.subr.mxu1 %v14856_v41 }
0x167d   :  { %13452 = vmatpush3.msra.mxu0 %v5915_v60 }
0x167e   :  { %13453 = vmatprep.subr.mxu0 %v5914_v57 }
0x167f   :  { %13454 = vmatpush3.msra.mxu0 %v5914_v57 }
0x1680   :  { %13455 = vmatprep.subr.mxu0 %v5913_v38 }
0x1681   :  { %13456 = vmatpush3.msra.mxu0 %v5913_v38  ;;  %v6186_v38 = vld [vmem:[#allocation16 + $0x170] sm:$0xff] }
0x1682   :  { %13457 = vmatprep.subr.mxu0 %v5912_v14 }
0x1683   :  { %13458 = vmatpush3.msra.mxu0 %v5912_v14 }
0x1684   :  { %13459 = vmatprep.subr.mxu0 %v5911_v44 }
0x1685   :  { %13460 = vmatpush3.msra.mxu0 %v5911_v44  ;;  %v14154_v44 = vld [vmem:[#allocation2 + $0x20] sm:$0xff] }
0x1686   :  { %13461 = vmatprep.subr.mxu0 %v5910_v11 }
0x1687   :  { %13462 = vmatpush3.msra.mxu0 %v5910_v11  ;;  %v6182_v11 = vld [vmem:[#allocation16 + $0x150] sm:$0xff] }
0x1688   :  { %13463 = vmatprep.subr.mxu0 %v5909_v6 }
0x1689   :  { %13464 = vmatpush3.msra.mxu0 %v5909_v6  ;;  %v6180_v6 = vld [vmem:[#allocation16 + $0x140] sm:$0xff] }
0x168a   :  { %13465 = vmatprep.subr.mxu0 %v5908_v35 }
0x168b   :  { %13466 = vmatpush3.msra.mxu0 %v5908_v35  ;;  %v6178_v35 = vld [vmem:[#allocation16 + $0x130] sm:$0xff] }
0x168c   :  { %13467 = vmatprep.subr.mxu0 %v5907_v27 }
0x168d   :  { %13468 = vmatpush3.msra.mxu0 %v5907_v27  ;;  %v6176_v27 = vld [vmem:[#allocation16 + $0x120] sm:$0xff] }
0x168e   :  { %13469 = vmatprep.subr.mxu0 %v5906_v18 }
0x168f   :  { %13470 = vmatpush3.msra.mxu0 %v5906_v18  ;;  %v6174_v18 = vld [vmem:[#allocation16 + $0x110] sm:$0xff] }
0x1690   :  { %13471 = vmatprep.subr.mxu0 %v5905_v33 }
0x1691   :  { %13472 = vmatpush3.msra.mxu0 %v5905_v33  ;;  %v6172_v33 = vld [vmem:[#allocation16 + $0x100] sm:$0xff] }
0x1692   :  { %13473 = vmatprep.subr.mxu0 %v5904_v19 }
0x1693   :  { %13474 = vmatpush3.msra.mxu0 %v5904_v19 }
0x1694   :  { %13475 = vmatprep.subr.mxu0 %v5903_v62 }
0x1695   :  { %13476 = vmatpush3.msra.mxu0 %v5903_v62 }
0x1696   :  { %13477 = vmatprep.subr.mxu0 %v5902_v1 }
0x1697   :  { %13478 = vmatpush3.msra.mxu0 %v5902_v1 }
0x1698   :  { %13479 = vmatprep.subr.mxu0 %v5901_v42 }
0x1699   :  { %13480 = vmatpush3.msra.mxu0 %v5901_v42 }
0x169a   :  { %13481 = vmatprep.subr.mxu0 %v5900_v63 }
0x169b   :  { %13482 = vmatpush3.msra.mxu0 %v5900_v63 }
0x169c   :  { %13517 = vmatprep.subr.mxu0 %v6187_v54 }
0x173a   :  { %v5523_v59 = vpop.f32.mrf.mxu1 }
0x173b   :  { %v5610_v45 = vmul.f32 0.001953125, %v5523_v59 }
0x173c   :  { %v13367_v50 = vpop.f32.mrf.mxu1  ;;  %v5606_v53 = vpop.f32.mrf.mxu0 }
0x173d   :  { %v5612_v32 = vmul.f32 %v5610_v45, %v5610_v45  ;;  %v5611_v28 = vmul.f32 0.001953125, %v5606_v53  ;;  %13406 = vmatmul.mubr.msk.f32.vlgmr.msra.gmra.mxu1 %vm1697_vm3, %v5610_v45  ;;  %v5789_v45 = vrot.slane %v16002_v51, %v15417_v55 }
0x173e   :  { %v13402_v29 = vpop.f32.mrf.mxu0  ;;  %13409 = vmatpush3.msra.mxu1 %v14153_v31  ;;  %13410 = vmatprep.mubr.msk.f32.mxu1 %vm14857_vm2, %v14856_v41 }
0x173f   :  { %v5613_v58 = vsub.f32 %v5611_v28, %v5612_v32  ;;  %13413 = vmatprep.subr.mxu1 %v5813_v34 }
0x1741   :  { %v5614_v24 = vadd.f32 1e-05, %v5613_v58 }
0x1743   :  { %14039 = vrsqrt.f32 %v5614_v24 }
0x1750   :  { %v14040_v30 = vpop.eup %14039 }
0x1751   :  { %13411 = vmatmul.mubr.msk.f32.vlgmr.msra.gmra.mxu1 %vm1697_vm3, %v14040_v30 }
0x1752   :  { %13414 = vmatpush3.msra.mxu1 %v5813_v34 }
0x1753   :  { %13415 = vmatprep.subr.mxu1 %v5812_v46 }
0x1754   :  { %13416 = vmatpush3.msra.mxu1 %v5812_v46 }
0x1755   :  { %13417 = vmatprep.subr.mxu1 %v5811_v5 }
0x1756   :  { %13418 = vmatpush3.msra.mxu1 %v5811_v5  ;;  %v6185_v5 = vld [vmem:[#allocation16 + $0x168] sm:$0xff] }
0x1757   :  { %13419 = vmatprep.subr.mxu1 %v5810_v8 }
0x1758   :  { %13420 = vmatpush3.msra.mxu1 %v5810_v8  ;;  %v6184_v8 = vld [vmem:[#allocation16 + $0x160] sm:$0xff] }
0x1759   :  { %13421 = vmatprep.subr.mxu1 %v5809_v37 }
0x175a   :  { %13422 = vmatpush3.msra.mxu1 %v5809_v37  ;;  %v6183_v37 = vld [vmem:[#allocation16 + $0x158] sm:$0xff] }
0x175b   :  { %13423 = vmatprep.subr.mxu1 %v5808_v48 }
0x175c   :  { %13424 = vmatpush3.msra.mxu1 %v5808_v48  ;;  %v6181_v48 = vld [vmem:[#allocation16 + $0x148] sm:$0xff] }
0x175d   :  { %13425 = vmatprep.subr.mxu1 %v5807_v20 }
0x175e   :  { %13426 = vmatpush3.msra.mxu1 %v5807_v20  ;;  %v6179_v20 = vld [vmem:[#allocation16 + $0x138] sm:$0xff] }
0x175f   :  { %13427 = vmatprep.subr.mxu1 %v5806_v56 }
0x1760   :  { %13428 = vmatpush3.msra.mxu1 %v5806_v56  ;;  %v6177_v56 = vld [vmem:[#allocation16 + $0x128] sm:$0xff] }
0x1761   :  { %13429 = vmatprep.subr.mxu1 %v5805_v25 }
0x1762   :  { %13430 = vmatpush3.msra.mxu1 %v5805_v25  ;;  %v6175_v25 = vld [vmem:[#allocation16 + $0x118] sm:$0xff] }
0x1763   :  { %13431 = vmatprep.subr.mxu1 %v5804_v13 }
0x1764   :  { %13432 = vmatpush3.msra.mxu1 %v5804_v13  ;;  %v6173_v13 = vld [vmem:[#allocation16 + $0x108] sm:$0xff] }
0x1765   :  { %13433 = vmatprep.subr.mxu1 %v5803_v61 }
0x1766   :  { %13434 = vmatpush3.msra.mxu1 %v5803_v61  ;;  %v14155_v61 = vld [vmem:[#allocation2 + $0x60] sm:$0xff] }
0x1767   :  { %13435 = vmatprep.subr.mxu1 %v5802_v16 }
0x1768   :  { %13436 = vmatpush3.msra.mxu1 %v5802_v16 }
0x1769   :  { %13437 = vmatprep.subr.mxu1 %v5801_v0 }
0x176a   :  { %13438 = vmatpush3.msra.mxu1 %v5801_v0 }
0x176b   :  { %13439 = vmatprep.subr.mxu1 %v5800_v39 }
0x176c   :  { %13440 = vmatpush3.msra.mxu1 %v5800_v39 }
0x176d   :  { %13441 = vmatprep.subr.mxu1 %v5799_v49 }
0x176e   :  { %13442 = vmatpush3.msra.mxu1 %v5799_v49  ;;  %v14156_v49 = vld [vmem:[#allocation2 + $0x28] sm:$0xff] }
0x176f   :  { %13443 = vmatprep.subr.mxu1 %v5798_v43 }
0x1770   :  { %13444 = vmatpush3.msra.mxu1 %v5798_v43  ;;  %v14157_v43 = vld [vmem:[#allocation2 + $0x30] sm:$0xff] }
0x17fd   :  { %v5685_v2 = vpop.f32.mrf.mxu1 }
0x17fe   :  { %v5765_v4 = vrot.slane %v5685_v2, %v15371_v22  ;;  %v14159_v2 = vld [vmem:[#allocation2] sm:$0xff] }
0x17ff   :  { %v13407_v3 = vpop.f32.mrf.mxu1 }
0x1800   :  { %v5766_v10 = vsub.f32 %v16015_v9, %v5765_v4  ;;  %v5767_v23 = vsub.f32 %v16013_v36, %v5765_v4  ;;  %v5768_v31 = vsub.f32 %v16026_v47, %v5765_v4  ;;  %v5769_v60 = vsub.f32 %v16024_v40, %v5765_v4  ;;  %v14160_v3 = vld [vmem:[#allocation2 + $0x8] sm:$0xff]  ;;  %v14161_v4 = vld [vmem:[#allocation2 + $0x10] sm:$0xff] }
0x1811   :  { %v5758_v12 = vpop.f32.mrf.mxu1 }
0x1812   :  { %v5773_v59 = vrot.slane %v5758_v12, %v15371_v22 }
0x1813   :  { %v13412_v50 = vpop.f32.mrf.mxu1 }
0x1814   :  { %v5774_v53 = vmul.f32 %v5773_v59, %v5766_v10  ;;  %v5775_v32 = vmul.f32 %v5773_v59, %v5767_v23  ;;  %v5776_v28 = vmul.f32 %v5773_v59, %v5768_v31  ;;  %v5777_v29 = vmul.f32 %v5773_v59, %v5769_v60  ;;  %v14163_v10 = vld [vmem:[#allocation2 + $0x40] sm:$0xff]  ;;  %v6378_v59 = vld [vmem:[#allocation16 + $0x1f8] sm:$0xff]  ;;  %v14164_v50 = vld [vmem:[#allocation2 + $0x48] sm:$0xff] }
0x1816   :  { %v5782_v58 = vmul.f32 %v5781_v7, %v5774_v53  ;;  %v5783_v24 = vmul.f32 %v5781_v7, %v5775_v32  ;;  %v5784_v9 = vmul.f32 %v5781_v7, %v5776_v28  ;;  %v5785_v30 = vmul.f32 %v5781_v7, %v5777_v29  ;;  %v14162_v7 = vld [vmem:[#allocation2 + $0x18] sm:$0xff]  ;;  %v14165_v53 = vld [vmem:[#allocation2 + $0x50] sm:$0xff]  ;;  %v6376_v32 = vld [vmem:[#allocation16 + $0x1e8] sm:$0xff] }
0x1817   :  { %v6375_v28 = vld [vmem:[#allocation16 + $0x1e0] sm:$0xff] }
0x1818   :  { %v5790_v34 = vadd.f32 %v5789_v45, %v5782_v58  ;;  %v5791_v36 = vadd.f32 %v5789_v45, %v5783_v24  ;;  %v5792_v57 = vadd.f32 %v5789_v45, %v5784_v9  ;;  %v5793_v46 = vadd.f32 %v5789_v45, %v5785_v30  ;;  %v6377_v45 = vld [vmem:[#allocation16 + $0x1f0] sm:$0xff]  ;;  %v14166_v29 = vld [vmem:[#allocation2 + $0x58] sm:$0xff]  ;;  %v6374_v58 = vld [vmem:[#allocation16 + $0x1d8] sm:$0xff] }
0x1819   :  { %v6373_v24 = vld [vmem:[#allocation16 + $0x1d0] sm:$0xff]  ;;  %v6372_v9 = vld [vmem:[#allocation16 + $0x1c8] sm:$0xff]  ;;  %v6371_v30 = vld [vmem:[#allocation16 + $0x1c0] sm:$0xff] }
0x181a   :  { %v16051_v47 = vmax.f32 %v5790_v34, 0.0  ;;  %v16053_v40 = vmax.f32 %v5791_v36, 0.0  ;;  %v16057_v51 = vmax.f32 %v5792_v57, 0.0  ;;  %v16063_v14 = vmax.f32 %v5793_v46, 0.0  ;;  %v6370_v34 = vld [vmem:[#allocation16 + $0x1b8] sm:$0xff]  ;;  %v6369_v36 = vld [vmem:[#allocation16 + $0x1b0] sm:$0xff] }
0x181b   :  { %v6368_v57 = vld [vmem:[#allocation16 + $0x1a8] sm:$0xff]  ;;  %v6367_v46 = vld [vmem:[#allocation16 + $0x1a0] sm:$0xff] }
0x181c   :  { %13445 = vmatprep.mubr.f32.mxu1 %v16051_v47  ;;  %13483 = vmatprep.mubr.f32.mxu0 %v16051_v47 }
0x181d   :  { %13446 = vmatmul.mubr.f32.vlgmr.msra.gmra.mxu1 %v16053_v40  ;;  %13484 = vmatmul.mubr.f32.vlgmr.msra.gmra.mxu0 %v16053_v40 }
0x181e   :  { %13518 = vmatpush3.msra.mxu0 %v6187_v54  ;;  %13448 = vmatprep.mubr.f32.mxu1 %v16057_v51  ;;  %v14158_v54 = vld [vmem:[#allocation2 + $0x38] sm:$0xff] }
0x181f   :  { %13486 = vmatprep.mubr.f32.mxu0 %v16057_v51  ;;  %13519 = vmatprep.subr.mxu0 %v6186_v38 }
0x1820   :  { %13520 = vmatpush3.msra.mxu0 %v6186_v38  ;;  %v6366_v38 = vld [vmem:[#allocation16 + $0x198] sm:$0xff] }
0x1821   :  { %13521 = vmatprep.subr.mxu0 %v6185_v5  ;;  %13449 = vmatmul.mubr.f32.gmra.mxu1 %v16063_v14 }
0x1822   :  { %13487 = vmatmul.mubr.f32.gmra.mxu0 %v16063_v14  ;;  %13497 = vmatprep.mubr.msk.f32.mxu1 %vm709_vm1, %v14154_v44  ;;  %v6363_v44 = vld [vmem:[#allocation16 + $0x180] sm:$0xff] }
0x1823   :  { %13522 = vmatpush3.msra.mxu0 %v6185_v5  ;;  %13549 = vmatprep.mubr.f32.mxu0 %v16051_v47  ;;  %v6365_v5 = vld [vmem:[#allocation16 + $0x190] sm:$0xff] }
0x1824   :  { %13523 = vmatprep.subr.mxu0 %v6184_v8 }
0x1825   :  { %13524 = vmatpush3.msra.mxu0 %v6184_v8  ;;  %v6364_v8 = vld [vmem:[#allocation16 + $0x188] sm:$0xff] }
0x1826   :  { %13525 = vmatprep.subr.mxu0 %v6183_v37 }
0x1827   :  { %13526 = vmatpush3.msra.mxu0 %v6183_v37  ;;  %v14167_v37 = vld [vmem:[#allocation2 + $0x80] sm:$0xff] }
0x1828   :  { %13527 = vmatprep.subr.mxu0 %v6182_v11 }
0x1829   :  { %13528 = vmatpush3.msra.mxu0 %v6182_v11 }
0x182a   :  { %13529 = vmatprep.subr.mxu0 %v6181_v48 }
0x182b   :  { %13530 = vmatpush3.msra.mxu0 %v6181_v48 }
0x182c   :  { %13531 = vmatprep.subr.mxu0 %v6180_v6 }
0x182d   :  { %13532 = vmatpush3.msra.mxu0 %v6180_v6 }
0x182e   :  { %13533 = vmatprep.subr.mxu0 %v6179_v20 }
0x182f   :  { %13534 = vmatpush3.msra.mxu0 %v6179_v20 }
0x1830   :  { %13535 = vmatprep.subr.mxu0 %v6178_v35 }
0x1831   :  { %13536 = vmatpush3.msra.mxu0 %v6178_v35 }
0x1832   :  { %13537 = vmatprep.subr.mxu0 %v6177_v56 }
0x1833   :  { %13538 = vmatpush3.msra.mxu0 %v6177_v56 }
0x1834   :  { %13539 = vmatprep.subr.mxu0 %v6176_v27 }
0x1835   :  { %13540 = vmatpush3.msra.mxu0 %v6176_v27 }
0x1836   :  { %13541 = vmatprep.subr.mxu0 %v6175_v25 }
0x1837   :  { %13542 = vmatpush3.msra.mxu0 %v6175_v25 }
0x1838   :  { %13543 = vmatprep.subr.mxu0 %v6174_v18 }
0x1839   :  { %13544 = vmatpush3.msra.mxu0 %v6174_v18 }
0x183a   :  { %13545 = vmatprep.subr.mxu0 %v6173_v13 }
0x183b   :  { %13546 = vmatpush3.msra.mxu0 %v6173_v13 }
0x183c   :  { %13547 = vmatprep.subr.mxu0 %v6172_v33 }
0x183d   :  { %13548 = vmatpush3.msra.mxu0 %v6172_v33 }
0x183e   :  { %13550 = vmatmul.mubr.f32.vlgmr.msra.gmra.mxu0 %v16053_v40 }
0x183f   :  { %13552 = vmatprep.mubr.f32.mxu0 %v16057_v51 }
0x1842   :  { %13553 = vmatmul.mubr.f32.gmra.mxu0 %v16063_v14 }
0x1843   :  { %13615 = vmatprep.mubr.msk.f32.mxu0 %vm709_vm1, %v14155_v61 }
0x18dd   :  { %v13485_v19 = vpop.f32.mrf.mxu0  ;;  %v13447_v62 = vpop.f32.mrf.mxu1 }
0x18df   :  { %v5982_v16 = vpop.f32.mrf.mxu0  ;;  %v5880_v1 = vpop.f32.mrf.mxu1 }
0x18e1   :  { %v13450_v42 = vpop.f32.mrf.mxu1 }
0x18e2   :  { %v13488_v0 = vpop.f32.mrf.mxu0 }
0x18e3   :  { %13489 = vmatprep.subr.mxu1 %v13488_v0  ;;  %v5890_v63 = vpop.f32.mrf.mxu1 }
0x18e4   :  { %v5992_v39 = vpop.f32.mrf.mxu0  ;;  %13490 = vmatpush3.msra.mxu1 %v13488_v0 }
0x18e5   :  { %13491 = vmatprep.subr.mxu1 %v5992_v39 }
0x18e6   :  { %13492 = vmatpush3.msra.mxu1 %v5992_v39 }
0x18e7   :  { %13493 = vmatprep.subr.mxu1 %v13485_v19 }
0x18e8   :  { %13494 = vmatpush3.msra.mxu1 %v13485_v19 }
0x18e9   :  { %13495 = vmatprep.subr.mxu1 %v5982_v16 }
0x18ea   :  { %13496 = vmatpush3.msra.mxu1 %v5982_v16 }
0x18eb   :  { %13503 = vmatprep.subr.mxu1 %v13450_v42  ;;  %13498 = vmatmul.mubr.msk.f32.vlgmr.msra.gmra.mxu1 %vm709_vm1, %v14156_v49 }
0x18ec   :  { %13504 = vmatpush3.msra.mxu1 %v13450_v42  ;;  %13500 = vmatprep.mubr.msk.f32.mxu1 %vm709_vm1, %v14157_v43 }
0x18ed   :  { %13505 = vmatprep.subr.mxu1 %v5890_v63 }
0x18ee   :  { %13506 = vmatpush3.msra.mxu1 %v5890_v63 }
0x18ef   :  { %13507 = vmatprep.subr.mxu1 %v13447_v62  ;;  %13501 = vmatmul.mubr.msk.f32.gmra.mxu1 %vm709_vm1, %v14158_v54 }
0x18f0   :  { %13508 = vmatpush3.msra.mxu1 %v13447_v62  ;;  %13511 = vmatprep.mubr.msk.f32.mxu1 %vm709_vm1, %v14159_v2 }
0x18f1   :  { %13509 = vmatprep.subr.mxu1 %v5880_v1 }
0x18f2   :  { %13510 = vmatpush3.msra.mxu1 %v5880_v1 }
0x18f3   :  { %13512 = vmatmul.mubr.msk.f32.vlgmr.msra.gmra.mxu1 %vm709_vm1, %v14160_v3  ;;  %v6569_v3 = vld [vmem:[#allocation16 + $0x278] sm:$0xff] }
0x18f4   :  { %13514 = vmatprep.mubr.msk.f32.mxu1 %vm709_vm1, %v14161_v4  ;;  %v6568_v4 = vld [vmem:[#allocation16 + $0x270] sm:$0xff] }
0x18f7   :  { %13515 = vmatmul.mubr.msk.f32.gmra.mxu1 %vm709_vm1, %v14162_v7  ;;  %v14168_v7 = vld [vmem:[#allocation2 + $0x68] sm:$0xff] }
0x18f8   :  { %13563 = vmatprep.mubr.msk.f32.mxu1 %vm709_vm1, %v14163_v10  ;;  %v14169_v10 = vld [vmem:[#allocation2 + $0x70] sm:$0xff] }
0x18fe   :  { %v13551_v12 = vpop.f32.mrf.mxu0 }
0x1900   :  { %v6254_v23 = vpop.f32.mrf.mxu0 }
0x1902   :  { %v13554_v31 = vpop.f32.mrf.mxu0 }
0x1903   :  { %13555 = vmatprep.subr.mxu1 %v13554_v31 }
0x1904   :  { %v6264_v60 = vpop.f32.mrf.mxu0  ;;  %13556 = vmatpush3.msra.mxu1 %v13554_v31  ;;  %v14170_v31 = vld [vmem:[#allocation2 + $0x78] sm:$0xff] }
0x1905   :  { %13557 = vmatprep.subr.mxu1 %v6264_v60 }
0x1906   :  { %13558 = vmatpush3.msra.mxu1 %v6264_v60  ;;  %v6565_v60 = vld [vmem:[#allocation16 + $0x258] sm:$0xff] }
0x1907   :  { %13559 = vmatprep.subr.mxu1 %v13551_v12 }
0x1908   :  { %13560 = vmatpush3.msra.mxu1 %v13551_v12  ;;  %v6567_v12 = vld [vmem:[#allocation16 + $0x268] sm:$0xff] }
0x1909   :  { %13561 = vmatprep.subr.mxu1 %v6254_v23 }
0x190a   :  { %13562 = vmatpush3.msra.mxu1 %v6254_v23  ;;  %v6566_v23 = vld [vmem:[#allocation16 + $0x260] sm:$0xff] }
0x190b   :  { %13564 = vmatmul.mubr.msk.f32.vlgmr.msra.gmra.mxu1 %vm709_vm1, %v14164_v50  ;;  %13569 = vmatprep.subr.mxu1 %v6378_v59  ;;  %v6562_v50 = vld [vmem:[#allocation16 + $0x240] sm:$0xff] }
0x190c   :  { %13570 = vmatpush3.msra.mxu1 %v6378_v59  ;;  %13566 = vmatprep.mubr.msk.f32.mxu1 %vm709_vm1, %v14165_v53  ;;  %v6564_v59 = vld [vmem:[#allocation16 + $0x250] sm:$0xff]  ;;  %v6561_v53 = vld [vmem:[#allocation16 + $0x238] sm:$0xff] }
0x190d   :  { %13571 = vmatprep.subr.mxu1 %v6377_v45 }
0x190e   :  { %13572 = vmatpush3.msra.mxu1 %v6377_v45  ;;  %v6563_v45 = vld [vmem:[#allocation16 + $0x248] sm:$0xff] }
0x190f   :  { %13567 = vmatmul.mubr.msk.f32.gmra.mxu1 %vm709_vm1, %v14166_v29  ;;  %13573 = vmatprep.subr.mxu1 %v6376_v32  ;;  %v6557_v29 = vld [vmem:[#allocation16 + $0x218] sm:$0xff] }
0x1910   :  { %13574 = vmatpush3.msra.mxu1 %v6376_v32  ;;  %13601 = vmatprep.mubr.f32.mxu1 %v16051_v47  ;;  %v6560_v32 = vld [vmem:[#allocation16 + $0x230] sm:$0xff] }
0x1911   :  { %13575 = vmatprep.subr.mxu1 %v6375_v28 }
0x1912   :  { %13576 = vmatpush3.msra.mxu1 %v6375_v28  ;;  %v6559_v28 = vld [vmem:[#allocation16 + $0x228] sm:$0xff] }
0x1913   :  { %13577 = vmatprep.subr.mxu1 %v6374_v58 }
0x1914   :  { %13578 = vmatpush3.msra.mxu1 %v6374_v58  ;;  %v6556_v58 = vld [vmem:[#allocation16 + $0x210] sm:$0xff] }
0x1915   :  { %13579 = vmatprep.subr.mxu1 %v6373_v24 }
0x1916   :  { %13580 = vmatpush3.msra.mxu1 %v6373_v24  ;;  %v6555_v24 = vld [vmem:[#allocation16 + $0x208] sm:$0xff] }
0x1917   :  { %13581 = vmatprep.subr.mxu1 %v6372_v9 }
0x1918   :  { %13582 = vmatpush3.msra.mxu1 %v6372_v9  ;;  %v6554_v9 = vld [vmem:[#allocation16 + $0x200] sm:$0xff] }
0x1919   :  { %13583 = vmatprep.subr.mxu1 %v6371_v30 }
0x191a   :  { %13584 = vmatpush3.msra.mxu1 %v6371_v30 }
0x191b   :  { %13585 = vmatprep.subr.mxu1 %v6370_v34 }
0x191c   :  { %13586 = vmatpush3.msra.mxu1 %v6370_v34 }
0x191d   :  { %13587 = vmatprep.subr.mxu1 %v6369_v36 }
0x191e   :  { %13588 = vmatpush3.msra.mxu1 %v6369_v36 }
0x191f   :  { %13589 = vmatprep.subr.mxu1 %v6368_v57 }
0x1920   :  { %13590 = vmatpush3.msra.mxu1 %v6368_v57 }
0x1921   :  { %13591 = vmatprep.subr.mxu1 %v6367_v46 }
0x1922   :  { %13592 = vmatpush3.msra.mxu1 %v6367_v46 }
0x1923   :  { %13593 = vmatprep.subr.mxu1 %v6366_v38 }
0x1924   :  { %13594 = vmatpush3.msra.mxu1 %v6366_v38 }
0x1925   :  { %13595 = vmatprep.subr.mxu1 %v6365_v5 }
0x1926   :  { %13596 = vmatpush3.msra.mxu1 %v6365_v5 }
0x1927   :  { %13597 = vmatprep.subr.mxu1 %v6364_v8 }
0x1928   :  { %13598 = vmatpush3.msra.mxu1 %v6364_v8 }
0x1929   :  { %13599 = vmatprep.subr.mxu1 %v6363_v44 }
0x192a   :  { %13600 = vmatpush3.msra.mxu1 %v6363_v44 }
0x192b   :  { %13602 = vmatmul.mubr.f32.vlgmr.msra.gmra.mxu1 %v16053_v40 }
0x192c   :  { %13604 = vmatprep.mubr.f32.mxu1 %v16057_v51 }
0x192f   :  { %13605 = vmatmul.mubr.f32.gmra.mxu1 %v16063_v14 }
0x1930   :  { %13667 = vmatprep.mubr.msk.f32.mxu1 %vm709_vm1, %v14167_v37 }
0x19ab   :  { %v13499_v11 = vpop.f32.mrf.mxu1 }
0x19ad   :  { %v6067_v48 = vpop.f32.mrf.mxu1 }
0x19af   :  { %v13502_v6 = vpop.f32.mrf.mxu1 }
0x19b1   :  { %v6077_v20 = vpop.f32.mrf.mxu1 }
0x19b3   :  { %v13513_v35 = vpop.f32.mrf.mxu1 }
0x19b4   :  { %v6158_v56 = vadd.f32 %v13513_v35, %v13499_v11  ;;  %v6872_v11 = vld [vmem:[#allocation25 + $0x78] sm:$0xff] }
0x19b5   :  { %v6152_v27 = vpop.f32.mrf.mxu1  ;;  %v6868_v35 = vld [vmem:[#allocation25 + $0x58] sm:$0xff] }
0x19b6   :  { %v6153_v25 = vadd.f32 %v6152_v27, %v6067_v48  ;;  %v6871_v48 = vld [vmem:[#allocation25 + $0x70] sm:$0xff]  ;;  %v6865_v27 = vld [vmem:[#allocation25 + $0x40] sm:$0xff] }
0x19b7   :  { %v13516_v18 = vpop.f32.mrf.mxu1 }
0x19b8   :  { %v6168_v13 = vadd.f32 %v13516_v18, %v13502_v6  ;;  %v6870_v6 = vld [vmem:[#allocation25 + $0x68] sm:$0xff]  ;;  %v6861_v18 = vld [vmem:[#allocation25 + $0x20] sm:$0xff] }
0x19b9   :  { %v6162_v33 = vpop.f32.mrf.mxu1 }
0x19ba   :  { %v6163_v61 = vadd.f32 %v6162_v33, %v6077_v20  ;;  %v6869_v20 = vld [vmem:[#allocation25 + $0x60] sm:$0xff] }
0x19cb   :  { %v13565_v19 = vpop.f32.mrf.mxu1 }
0x19cc   :  { %v16089_v16 = vadd.f32 %v13565_v19, %v6158_v56  ;;  %v6867_v56 = vld [vmem:[#allocation25 + $0x50] sm:$0xff] }
0x19cd   :  { %v6339_v62 = vpop.f32.mrf.mxu1 }
0x19ce   :  { %v16091_v0 = vadd.f32 %v6339_v62, %v6153_v25  ;;  %v6862_v25 = vld [vmem:[#allocation25 + $0x28] sm:$0xff]  ;;  %v11033_v62 = vld [vmem:[#allocation17] ss:$0 sm:$0xff] }
0x19cf   :  { %v13568_v1 = vpop.f32.mrf.mxu1 }
0x19d0   :  { %v16093_v39 = vadd.f32 %v13568_v1, %v6168_v13  ;;  %v6860_v13 = vld [vmem:[#allocation25 + $0x18] sm:$0xff] }
0x19d1   :  { %v6349_v42 = vpop.f32.mrf.mxu1 }
0x19d2   :  { %v16095_v49 = vadd.f32 %v6349_v42, %v6163_v61 }
0x19eb   :  { %v13603_v63 = vpop.f32.mrf.mxu1 }
0x19ed   :  { %v6445_v43 = vpop.f32.mrf.mxu1 }
0x19ef   :  { %v13606_v54 = vpop.f32.mrf.mxu1 }
0x19f0   :  { %13607 = vmatprep.subr.mxu0 %v13606_v54 }
0x19f1   :  { %v6455_v2 = vpop.f32.mrf.mxu1  ;;  %13608 = vmatpush3.msra.mxu0 %v13606_v54 }
0x19f2   :  { %13609 = vmatprep.subr.mxu0 %v6455_v2 }
0x19f3   :  { %13610 = vmatpush3.msra.mxu0 %v6455_v2  ;;  %v6756_v2 = vld [vmem:[#allocation19 + $0x8] sm:$0xff] }
0x19f4   :  { %13611 = vmatprep.subr.mxu0 %v13603_v63 }
0x19f5   :  { %13612 = vmatpush3.msra.mxu0 %v13603_v63 }
0x19f6   :  { %13613 = vmatprep.subr.mxu0 %v6445_v43 }
0x19f7   :  { %13614 = vmatpush3.msra.mxu0 %v6445_v43 }
0x19f8   :  { %13616 = vmatmul.mubr.msk.f32.vlgmr.msra.gmra.mxu0 %vm709_vm1, %v14168_v7  ;;  %13621 = vmatprep.subr.mxu0 %v6569_v3  ;;  %v6887_v7 = vld [vmem:[#allocation26 + $0x70] sm:$0xff] }
0x19f9   :  { %13622 = vmatpush3.msra.mxu0 %v6569_v3  ;;  %13618 = vmatprep.mubr.msk.f32.mxu0 %vm709_vm1, %v14169_v10  ;;  %v6888_v3 = vld [vmem:[#allocation26 + $0x78] sm:$0xff]  ;;  %v6886_v10 = vld [vmem:[#allocation26 + $0x68] sm:$0xff] }
0x19fa   :  { %13623 = vmatprep.subr.mxu0 %v6568_v4 }
0x19fb   :  { %13624 = vmatpush3.msra.mxu0 %v6568_v4  ;;  %v6757_v4 = vld [vmem:[#allocation19 + $0x10] sm:$0xff] }
0x19fc   :  { %13619 = vmatmul.mubr.msk.f32.gmra.mxu0 %vm709_vm1, %v14170_v31  ;;  %13625 = vmatprep.subr.mxu0 %v6567_v12  ;;  %v6884_v31 = vld [vmem:[#allocation26 + $0x58] sm:$0xff] }
0x19fd   :  { %13626 = vmatpush3.msra.mxu0 %v6567_v12  ;;  %13653 = vmatprep.mubr.f32.mxu0 %v16051_v47  ;;  %v6558_v47 = vld [vmem:[#allocation16 + $0x220] sm:$0xff] }
0x19fe   :  { %13627 = vmatprep.subr.mxu0 %v6566_v23  ;;  %v6885_v12 = vld [vmem:[#allocation26 + $0x60] sm:$0xff] }
0x19ff   :  { %13628 = vmatpush3.msra.mxu0 %v6566_v23  ;;  %v6758_v23 = vld [vmem:[#allocation19 + $0x18] sm:$0xff] }
0x1a00   :  { %13629 = vmatprep.subr.mxu0 %v6565_v60 }
0x1a01   :  { %13630 = vmatpush3.msra.mxu0 %v6565_v60  ;;  %v6883_v60 = vld [vmem:[#allocation26 + $0x50] sm:$0xff] }
0x1a02   :  { %13631 = vmatprep.subr.mxu0 %v6564_v59 }
0x1a03   :  { %13632 = vmatpush3.msra.mxu0 %v6564_v59  ;;  %v6882_v59 = vld [vmem:[#allocation26 + $0x48] sm:$0xff] }
0x1a04   :  { %13633 = vmatprep.subr.mxu0 %v6563_v45 }
0x1a05   :  { %13634 = vmatpush3.msra.mxu0 %v6563_v45  ;;  %v6881_v45 = vld [vmem:[#allocation26 + $0x40] sm:$0xff] }
0x1a06   :  { %13635 = vmatprep.subr.mxu0 %v6562_v50 }
0x1a07   :  { %13636 = vmatpush3.msra.mxu0 %v6562_v50  ;;  %v6880_v50 = vld [vmem:[#allocation26 + $0x38] sm:$0xff] }
0x1a08   :  { %13637 = vmatprep.subr.mxu0 %v6561_v53 }
0x1a09   :  { %13638 = vmatpush3.msra.mxu0 %v6561_v53  ;;  %v6879_v53 = vld [vmem:[#allocation26 + $0x30] sm:$0xff] }
0x1a0a   :  { %13639 = vmatprep.subr.mxu0 %v6560_v32 }
0x1a0b   :  { %13640 = vmatpush3.msra.mxu0 %v6560_v32  ;;  %v6878_v32 = vld [vmem:[#allocation26 + $0x28] sm:$0xff] }
0x1a0c   :  { %13641 = vmatprep.subr.mxu0 %v6559_v28 }
0x1a0d   :  { %13642 = vmatpush3.msra.mxu0 %v6559_v28  ;;  %v6877_v28 = vld [vmem:[#allocation26 + $0x20] sm:$0xff] }
0x1a0e   :  { %13643 = vmatprep.subr.mxu0 %v6558_v47 }
0x1a0f   :  { %13644 = vmatpush3.msra.mxu0 %v6558_v47  ;;  %v6876_v47 = vld [vmem:[#allocation26 + $0x18] sm:$0xff] }
0x1a10   :  { %13645 = vmatprep.subr.mxu0 %v6557_v29 }
0x1a11   :  { %13646 = vmatpush3.msra.mxu0 %v6557_v29  ;;  %v6875_v29 = vld [vmem:[#allocation26 + $0x10] sm:$0xff] }
0x1a12   :  { %13647 = vmatprep.subr.mxu0 %v6556_v58 }
0x1a13   :  { %13648 = vmatpush3.msra.mxu0 %v6556_v58  ;;  %v6874_v58 = vld [vmem:[#allocation26 + $0x8] sm:$0xff] }
0x1a14   :  { %13649 = vmatprep.subr.mxu0 %v6555_v24 }
0x1a15   :  { %13650 = vmatpush3.msra.mxu0 %v6555_v24  ;;  %v6873_v24 = vld [vmem:[#allocation26] sm:$0xff] }
0x1a16   :  { %13651 = vmatprep.subr.mxu0 %v6554_v9 }
0x1a17   :  { %13652 = vmatpush3.msra.mxu0 %v6554_v9  ;;  %v6859_v9 = vld [vmem:[#allocation25 + $0x10] sm:$0xff] }
0x1a18   :  { %13654 = vmatmul.mubr.f32.vlgmr.msra.gmra.mxu0 %v16053_v40  ;;  %7006 = vmatprep.subr.mxu0 %v6872_v11  ;;  %v7107_v11 = vld [vmem:[#allocation26 + $0xb8] sm:$0xff] }
0x1a19   :  { %13656 = vmatprep.mubr.f32.mxu0 %v16057_v51  ;;  %7007 = vmatpush1.msra.mxu0 %v6871_v48  ;;  %v7106_v48 = vld [vmem:[#allocation26 + $0xb0] sm:$0xff] }
0x1a1a   :  { %7008 = vmatprep.subr.mxu0 %v6870_v6  ;;  %v16149_v6 = vld [vmem:[%s16832_s16 + $0x10] sm:$0xff] }
0x1a1b   :  { %7009 = vmatpush1.msra.mxu0 %v6869_v20  ;;  %v7105_v20 = vld [vmem:[#allocation26 + $0xa8] sm:$0xff] }
0x1a1c   :  { %13657 = vmatmul.mubr.f32.gmra.mxu0 %v16063_v14  ;;  %v6755_v14 = vld [vmem:[#allocation19] sm:$0xff]  ;;  %7010 = vmatprep.subr.mxu0 %v6868_v35 }
0x1a1d   :  { %7054 = vmatprep.mubr.f32.mxu0 %v14856_v41  ;;  %7011 = vmatpush1.msra.mxu0 %v6867_v56  ;;  %v7104_v35 = vld [vmem:[#allocation26 + $0xa0] sm:$0xff]  ;;  %v7103_v56 = vld [vmem:[#allocation26 + $0x98] sm:$0xff] }
0x1ab8   :  { %v13617_v30 = vpop.f32.mrf.mxu0 }
0x1ab9   :  { %v6550_v34 = vadd.f32 %v13617_v30, %v16089_v16  ;;  %v6858_v30 = vld [vmem:[#allocation25 + $0x8] sm:$0xff] }
0x1aba   :  { %v6530_v36 = vpop.f32.mrf.mxu0 }
0x1abb   :  { %v6549_v57 = vadd.f32 %v6530_v36, %v16091_v0  ;;  %v16137_v36 = vld [vmem:[%s16832_s16] sm:$0xff] }
0x1abc   :  { %v13620_v46 = vpop.f32.mrf.mxu0 }
0x1abd   :  { %v6552_v38 = vadd.f32 %v13620_v46, %v16093_v39  ;;  %v7114_v46 = vld [vmem:[#allocation26 + $0xf0] sm:$0xff] }
0x1abe   :  { %v6540_v5 = vpop.f32.mrf.mxu0 }
0x1abf   :  { %v6551_v8 = vadd.f32 %v6540_v5, %v16095_v49  ;;  %v7098_v5 = vld [vmem:[#allocation25 + $0xf8] sm:$0xff] }
0x1ad8   :  { %v13655_v44 = vpop.f32.mrf.mxu0 }
0x1ada   :  { %v6636_v40 = vpop.f32.mrf.mxu0 }
0x1adc   :  { %v13658_v37 = vpop.f32.mrf.mxu0 }
0x1add   :  { %13659 = vmatprep.subr.mxu1 %v13658_v37 }
0x1ade   :  { %v6646_v51 = vpop.f32.mrf.mxu0  ;;  %13660 = vmatpush3.msra.mxu1 %v13658_v37  ;;  %v16143_v37 = vld [vmem:[%s16832_s16 + $0x8] sm:$0xff] }
0x1adf   :  { %13661 = vmatprep.subr.mxu1 %v6646_v51 }
0x1ae0   :  { %13662 = vmatpush3.msra.mxu1 %v6646_v51  ;;  %v7109_v51 = vld [vmem:[#allocation26 + $0xc8] sm:$0xff] }
0x1ae1   :  { %13663 = vmatprep.subr.mxu1 %v13655_v44 }
0x1ae2   :  { %13664 = vmatpush3.msra.mxu1 %v13655_v44  ;;  %v7111_v44 = vld [vmem:[#allocation26 + $0xd8] sm:$0xff] }
0x1ae3   :  { %13665 = vmatprep.subr.mxu1 %v6636_v40 }
0x1ae4   :  { %13666 = vmatpush3.msra.mxu1 %v6636_v40  ;;  %v7110_v40 = vld [vmem:[#allocation26 + $0xd0] sm:$0xff] }
0x1ae5   :  { %13668 = vmatmul.mubr.msk.f32.vlgmr.msra.gmra.mxu1 %vm709_vm1, %v15969_v15  ;;  %v6866_v15 = vld [vmem:[#allocation25 + $0x48] sm:$0xff] }
0x1ae6   :  { %13670 = vmatprep.mubr.msk.f32.mxu1 %vm709_vm1, %v15974_v21  ;;  %v6864_v21 = vld [vmem:[#allocation25 + $0x38] sm:$0xff]  ;;  %7012 = vmatprep.subr.mxu0 %v6866_v15  ;;  %v7102_v15 = vld [vmem:[#allocation26 + $0x90] sm:$0xff] }
0x1ae7   :  { %7013 = vmatpush1.msra.mxu0 %v6865_v27  ;;  %v16155_v27 = vld [vmem:[%s16832_s16 + $0x18] sm:$0xff] }
0x1ae8   :  { %7014 = vmatprep.subr.mxu0 %v6864_v21  ;;  %v7101_v21 = vld [vmem:[#allocation26 + $0x88] sm:$0xff] }
0x1ae9   :  { %13671 = vmatmul.mubr.msk.f32.gmra.mxu1 %vm709_vm1, %v15979_v26  ;;  %v6863_v26 = vld [vmem:[#allocation25 + $0x30] sm:$0xff] }
0x1aea   :  { %13681 = vmatprep.mubr.msk.f32.mxu1 %vm709_vm1, %v6755_v14  ;;  %7015 = vmatpush1.msra.mxu0 %v6863_v26  ;;  %v7108_v14 = vld [vmem:[#allocation26 + $0xc0] sm:$0xff] }
0x1aeb   :  { %7016 = vmatprep.subr.mxu0 %v6862_v25  ;;  %v7100_v26 = vld [vmem:[#allocation26 + $0x80] sm:$0xff] }
0x1aec   :  { %7017 = vmatpush1.msra.mxu0 %v6861_v18  ;;  %v7097_v18 = vld [vmem:[#allocation25 + $0xf0] sm:$0xff] }
0x1aed   :  { %7018 = vmatprep.subr.mxu0 %v6860_v13 }
0x1aee   :  { %7019 = vmatpush1.msra.mxu0 %v6859_v9  ;;  %v7503_v9 = vld [vmem:[#allocation26 + $0x118] sm:$0xff] }
0x1aef   :  { %7020 = vmatprep.subr.mxu0 %v6858_v30  ;;  %v7502_v30 = vld [vmem:[#allocation26 + $0x110] sm:$0xff] }
0x1ba5   :  { %v13669_v33 = vpop.f32.mrf.mxu1 }
0x1ba6   :  { %v6741_v1 = vadd.f32 %v13669_v33, %v6550_v34  ;;  %v7115_v34 = vld [vmem:[#allocation26 + $0xf8] sm:$0xff]  ;;  %v7096_v33 = vld [vmem:[#allocation25 + $0xe8] sm:$0xff] }
0x1ba7   :  { %v6721_v61 = vpop.f32.mrf.mxu1 }
0x1ba8   :  { %v6740_v49 = vadd.f32 %v6721_v61, %v6549_v57  ;;  %v16122_v43 = vadd.f32 %v11033_v62, %v6741_v1  ;;  %v6857_v57 = vld [vmem:[#allocation25] sm:$0xff] }
0x1ba9   :  { %v13672_v19 = vpop.f32.mrf.mxu1  ;;  %7021 = vmatpush1.msra.mxu0 %v6857_v57  ;;  %v7095_v61 = vld [vmem:[#allocation25 + $0xe0] sm:$0xff] }
0x1baa   :  { %v6743_v16 = vadd.f32 %v13672_v19, %v6552_v38  ;;  %v16126_v54 = vadd.f32 %v11033_v62, %v6740_v49  ;;  %v7113_v38 = vld [vmem:[#allocation26 + $0xe8] sm:$0xff]  ;;  %7221 = vmatprep.subr.mxu0 %v7098_v5  ;;  %v7094_v19 = vld [vmem:[#allocation25 + $0xd8] sm:$0xff]  ;;  %v7091_v1 = vld [vmem:[#allocation25 + $0xc0] sm:$0xff] }
0x1bab   :  { %v6731_v0 = vpop.f32.mrf.mxu1  ;;  %v7089_v49 = vld [vmem:[#allocation25 + $0xb0] sm:$0xff]  ;;  %v7500_v57 = vld [vmem:[#allocation26 + $0x100] sm:$0xff] }
0x1bac   :  { %v16116_v39 = vadd.f32 %v11033_v62, %v6743_v16  ;;  %v6742_v42 = vadd.f32 %v6731_v0, %v6551_v8  ;;  %v7112_v8 = vld [vmem:[#allocation26 + $0xe0] sm:$0xff]  ;;  %v7093_v16 = vld [vmem:[#allocation25 + $0xd0] sm:$0xff]  ;;  %v7092_v0 = vld [vmem:[#allocation25 + $0xc8] sm:$0xff] }
0x1bae   :  { %v16118_v63 = vadd.f32 %v11033_v62, %v6742_v42  ;;  %13673 = vmatprep.subr.mxu1 %v16116_v39  ;;  %v7090_v42 = vld [vmem:[#allocation25 + $0xb8] sm:$0xff] }
0x1baf   :  { %13674 = vmatpush3.msra.mxu1 %v16116_v39 }
0x1bb0   :  { %13675 = vmatprep.subr.mxu1 %v16118_v63 }
0x1bb1   :  { %13676 = vmatpush3.msra.mxu1 %v16118_v63 }
0x1bb2   :  { %13677 = vmatprep.subr.mxu1 %v16122_v43 }
0x1bb3   :  { %13678 = vmatpush3.msra.mxu1 %v16122_v43 }
0x1bb4   :  { %13679 = vmatprep.subr.mxu1 %v16126_v54 }
0x1bb5   :  { %13680 = vmatpush3.msra.mxu1 %v16126_v54 }
0x1bb6   :  { %13682 = vmatmul.mubr.msk.f32.vlgmr.msra.gmra.mxu1 %vm709_vm1, %v6756_v2  ;;  %6905 = vmatprep.subr.mxu1 %v6888_v3  ;;  %v7088_v3 = vld [vmem:[#allocation25 + $0xa8] sm:$0xff] }
0x1bb7   :  { %13684 = vmatprep.mubr.msk.f32.mxu1 %vm709_vm1, %v6757_v4  ;;  %6906 = vmatpush1.msra.mxu1 %v6887_v7  ;;  %v7087_v4 = vld [vmem:[#allocation25 + $0xa0] sm:$0xff]  ;;  %v7086_v7 = vld [vmem:[#allocation25 + $0x98] sm:$0xff] }
0x1bb8   :  { %6907 = vmatprep.subr.mxu1 %v6886_v10  ;;  %v7085_v10 = vld [vmem:[#allocation25 + $0x90] sm:$0xff] }
0x1bb9   :  { %6908 = vmatpush1.msra.mxu1 %v6885_v12  ;;  %v7084_v12 = vld [vmem:[#allocation25 + $0x88] sm:$0xff] }
0x1bba   :  { %13685 = vmatmul.mubr.msk.f32.gmra.mxu1 %vm709_vm1, %v6758_v23  ;;  %6909 = vmatprep.subr.mxu1 %v6884_v31  ;;  %v7083_v23 = vld [vmem:[#allocation25 + $0x80] sm:$0xff]  ;;  %v7515_v31 = vld [vmem:[#allocation26 + $0x178] sm:$0xff] }
0x1bbb   :  { %6910 = vmatpush1.msra.mxu1 %v6883_v60  ;;  %6953 = vmatprep.mubr.f32.mxu1 %v14856_v41  ;;  %v7514_v60 = vld [vmem:[#allocation26 + $0x170] sm:$0xff] }
0x1bbc   :  { %6911 = vmatprep.subr.mxu1 %v6882_v59  ;;  %v7513_v59 = vld [vmem:[#allocation26 + $0x168] sm:$0xff] }
0x1bbd   :  { %6912 = vmatpush1.msra.mxu1 %v6881_v45  ;;  %v7512_v45 = vld [vmem:[#allocation26 + $0x160] sm:$0xff] }
0x1bbe   :  { %6913 = vmatprep.subr.mxu1 %v6880_v50  ;;  %v7511_v50 = vld [vmem:[#allocation26 + $0x158] sm:$0xff] }
0x1bbf   :  { %6914 = vmatpush1.msra.mxu1 %v6879_v53  ;;  %v7510_v53 = vld [vmem:[#allocation26 + $0x150] sm:$0xff] }
0x1bc0   :  { %6915 = vmatprep.subr.mxu1 %v6878_v32  ;;  %v7509_v32 = vld [vmem:[#allocation26 + $0x148] sm:$0xff] }
0x1bc1   :  { %6916 = vmatpush1.msra.mxu1 %v6877_v28  ;;  %v7508_v28 = vld [vmem:[#allocation26 + $0x140] sm:$0xff] }
0x1bc2   :  { %6917 = vmatprep.subr.mxu1 %v6876_v47  ;;  %v7507_v47 = vld [vmem:[#allocation26 + $0x138] sm:$0xff] }
0x1bc3   :  { %6918 = vmatpush1.msra.mxu1 %v6875_v29  ;;  %v7506_v29 = vld [vmem:[#allocation26 + $0x130] sm:$0xff] }
0x1bc4   :  { %6919 = vmatprep.subr.mxu1 %v6874_v58  ;;  %v7505_v58 = vld [vmem:[#allocation26 + $0x128] sm:$0xff] }
0x1bc5   :  { %6920 = vmatpush1.msra.mxu1 %v6873_v24  ;;  %v7504_v24 = vld [vmem:[#allocation26 + $0x120] sm:$0xff] }
0x1bc6   :  { %11038 = vmatmul.mubr.msk.f32.vlgmr.msra.gmra.mxu1 %vm508_vm0, %v16137_v36  ;;  %7132 = vmatprep.subr.mxu1 %v7115_v34  ;;  %v7501_v34 = vld [vmem:[#allocation26 + $0x108] sm:$0xff] }
0x1bc7   :  { %7133 = vmatpush1.msra.mxu1 %v7114_v46  ;;  %6959 = vmatprep.mubr.f32.mxu1 %v14856_v41 }
0x1bc8   :  { %7134 = vmatprep.subr.mxu1 %v7113_v38 }
0x1bc9   :  { %7135 = vmatpush1.msra.mxu1 %v7112_v8 }
0x1bca   :  { %11039 = vmatmul.mubr.msk.f32.gmra.mxu1 %vm508_vm0, %v16143_v37  ;;  %7136 = vmatprep.subr.mxu1 %v7111_v44 }
0x1bcb   :  { %7137 = vmatpush1.msra.mxu1 %v7110_v40  ;;  %6965 = vmatprep.mubr.f32.mxu1 %v14856_v41 }
0x1bcc   :  { %7138 = vmatprep.subr.mxu1 %v7109_v51 }
0x1bcd   :  { %7139 = vmatpush1.msra.mxu1 %v7108_v14 }
0x1bce   :  { %11040 = vmatmul.mubr.msk.f32.gmra.mxu1 %vm508_vm0, %v16149_v6  ;;  %7140 = vmatprep.subr.mxu1 %v7107_v11 }
0x1bcf   :  { %7141 = vmatpush1.msra.mxu1 %v7106_v48  ;;  %6971 = vmatprep.mubr.f32.mxu1 %v14856_v41 }
0x1bd0   :  { %7142 = vmatprep.subr.mxu1 %v7105_v20 }
0x1bd1   :  { %7143 = vmatpush1.msra.mxu1 %v7104_v35 }
0x1bd2   :  { %11041 = vmatmul.mubr.msk.f32.gmra.mxu1 %vm508_vm0, %v16155_v27  ;;  %7144 = vmatprep.subr.mxu1 %v7103_v56 }
0x1bd3   :  { %7145 = vmatpush1.msra.mxu1 %v7102_v15  ;;  %7180 = vmatprep.mubr.f32.mxu1 %v14856_v41 }
0x1bd4   :  { %7146 = vmatprep.subr.mxu1 %v7101_v21 }
0x1bd5   :  { %7147 = vmatpush1.msra.mxu1 %v7100_v26 }
0x1bd6   :  { %11046 = vmatmul.mubr.msk.f32.vlgmr.msra.gmra.mxu1 %vm508_vm0, %v16137_v36 }
0x1bd7   :  { %7186 = vmatprep.mubr.f32.mxu1 %v14856_v41 }
0x1bda   :  { %11047 = vmatmul.mubr.msk.f32.gmra.mxu1 %vm508_vm0, %v16143_v37 }
0x1bdb   :  { %7192 = vmatprep.mubr.f32.mxu1 %v14856_v41 }
0x1bde   :  { %11048 = vmatmul.mubr.msk.f32.gmra.mxu1 %vm508_vm0, %v16149_v6 }
0x1bdf   :  { %7198 = vmatprep.mubr.f32.mxu1 %v14856_v41 }
0x1be2   :  { %11049 = vmatmul.mubr.msk.f32.gmra.mxu1 %vm508_vm0, %v16155_v27 }
0x1be3   :  { %7371 = vmatprep.mubr.f32.mxu1 %v14856_v41 }
0x1c76   :  { %v16172_v25 = vpop.f32.mrf.mxu1 }
0x1c78   :  { %v16174_v13 = vpop.f32.mrf.mxu1 }
0x1c79   :  { %11042 = vmatmul.mubr.msk.f32.vlgmr.msra.gmra.mxu0 %vm508_vm0, %v16174_v13 }
0x1c7a   :  { %7222 = vmatpush1.msra.mxu0 %v7097_v18  ;;  %7060 = vmatprep.mubr.f32.mxu0 %v14856_v41  ;;  %v16179_v62 = vpop.f32.mrf.mxu1 }
0x1c7b   :  { %7223 = vmatprep.subr.mxu0 %v7096_v33 }
0x1c7c   :  { %7224 = vmatpush1.msra.mxu0 %v7095_v61  ;;  %v16184_v2 = vpop.f32.mrf.mxu1 }
0x1c7d   :  { %11043 = vmatmul.mubr.msk.f32.gmra.mxu0 %vm508_vm0, %v16172_v25  ;;  %7225 = vmatprep.subr.mxu0 %v7094_v19 }
0x1c7e   :  { %7226 = vmatpush1.msra.mxu0 %v7093_v16  ;;  %7066 = vmatprep.mubr.f32.mxu0 %v14856_v41 }
0x1c7f   :  { %7227 = vmatprep.subr.mxu0 %v7092_v0 }
0x1c80   :  { %7228 = vmatpush1.msra.mxu0 %v7091_v1 }
0x1c81   :  { %11044 = vmatmul.mubr.msk.f32.gmra.mxu0 %vm508_vm0, %v16184_v2  ;;  %7229 = vmatprep.subr.mxu0 %v7090_v42 }
0x1c82   :  { %7230 = vmatpush1.msra.mxu0 %v7089_v49  ;;  %7072 = vmatprep.mubr.f32.mxu0 %v14856_v41 }
0x1c83   :  { %7231 = vmatprep.subr.mxu0 %v7088_v3 }
0x1c84   :  { %7232 = vmatpush1.msra.mxu0 %v7087_v4 }
0x1c85   :  { %11045 = vmatmul.mubr.msk.f32.gmra.mxu0 %vm508_vm0, %v16179_v62  ;;  %7233 = vmatprep.subr.mxu0 %v7086_v7 }
0x1c86   :  { %7234 = vmatpush1.msra.mxu0 %v7085_v10  ;;  %7269 = vmatprep.mubr.f32.mxu0 %v14856_v41  ;;  %v16216_v46 = vpop.f32.mrf.mxu1 }
0x1c87   :  { %7235 = vmatprep.subr.mxu0 %v7084_v12 }
0x1c88   :  { %7236 = vmatpush1.msra.mxu0 %v7083_v23  ;;  %v6957_v38 = vpop.f32.mrf.mxu1 }
0x1c89   :  { %11050 = vmatmul.mubr.msk.f32.vlgmr.msra.gmra.mxu0 %vm508_vm0, %v16174_v13  ;;  %7532 = vmatprep.subr.mxu0 %v7515_v31 }
0x1c8a   :  { %7275 = vmatprep.mubr.f32.mxu0 %v14856_v41  ;;  %7533 = vmatpush1.msra.mxu0 %v7514_v60  ;;  %v6961_v5 = vpop.f32.mrf.mxu1 }
0x1c8b   :  { %7534 = vmatprep.subr.mxu0 %v7513_v59 }
0x1c8c   :  { %7535 = vmatpush1.msra.mxu0 %v7512_v45  ;;  %v6963_v8 = vpop.f32.mrf.mxu1 }
0x1c8d   :  { %11051 = vmatmul.mubr.msk.f32.gmra.mxu0 %vm508_vm0, %v16172_v25  ;;  %7536 = vmatprep.subr.mxu0 %v7511_v50 }
0x1c8e   :  { %7281 = vmatprep.mubr.f32.mxu0 %v14856_v41  ;;  %7537 = vmatpush1.msra.mxu0 %v7510_v53  ;;  %v6967_v44 = vpop.f32.mrf.mxu1 }
0x1c8f   :  { %7538 = vmatprep.subr.mxu0 %v7509_v32 }
0x1c90   :  { %7539 = vmatpush1.msra.mxu0 %v7508_v28  ;;  %v6969_v40 = vpop.f32.mrf.mxu1 }
0x1c91   :  { %11052 = vmatmul.mubr.msk.f32.gmra.mxu0 %vm508_vm0, %v16184_v2  ;;  %7540 = vmatprep.subr.mxu0 %v7507_v47 }
0x1c92   :  { %7287 = vmatprep.mubr.f32.mxu0 %v14856_v41  ;;  %7541 = vmatpush1.msra.mxu0 %v7506_v29  ;;  %v6973_v51 = vpop.f32.mrf.mxu1  ;;  %v7295_v29 = vld [vmem:[#allocation23 + $0x18] sm:$0xff] }
0x1c93   :  { %7542 = vmatprep.subr.mxu0 %v7505_v58 }
0x1c94   :  { %7543 = vmatpush1.msra.mxu0 %v7504_v24  ;;  %v6975_v14 = vpop.f32.mrf.mxu1 }
0x1c95   :  { %11053 = vmatmul.mubr.msk.f32.gmra.mxu0 %vm508_vm0, %v16179_v62  ;;  %7544 = vmatprep.subr.mxu0 %v7503_v9 }
0x1c96   :  { %7580 = vmatprep.mubr.f32.mxu0 %v14856_v41  ;;  %7545 = vmatpush1.msra.mxu0 %v7502_v30  ;;  %v7182_v20 = vpop.f32.mrf.mxu1 }
0x1c97   :  { %7546 = vmatprep.subr.mxu0 %v7501_v34  ;;  %v7296_v34 = vld [vmem:[#allocation23 + $0x20] sm:$0xff] }
0x1c98   :  { %7547 = vmatpush1.msra.mxu0 %v7500_v57  ;;  %v7184_v15 = vpop.f32.mrf.mxu1 }
0x1c99   :  { %11060 = vmatmul.mubr.msk.f32.vlgmr.msra.gmra.mxu0 %vm508_vm0, %v16137_v36 }
0x1c9a   :  { %7586 = vmatprep.mubr.f32.mxu0 %v14856_v41  ;;  %v7188_v18 = vpop.f32.mrf.mxu1 }
0x1c9c   :  { %v7190_v19 = vpop.f32.mrf.mxu1 }
0x1c9d   :  { %11061 = vmatmul.mubr.msk.f32.gmra.mxu0 %vm508_vm0, %v16143_v37 }
0x1c9e   :  { %7592 = vmatprep.mubr.f32.mxu0 %v14856_v41  ;;  %v7194_v1 = vpop.f32.mrf.mxu1 }
0x1ca0   :  { %v7196_v3 = vpop.f32.mrf.mxu1 }
0x1ca1   :  { %11062 = vmatmul.mubr.msk.f32.gmra.mxu0 %vm508_vm0, %v16149_v6 }
0x1ca2   :  { %7598 = vmatprep.mubr.f32.mxu0 %v14856_v41  ;;  %v7200_v7 = vpop.f32.mrf.mxu1 }
0x1ca4   :  { %v7202_v23 = vpop.f32.mrf.mxu1 }
0x1ca5   :  { %11063 = vmatmul.mubr.msk.f32.gmra.mxu0 %vm508_vm0, %v16155_v27 }
0x1ca6   :  { %7771 = vmatprep.mubr.f32.mxu0 %v14856_v41 }
0x1d39   :  { %v7056_v11 = vpop.f32.mrf.mxu0 }
0x1d3b   :  { %v7058_v48 = vpop.f32.mrf.mxu0 }
0x1d3d   :  { %v7062_v35 = vpop.f32.mrf.mxu0 }
0x1d3f   :  { %v7064_v56 = vpop.f32.mrf.mxu0 }
0x1d40   :  { %v7065_v57 = vadd.f32 %v7064_v56, %v6963_v8  ;;  %v7497_v8 = vld [vmem:[#allocation25 + $0x170] sm:$0xff]  ;;  %v7491_v56 = vld [vmem:[#allocation25 + $0x140] sm:$0xff] }
0x1d41   :  { %v7068_v21 = vpop.f32.mrf.mxu0 }
0x1d42   :  { %v7069_v30 = vadd.f32 %v7068_v21, %v6967_v44  ;;  %v7495_v44 = vld [vmem:[#allocation25 + $0x160] sm:$0xff]  ;;  %v7490_v21 = vld [vmem:[#allocation25 + $0x138] sm:$0xff] }
0x1d43   :  { %v7070_v26 = vpop.f32.mrf.mxu0 }
0x1d44   :  { %v7071_v9 = vadd.f32 %v7070_v26, %v6969_v40  ;;  %v7297_v40 = vld [vmem:[#allocation23 + $0x28] sm:$0xff]  ;;  %v7081_v26 = vld [vmem:[#allocation23 + $0x10] sm:$0xff] }
0x1d45   :  { %v7074_v33 = vpop.f32.mrf.mxu0 }
0x1d46   :  { %v7075_v24 = vadd.f32 %v7074_v33, %v6973_v51  ;;  %v7057_v51 = vadd.f32 %v7056_v11, %v16216_v46  ;;  %v7494_v46 = vld [vmem:[#allocation25 + $0x158] sm:$0xff]  ;;  %v7080_v11 = vld [vmem:[#allocation23 + $0x8] sm:$0xff]  ;;  %v7488_v33 = vld [vmem:[#allocation25 + $0x128] sm:$0xff] }
0x1d47   :  { %v7076_v61 = vpop.f32.mrf.mxu0 }
0x1d48   :  { %v7077_v58 = vadd.f32 %v7076_v61, %v6975_v14  ;;  %v7498_v14 = vld [vmem:[#allocation25 + $0x178] sm:$0xff]  ;;  %v7487_v61 = vld [vmem:[#allocation25 + $0x120] sm:$0xff] }
0x1d49   :  { %v7271_v16 = vpop.f32.mrf.mxu0 }
0x1d4a   :  { %v7272_v47 = vadd.f32 %v7271_v16, %v7182_v20  ;;  %v7059_v20 = vadd.f32 %v7058_v48, %v6957_v38  ;;  %v7496_v38 = vld [vmem:[#allocation25 + $0x168] sm:$0xff]  ;;  %v7493_v48 = vld [vmem:[#allocation25 + $0x150] sm:$0xff] }
0x1d4b   :  { %v7273_v0 = vpop.f32.mrf.mxu0  ;;  %v7485_v16 = vld [vmem:[#allocation25 + $0x110] sm:$0xff] }
0x1d4c   :  { %v7274_v28 = vadd.f32 %v7273_v0, %v7184_v15  ;;  %v7063_v15 = vadd.f32 %v7062_v35, %v6961_v5  ;;  %v7079_v5 = vld [vmem:[#allocation23] sm:$0xff] }
0x1d4d   :  { %v7277_v42 = vpop.f32.mrf.mxu0  ;;  %v7492_v35 = vld [vmem:[#allocation25 + $0x148] sm:$0xff] }
0x1d4e   :  { %v7278_v32 = vadd.f32 %v7277_v42, %v7188_v18  ;;  %v7489_v18 = vld [vmem:[#allocation25 + $0x130] sm:$0xff]  ;;  %v7484_v0 = vld [vmem:[#allocation25 + $0x108] sm:$0xff]  ;;  %v7829_v42 = vld [vmem:[#allocation26 + $0x1f8] sm:$0xff] }
0x1d4f   :  { %v7279_v49 = vpop.f32.mrf.mxu0 }
0x1d50   :  { %v7280_v53 = vadd.f32 %v7279_v49, %v7190_v19  ;;  %v7486_v19 = vld [vmem:[#allocation25 + $0x118] sm:$0xff]  ;;  %v7828_v49 = vld [vmem:[#allocation26 + $0x1f0] sm:$0xff] }
0x1d51   :  { %v7283_v4 = vpop.f32.mrf.mxu0 }
0x1d52   :  { %v7284_v50 = vadd.f32 %v7283_v4, %v7194_v1  ;;  %v7483_v1 = vld [vmem:[#allocation25 + $0x100] sm:$0xff] }
0x1d53   :  { %v7285_v10 = vpop.f32.mrf.mxu0  ;;  %v7826_v4 = vld [vmem:[#allocation26 + $0x1e0] sm:$0xff] }
0x1d54   :  { %v7286_v45 = vadd.f32 %v7285_v10, %v7196_v3  ;;  %v7827_v3 = vld [vmem:[#allocation26 + $0x1e8] sm:$0xff]  ;;  %v7824_v10 = vld [vmem:[#allocation26 + $0x1d0] sm:$0xff] }
0x1d55   :  { %v7289_v12 = vpop.f32.mrf.mxu0 }
0x1d56   :  { %v7290_v59 = vadd.f32 %v7289_v12, %v7200_v7  ;;  %v7825_v7 = vld [vmem:[#allocation26 + $0x1d8] sm:$0xff]  ;;  %v7823_v12 = vld [vmem:[#allocation26 + $0x1c8] sm:$0xff] }
0x1d57   :  { %v7291_v31 = vpop.f32.mrf.mxu0 }
0x1d58   :  { %v7292_v60 = vadd.f32 %v7291_v31, %v7202_v23  ;;  %v7822_v23 = vld [vmem:[#allocation26 + $0x1c0] sm:$0xff]  ;;  %v7821_v31 = vld [vmem:[#allocation26 + $0x1b8] sm:$0xff] }
0x1d5a   :  { %7331 = vmatprep.subr.mxu1 %v7292_v60  ;;  %v7820_v60 = vld [vmem:[#allocation26 + $0x1b0] sm:$0xff] }
0x1d5b   :  { %7332 = vmatpush1.msra.mxu1 %v7290_v59  ;;  %v7819_v59 = vld [vmem:[#allocation26 + $0x1a8] sm:$0xff] }
0x1d5c   :  { %7333 = vmatprep.subr.mxu1 %v7286_v45  ;;  %v7818_v45 = vld [vmem:[#allocation26 + $0x1a0] sm:$0xff] }
0x1d5d   :  { %7334 = vmatpush1.msra.mxu1 %v7284_v50  ;;  %v7817_v50 = vld [vmem:[#allocation26 + $0x198] sm:$0xff] }
0x1d5e   :  { %7335 = vmatprep.subr.mxu1 %v7280_v53  ;;  %v7816_v53 = vld [vmem:[#allocation26 + $0x190] sm:$0xff] }
0x1d5f   :  { %7336 = vmatpush1.msra.mxu1 %v7278_v32  ;;  %v7815_v32 = vld [vmem:[#allocation26 + $0x188] sm:$0xff] }
0x1d60   :  { %7337 = vmatprep.subr.mxu1 %v7274_v28  ;;  %v7814_v28 = vld [vmem:[#allocation26 + $0x180] sm:$0xff] }
0x1d61   :  { %7338 = vmatpush1.msra.mxu1 %v7272_v47 }
0x1d62   :  { %11054 = vmatmul.mubr.msk.f32.vlgmr.msra.gmra.mxu1 %vm709_vm1, %v7295_v29  ;;  %7423 = vmatprep.subr.mxu1 %v7077_v58 }
0x1d63   :  { %7424 = vmatpush1.msra.mxu1 %v7075_v24  ;;  %7377 = vmatprep.mubr.f32.mxu1 %v14856_v41 }
0x1d64   :  { %7425 = vmatprep.subr.mxu1 %v7071_v9 }
0x1d65   :  { %7426 = vmatpush1.msra.mxu1 %v7069_v30 }
0x1d66   :  { %11055 = vmatmul.mubr.msk.f32.gmra.mxu1 %vm709_vm1, %v7296_v34  ;;  %7427 = vmatprep.subr.mxu1 %v7065_v57 }
0x1d67   :  { %7428 = vmatpush1.msra.mxu1 %v7063_v15  ;;  %7383 = vmatprep.mubr.f32.mxu1 %v14856_v41 }
0x1d68   :  { %7429 = vmatprep.subr.mxu1 %v7059_v20  ;;  %v7582_v20 = vpop.f32.mrf.mxu0 }
0x1d69   :  { %7430 = vmatpush1.msra.mxu1 %v7057_v51 }
0x1d6a   :  { %11056 = vmatmul.mubr.msk.f32.gmra.mxu1 %vm709_vm1, %v7297_v40  ;;  %7621 = vmatprep.subr.mxu1 %v7498_v14 }
0x1d6b   :  { %7463 = vmatprep.mubr.f32.mxu1 %v14856_v41 }
0x1d6e   :  { %11057 = vmatmul.mubr.msk.f32.vlgmr.msra.gmra.mxu1 %vm709_vm1, %v7079_v5 }
0x1d6f   :  { %7622 = vmatpush1.msra.mxu1 %v7497_v8  ;;  %7469 = vmatprep.mubr.f32.mxu1 %v14856_v41  ;;  %v7584_v8 = vpop.f32.mrf.mxu0 }
0x1d70   :  { %7623 = vmatprep.subr.mxu1 %v7496_v38 }
0x1d71   :  { %7624 = vmatpush1.msra.mxu1 %v7495_v44 }
0x1d72   :  { %7625 = vmatprep.subr.mxu1 %v7494_v46  ;;  %11058 = vmatmul.mubr.msk.f32.gmra.mxu1 %vm709_vm1, %v7080_v11 }
0x1d73   :  { %7626 = vmatpush1.msra.mxu1 %v7493_v48  ;;  %7475 = vmatprep.mubr.f32.mxu1 %v14856_v41  ;;  %v7588_v48 = vpop.f32.mrf.mxu0 }
0x1d74   :  { %7627 = vmatprep.subr.mxu1 %v7492_v35 }
0x1d75   :  { %7628 = vmatpush1.msra.mxu1 %v7491_v56  ;;  %v7590_v56 = vpop.f32.mrf.mxu0 }
0x1d76   :  { %7629 = vmatprep.subr.mxu1 %v7490_v21  ;;  %11059 = vmatmul.mubr.msk.f32.gmra.mxu1 %vm709_vm1, %v7081_v26 }
0x1d77   :  { %7630 = vmatpush1.msra.mxu1 %v7489_v18  ;;  %7669 = vmatprep.mubr.f32.mxu1 %v14856_v41  ;;  %v7594_v18 = vpop.f32.mrf.mxu0 }
0x1d78   :  { %7631 = vmatprep.subr.mxu1 %v7488_v33 }
0x1d79   :  { %7632 = vmatpush1.msra.mxu1 %v7487_v61 }
0x1d7a   :  { %7633 = vmatprep.subr.mxu1 %v7486_v19  ;;  %v7596_v19 = vpop.f32.mrf.mxu0 }
0x1d7b   :  { %7634 = vmatpush1.msra.mxu1 %v7485_v16 }
0x1d7c   :  { %7635 = vmatprep.subr.mxu1 %v7484_v0  ;;  %v7600_v0 = vpop.f32.mrf.mxu0 }
0x1d7d   :  { %7636 = vmatpush1.msra.mxu1 %v7483_v1 }
0x1d7e   :  { %11064 = vmatmul.mubr.msk.f32.vlgmr.msra.gmra.mxu1 %vm508_vm0, %v16174_v13  ;;  %7846 = vmatprep.subr.mxu1 %v7829_v42 }
0x1d7f   :  { %7675 = vmatprep.mubr.f32.mxu1 %v14856_v41  ;;  %7847 = vmatpush1.msra.mxu1 %v7828_v49  ;;  %v7602_v49 = vpop.f32.mrf.mxu0 }
0x1d80   :  { %7848 = vmatprep.subr.mxu1 %v7827_v3 }
0x1d81   :  { %7849 = vmatpush1.msra.mxu1 %v7826_v4 }
0x1d82   :  { %11065 = vmatmul.mubr.msk.f32.gmra.mxu1 %vm508_vm0, %v16172_v25  ;;  %7850 = vmatprep.subr.mxu1 %v7825_v7 }
0x1d83   :  { %7681 = vmatprep.mubr.f32.mxu1 %v14856_v41  ;;  %7851 = vmatpush1.msra.mxu1 %v7824_v10 }
0x1d84   :  { %7852 = vmatprep.subr.mxu1 %v7823_v12 }
0x1d85   :  { %7853 = vmatpush1.msra.mxu1 %v7822_v23 }
0x1d86   :  { %11066 = vmatmul.mubr.msk.f32.gmra.mxu1 %vm508_vm0, %v16184_v2  ;;  %7854 = vmatprep.subr.mxu1 %v7821_v31 }
0x1d87   :  { %7687 = vmatprep.mubr.f32.mxu1 %v14856_v41  ;;  %7855 = vmatpush1.msra.mxu1 %v7820_v60 }
0x1d88   :  { %7856 = vmatprep.subr.mxu1 %v7819_v59 }
0x1d89   :  { %7857 = vmatpush1.msra.mxu1 %v7818_v45  ;;  %v7695_v45 = vld [vmem:[#allocation23 + $0x30] sm:$0xff] }
0x1d8a   :  { %11067 = vmatmul.mubr.msk.f32.gmra.mxu1 %vm508_vm0, %v16179_v62  ;;  %7858 = vmatprep.subr.mxu1 %v7817_v50  ;;  %v7812_v50 = vld [vmem:[#allocation25 + $0x1f8] sm:$0xff] }
0x1d8b   :  { %7894 = vmatprep.mubr.f32.mxu1 %v14856_v41  ;;  %7859 = vmatpush1.msra.mxu1 %v7816_v53  ;;  %v7811_v53 = vld [vmem:[#allocation25 + $0x1f0] sm:$0xff] }
0x1d8c   :  { %7860 = vmatprep.subr.mxu1 %v7815_v32  ;;  %v7810_v32 = vld [vmem:[#allocation25 + $0x1e8] sm:$0xff] }
0x1d8d   :  { %7861 = vmatpush1.msra.mxu1 %v7814_v28  ;;  %v7809_v28 = vld [vmem:[#allocation25 + $0x1e0] sm:$0xff] }
0x1d8e   :  { %11071 = vmatmul.mubr.msk.f32.vlgmr.msra.gmra.mxu1 %vm508_vm0, %v16137_v36 }
0x1d8f   :  { %7900 = vmatprep.mubr.f32.mxu1 %v14856_v41 }
0x1d92   :  { %11072 = vmatmul.mubr.msk.f32.gmra.mxu1 %vm508_vm0, %v16143_v37 }
0x1d93   :  { %7906 = vmatprep.mubr.f32.mxu1 %v14856_v41 }
0x1d96   :  { %11073 = vmatmul.mubr.msk.f32.gmra.mxu1 %vm508_vm0, %v16149_v6 }
0x1d97   :  { %7912 = vmatprep.mubr.f32.mxu1 %v14856_v41 }
0x1d9a   :  { %11074 = vmatmul.mubr.msk.f32.gmra.mxu1 %vm508_vm0, %v16155_v27 }
0x1d9b   :  { %8085 = vmatprep.mubr.f32.mxu1 %v14856_v41 }
0x1e22   :  { %v7373_v47 = vpop.f32.mrf.mxu1 }
0x1e24   :  { %v7375_v29 = vpop.f32.mrf.mxu1 }
0x1e26   :  { %v7379_v58 = vpop.f32.mrf.mxu1 }
0x1e28   :  { %v7381_v24 = vpop.f32.mrf.mxu1 }
0x1e2a   :  { %v7385_v9 = vpop.f32.mrf.mxu1 }
0x1e2c   :  { %v7387_v30 = vpop.f32.mrf.mxu1 }
0x1e2e   :  { %v7465_v34 = vpop.f32.mrf.mxu1 }
0x1e2f   :  { %v16255_v57 = vadd.f32 %v7465_v34, %v7373_v47  ;;  %v7696_v47 = vld [vmem:[#allocation23 + $0x38] sm:$0xff]  ;;  %v7804_v34 = vld [vmem:[#allocation25 + $0x1b8] sm:$0xff] }
0x1e30   :  { %v7467_v15 = vpop.f32.mrf.mxu1 }
0x1e31   :  { %v16257_v51 = vadd.f32 %v7467_v15, %v7375_v29  ;;  %v7808_v29 = vld [vmem:[#allocation25 + $0x1d8] sm:$0xff]  ;;  %v7803_v15 = vld [vmem:[#allocation25 + $0x1b0] sm:$0xff] }
0x1e32   :  { %v7471_v40 = vpop.f32.mrf.mxu1 }
0x1e33   :  { %v16259_v14 = vadd.f32 %v7471_v40, %v7379_v58  ;;  %v7807_v58 = vld [vmem:[#allocation25 + $0x1d0] sm:$0xff]  ;;  %v7801_v40 = vld [vmem:[#allocation25 + $0x1a0] sm:$0xff] }
0x1e34   :  { %v7473_v5 = vpop.f32.mrf.mxu1 }
0x1e35   :  { %v16261_v38 = vadd.f32 %v7473_v5, %v7381_v24  ;;  %v7806_v24 = vld [vmem:[#allocation25 + $0x1c8] sm:$0xff]  ;;  %v7800_v5 = vld [vmem:[#allocation25 + $0x198] sm:$0xff] }
0x1e36   :  { %v7477_v44 = vpop.f32.mrf.mxu1 }
0x1e37   :  { %v16263_v46 = vadd.f32 %v7477_v44, %v7385_v9  ;;  %v7805_v9 = vld [vmem:[#allocation25 + $0x1c0] sm:$0xff]  ;;  %v7798_v44 = vld [vmem:[#allocation25 + $0x188] sm:$0xff] }
0x1e38   :  { %v7479_v11 = vpop.f32.mrf.mxu1 }
0x1e39   :  { %v16265_v35 = vadd.f32 %v7479_v11, %v7387_v30  ;;  %v7697_v30 = vld [vmem:[#allocation23 + $0x40] sm:$0xff]  ;;  %v7797_v11 = vld [vmem:[#allocation25 + $0x180] sm:$0xff] }
0x1e3e   :  { %v7671_v21 = vpop.f32.mrf.mxu1 }
0x1e3f   :  { %v7672_v59 = vadd.f32 %v7671_v21, %v7582_v20  ;;  %v7802_v20 = vld [vmem:[#allocation25 + $0x1a8] sm:$0xff] }
0x1e40   :  { %v7673_v26 = vpop.f32.mrf.mxu1  ;;  %v8141_v21 = vld [vmem:[#allocation26 + $0x268] sm:$0xff] }
0x1e41   :  { %v7674_v60 = vadd.f32 %v7673_v26, %v7584_v8  ;;  %v7799_v8 = vld [vmem:[#allocation25 + $0x190] sm:$0xff]  ;;  %v8140_v26 = vld [vmem:[#allocation26 + $0x260] sm:$0xff] }
0x1e42   :  { %v7677_v33 = vpop.f32.mrf.mxu1 }
0x1e43   :  { %v7678_v31 = vadd.f32 %v7677_v33, %v7588_v48  ;;  %v8143_v48 = vld [vmem:[#allocation26 + $0x278] sm:$0xff]  ;;  %v8138_v33 = vld [vmem:[#allocation26 + $0x250] sm:$0xff] }
0x1e44   :  { %v7679_v61 = vpop.f32.mrf.mxu1 }
0x1e45   :  { %v7680_v23 = vadd.f32 %v7679_v61, %v7590_v56  ;;  %v8142_v56 = vld [vmem:[#allocation26 + $0x270] sm:$0xff]  ;;  %v8137_v61 = vld [vmem:[#allocation26 + $0x248] sm:$0xff] }
0x1e46   :  { %v7683_v16 = vpop.f32.mrf.mxu1 }
0x1e47   :  { %v7684_v12 = vadd.f32 %v7683_v16, %v7594_v18  ;;  %v8139_v18 = vld [vmem:[#allocation26 + $0x258] sm:$0xff] }
0x1e48   :  { %v7685_v1 = vpop.f32.mrf.mxu1  ;;  %v8135_v16 = vld [vmem:[#allocation26 + $0x238] sm:$0xff] }
0x1e49   :  { %v7686_v10 = vadd.f32 %v7685_v1, %v7596_v19  ;;  %v8136_v19 = vld [vmem:[#allocation26 + $0x240] sm:$0xff]  ;;  %v8133_v1 = vld [vmem:[#allocation26 + $0x228] sm:$0xff] }
0x1e4a   :  { %v7689_v42 = vpop.f32.mrf.mxu1 }
0x1e4b   :  { %v7690_v7 = vadd.f32 %v7689_v42, %v7600_v0  ;;  %v8134_v0 = vld [vmem:[#allocation26 + $0x230] sm:$0xff]  ;;  %v8132_v42 = vld [vmem:[#allocation26 + $0x220] sm:$0xff] }
0x1e4c   :  { %v7691_v3 = vpop.f32.mrf.mxu1 }
0x1e4d   :  { %v7692_v4 = vadd.f32 %v7691_v3, %v7602_v49  ;;  %v8131_v49 = vld [vmem:[#allocation26 + $0x218] sm:$0xff]  ;;  %v8130_v3 = vld [vmem:[#allocation26 + $0x210] sm:$0xff] }
0x1e4f   :  { %7731 = vmatprep.subr.mxu0 %v7692_v4  ;;  %v8129_v4 = vld [vmem:[#allocation26 + $0x208] sm:$0xff] }
0x1e50   :  { %7732 = vmatpush1.msra.mxu0 %v7690_v7  ;;  %v8128_v7 = vld [vmem:[#allocation26 + $0x200] sm:$0xff] }
0x1e51   :  { %7733 = vmatprep.subr.mxu0 %v7686_v10 }
0x1e52   :  { %7734 = vmatpush1.msra.mxu0 %v7684_v12 }
0x1e53   :  { %7735 = vmatprep.subr.mxu0 %v7680_v23  ;;  %v7896_v23 = vpop.f32.mrf.mxu1 }
0x1e54   :  { %7736 = vmatpush1.msra.mxu0 %v7678_v31 }
0x1e55   :  { %7737 = vmatprep.subr.mxu0 %v7674_v60 }
0x1e56   :  { %7738 = vmatpush1.msra.mxu0 %v7672_v59  ;;  %v7898_v59 = vpop.f32.mrf.mxu1 }
0x1e57   :  { %11068 = vmatmul.mubr.msk.f32.vlgmr.msra.gmra.mxu0 %vm709_vm1, %v7695_v45  ;;  %7935 = vmatprep.subr.mxu0 %v7812_v50 }
0x1e58   :  { %7936 = vmatpush1.msra.mxu0 %v7811_v53  ;;  %7777 = vmatprep.mubr.f32.mxu0 %v14856_v41  ;;  %v7902_v53 = vpop.f32.mrf.mxu1 }
0x1e59   :  { %7937 = vmatprep.subr.mxu0 %v7810_v32 }
0x1e5a   :  { %7938 = vmatpush1.msra.mxu0 %v7809_v28 }
0x1e5b   :  { %11069 = vmatmul.mubr.msk.f32.gmra.mxu0 %vm709_vm1, %v7696_v47  ;;  %7939 = vmatprep.subr.mxu0 %v7808_v29 }
0x1e5c   :  { %7940 = vmatpush1.msra.mxu0 %v7807_v58  ;;  %7783 = vmatprep.mubr.f32.mxu0 %v14856_v41 }
0x1e5d   :  { %7941 = vmatprep.subr.mxu0 %v7806_v24 }
0x1e5e   :  { %7942 = vmatpush1.msra.mxu0 %v7805_v9 }
0x1e5f   :  { %11070 = vmatmul.mubr.msk.f32.gmra.mxu0 %vm709_vm1, %v7697_v30  ;;  %7943 = vmatprep.subr.mxu0 %v7804_v34 }
0x1e60   :  { %7944 = vmatpush1.msra.mxu0 %v7803_v15  ;;  %7983 = vmatprep.mubr.f32.mxu0 %v14856_v41 }
0x1e61   :  { %7945 = vmatprep.subr.mxu0 %v7802_v20 }
0x1e62   :  { %7946 = vmatpush1.msra.mxu0 %v7801_v40 }
0x1e63   :  { %7947 = vmatprep.subr.mxu0 %v7800_v5 }
0x1e64   :  { %7948 = vmatpush1.msra.mxu0 %v7799_v8 }
0x1e65   :  { %7949 = vmatprep.subr.mxu0 %v7798_v44 }
0x1e66   :  { %7950 = vmatpush1.msra.mxu0 %v7797_v11 }
0x1e67   :  { %11075 = vmatmul.mubr.msk.f32.vlgmr.msra.gmra.mxu0 %vm508_vm0, %v16174_v13  ;;  %8160 = vmatprep.subr.mxu0 %v8143_v48 }
0x1e68   :  { %7989 = vmatprep.mubr.f32.mxu0 %v14856_v41  ;;  %8161 = vmatpush1.msra.mxu0 %v8142_v56  ;;  %v8009_v56 = vld [vmem:[#allocation23 + $0x48] sm:$0xff] }
0x1e69   :  { %8162 = vmatprep.subr.mxu0 %v8141_v21  ;;  %v8126_v21 = vld [vmem:[#allocation25 + $0x278] sm:$0xff] }
0x1e6a   :  { %8163 = vmatpush1.msra.mxu0 %v8140_v26  ;;  %v8125_v26 = vld [vmem:[#allocation25 + $0x270] sm:$0xff] }
0x1e6b   :  { %11076 = vmatmul.mubr.msk.f32.gmra.mxu0 %vm508_vm0, %v16172_v25  ;;  %8164 = vmatprep.subr.mxu0 %v8139_v18  ;;  %v8124_v18 = vld [vmem:[#allocation25 + $0x268] sm:$0xff] }
0x1e6c   :  { %7995 = vmatprep.mubr.f32.mxu0 %v14856_v41  ;;  %8165 = vmatpush1.msra.mxu0 %v8138_v33  ;;  %v8123_v33 = vld [vmem:[#allocation25 + $0x260] sm:$0xff] }
0x1e6d   :  { %8166 = vmatprep.subr.mxu0 %v8137_v61  ;;  %v8010_v61 = vld [vmem:[#allocation23 + $0x50] sm:$0xff] }
0x1e6e   :  { %8167 = vmatpush1.msra.mxu0 %v8136_v19  ;;  %v8122_v19 = vld [vmem:[#allocation25 + $0x258] sm:$0xff] }
0x1e6f   :  { %11077 = vmatmul.mubr.msk.f32.gmra.mxu0 %vm508_vm0, %v16184_v2  ;;  %8168 = vmatprep.subr.mxu0 %v8135_v16  ;;  %v8121_v16 = vld [vmem:[#allocation25 + $0x250] sm:$0xff] }
0x1e70   :  { %8001 = vmatprep.mubr.f32.mxu0 %v14856_v41  ;;  %8169 = vmatpush1.msra.mxu0 %v8134_v0  ;;  %v8120_v0 = vld [vmem:[#allocation25 + $0x248] sm:$0xff] }
0x1e71   :  { %8170 = vmatprep.subr.mxu0 %v8133_v1  ;;  %v8119_v1 = vld [vmem:[#allocation25 + $0x240] sm:$0xff] }
0x1e72   :  { %8171 = vmatpush1.msra.mxu0 %v8132_v42  ;;  %v8011_v42 = vld [vmem:[#allocation23 + $0x58] sm:$0xff] }
0x1e73   :  { %11078 = vmatmul.mubr.msk.f32.gmra.mxu0 %vm508_vm0, %v16179_v62  ;;  %8172 = vmatprep.subr.mxu0 %v8131_v49  ;;  %v8118_v49 = vld [vmem:[#allocation25 + $0x238] sm:$0xff] }
0x1e74   :  { %8208 = vmatprep.mubr.f32.mxu0 %v14856_v41  ;;  %8173 = vmatpush1.msra.mxu0 %v8130_v3  ;;  %v8117_v3 = vld [vmem:[#allocation25 + $0x230] sm:$0xff] }
0x1e75   :  { %8174 = vmatprep.subr.mxu0 %v8129_v4  ;;  %v8116_v4 = vld [vmem:[#allocation25 + $0x228] sm:$0xff] }
0x1e76   :  { %8175 = vmatpush1.msra.mxu0 %v8128_v7  ;;  %v8115_v7 = vld [vmem:[#allocation25 + $0x220] sm:$0xff] }
0x1e77   :  { %11082 = vmatmul.mubr.msk.f32.vlgmr.msra.gmra.mxu0 %vm508_vm0, %v16137_v36 }
0x1e78   :  { %8214 = vmatprep.mubr.f32.mxu0 %v14856_v41 }
0x1e7b   :  { %11083 = vmatmul.mubr.msk.f32.gmra.mxu0 %vm508_vm0, %v16143_v37 }
0x1e7c   :  { %8220 = vmatprep.mubr.f32.mxu0 %v14856_v41 }
0x1e7f   :  { %11084 = vmatmul.mubr.msk.f32.gmra.mxu0 %vm508_vm0, %v16149_v6 }
0x1e80   :  { %8226 = vmatprep.mubr.f32.mxu0 %v14856_v41 }
0x1e83   :  { %11085 = vmatmul.mubr.msk.f32.gmra.mxu0 %vm508_vm0, %v16155_v27 }
0x1e84   :  { %8399 = vmatprep.mubr.f32.mxu0 %v14856_v41 }
0x1f17   :  { %v7773_v10 = vpop.f32.mrf.mxu0 }
0x1f18   :  { %v16298_v36 = vadd.f32 %v7773_v10, %v16255_v57  ;;  %v8114_v10 = vld [vmem:[#allocation25 + $0x218] sm:$0xff] }
0x1f19   :  { %v7775_v12 = vpop.f32.mrf.mxu0 }
0x1f1a   :  { %v16301_v37 = vadd.f32 %v7775_v12, %v16257_v51  ;;  %v7904_v51 = vpop.f32.mrf.mxu1  ;;  %v8113_v12 = vld [vmem:[#allocation25 + $0x210] sm:$0xff] }
0x1f1b   :  { %v7779_v31 = vpop.f32.mrf.mxu0 }
0x1f1c   :  { %v16304_v60 = vadd.f32 %v7779_v31, %v16259_v14  ;;  %v7908_v29 = vpop.f32.mrf.mxu1  ;;  %v8111_v31 = vld [vmem:[#allocation25 + $0x200] sm:$0xff] }
0x1f1d   :  { %v7781_v6 = vpop.f32.mrf.mxu0 }
0x1f1e   :  { %v16307_v45 = vadd.f32 %v7781_v6, %v16261_v38  ;;  %v7910_v24 = vpop.f32.mrf.mxu1  ;;  %v16333_v6 = vld [vmem:[#allocation29 + $0x78] sm:$0xff] }
0x1f1f   :  { %v7785_v27 = vpop.f32.mrf.mxu0 }
0x1f20   :  { %v16310_v50 = vadd.f32 %v7785_v27, %v16263_v46  ;;  %v7914_v30 = vpop.f32.mrf.mxu1  ;;  %v16355_v27 = vld [vmem:[#allocation29 + $0x48] sm:$0xff] }
0x1f21   :  { %v7787_v57 = vpop.f32.mrf.mxu0 }
0x1f22   :  { %v16313_v32 = vadd.f32 %v7787_v57, %v16265_v35  ;;  %v7916_v15 = vpop.f32.mrf.mxu1  ;;  %v16359_v57 = vld [vmem:[#allocation29 + $0x40] sm:$0xff] }
0x1f27   :  { %v7985_v28 = vpop.f32.mrf.mxu0 }
0x1f28   :  { %v7986_v48 = vadd.f32 %v7985_v28, %v7896_v23  ;;  %v8112_v23 = vld [vmem:[#allocation25 + $0x208] sm:$0xff] }
0x1f29   :  { %v7987_v47 = vpop.f32.mrf.mxu0 }
0x1f2a   :  { %v7988_v11 = vadd.f32 %v7987_v47, %v7898_v59  ;;  %v16339_v59 = vld [vmem:[#allocation29 + $0x68] sm:$0xff] }
0x1f2b   :  { %v7991_v14 = vpop.f32.mrf.mxu0 }
0x1f2c   :  { %v7992_v44 = vadd.f32 %v7991_v14, %v7902_v53 }
0x1f2d   :  { %v7993_v58 = vpop.f32.mrf.mxu0 }
0x1f2e   :  { %v7994_v35 = vadd.f32 %v7993_v58, %v7904_v51 }
0x1f2f   :  { %v7997_v9 = vpop.f32.mrf.mxu0 }
0x1f30   :  { %v7998_v8 = vadd.f32 %v7997_v9, %v7908_v29 }
0x1f31   :  { %v7999_v38 = vpop.f32.mrf.mxu0 }
0x1f32   :  { %v8000_v5 = vadd.f32 %v7999_v38, %v7910_v24 }
0x1f33   :  { %v8003_v34 = vpop.f32.mrf.mxu0 }
0x1f34   :  { %v8004_v40 = vadd.f32 %v8003_v34, %v7914_v30 }
0x1f35   :  { %v8005_v20 = vpop.f32.mrf.mxu0 }
0x1f36   :  { %v8006_v46 = vadd.f32 %v8005_v20, %v7916_v15 }
0x1f37   :  { %v8210_v47 = vpop.f32.mrf.mxu0 }
0x1f38   :  { %8045 = vmatprep.subr.mxu1 %v8006_v46 }
0x1f39   :  { %8046 = vmatpush1.msra.mxu1 %v8004_v40  ;;  %v8212_v9 = vpop.f32.mrf.mxu0 }
0x1f3a   :  { %8047 = vmatprep.subr.mxu1 %v8000_v5 }
0x1f3b   :  { %8048 = vmatpush1.msra.mxu1 %v7998_v8  ;;  %v8216_v15 = vpop.f32.mrf.mxu0 }
0x1f3c   :  { %8049 = vmatprep.subr.mxu1 %v7994_v35 }
0x1f3d   :  { %8050 = vmatpush1.msra.mxu1 %v7992_v44 }
0x1f3e   :  { %8051 = vmatprep.subr.mxu1 %v7988_v11 }
0x1f3f   :  { %8052 = vmatpush1.msra.mxu1 %v7986_v48 }
0x1f40   :  { %11079 = vmatmul.mubr.msk.f32.vlgmr.msra.gmra.mxu1 %vm709_vm1, %v8009_v56  ;;  %8249 = vmatprep.subr.mxu1 %v8126_v21 }
0x1f41   :  { %8250 = vmatpush1.msra.mxu1 %v8125_v26  ;;  %8091 = vmatprep.mubr.f32.mxu1 %v14856_v41 }
0x1f42   :  { %8251 = vmatprep.subr.mxu1 %v8124_v18 }
0x1f43   :  { %8252 = vmatpush1.msra.mxu1 %v8123_v33 }
0x1f44   :  { %11080 = vmatmul.mubr.msk.f32.gmra.mxu1 %vm709_vm1, %v8010_v61  ;;  %8253 = vmatprep.subr.mxu1 %v8122_v19 }
0x1f45   :  { %8254 = vmatpush1.msra.mxu1 %v8121_v16  ;;  %8097 = vmatprep.mubr.f32.mxu1 %v14856_v41 }
0x1f46   :  { %8255 = vmatprep.subr.mxu1 %v8120_v0  ;;  %v8323_v0 = vld [vmem:[#allocation23 + $0x60] sm:$0xff] }
0x1f47   :  { %8256 = vmatpush1.msra.mxu1 %v8119_v1  ;;  %v8324_v1 = vld [vmem:[#allocation23 + $0x68] sm:$0xff] }
0x1f48   :  { %11081 = vmatmul.mubr.msk.f32.gmra.mxu1 %vm709_vm1, %v8011_v42  ;;  %8257 = vmatprep.subr.mxu1 %v8118_v49  ;;  %v8325_v42 = vld [vmem:[#allocation23 + $0x70] sm:$0xff]  ;;  %v8431_v49 = vld [vmem:[#allocation29 + $0x38] sm:$0xff] }
0x1f49   :  { %8258 = vmatpush1.msra.mxu1 %v8117_v3  ;;  %8297 = vmatprep.mubr.f32.mxu1 %v14856_v41  ;;  %v8430_v3 = vld [vmem:[#allocation29 + $0x30] sm:$0xff] }
0x1f4a   :  { %8259 = vmatprep.subr.mxu1 %v8116_v4  ;;  %v8429_v4 = vld [vmem:[#allocation29 + $0x28] sm:$0xff] }
0x1f4b   :  { %8260 = vmatpush1.msra.mxu1 %v8115_v7  ;;  %v8428_v7 = vld [vmem:[#allocation29 + $0x20] sm:$0xff] }
0x1f4c   :  { %8261 = vmatprep.subr.mxu1 %v8114_v10  ;;  %v8427_v10 = vld [vmem:[#allocation29 + $0x18] sm:$0xff] }
0x1f4d   :  { %8262 = vmatpush1.msra.mxu1 %v8113_v12  ;;  %v8426_v12 = vld [vmem:[#allocation29 + $0x10] sm:$0xff] }
0x1f4e   :  { %8263 = vmatprep.subr.mxu1 %v8112_v23  ;;  %v8425_v23 = vld [vmem:[#allocation29 + $0x8] sm:$0xff] }
0x1f4f   :  { %8264 = vmatpush1.msra.mxu1 %v8111_v31  ;;  %v8424_v31 = vld [vmem:[#allocation29] sm:$0xff] }
0x1f50   :  { %11086 = vmatmul.mubr.msk.f32.vlgmr.msra.gmra.mxu1 %vm508_vm0, %v16174_v13  ;;  %8499 = vmatprep.subr.mxu1 %v14856_v41  ;;  %v16335_v13 = vld [vmem:[#allocation29 + $0x70] sm:$0xff] }
0x1f51   :  { %8303 = vmatprep.mubr.f32.mxu1 %v14856_v41  ;;  %8500 = vmatpush1.msra.mxu1 %v16333_v6 }
0x1f52   :  { %8501 = vmatprep.subr.mxu1 %v14856_v41 }
0x1f53   :  { %8502 = vmatpush1.msra.mxu1 %v16335_v13 }
0x1f54   :  { %11087 = vmatmul.mubr.msk.f32.gmra.mxu1 %vm508_vm0, %v16172_v25  ;;  %8503 = vmatprep.subr.mxu1 %v14856_v41  ;;  %v16343_v25 = vld [vmem:[#allocation29 + $0x60] sm:$0xff] }
0x1f55   :  { %8309 = vmatprep.mubr.f32.mxu1 %v14856_v41  ;;  %8504 = vmatpush1.msra.mxu1 %v16339_v59 }
0x1f56   :  { %8505 = vmatprep.subr.mxu1 %v14856_v41 }
0x1f57   :  { %8506 = vmatpush1.msra.mxu1 %v16343_v25 }
0x1f58   :  { %11088 = vmatmul.mubr.msk.f32.gmra.mxu1 %vm508_vm0, %v16184_v2  ;;  %8507 = vmatprep.subr.mxu1 %v14856_v41  ;;  %v16351_v2 = vld [vmem:[#allocation29 + $0x50] sm:$0xff] }
0x1f59   :  { %8315 = vmatprep.mubr.f32.mxu1 %v14856_v41 }
0x1f5c   :  { %11089 = vmatmul.mubr.msk.f32.gmra.mxu1 %vm508_vm0, %v16179_v62  ;;  %v16347_v62 = vld [vmem:[#allocation29 + $0x58] sm:$0xff] }
0x1f5d   :  { %8508 = vmatpush1.msra.mxu1 %v16347_v62 }
0x1f5e   :  { %8509 = vmatprep.subr.mxu1 %v14856_v41 }
0x1f5f   :  { %8510 = vmatpush1.msra.mxu1 %v16351_v2 }
0x1f60   :  { %8511 = vmatprep.subr.mxu1 %v14856_v41 }
0x1f61   :  { %8512 = vmatpush1.msra.mxu1 %v16355_v27 }
0x1f62   :  { %8513 = vmatprep.subr.mxu1 %v14856_v41 }
0x1f63   :  { %8514 = vmatpush1.msra.mxu1 %v16359_v57 }
0x1f64   :  { %8515 = vmatprep.subr.mxu1 %v14856_v41 }
0x1f65   :  { %8516 = vmatpush1.msra.mxu1 %v8431_v49 }
0x1f66   :  { %8517 = vmatprep.subr.mxu1 %v14856_v41 }
0x1f67   :  { %8518 = vmatpush1.msra.mxu1 %v8430_v3 }
0x1f68   :  { %8519 = vmatprep.subr.mxu1 %v14856_v41 }
0x1f69   :  { %8520 = vmatpush1.msra.mxu1 %v8429_v4 }
0x1f6a   :  { %8521 = vmatprep.subr.mxu1 %v14856_v41 }
0x1f6b   :  { %8522 = vmatpush1.msra.mxu1 %v8428_v7 }
0x1f6c   :  { %8523 = vmatprep.subr.mxu1 %v14856_v41 }
0x1f6d   :  { %8524 = vmatpush1.msra.mxu1 %v8427_v10 }
0x1f6e   :  { %8525 = vmatprep.subr.mxu1 %v14856_v41 }
0x1f6f   :  { %8526 = vmatpush1.msra.mxu1 %v8426_v12 }
0x1f70   :  { %8527 = vmatprep.subr.mxu1 %v14856_v41 }
0x1f71   :  { %8528 = vmatpush1.msra.mxu1 %v8425_v23 }
0x1f72   :  { %8529 = vmatprep.subr.mxu1 %v14856_v41 }
0x1f73   :  { %8530 = vmatpush1.msra.mxu1 %v8424_v31 }
0x1f74   :  { %8547 = vmatprep.subr.mxu1 %v14856_v41 }
0x2000   :  { %v8087_v53 = vpop.f32.mrf.mxu1 }
0x2001   :  { %v16366_v51 = vadd.f32 %v8087_v53, %v16298_v36  ;;  %v8451_v53 = vld [vmem:[#allocation31 + $0x18] sm:$0xff] }
0x2002   :  { %v8089_v28 = vpop.f32.mrf.mxu1 }
0x2003   :  { %v16369_v29 = vadd.f32 %v8089_v28, %v16301_v37  ;;  %v8218_v37 = vpop.f32.mrf.mxu0  ;;  %v8459_v28 = vsub.s32 4, %v15366_v17 }
0x2004   :  { %v8093_v14 = vpop.f32.mrf.mxu1 }
0x2005   :  { %v16372_v58 = vadd.f32 %v8093_v14, %v16304_v60  ;;  %v8222_v5 = vpop.f32.mrf.mxu0 }
0x2006   :  { %v8095_v24 = vpop.f32.mrf.mxu1 }
0x2007   :  { %v16375_v30 = vadd.f32 %v8095_v24, %v16307_v45  ;;  %v8224_v35 = vpop.f32.mrf.mxu0 }
0x2008   :  { %v8099_v38 = vpop.f32.mrf.mxu1 }
0x2009   :  { %v16378_v34 = vadd.f32 %v8099_v38, %v16310_v50  ;;  %v8228_v11 = vpop.f32.mrf.mxu0 }
0x200a   :  { %v8101_v36 = vpop.f32.mrf.mxu1 }
0x200b   :  { %v16381_v20 = vadd.f32 %v8101_v36, %v16313_v32  ;;  %v8230_v56 = vpop.f32.mrf.mxu0 }
0x2010   :  { %v8299_v46 = vpop.f32.mrf.mxu1 }
0x2011   :  { %v8300_v16 = vadd.f32 %v8299_v46, %v8210_v47  ;;  %v16436_v47 = vld [vmem:[#allocation28] sm:$0x77] }
0x2012   :  { %v8301_v40 = vpop.f32.mrf.mxu1  ;;  %v8460_v14 = vrot.slane %v16436_v47, %v8459_v28 }
0x2013   :  { %v8302_v19 = vadd.f32 %v8301_v40, %v8212_v9  ;;  %v8456_v9 = vrot.slane %v16436_v47, %v15371_v22 }
0x2014   :  { %v8305_v60 = vpop.f32.mrf.mxu1 }
0x2015   :  { %v8306_v61 = vadd.f32 %v8305_v60, %v8216_v15  ;;  %v8470_v15 = vrot.slane %v8460_v14, %v15371_v22  ;;  %v8466_v46 = vrot.slane %v8456_v9, %v15371_v22 }
0x2016   :  { %v8307_v8 = vpop.f32.mrf.mxu1 }
0x2017   :  { %v8308_v32 = vadd.f32 %v8307_v8, %v8218_v37 }
0x2018   :  { %v8311_v44 = vpop.f32.mrf.mxu1 }
0x2019   :  { %v8312_v33 = vadd.f32 %v8311_v44, %v8222_v5 }
0x201a   :  { %v8313_v45 = vpop.f32.mrf.mxu1 }
0x201b   :  { %v8314_v18 = vadd.f32 %v8313_v45, %v8224_v35 }
0x201c   :  { %v8317_v48 = vpop.f32.mrf.mxu1 }
0x201d   :  { %v8318_v26 = vadd.f32 %v8317_v48, %v8228_v11 }
0x201e   :  { %v8319_v21 = vpop.f32.mrf.mxu1 }
0x201f   :  { %v8320_v50 = vadd.f32 %v8319_v21, %v8230_v56 }
0x2021   :  { %8359 = vmatprep.subr.mxu0 %v8320_v50 }
0x2022   :  { %8360 = vmatpush1.msra.mxu0 %v8318_v26 }
0x2023   :  { %8361 = vmatprep.subr.mxu0 %v8314_v18 }
0x2024   :  { %8362 = vmatpush1.msra.mxu0 %v8312_v33 }
0x2025   :  { %8363 = vmatprep.subr.mxu0 %v8308_v32 }
0x2026   :  { %8364 = vmatpush1.msra.mxu0 %v8306_v61 }
0x2027   :  { %8365 = vmatprep.subr.mxu0 %v8302_v19 }
0x2028   :  { %8366 = vmatpush1.msra.mxu0 %v8300_v16 }
0x2029   :  { %11090 = vmatmul.mubr.msk.f32.vlgmr.msra.gmra.mxu0 %vm709_vm1, %v8323_v0  ;;  %8597 = vmatprep.subr.mxu0 %v14856_v41 }
0x202a   :  { %8405 = vmatprep.mubr.f32.mxu0 %v14856_v41  ;;  %8598 = vmatpush1.msra.mxu0 %v16333_v6  ;;  %v8447_v6 = vld [vmem:[#allocation29 + $0xb8] sm:$0xff] }
0x202b   :  { %8599 = vmatprep.subr.mxu0 %v14856_v41  ;;  %8548 = vmatpush2.msra.mxu1 %v8447_v6 }
0x202c   :  { %8600 = vmatpush1.msra.mxu0 %v16335_v13  ;;  %8549 = vmatprep.subr.mxu1 %v14856_v41  ;;  %v8446_v13 = vld [vmem:[#allocation29 + $0xb0] sm:$0xff] }
0x202d   :  { %11091 = vmatmul.mubr.msk.f32.gmra.mxu0 %vm709_vm1, %v8324_v1  ;;  %8601 = vmatprep.subr.mxu0 %v14856_v41 }
0x202e   :  { %8411 = vmatprep.mubr.f32.mxu0 %v14856_v41  ;;  %8602 = vmatpush1.msra.mxu0 %v16339_v59  ;;  %v8445_v59 = vld [vmem:[#allocation29 + $0xa8] sm:$0xff] }
0x202f   :  { %8603 = vmatprep.subr.mxu0 %v14856_v41  ;;  %8550 = vmatpush2.msra.mxu1 %v8446_v13 }
0x2030   :  { %8604 = vmatpush1.msra.mxu0 %v16343_v25  ;;  %8551 = vmatprep.subr.mxu1 %v14856_v41  ;;  %v8444_v25 = vld [vmem:[#allocation29 + $0xa0] sm:$0xff] }
0x2031   :  { %11092 = vmatmul.mubr.msk.f32.gmra.mxu0 %vm709_vm1, %v8325_v42  ;;  %8605 = vmatprep.subr.mxu0 %v14856_v41 }
0x2032   :  { %8606 = vmatpush1.msra.mxu0 %v16347_v62  ;;  %8552 = vmatpush2.msra.mxu1 %v8445_v59  ;;  %v8443_v62 = vld [vmem:[#allocation29 + $0x98] sm:$0xff] }
0x2033   :  { %8607 = vmatprep.subr.mxu0 %v14856_v41  ;;  %8553 = vmatprep.subr.mxu1 %v14856_v41 }
0x2034   :  { %8608 = vmatpush1.msra.mxu0 %v16351_v2  ;;  %8554 = vmatpush2.msra.mxu1 %v8444_v25  ;;  %v8442_v2 = vld [vmem:[#allocation29 + $0x90] sm:$0xff] }
0x2035   :  { %8609 = vmatprep.subr.mxu0 %v14856_v41  ;;  %8555 = vmatprep.subr.mxu1 %v14856_v41 }
0x2036   :  { %8610 = vmatpush1.msra.mxu0 %v16355_v27  ;;  %8556 = vmatpush2.msra.mxu1 %v8443_v62  ;;  %v8441_v27 = vld [vmem:[#allocation29 + $0x88] sm:$0xff] }
0x2037   :  { %8611 = vmatprep.subr.mxu0 %v14856_v41  ;;  %8557 = vmatprep.subr.mxu1 %v14856_v41 }
0x2038   :  { %8612 = vmatpush1.msra.mxu0 %v16359_v57  ;;  %8558 = vmatpush2.msra.mxu1 %v8442_v2  ;;  %v8440_v57 = vld [vmem:[#allocation29 + $0x80] sm:$0xff] }
0x2039   :  { %8613 = vmatprep.subr.mxu0 %v14856_v41  ;;  %8559 = vmatprep.subr.mxu1 %v14856_v41 }
0x203a   :  { %8614 = vmatpush1.msra.mxu0 %v8431_v49  ;;  %8560 = vmatpush2.msra.mxu1 %v8441_v27 }
0x203b   :  { %8615 = vmatprep.subr.mxu0 %v14856_v41  ;;  %8561 = vmatprep.subr.mxu1 %v14856_v41 }
0x203c   :  { %8616 = vmatpush1.msra.mxu0 %v8430_v3  ;;  %8562 = vmatpush2.msra.mxu1 %v8440_v57 }
0x203d   :  { %8617 = vmatprep.subr.mxu0 %v14856_v41  ;;  %8705 = vmatprep.subr.mxu1 %v8451_v53 }
0x203e   :  { %8618 = vmatpush1.msra.mxu0 %v8429_v4 }
0x203f   :  { %8619 = vmatprep.subr.mxu0 %v14856_v41 }
0x2040   :  { %8620 = vmatpush1.msra.mxu0 %v8428_v7 }
0x2041   :  { %8621 = vmatprep.subr.mxu0 %v14856_v41 }
0x2042   :  { %8622 = vmatpush1.msra.mxu0 %v8427_v10 }
0x2043   :  { %8623 = vmatprep.subr.mxu0 %v14856_v41 }
0x2044   :  { %8624 = vmatpush1.msra.mxu0 %v8426_v12 }
0x2045   :  { %8625 = vmatprep.subr.mxu0 %v14856_v41 }
0x2046   :  { %8626 = vmatpush1.msra.mxu0 %v8425_v23 }
0x2047   :  { %8627 = vmatprep.subr.mxu0 %v14856_v41 }
0x2048   :  { %8628 = vmatpush1.msra.mxu0 %v8424_v31 }
0x2049   :  { %8645 = vmatprep.subr.mxu0 %v14856_v41 }
0x204a   :  { %8646 = vmatpush2.msra.mxu0 %v8447_v6 }
0x204b   :  { %8647 = vmatprep.subr.mxu0 %v14856_v41 }
0x204c   :  { %8648 = vmatpush2.msra.mxu0 %v8446_v13 }
0x204d   :  { %8649 = vmatprep.subr.mxu0 %v14856_v41 }
0x204e   :  { %8650 = vmatpush2.msra.mxu0 %v8445_v59 }
0x204f   :  { %8651 = vmatprep.subr.mxu0 %v14856_v41 }
0x2050   :  { %8652 = vmatpush2.msra.mxu0 %v8444_v25 }
0x2051   :  { %8653 = vmatprep.subr.mxu0 %v14856_v41 }
0x2052   :  { %8654 = vmatpush2.msra.mxu0 %v8443_v62 }
0x2053   :  { %8655 = vmatprep.subr.mxu0 %v14856_v41 }
0x2054   :  { %8656 = vmatpush2.msra.mxu0 %v8442_v2 }
0x2055   :  { %8657 = vmatprep.subr.mxu0 %v14856_v41 }
0x2056   :  { %8658 = vmatpush2.msra.mxu0 %v8441_v27 }
0x2057   :  { %8659 = vmatprep.subr.mxu0 %v14856_v41 }
0x2058   :  { %8660 = vmatpush2.msra.mxu0 %v8440_v57 }
0x2059   :  { %8779 = vmatprep.subr.mxu0 %v8451_v53 }
0x20e9   :  { %v8401_v24 = vpop.f32.mrf.mxu0 }
0x20ea   :  { %v8418_v37 = vadd.f32 %v8401_v24, %v16366_v51 }
0x20eb   :  { %v8403_v38 = vpop.f32.mrf.mxu0 }
0x20ec   :  { %v8419_v36 = vadd.f32 %v8403_v38, %v16369_v29  ;;  %v16451_v11 = vadd.f32 %v8466_v46, %v8418_v37 }
0x20ed   :  { %v8407_v40 = vpop.f32.mrf.mxu0 }
0x20ee   :  { %v8420_v5 = vadd.f32 %v8407_v40, %v16372_v58  ;;  %v16446_v8 = vadd.f32 %v8470_v15, %v8419_v36  ;;  %v8569_v26 = vmul.f32 %v16451_v11, %v16451_v11 }
0x20ef   :  { %v8409_v60 = vpop.f32.mrf.mxu0 }
0x20f0   :  { %v16448_v35 = vadd.f32 %v8466_v46, %v8420_v5  ;;  %v8421_v44 = vadd.f32 %v8409_v60, %v16375_v30  ;;  %v8570_v58 = vmul.f32 %v16446_v8, %v16446_v8 }
0x20f1   :  { %v8413_v45 = vpop.f32.mrf.mxu0 }
0x20f2   :  { %v16453_v29 = vadd.f32 %v8470_v15, %v8421_v44  ;;  %v8571_v51 = vmul.f32 %v16448_v35, %v16448_v35  ;;  %v8422_v48 = vadd.f32 %v8413_v45, %v16378_v34  ;;  %v8477_v18 = vadd.f32 %v16448_v35, %v16451_v11  ;;  %v8450_v45 = vld [vmem:[#allocation31 + $0x10] sm:$0xff] }
0x20f3   :  { %v8415_v56 = vpop.f32.mrf.mxu0  ;;  %v8485_v34 = vsel %vm508_vm0, %v16446_v8, 0.0  ;;  %v8583_v1 = vsel %vm508_vm0, %v8570_v58, 0.0 }
0x20f4   :  { %v8486_v21 = vsel %vm508_vm0, %v16453_v29, 0.0  ;;  %v8572_v30 = vmul.f32 %v16453_v29, %v16453_v29  ;;  %v8423_v50 = vadd.f32 %v8415_v56, %v16381_v20  ;;  %v16469_v33 = vadd.f32 %v8466_v46, %v8422_v48  ;;  %v8448_v48 = vld [vmem:[#allocation31] sm:$0xff] }
0x20f5   :  { %v8575_v19 = vadd.f32 %v8571_v51, %v8569_v26  ;;  %v8487_v16 = vadd.f32 %v8486_v21, %v8485_v34  ;;  %v8449_v51 = vld [vmem:[#allocation31 + $0x8] sm:$0xff] }
0x20f6   :  { %v8584_v32 = vsel %vm508_vm0, %v8572_v30, 0.0  ;;  %v16474_v61 = vadd.f32 %v8470_v15, %v8423_v50  ;;  %v8478_v0 = vadd.f32 %v8477_v18, %v16469_v33  ;;  %v8573_v20 = vmul.f32 %v16469_v33, %v16469_v33 }
0x20f7   :  { %v8585_v3 = vadd.f32 %v8584_v32, %v8583_v1  ;;  %v11109_v1 = vld [vmem:[%s16833_s18 + $0xb0] sm:$0xff] }
0x20f8   :  { %v8488_v42 = vsel %vm508_vm0, %v16474_v61, 0.0  ;;  %v8574_v49 = vmul.f32 %v16474_v61, %v16474_v61  ;;  %v8479_v4 = vrot.slane %v8478_v0, 4  ;;  %v8576_v7 = vadd.f32 %v8575_v19, %v8573_v20  ;;  %v8952_v20 = vld [vmem:[%s16833_s18 + $0x50] sm:$0xff] }
0x20f9   :  { %v8489_v10 = vadd.f32 %v8488_v42, %v8487_v16  ;;  %v8953_v16 = vld [vmem:[%s16833_s18 + $0x58] sm:$0xff]  ;;  %v8951_v42 = vld [vmem:[%s16833_s18 + $0x48] sm:$0xff] }
0x20fa   :  { %v8586_v12 = vsel %vm508_vm0, %v8574_v49, 0.0  ;;  %v8480_v23 = vadd.f32 %v8479_v4, %v8478_v0  ;;  %v8577_v31 = vrot.slane %v8576_v7, 4  ;;  %v11110_v0 = vld [vmem:[%s16833_s18 + $0xb8] sm:$0xff]  ;;  %v11108_v49 = vld [vmem:[%s16833_s18 + $0xa8] sm:$0xff]  ;;  %v11107_v4 = vld [vmem:[%s16833_s18 + $0xa0] sm:$0xff] }
0x20fb   :  { %v8490_v6 = vrot.slane %v8489_v10, 4  ;;  %v8587_v13 = vadd.f32 %v8586_v12, %v8585_v3  ;;  %v8950_v3 = vld [vmem:[%s16833_s18 + $0x40] sm:$0xff]  ;;  %v8948_v12 = vld [vmem:[%s16833_s18 + $0x30] sm:$0xff] }
0x20fc   :  { %v8481_v59 = vrot.slane %v8480_v23, 2  ;;  %v8578_v25 = vadd.f32 %v8577_v31, %v8576_v7  ;;  %v8949_v7 = vld [vmem:[%s16833_s18 + $0x38] sm:$0xff]  ;;  %v8947_v31 = vld [vmem:[%s16833_s18 + $0x28] sm:$0xff] }
0x20fd   :  { %v8491_v62 = vadd.f32 %v8490_v6, %v8489_v10  ;;  %v8588_v2 = vrot.slane %v8587_v13, 4  ;;  %v11106_v10 = vld [vmem:[%s16833_s18 + $0x98] sm:$0xff]  ;;  %v11104_v6 = vld [vmem:[%s16833_s18 + $0x88] sm:$0xff] }
0x20fe   :  { %v8482_v27 = vadd.f32 %v8481_v59, %v8480_v23  ;;  %v8579_v57 = vrot.slane %v8578_v25, 2  ;;  %v11105_v23 = vld [vmem:[%s16833_s18 + $0x90] sm:$0xff]  ;;  %v11103_v59 = vld [vmem:[%s16833_s18 + $0x80] sm:$0xff] }
0x20ff   :  { %v8492_v53 = vrot.slane %v8491_v62, 2  ;;  %v8589_v28 = vadd.f32 %v8588_v2, %v8587_v13  ;;  %v8946_v13 = vld [vmem:[%s16833_s18 + $0x20] sm:$0xff] }
0x2100   :  { %v8580_v14 = vadd.f32 %v8579_v57, %v8578_v25  ;;  %v8483_v38 = vrot.slane %v8482_v27, 1  ;;  %v8853_v57 = vrot.slane %v16436_v47, %v15413_v52 }
0x2101   :  { %v8493_v24 = vadd.f32 %v8492_v53, %v8491_v62  ;;  %v8590_v9 = vrot.slane %v8589_v28, 2  ;;  %v8856_v62 = vsub.s32 5, %v15366_v17  ;;  %v8880_v53 = vsub.s32 6, %v15366_v17 }
0x2102   :  { %v8581_v37 = vrot.slane %v8580_v14, 1  ;;  %v8484_v5 = vadd.f32 %v8483_v38, %v8482_v27 }
0x2103   :  { %v8494_v36 = vrot.slane %v8493_v24, 1  ;;  %v8591_v15 = vadd.f32 %v8590_v9, %v8589_v28  ;;  %v8857_v27 = vrot.slane %v16436_v47, %v8856_v62 }
0x2104   :  { %v8582_v44 = vadd.f32 %v8581_v37, %v8580_v14 }
0x2105   :  { %v8495_v46 = vadd.f32 %v8494_v36, %v8493_v24  ;;  %v8592_v40 = vrot.slane %v8591_v15, 1  ;;  %v8877_v24 = vrot.slane %v16436_v47, %v15417_v55  ;;  %v8867_v38 = vrot.slane %v8857_v27, %v15413_v52 }
0x2106   :  { %v8863_v36 = vrot.slane %v8853_v57, %v15413_v52 }
0x2107   :  { %11093 = vmatprep.mubr.msk.f32.mxu1 %vm508_vm0, %v8495_v46  ;;  %v8593_v60 = vadd.f32 %v8592_v40, %v8591_v15  ;;  %v8881_v15 = vrot.slane %v16436_v47, %v8880_v53 }
0x2108   :  { %8564 = vmatmul.mubr.f32.vlgmr.msra.gmra.mxu1 %v8484_v5 }
0x2109   :  { %11094 = vmatprep.mubr.msk.f32.mxu0 %vm508_vm0, %v8593_v60  ;;  %8741 = vmatprep.mubr.f32.mxu1 %v14856_v41 }
0x210a   :  { %8662 = vmatmul.mubr.f32.vlgmr.msra.gmra.mxu0 %v8582_v44  ;;  %8706 = vmatpush1.msra.mxu1 %v8450_v45 }
0x210b   :  { %8815 = vmatprep.mubr.f32.mxu0 %v14856_v41  ;;  %8780 = vmatpush1.msra.mxu0 %v8450_v45 }
0x210c   :  { %8707 = vmatprep.subr.mxu1 %v8449_v51  ;;  %8781 = vmatprep.subr.mxu0 %v8449_v51  ;;  %v8887_v51 = vrot.slane %v8877_v24, %v15417_v55 }
0x210d   :  { %8708 = vmatpush1.msra.mxu1 %v8448_v48  ;;  %8782 = vmatpush1.msra.mxu0 %v8448_v48 }
0x210e   :  { %13687 = vmatprep.subr.mxu1 %v8953_v16  ;;  %13714 = vmatprep.subr.mxu0 %v11110_v0 }
0x21c8   :  { %v8565_v56 = vpop.f32.mrf.mxu1 }
0x21c9   :  { %v8667_v58 = vmul.f32 0.0034722222, %v8565_v56 }
0x21ca   :  { %v8567_v21 = vpop.f32.mrf.mxu1  ;;  %v8663_v30 = vpop.f32.mrf.mxu0 }
0x21cb   :  { %v8669_v50 = vmul.f32 %v8667_v58, %v8667_v58  ;;  %v8668_v26 = vmul.f32 0.0034722222, %v8663_v30  ;;  %11095 = vmatmul.mubr.msk.f32.vlgmr.msra.gmra.mxu1 %vm8673_vm4, %v8667_v58  ;;  %v11102_v58 = vld [vmem:[%s16833_s18 + $0x78] sm:$0xff]  ;;  %v8891_v21 = vrot.slane %v8881_v15, %v15417_v55 }
0x21cc   :  { %v8665_v18 = vpop.f32.mrf.mxu0  ;;  %13688 = vmatpush3.msra.mxu1 %v8953_v16  ;;  %v8943_v16 = vld [vmem:[%s16833_s18 + $0x8] sm:$0xff] }
0x21cd   :  { %v8670_v34 = vsub.f32 %v8668_v26, %v8669_v50  ;;  %13689 = vmatprep.subr.mxu1 %v8952_v20 }
0x21ce   :  { %13690 = vmatpush3.msra.mxu1 %v8952_v20 }
0x21cf   :  { %v8671_v32 = vadd.f32 1e-05, %v8670_v34  ;;  %13691 = vmatprep.subr.mxu1 %v8951_v42 }
0x21d0   :  { %13692 = vmatpush3.msra.mxu1 %v8951_v42 }
0x21d1   :  { %14041 = vrsqrt.f32 %v8671_v32  ;;  %13693 = vmatprep.subr.mxu1 %v8950_v3 }
0x21d2   :  { %13694 = vmatpush3.msra.mxu1 %v8950_v3 }
0x21d3   :  { %13695 = vmatprep.subr.mxu1 %v8949_v7 }
0x21d4   :  { %13696 = vmatpush3.msra.mxu1 %v8949_v7  ;;  %v8942_v7 = vld [vmem:[%s16833_s18] sm:$0xff] }
0x21d5   :  { %13697 = vmatprep.subr.mxu1 %v8948_v12 }
0x21d6   :  { %13698 = vmatpush3.msra.mxu1 %v8948_v12 }
0x21d7   :  { %13699 = vmatprep.subr.mxu1 %v8947_v31 }
0x21d8   :  { %13700 = vmatpush3.msra.mxu1 %v8947_v31 }
0x21d9   :  { %13701 = vmatprep.subr.mxu1 %v8946_v13 }
0x21da   :  { %13702 = vmatpush3.msra.mxu1 %v8946_v13 }
0x21de   :  { %v14042_v19 = vpop.eup %14041 }
0x21df   :  { %11096 = vmatmul.mubr.msk.f32.vlgmr.msra.gmra.mxu0 %vm8673_vm4, %v14042_v19 }
0x21e0   :  { %13715 = vmatpush3.msra.mxu0 %v11110_v0  ;;  %v11100_v0 = vld [vmem:[%s16833_s18 + $0x68] sm:$0xff] }
0x21e1   :  { %13716 = vmatprep.subr.mxu0 %v11109_v1 }
0x21e2   :  { %13717 = vmatpush3.msra.mxu0 %v11109_v1 }
0x21e3   :  { %13718 = vmatprep.subr.mxu0 %v11108_v49 }
0x21e4   :  { %13719 = vmatpush3.msra.mxu0 %v11108_v49 }
0x21e5   :  { %13720 = vmatprep.subr.mxu0 %v11107_v4 }
0x21e6   :  { %13721 = vmatpush3.msra.mxu0 %v11107_v4 }
0x21e7   :  { %13722 = vmatprep.subr.mxu0 %v11106_v10 }
0x21e8   :  { %13723 = vmatpush3.msra.mxu0 %v11106_v10  ;;  %v11099_v10 = vld [vmem:[%s16833_s18 + $0x60] sm:$0xff] }
0x21e9   :  { %13724 = vmatprep.subr.mxu0 %v11105_v23 }
0x21ea   :  { %13725 = vmatpush3.msra.mxu0 %v11105_v23 }
0x21eb   :  { %13726 = vmatprep.subr.mxu0 %v11104_v6 }
0x21ec   :  { %13727 = vmatpush3.msra.mxu0 %v11104_v6 }
0x21ed   :  { %13728 = vmatprep.subr.mxu0 %v11103_v59 }
0x21ee   :  { %13729 = vmatpush3.msra.mxu0 %v11103_v59 }
0x21ef   :  { %13730 = vmatprep.subr.mxu0 %v11102_v58 }
0x21f0   :  { %13731 = vmatpush3.msra.mxu0 %v11102_v58  ;;  %v11125_v58 = vld [vmem:[%s16833_s18 + $0x100] sm:$0xff] }
0x228b   :  { %v8743_v25 = vpop.f32.mrf.mxu1 }
0x228c   :  { %v8825_v28 = vrot.slane %v8743_v25, %v15371_v22 }
0x228d   :  { %v8745_v2 = vpop.f32.mrf.mxu1 }
0x228e   :  { %v8829_v14 = vrot.slane %v8745_v2, %v15371_v22  ;;  %v8830_v37 = vsub.f32 %v16451_v11, %v8825_v28  ;;  %v8832_v17 = vsub.f32 %v16448_v35, %v8825_v28  ;;  %v8834_v46 = vsub.f32 %v16469_v33, %v8825_v28  ;;  %v8945_v35 = vld [vmem:[%s16833_s18 + $0x18] sm:$0xff]  ;;  %v8944_v33 = vld [vmem:[%s16833_s18 + $0x10] sm:$0xff] }
0x228f   :  { %13703 = vmatprep.subr.mxu1 %v8945_v35 }
0x2290   :  { %v8831_v5 = vsub.f32 %v16446_v8, %v8829_v14  ;;  %v8833_v60 = vsub.f32 %v16453_v29, %v8829_v14  ;;  %v8835_v44 = vsub.f32 %v16474_v61, %v8829_v14  ;;  %v11101_v8 = vld [vmem:[%s16833_s18 + $0x70] sm:$0xff]  ;;  %13704 = vmatpush3.msra.mxu1 %v8945_v35  ;;  %v11126_v35 = vld [vmem:[%s16833_s18 + $0x108] sm:$0xff] }
0x2291   :  { %13705 = vmatprep.subr.mxu1 %v8944_v33  ;;  %13732 = vmatprep.subr.mxu0 %v11101_v8 }
0x2292   :  { %13706 = vmatpush3.msra.mxu1 %v8944_v33  ;;  %13733 = vmatpush3.msra.mxu0 %v11101_v8  ;;  %v11124_v33 = vld [vmem:[%s16833_s18 + $0xf8] sm:$0xff]  ;;  %v11122_v8 = vld [vmem:[%s16833_s18 + $0xe8] sm:$0xff] }
0x2293   :  { %13707 = vmatprep.subr.mxu1 %v8943_v16  ;;  %13734 = vmatprep.subr.mxu0 %v11100_v0 }
0x2294   :  { %13708 = vmatpush3.msra.mxu1 %v8943_v16  ;;  %13735 = vmatpush3.msra.mxu0 %v11100_v0 }
0x2295   :  { %13709 = vmatprep.subr.mxu1 %v8942_v7  ;;  %13736 = vmatprep.subr.mxu0 %v11099_v10 }
0x2296   :  { %13710 = vmatpush3.msra.mxu1 %v8942_v7  ;;  %13737 = vmatpush3.msra.mxu0 %v11099_v10  ;;  %v11140_v7 = vld [vmem:[%s16833_s18 + $0x158] sm:$0xff]  ;;  %v11139_v10 = vld [vmem:[%s16833_s18 + $0x150] sm:$0xff] }
0x2297   :  { %13741 = vmatprep.subr.mxu1 %v14856_v41  ;;  %13748 = vmatprep.subr.mxu0 %v14856_v41 }
0x229f   :  { %v8817_v9 = vpop.f32.mrf.mxu0 }
0x22a0   :  { %v8839_v40 = vrot.slane %v8817_v9, %v15371_v22 }
0x22a1   :  { %v8819_v45 = vpop.f32.mrf.mxu0 }
0x22a2   :  { %v8844_v47 = vmul.f32 %v8839_v40, %v8830_v37  ;;  %v8846_v48 = vmul.f32 %v8839_v40, %v8832_v17  ;;  %v8848_v56 = vmul.f32 %v8839_v40, %v8834_v46  ;;  %v8843_v11 = vrot.slane %v8819_v45, %v15371_v22  ;;  %v9126_v45 = vld [vmem:[#allocation32 + $0x4] sm:$0xf] }
0x22a4   :  { %v8845_v29 = vmul.f32 %v8843_v11, %v8831_v5  ;;  %v8847_v61 = vmul.f32 %v8843_v11, %v8833_v60  ;;  %v8849_v30 = vmul.f32 %v8843_v11, %v8835_v44  ;;  %v8870_v50 = vmul.f32 %v8863_v36, %v8846_v48  ;;  %v9036_v11 = vld [vmem:[#allocation32] sm:$0xf] }
0x22a5   :  { %v8872_v26 = vmul.f32 %v8863_v36, %v8848_v56  ;;  %v8868_v18 = vmul.f32 %v8863_v36, %v8844_v47  ;;  %v11127_v56 = vld [vmem:[%s16833_s18 + $0x110] sm:$0xff] }
0x22a6   :  { %v8871_v34 = vmul.f32 %v8867_v38, %v8847_v61  ;;  %v8873_v32 = vmul.f32 %v8867_v38, %v8849_v30  ;;  %v8894_v19 = vadd.f32 %v8887_v51, %v8870_v50  ;;  %v8869_v20 = vmul.f32 %v8867_v38, %v8845_v29  ;;  %v11121_v29 = vld [vmem:[%s16833_s18 + $0xe0] sm:$0xff]  ;;  %v11120_v61 = vld [vmem:[%s16833_s18 + $0xd8] sm:$0xff]  ;;  %v11119_v30 = vld [vmem:[%s16833_s18 + $0xd0] sm:$0xff] }
0x22a7   :  { %v8896_v1 = vadd.f32 %v8887_v51, %v8872_v26  ;;  %v8892_v49 = vadd.f32 %v8887_v51, %v8868_v18  ;;  %v11128_v51 = vld [vmem:[%s16833_s18 + $0x118] sm:$0xff]  ;;  %v11118_v50 = vld [vmem:[%s16833_s18 + $0xc8] sm:$0xff]  ;;  %v11117_v26 = vld [vmem:[%s16833_s18 + $0xc0] sm:$0xff] }
0x22a8   :  { %v8900_v42 = vmax.f32 %v8894_v19, 0.0  ;;  %v8895_v3 = vadd.f32 %v8891_v21, %v8871_v34  ;;  %v8897_v4 = vadd.f32 %v8891_v21, %v8873_v32  ;;  %v8893_v2 = vadd.f32 %v8891_v21, %v8869_v20  ;;  %v11123_v21 = vld [vmem:[%s16833_s18 + $0xf0] sm:$0xff]  ;;  %v9369_v20 = vld [vmem:[#allocation32 + $0x8] sm:$0xf] }
0x22a9   :  { %v8902_v12 = vmax.f32 %v8896_v1, 0.0  ;;  %v8898_v59 = vmax.f32 %v8892_v49, 0.0  ;;  %v11144_v1 = vld [vmem:[%s16833_s18 + $0x178] sm:$0xff]  ;;  %v11143_v49 = vld [vmem:[%s16833_s18 + $0x170] sm:$0xff] }
0x22aa   :  { %v8909_v23 = vrot.slane %v8900_v42, 4  ;;  %v8901_v31 = vmax.f32 %v8895_v3, 0.0  ;;  %v8903_v6 = vmax.f32 %v8897_v4, 0.0  ;;  %v8899_v14 = vmax.f32 %v8893_v2, 0.0  ;;  %v11142_v3 = vld [vmem:[%s16833_s18 + $0x168] sm:$0xff]  ;;  %v11141_v4 = vld [vmem:[%s16833_s18 + $0x160] sm:$0xff] }
0x22ab   :  { %v8910_v13 = vrot.slane %v8902_v12, 4  ;;  %v11138_v12 = vld [vmem:[%s16833_s18 + $0x148] sm:$0xff] }
0x22ac   :  { %v8913_v25 = vrot.slane %v8903_v6, 4  ;;  %v8912_v62 = vrot.slane %v8901_v31, 4  ;;  %v11135_v6 = vld [vmem:[%s16833_s18 + $0x130] sm:$0xff] }
0x22ad   :  { %v8921_v27 = vmax.f32 %v8900_v42, %v8910_v13  ;;  %v8911_v57 = vsel %vm8908_vm5, %v8909_v23, %v8910_v13  ;;  %v11137_v23 = vld [vmem:[%s16833_s18 + $0x140] sm:$0xff]  ;;  %v11134_v13 = vld [vmem:[%s16833_s18 + $0x128] sm:$0xff] }
0x22ae   :  { %v8919_v53 = vmax.f32 %v8898_v59, %v8911_v57  ;;  %v8914_v28 = vsel %vm8908_vm5, %v8912_v62, %v8913_v25  ;;  %v8922_v24 = vmax.f32 %v8901_v31, %v8913_v25  ;;  %v11136_v31 = vld [vmem:[%s16833_s18 + $0x138] sm:$0xff]  ;;  %v11133_v59 = vld [vmem:[%s16833_s18 + $0x120] sm:$0xff]  ;;  %v9536_v57 = vld [vmem:[#allocation32 + $0xc] sm:$0xf] }
0x22af   :  { %8931 = vrot.lane.b32.xlu1 %v8921_v27, %s14858_s2  ;;  %v8920_v9 = vmax.f32 %v8899_v14, %v8914_v28  ;;  %v11159_v14 = vld [vmem:[%s16833_s18 + $0x1d0] sm:$0xff] }
0x22b0   :  { %8927 = vrot.lane.b32.xlu0 %v8919_v53, %s14858_s2 }
0x22b3   :  { %8933 = vrot.lane.b32.xlu1 %v8922_v24, %s14858_s2  ;;  %v11158_v24 = vld [vmem:[%s16833_s18 + $0x1c8] sm:$0xff] }
0x22b4   :  { %8929 = vrot.lane.b32.xlu0 %v8920_v9, %s14858_s2  ;;  %v11157_v9 = vld [vmem:[%s16833_s18 + $0x1c0] sm:$0xff] }
0x2321   :  { %v8932_v38 = vpop.permute.xlu1 %8931 }
0x2322   :  { %v8928_v36 = vpop.permute.xlu0 %8927 }
0x2325   :  { %v8934_v15 = vpop.permute.xlu1 %8933 }
0x2326   :  { %v8936_v37 = vsel %vm709_vm1, %v8932_v38, %v8934_v15  ;;  %v8930_v17 = vpop.permute.xlu0 %8929  ;;  %v11156_v38 = vld [vmem:[%s16833_s18 + $0x1b8] sm:$0xff]  ;;  %v11154_v15 = vld [vmem:[%s16833_s18 + $0x1a8] sm:$0xff] }
0x2327   :  { %v8935_v46 = vsel %vm709_vm1, %v8928_v36, %v8930_v17  ;;  %v16545_v5 = vmax.f32 %v8921_v27, %v8936_v37  ;;  %v11155_v36 = vld [vmem:[%s16833_s18 + $0x1b0] sm:$0xff]  ;;  %v11153_v37 = vld [vmem:[%s16833_s18 + $0x1a0] sm:$0xff]  ;;  %v11152_v17 = vld [vmem:[%s16833_s18 + $0x198] sm:$0xff] }
0x2328   :  { %v16543_v40 = vmax.f32 %v8919_v53, %v8935_v46  ;;  %v11160_v53 = vld [vmem:[%s16833_s18 + $0x1d8] sm:$0xff]  ;;  %v11151_v46 = vld [vmem:[%s16833_s18 + $0x190] sm:$0xff] }
0x232a   :  { %13711 = vmatprep.mubr.msk.f32.mxu1 %vm8954_vm6, %v16543_v40  ;;  %13738 = vmatprep.mubr.msk.f32.mxu0 %vm8954_vm6, %v16543_v40 }
0x232b   :  { %13712 = vmatmul.mubr.msk.f32.vlgmr.msra.gmra.mxu1 %vm8954_vm6, %v16545_v5  ;;  %13739 = vmatmul.mubr.msk.f32.vlgmr.msra.gmra.mxu0 %vm8954_vm6, %v16545_v5 }
0x232c   :  { %13745 = vmatprep.mubr.msk.f32.mxu1 %vm14857_vm2, %v14856_v41  ;;  %13752 = vmatprep.mubr.msk.f32.mxu0 %vm14857_vm2, %v14856_v41 }
0x23eb   :  { %v13713_v60 = vpop.f32.mrf.mxu1  ;;  %v13740_v44 = vpop.f32.mrf.mxu0 }
0x23ec   :  { %13742 = vmatpush3.msk.msra.mxu1 %vm8908_vm5, %v13740_v44  ;;  %13749 = vmatpush3.msk.msra.mxu0 %vm8908_vm5, %v13713_v60  ;;  %v11149_v60 = vld [vmem:[%s16833_s18 + $0x180] sm:$0xff] }
0x23ed   :  { %v9027_v47 = vpop.f32.mrf.mxu1  ;;  %v9116_v48 = vpop.f32.mrf.mxu0  ;;  %13743 = vmatprep.subr.mxu1 %v14856_v41  ;;  %13750 = vmatprep.subr.mxu0 %v14856_v41 }
0x23ee   :  { %13744 = vmatpush3.msra.mxu1 %v9116_v48  ;;  %13751 = vmatpush3.msra.mxu0 %v9027_v47  ;;  %v9703_v48 = vld [vmem:[#allocation32 + $0x10] sm:$0xf] }
0x23ef   :  { %13746 = vmatmul.mubr.msk.f32.vlgmr.msra.gmra.mxu1 %vm9127_vm7, %v9126_v45  ;;  %13755 = vmatprep.subr.mxu1 %v11128_v51 }
0x23f0   :  { %13756 = vmatpush3.msra.mxu1 %v11128_v51  ;;  %13779 = vmatprep.mubr.msk.f32.mxu1 %vm8954_vm6, %v16543_v40 }
0x23f1   :  { %13757 = vmatprep.subr.mxu1 %v11127_v56  ;;  %13753 = vmatmul.mubr.msk.f32.vlgmr.msra.gmra.mxu0 %vm9127_vm7, %v9036_v11  ;;  %v9783_v11 = vld [vmem:[#allocation35 + $0x10] sm:$0xff] }
0x23f2   :  { %13758 = vmatpush3.msra.mxu1 %v11127_v56  ;;  %13782 = vmatprep.subr.mxu0 %v14856_v41 }
0x23f3   :  { %13759 = vmatprep.subr.mxu1 %v11126_v35  ;;  %13786 = vmatprep.mubr.msk.f32.mxu0 %vm14857_vm2, %v14856_v41 }
0x23f4   :  { %13760 = vmatpush3.msra.mxu1 %v11126_v35  ;;  %v9782_v35 = vld [vmem:[#allocation35 + $0x8] sm:$0xff] }
0x23f5   :  { %13761 = vmatprep.subr.mxu1 %v11125_v58 }
0x23f6   :  { %13762 = vmatpush3.msra.mxu1 %v11125_v58  ;;  %v9781_v58 = vld [vmem:[#allocation35] sm:$0xff] }
0x23f7   :  { %13763 = vmatprep.subr.mxu1 %v11124_v33 }
0x23f8   :  { %13764 = vmatpush3.msra.mxu1 %v11124_v33  ;;  %v16641_v33 = vld [vmem:[#allocation34] sm:$0x7] }
0x23f9   :  { %13765 = vmatprep.subr.mxu1 %v11123_v21 }
0x23fa   :  { %13766 = vmatpush3.msra.mxu1 %v11123_v21  ;;  %v9790_v21 = vrot.slane %v16641_v33, %v15371_v22 }
0x23fb   :  { %13767 = vmatprep.subr.mxu1 %v11122_v8 }
0x23fc   :  { %13768 = vmatpush3.msra.mxu1 %v11122_v8 }
0x23fd   :  { %13769 = vmatprep.subr.mxu1 %v11121_v29 }
0x23fe   :  { %13770 = vmatpush3.msra.mxu1 %v11121_v29 }
0x23ff   :  { %13771 = vmatprep.subr.mxu1 %v11120_v61 }
0x2400   :  { %13772 = vmatpush3.msra.mxu1 %v11120_v61 }
0x2401   :  { %13773 = vmatprep.subr.mxu1 %v11119_v30 }
0x2402   :  { %13774 = vmatpush3.msra.mxu1 %v11119_v30 }
0x2403   :  { %13775 = vmatprep.subr.mxu1 %v11118_v50 }
0x2404   :  { %13776 = vmatpush3.msra.mxu1 %v11118_v50 }
0x2405   :  { %13777 = vmatprep.subr.mxu1 %v11117_v26 }
0x2406   :  { %13778 = vmatpush3.msra.mxu1 %v11117_v26 }
0x2407   :  { %13780 = vmatmul.mubr.msk.f32.vlgmr.msra.gmra.mxu1 %vm8954_vm6, %v16545_v5  ;;  %13816 = vmatprep.subr.mxu1 %v14856_v41 }
0x2408   :  { %13820 = vmatprep.mubr.msk.f32.mxu1 %vm14857_vm2, %v14856_v41 }
0x24af   :  { %v9200_v18 = vpop.f32.mrf.mxu1 }
0x24b1   :  { %v13747_v34 = vpop.f32.mrf.mxu1  ;;  %v9276_v32 = vpop.f32.mrf.mxu0 }
0x24b2   :  { %v9277_v19 = vadd.f32 %v9276_v32, %v9200_v18 }
0x24b3   :  { %v13754_v16 = vpop.f32.mrf.mxu0 }
0x24c7   :  { %v13781_v0 = vpop.f32.mrf.mxu1 }
0x24c8   :  { %13783 = vmatpush3.msk.msra.mxu0 %vm8908_vm5, %v13781_v0 }
0x24c9   :  { %v9359_v42 = vpop.f32.mrf.mxu1  ;;  %13784 = vmatprep.subr.mxu0 %v14856_v41 }
0x24ca   :  { %13785 = vmatpush3.msra.mxu0 %v9359_v42 }
0x24cb   :  { %13787 = vmatmul.mubr.msk.f32.vlgmr.msra.gmra.mxu0 %vm9127_vm7, %v9369_v20  ;;  %13789 = vmatprep.subr.mxu0 %v11144_v1 }
0x24cc   :  { %13790 = vmatpush3.msra.mxu0 %v11144_v1  ;;  %13813 = vmatprep.mubr.msk.f32.mxu0 %vm8954_vm6, %v16543_v40 }
0x24cd   :  { %13791 = vmatprep.subr.mxu0 %v11143_v49 }
0x24ce   :  { %13792 = vmatpush3.msra.mxu0 %v11143_v49 }
0x24cf   :  { %13793 = vmatprep.subr.mxu0 %v11142_v3 }
0x24d0   :  { %13794 = vmatpush3.msra.mxu0 %v11142_v3 }
0x24d1   :  { %13795 = vmatprep.subr.mxu0 %v11141_v4 }
0x24d2   :  { %13796 = vmatpush3.msra.mxu0 %v11141_v4 }
0x24d3   :  { %13797 = vmatprep.subr.mxu0 %v11140_v7 }
0x24d4   :  { %13798 = vmatpush3.msra.mxu0 %v11140_v7 }
0x24d5   :  { %13799 = vmatprep.subr.mxu0 %v11139_v10 }
0x24d6   :  { %13800 = vmatpush3.msra.mxu0 %v11139_v10  ;;  %v9786_v10 = vld [vmem:[#allocation37 + $0x8] sm:$0xff] }
0x24d7   :  { %13801 = vmatprep.subr.mxu0 %v11138_v12 }
0x24d8   :  { %13802 = vmatpush3.msra.mxu0 %v11138_v12  ;;  %v9785_v12 = vld [vmem:[#allocation37] sm:$0xff] }
0x24d9   :  { %13803 = vmatprep.subr.mxu0 %v11137_v23 }
0x24da   :  { %13804 = vmatpush3.msra.mxu0 %v11137_v23 }
0x24db   :  { %13805 = vmatprep.subr.mxu0 %v11136_v31 }
0x24dc   :  { %13806 = vmatpush3.msra.mxu0 %v11136_v31 }
0x24dd   :  { %13807 = vmatprep.subr.mxu0 %v11135_v6 }
0x24de   :  { %13808 = vmatpush3.msra.mxu0 %v11135_v6 }
0x24df   :  { %13809 = vmatprep.subr.mxu0 %v11134_v13 }
0x24e0   :  { %13810 = vmatpush3.msra.mxu0 %v11134_v13 }
0x24e1   :  { %13811 = vmatprep.subr.mxu0 %v11133_v59 }
0x24e2   :  { %13812 = vmatpush3.msra.mxu0 %v11133_v59 }
0x24e3   :  { %13814 = vmatmul.mubr.msk.f32.vlgmr.msra.gmra.mxu0 %vm8954_vm6, %v16545_v5  ;;  %13850 = vmatprep.subr.mxu0 %v14856_v41 }
0x24e4   :  { %13854 = vmatprep.mubr.msk.f32.mxu0 %vm14857_vm2, %v14856_v41 }
0x258b   :  { %v9442_v25 = vpop.f32.mrf.mxu0 }
0x258c   :  { %v9446_v62 = vadd.f32 %v9442_v25, %v9277_v19 }
0x258d   :  { %v13788_v2 = vpop.f32.mrf.mxu0 }
0x25a3   :  { %v13815_v27 = vpop.f32.mrf.mxu0 }
0x25a4   :  { %13817 = vmatpush3.msk.msra.mxu1 %vm8908_vm5, %v13815_v27 }
0x25a5   :  { %v9526_v28 = vpop.f32.mrf.mxu0  ;;  %13818 = vmatprep.subr.mxu1 %v14856_v41 }
0x25a6   :  { %13819 = vmatpush3.msra.mxu1 %v9526_v28  ;;  %v10138_v28 = vld [vmem:[#allocation38 + $0x10] sm:$0xff] }
0x25a7   :  { %13821 = vmatmul.mubr.msk.f32.vlgmr.msra.gmra.mxu1 %vm9127_vm7, %v9536_v57  ;;  %13823 = vmatprep.subr.mxu1 %v11160_v53 }
0x25a8   :  { %13824 = vmatpush3.msra.mxu1 %v11160_v53  ;;  %13847 = vmatprep.mubr.msk.f32.mxu1 %vm8954_vm6, %v16543_v40  ;;  %v11150_v40 = vld [vmem:[%s16833_s18 + $0x188] sm:$0xff]  ;;  %v10139_v53 = vld [vmem:[#allocation38 + $0x18] sm:$0xff] }
0x25a9   :  { %13825 = vmatprep.subr.mxu1 %v11159_v14 }
0x25aa   :  { %13826 = vmatpush3.msra.mxu1 %v11159_v14 }
0x25ab   :  { %13827 = vmatprep.subr.mxu1 %v11158_v24 }
0x25ac   :  { %13828 = vmatpush3.msra.mxu1 %v11158_v24 }
0x25ad   :  { %13829 = vmatprep.subr.mxu1 %v11157_v9 }
0x25ae   :  { %13830 = vmatpush3.msra.mxu1 %v11157_v9 }
0x25af   :  { %13831 = vmatprep.subr.mxu1 %v11156_v38 }
0x25b0   :  { %13832 = vmatpush3.msra.mxu1 %v11156_v38 }
0x25b1   :  { %13833 = vmatprep.subr.mxu1 %v11155_v36 }
0x25b2   :  { %13834 = vmatpush3.msra.mxu1 %v11155_v36 }
0x25b3   :  { %13835 = vmatprep.subr.mxu1 %v11154_v15 }
0x25b4   :  { %13836 = vmatpush3.msra.mxu1 %v11154_v15 }
0x25b5   :  { %13837 = vmatprep.subr.mxu1 %v11153_v37 }
0x25b6   :  { %13838 = vmatpush3.msra.mxu1 %v11153_v37  ;;  %v10119_v37 = vrot.slane %v16641_v33, %v15413_v52 }
0x25b7   :  { %13839 = vmatprep.subr.mxu1 %v11152_v17 }
0x25b8   :  { %13840 = vmatpush3.msra.mxu1 %v11152_v17  ;;  %v10137_v17 = vld [vmem:[#allocation38 + $0x8] sm:$0xff] }
0x25b9   :  { %13841 = vmatprep.subr.mxu1 %v11151_v46 }
0x25ba   :  { %13842 = vmatpush3.msra.mxu1 %v11151_v46 }
0x25bb   :  { %13843 = vmatprep.subr.mxu1 %v11150_v40 }
0x25bc   :  { %13844 = vmatpush3.msra.mxu1 %v11150_v40  ;;  %v10136_v40 = vld [vmem:[#allocation38] sm:$0xff] }
0x25bd   :  { %13845 = vmatprep.subr.mxu1 %v11149_v60 }
0x25be   :  { %13846 = vmatpush3.msra.mxu1 %v11149_v60 }
0x25bf   :  { %13848 = vmatmul.mubr.msk.f32.vlgmr.msra.gmra.mxu1 %vm8954_vm6, %v16545_v5  ;;  %13886 = vmatprep.subr.mxu1 %v14856_v41  ;;  %v9784_v5 = vld [vmem:[#allocation35 + $0x18] sm:$0xff] }
0x25c0   :  { %13890 = vmatprep.mubr.msk.f32.mxu1 %vm14857_vm2, %v14856_v41  ;;  %13887 = vmatpush3.msra.mxu1 %v9786_v10 }
0x25c1   :  { %13888 = vmatprep.subr.mxu1 %v14856_v41 }
0x25c2   :  { %13889 = vmatpush3.msra.mxu1 %v9785_v12 }
0x25c3   :  { %10264 = vmatprep.subr.mxu1 %v14856_v41 }
0x2667   :  { %v9609_v44 = vpop.f32.mrf.mxu1 }
0x2668   :  { %v9613_v45 = vadd.f32 %v9609_v44, %v9446_v62  ;;  %v10124_v44 = vrot.slane %v16641_v33, %v15417_v55  ;;  %v10238_v33 = vld [vmem:[#allocation40 + $0x50] sm:$0xff] }
0x2669   :  { %v13822_v51 = vpop.f32.mrf.mxu1 }
0x267f   :  { %v13849_v47 = vpop.f32.mrf.mxu1 }
0x2680   :  { %13851 = vmatpush3.msk.msra.mxu0 %vm8908_vm5, %v13849_v47  ;;  %v10242_v47 = vld [vmem:[#allocation40 + $0x70] sm:$0xff] }
0x2681   :  { %v9693_v56 = vpop.f32.mrf.mxu1  ;;  %13852 = vmatprep.subr.mxu0 %v14856_v41 }
0x2682   :  { %13853 = vmatpush3.msra.mxu0 %v9693_v56  ;;  %v10241_v56 = vld [vmem:[#allocation40 + $0x68] sm:$0xff] }
0x2683   :  { %13855 = vmatmul.mubr.msk.f32.vlgmr.msra.gmra.mxu0 %vm9127_vm7, %v9703_v48  ;;  %13857 = vmatprep.subr.mxu0 %v14856_v41 }
0x2684   :  { %13865 = vmatprep.mubr.msk.f32.mxu0 %vm14857_vm2, %v14856_v41  ;;  %13858 = vmatpush3.msra.mxu0 %v9784_v5 }
0x2685   :  { %13859 = vmatprep.subr.mxu0 %v14856_v41 }
0x2686   :  { %13860 = vmatpush3.msra.mxu0 %v9783_v11 }
0x2687   :  { %13861 = vmatprep.subr.mxu0 %v14856_v41 }
0x2688   :  { %13862 = vmatpush3.msra.mxu0 %v9782_v35 }
0x2689   :  { %13863 = vmatprep.subr.mxu0 %v14856_v41 }
0x268a   :  { %13864 = vmatpush3.msra.mxu0 %v9781_v58 }
0x268b   :  { %13868 = vmatprep.subr.mxu0 %v14856_v41 }
0x2743   :  { %v9776_v8 = vpop.f32.mrf.mxu0 }
0x2744   :  { %v9780_v29 = vadd.f32 %v9776_v8, %v9613_v45  ;;  %v10243_v45 = vld [vmem:[#allocation40 + $0x78] sm:$0xff]  ;;  %v10236_v8 = vld [vmem:[#allocation40 + $0x40] sm:$0xff] }
0x2745   :  { %v13856_v61 = vpop.f32.mrf.mxu0 }
0x2746   :  { %v9791_v30 = vadd.f32 %v9790_v21, %v9780_v29  ;;  %v10237_v21 = vld [vmem:[#allocation40 + $0x48] sm:$0xff]  ;;  %v10235_v29 = vld [vmem:[#allocation40 + $0x38] sm:$0xff]  ;;  %v10234_v61 = vld [vmem:[#allocation40 + $0x30] sm:$0xff] }
0x2748   :  { %v9793_v50 = vsel %vm9792_vm8, %v9791_v30, 0.0  ;;  %v9873_v26 = vmul.f32 %v9791_v30, %v9791_v30 }
0x2749   :  { %v9794_v18 = vrot.slane %v9793_v50, 4 }
0x274a   :  { %v9874_v34 = vsel %vm9792_vm8, %v9873_v26, 0.0  ;;  %v10231_v26 = vld [vmem:[#allocation40 + $0x18] sm:$0xff] }
0x274b   :  { %v9795_v32 = vadd.f32 %v9794_v18, %v9793_v50  ;;  %v9875_v19 = vrot.slane %v9874_v34, 4  ;;  %v10232_v50 = vld [vmem:[#allocation40 + $0x20] sm:$0xff]  ;;  %v10230_v18 = vld [vmem:[#allocation40 + $0x10] sm:$0xff] }
0x274d   :  { %v9796_v16 = vrot.slane %v9795_v32, 2  ;;  %v9876_v0 = vadd.f32 %v9875_v19, %v9874_v34  ;;  %v10229_v34 = vld [vmem:[#allocation40 + $0x8] sm:$0xff]  ;;  %v10252_v19 = vld [vmem:[#allocation40 + $0xc0] sm:$0xff] }
0x274f   :  { %v9797_v20 = vadd.f32 %v9796_v16, %v9795_v32  ;;  %v9877_v1 = vrot.slane %v9876_v0, 2  ;;  %v10228_v32 = vld [vmem:[#allocation40] sm:$0xff]  ;;  %v10251_v16 = vld [vmem:[#allocation40 + $0xb8] sm:$0xff] }
0x2751   :  { %v9798_v42 = vrot.slane %v9797_v20, 1  ;;  %v9878_v3 = vadd.f32 %v9877_v1, %v9876_v0  ;;  %v10250_v0 = vld [vmem:[#allocation40 + $0xb0] sm:$0xff]  ;;  %v10248_v1 = vld [vmem:[#allocation40 + $0xa0] sm:$0xff] }
0x2753   :  { %v9799_v49 = vadd.f32 %v9798_v42, %v9797_v20  ;;  %v9879_v4 = vrot.slane %v9878_v3, 1  ;;  %v10249_v20 = vld [vmem:[#allocation40 + $0xa8] sm:$0xff] }
0x2755   :  { %13866 = vmatmul.mubr.msk.f32.vlgmr.msra.gmra.mxu0 %vm709_vm1, %v9799_v49  ;;  %v9880_v7 = vadd.f32 %v9879_v4, %v9878_v3  ;;  %v10362_v3 = vld [vmem:[#allocation41 + $0x78] sm:$0xff]  ;;  %v10361_v4 = vld [vmem:[#allocation41 + $0x70] sm:$0xff] }
0x2756   :  { %13869 = vmatpush3.msra.mxu0 %v9784_v5  ;;  %13876 = vmatprep.mubr.msk.f32.mxu0 %vm14857_vm2, %v14856_v41 }
0x2757   :  { %13870 = vmatprep.subr.mxu0 %v14856_v41 }
0x2758   :  { %13871 = vmatpush3.msra.mxu0 %v9783_v11  ;;  %v10240_v11 = vld [vmem:[#allocation40 + $0x60] sm:$0xff] }
0x2759   :  { %13872 = vmatprep.subr.mxu0 %v14856_v41 }
0x275a   :  { %13873 = vmatpush3.msra.mxu0 %v9782_v35  ;;  %v10239_v35 = vld [vmem:[#allocation40 + $0x58] sm:$0xff] }
0x275b   :  { %13874 = vmatprep.subr.mxu0 %v14856_v41 }
0x275c   :  { %13875 = vmatpush3.msra.mxu0 %v9781_v58 }
0x275d   :  { %13877 = vmatmul.mubr.msk.f32.vlgmr.msra.gmra.mxu0 %vm709_vm1, %v9880_v7  ;;  %13879 = vmatprep.subr.mxu0 %v14856_v41  ;;  %v10360_v7 = vld [vmem:[#allocation41 + $0x68] sm:$0xff] }
0x275e   :  { %13883 = vmatprep.mubr.msk.f32.mxu0 %vm14857_vm2, %v14856_v41  ;;  %13880 = vmatpush3.msra.mxu0 %v9786_v10  ;;  %v10359_v10 = vld [vmem:[#allocation41 + $0x60] sm:$0xff] }
0x275f   :  { %13881 = vmatprep.subr.mxu0 %v14856_v41 }
0x2760   :  { %13882 = vmatpush3.msra.mxu0 %v9785_v12  ;;  %v10358_v12 = vld [vmem:[#allocation41 + $0x58] sm:$0xff] }
0x2761   :  { %10183 = vmatprep.subr.mxu0 %v10139_v53  ;;  %v10347_v53 = vld [vmem:[#allocation41] sm:$0xff] }
0x2815   :  { %v9869_v23 = vpop.f32.mrf.mxu0 }
0x2816   :  { %v9954_v31 = vmul.f32 0.125, %v9869_v23  ;;  %v10357_v23 = vld [vmem:[#allocation41 + $0x50] sm:$0xff] }
0x2817   :  { %v13867_v6 = vpop.f32.mrf.mxu0 }
0x2818   :  { %13884 = vmatmul.mubr.msk.f32.vlgmr.msra.gmra.mxu0 %vm8673_vm4, %v9954_v31  ;;  %v9956_v59 = vmul.f32 %v9954_v31, %v9954_v31  ;;  %v10356_v31 = vld [vmem:[#allocation41 + $0x48] sm:$0xff]  ;;  %v10355_v6 = vld [vmem:[#allocation41 + $0x40] sm:$0xff] }
0x2819   :  { %10219 = vmatprep.mubr.f32.mxu0 %v14856_v41  ;;  %10184 = vmatpush1.msra.mxu0 %v10138_v28  ;;  %v10371_v28 = vld [vmem:[#allocation41 + $0xc0] sm:$0xff] }
0x281a   :  { %10185 = vmatprep.subr.mxu0 %v10137_v17  ;;  %v10365_v17 = vld [vmem:[#allocation41 + $0x90] sm:$0xff] }
0x281b   :  { %10186 = vmatpush1.msra.mxu0 %v10136_v40  ;;  %v10364_v40 = vld [vmem:[#allocation41 + $0x88] sm:$0xff] }
0x281c   :  { %10379 = vmatprep.subr.mxu0 %v14856_v41 }
0x281d   :  { %v9950_v13 = vpop.f32.mrf.mxu0 }
0x281e   :  { %v9955_v25 = vmul.f32 0.125, %v9950_v13  ;;  %v10354_v13 = vld [vmem:[#allocation41 + $0x38] sm:$0xff] }
0x281f   :  { %v13878_v62 = vpop.f32.mrf.mxu0 }
0x2820   :  { %v9957_v2 = vsub.f32 %v9955_v25, %v9956_v59  ;;  %v10353_v59 = vld [vmem:[#allocation41 + $0x30] sm:$0xff]  ;;  %v10352_v25 = vld [vmem:[#allocation41 + $0x28] sm:$0xff]  ;;  %v10351_v62 = vld [vmem:[#allocation41 + $0x20] sm:$0xff] }
0x2822   :  { %v9958_v27 = vadd.f32 1e-05, %v9957_v2  ;;  %v10350_v2 = vld [vmem:[#allocation41 + $0x18] sm:$0xff] }
0x2824   :  { %14043 = vrsqrt.f32 %v9958_v27  ;;  %v10349_v27 = vld [vmem:[#allocation41 + $0x10] sm:$0xff] }
0x2831   :  { %v14044_v57 = vpop.eup %14043 }
0x2832   :  { %13891 = vmatmul.mubr.msk.f32.vlgmr.msra.gmra.mxu1 %vm8673_vm4, %v14044_v57  ;;  %v10348_v57 = vld [vmem:[#allocation41 + $0x8] sm:$0xff] }
0x2833   :  { %10265 = vmatpush1.msra.mxu1 %v10243_v45  ;;  %v10140_v45 = vld [vmem:[%s16834_s4] sm:$0x3] }
0x2834   :  { %10266 = vmatprep.subr.mxu1 %v14856_v41 }
0x2835   :  { %10267 = vmatpush1.msra.mxu1 %v10242_v47  ;;  %v10149_v47 = vrot.slane %v10140_v45, %v15413_v52  ;;  %v10541_v52 = vld [vmem:[#allocation22 + $0x28] sm:$0xff] }
0x2836   :  { %10268 = vmatprep.subr.mxu1 %v14856_v41 }
0x2837   :  { %10269 = vmatpush1.msra.mxu1 %v10241_v56 }
0x2838   :  { %10270 = vmatprep.subr.mxu1 %v14856_v41 }
0x2839   :  { %10271 = vmatpush1.msra.mxu1 %v10240_v11 }
0x283a   :  { %10272 = vmatprep.subr.mxu1 %v14856_v41 }
0x283b   :  { %10273 = vmatpush1.msra.mxu1 %v10239_v35 }
0x283c   :  { %10274 = vmatprep.subr.mxu1 %v14856_v41 }
0x283d   :  { %10275 = vmatpush1.msra.mxu1 %v10238_v33  ;;  %v10462_v33 = vld [vmem:[#allocation20] sm:$0x3] }
0x283e   :  { %10276 = vmatprep.subr.mxu1 %v14856_v41 }
0x283f   :  { %10277 = vmatpush1.msra.mxu1 %v10237_v21  ;;  %v10536_v21 = vld [vmem:[#allocation22] sm:$0xff] }
0x2840   :  { %10278 = vmatprep.subr.mxu1 %v14856_v41 }
0x2841   :  { %10279 = vmatpush1.msra.mxu1 %v10236_v8  ;;  %v11170_v8 = vld [vmem:[%s16835_s9] ss:$0 sm:$0xff] }
0x2842   :  { %10280 = vmatprep.subr.mxu1 %v14856_v41 }
0x2843   :  { %10281 = vmatpush1.msra.mxu1 %v10235_v29  ;;  %v11172_v29 = vld [vmem:[%s16836_s21] ss:$0 sm:$0xff] }
0x2844   :  { %10282 = vmatprep.subr.mxu1 %v14856_v41 }
0x2845   :  { %10283 = vmatpush1.msra.mxu1 %v10234_v61 }
0x2846   :  { %10284 = vmatprep.subr.mxu1 %v14856_v41 }
0x28d8   :  { %v10029_v14 = vpop.f32.mrf.mxu0 }
0x28d9   :  { %v10109_v9 = vrot.slane %v10029_v14, %v15371_v22  ;;  %v10370_v14 = vld [vmem:[#allocation41 + $0xb8] sm:$0xff] }
0x28da   :  { %v13885_v24 = vpop.f32.mrf.mxu0 }
0x28db   :  { %v10110_v36 = vsub.f32 %v9791_v30, %v10109_v9  ;;  %v10233_v30 = vld [vmem:[#allocation40 + $0x28] sm:$0xff]  ;;  %v10369_v24 = vld [vmem:[#allocation41 + $0xb0] sm:$0xff]  ;;  %v10368_v9 = vld [vmem:[#allocation41 + $0xa8] sm:$0xff] }
0x28dc   :  { %10285 = vmatpush1.msra.mxu1 %v10233_v30 }
0x28dd   :  { %10286 = vmatprep.subr.mxu1 %v14856_v41 }
0x28de   :  { %10287 = vmatpush1.msra.mxu1 %v10232_v50 }
0x28df   :  { %10288 = vmatprep.subr.mxu1 %v14856_v41 }
0x28e0   :  { %10289 = vmatpush1.msra.mxu1 %v10231_v26 }
0x28e1   :  { %10290 = vmatprep.subr.mxu1 %v14856_v41 }
0x28e2   :  { %10291 = vmatpush1.msra.mxu1 %v10230_v18 }
0x28e3   :  { %10292 = vmatprep.subr.mxu1 %v14856_v41 }
0x28e4   :  { %10293 = vmatpush1.msra.mxu1 %v10229_v34 }
0x28e5   :  { %10294 = vmatprep.subr.mxu1 %v14856_v41 }
0x28e6   :  { %10295 = vmatpush1.msra.mxu1 %v10228_v32 }
0x28e7   :  { %10310 = vmatprep.subr.mxu1 %v14856_v41 }
0x28e8   :  { %10311 = vmatpush2.msra.mxu1 %v10252_v19 }
0x28e9   :  { %10312 = vmatprep.subr.mxu1 %v14856_v41 }
0x28ea   :  { %10313 = vmatpush2.msra.mxu1 %v10251_v16 }
0x28eb   :  { %10314 = vmatprep.subr.mxu1 %v14856_v41 }
0x28ec   :  { %10315 = vmatpush2.msra.mxu1 %v10250_v0 }
0x28ed   :  { %10316 = vmatprep.subr.mxu1 %v14856_v41 }
0x28ee   :  { %10317 = vmatpush2.msra.mxu1 %v10249_v20  ;;  %v10618_v20 = vld [vmem:[%s16837_s10] sm:$0xf] }
0x28ef   :  { %10318 = vmatprep.subr.mxu1 %v14856_v41 }
0x28f0   :  { %10319 = vmatpush2.msra.mxu1 %v10248_v1 }
0x28f1   :  { %10320 = vmatprep.subr.mxu1 %v14856_v41 }
0x28f2   :  { %v10102_v38 = vpop.f32.mrf.mxu1 }
0x28f3   :  { %v10114_v15 = vrot.slane %v10102_v38, %v15371_v22  ;;  %v10367_v38 = vld [vmem:[#allocation41 + $0xa0] sm:$0xff] }
0x28f4   :  { %v13892_v46 = vpop.f32.mrf.mxu1 }
0x28f5   :  { %v10115_v60 = vmul.f32 %v10114_v15, %v10110_v36  ;;  %v10247_v36 = vld [vmem:[#allocation40 + $0x98] sm:$0xff]  ;;  %v10366_v15 = vld [vmem:[#allocation41 + $0x98] sm:$0xff]  ;;  %v10245_v46 = vld [vmem:[#allocation40 + $0x88] sm:$0xff] }
0x28f6   :  { %10321 = vmatpush2.msra.mxu1 %v10247_v36  ;;  %v11176_v36 = vld [vmem:[%s16839_s11] ss:$0 sm:$0xff] }
0x28f7   :  { %v10120_v51 = vmul.f32 %v10119_v37, %v10115_v60  ;;  %10322 = vmatprep.subr.mxu1 %v14856_v41  ;;  %v10246_v37 = vld [vmem:[#allocation40 + $0x90] sm:$0xff]  ;;  %v10244_v60 = vld [vmem:[#allocation40 + $0x80] sm:$0xff] }
0x28f8   :  { %10323 = vmatpush2.msra.mxu1 %v10246_v37 }
0x28f9   :  { %v10125_v48 = vadd.f32 %v10124_v44, %v10120_v51  ;;  %10324 = vmatprep.subr.mxu1 %v14856_v41  ;;  %v10363_v44 = vld [vmem:[#allocation41 + $0x80] sm:$0xff]  ;;  %v10145_v51 = vrot.slane %v10140_v45, %v15371_v22 }
0x28fa   :  { %10325 = vmatpush2.msra.mxu1 %v10245_v46  ;;  %v10542_v22 = vld [vmem:[#allocation22 + $0x30] sm:$0xff] }
0x28fb   :  { %v10126_v5 = vmax.f32 %v10125_v48, 0.0  ;;  %10326 = vmatprep.subr.mxu1 %v14856_v41 }
0x28fc   :  { %10327 = vmatpush2.msra.mxu1 %v10244_v60 }
0x28fd   :  { %v10128_v55 = vrot.slane %v10126_v5, 2  ;;  %13893 = vmatprep.subr.mxu1 %v14856_v41 }
0x28ff   :  { %v10130_v58 = vmax.f32 %v10126_v5, %v10128_v55 }
0x2901   :  { %10132 = vrot.lane.b32.xlu0 %v10130_v58, %s14859_s7 }
0x2973   :  { %v10133_v42 = vpop.permute.xlu0 %10132 }
0x2974   :  { %v10135_v49 = vmax.f32 %v10130_v58, %v10133_v42  ;;  %v10543_v58 = vld [vmem:[#allocation22 + $0x38] sm:$0xff] }
0x2976   :  { %11169 = vmatmul.mubr.msk.f32.vlgmr.msra.gmra.mxu0 %vm8673_vm4, %v10135_v49 }
0x2977   :  { %10380 = vmatpush1.msra.mxu0 %v10362_v3 }
0x2978   :  { %10381 = vmatprep.subr.mxu0 %v14856_v41 }
0x2979   :  { %10382 = vmatpush1.msra.mxu0 %v10361_v4 }
0x297a   :  { %10383 = vmatprep.subr.mxu0 %v14856_v41 }
0x297b   :  { %10384 = vmatpush1.msra.mxu0 %v10360_v7 }
0x297c   :  { %10385 = vmatprep.subr.mxu0 %v14856_v41 }
0x297d   :  { %10386 = vmatpush1.msra.mxu0 %v10359_v10 }
0x297e   :  { %10387 = vmatprep.subr.mxu0 %v14856_v41 }
0x297f   :  { %10388 = vmatpush1.msra.mxu0 %v10358_v12  ;;  %v10716_v12 = vld [vmem:[%s16838_s12 + $0x60] sm:$0xf] }
0x2980   :  { %10389 = vmatprep.subr.mxu0 %v14856_v41 }
0x2981   :  { %10390 = vmatpush1.msra.mxu0 %v10357_v23 }
0x2982   :  { %10391 = vmatprep.subr.mxu0 %v14856_v41 }
0x2983   :  { %10392 = vmatpush1.msra.mxu0 %v10356_v31  ;;  %v10715_v31 = vld [vmem:[%s16838_s12 + $0x58] sm:$0xff] }
0x2984   :  { %10393 = vmatprep.subr.mxu0 %v14856_v41 }
0x2985   :  { %10394 = vmatpush1.msra.mxu0 %v10355_v6  ;;  %v10714_v6 = vld [vmem:[%s16838_s12 + $0x50] sm:$0xff] }
0x2986   :  { %10395 = vmatprep.subr.mxu0 %v14856_v41 }
0x2987   :  { %10396 = vmatpush1.msra.mxu0 %v10354_v13  ;;  %v10713_v13 = vld [vmem:[%s16838_s12 + $0x48] sm:$0xff] }
0x2988   :  { %10397 = vmatprep.subr.mxu0 %v14856_v41 }
0x2989   :  { %10398 = vmatpush1.msra.mxu0 %v10353_v59  ;;  %v10712_v59 = vld [vmem:[%s16838_s12 + $0x40] sm:$0xff] }
0x298a   :  { %10399 = vmatprep.subr.mxu0 %v14856_v41 }
0x298b   :  { %10400 = vmatpush1.msra.mxu0 %v10352_v25  ;;  %v10711_v25 = vld [vmem:[%s16838_s12 + $0x38] sm:$0xff] }
0x298c   :  { %10401 = vmatprep.subr.mxu0 %v14856_v41 }
0x298d   :  { %10402 = vmatpush1.msra.mxu0 %v10351_v62  ;;  %v10710_v62 = vld [vmem:[%s16838_s12 + $0x30] sm:$0xff] }
0x298e   :  { %10403 = vmatprep.subr.mxu0 %v14856_v41 }
0x298f   :  { %10404 = vmatpush1.msra.mxu0 %v10350_v2  ;;  %v10709_v2 = vld [vmem:[%s16838_s12 + $0x28] sm:$0xff] }
0x2990   :  { %10405 = vmatprep.subr.mxu0 %v14856_v41 }
0x2991   :  { %10406 = vmatpush1.msra.mxu0 %v10349_v27  ;;  %v10708_v27 = vld [vmem:[%s16838_s12 + $0x20] sm:$0xff] }
0x2992   :  { %10407 = vmatprep.subr.mxu0 %v14856_v41 }
0x2993   :  { %10408 = vmatpush1.msra.mxu0 %v10348_v57  ;;  %v10707_v57 = vld [vmem:[%s16838_s12 + $0x18] sm:$0xff] }
0x2994   :  { %10409 = vmatprep.subr.mxu0 %v14856_v41 }
0x2995   :  { %10410 = vmatpush1.msra.mxu0 %v10347_v53  ;;  %v10706_v53 = vld [vmem:[%s16838_s12 + $0x10] sm:$0xff] }
0x2996   :  { %10425 = vmatprep.subr.mxu0 %v14856_v41 }
0x2997   :  { %10426 = vmatpush2.msra.mxu0 %v10371_v28  ;;  %v10705_v28 = vld [vmem:[%s16838_s12 + $0x8] sm:$0xff] }
0x2998   :  { %10427 = vmatprep.subr.mxu0 %v14856_v41 }
0x2999   :  { %10428 = vmatpush2.msra.mxu0 %v10370_v14  ;;  %v10704_v14 = vld [vmem:[%s16838_s12] sm:$0xff] }
0x299a   :  { %10429 = vmatprep.subr.mxu0 %v14856_v41 }
0x299b   :  { %10430 = vmatpush2.msra.mxu0 %v10369_v24 }
0x299c   :  { %10431 = vmatprep.subr.mxu0 %v14856_v41 }
0x299d   :  { %10432 = vmatpush2.msra.mxu0 %v10368_v9 }
0x299e   :  { %10433 = vmatprep.subr.mxu0 %v14856_v41 }
0x299f   :  { %10434 = vmatpush2.msra.mxu0 %v10367_v38 }
0x29a0   :  { %10435 = vmatprep.subr.mxu0 %v14856_v41 }
0x29a1   :  { %10436 = vmatpush2.msra.mxu0 %v10366_v15 }
0x29a2   :  { %10437 = vmatprep.subr.mxu0 %v14856_v41 }
0x29a3   :  { %10438 = vmatpush2.msra.mxu0 %v10365_v17 }
0x29a4   :  { %10439 = vmatprep.subr.mxu0 %v14856_v41 }
0x29a5   :  { %10440 = vmatpush2.msra.mxu0 %v10364_v40 }
0x29a6   :  { %10441 = vmatprep.subr.mxu0 %v14856_v41 }
0x29a7   :  { %10442 = vmatpush2.msra.mxu0 %v10363_v44  ;;  %v11179_v44 = vld [vmem:[%s15041_s24] ss:$0 sm:$0xff]  ;;  %s14860_s24 = smov [#allocation44]  }
0x29a8   :  { %13904 = vmatprep.subr.mxu0 %v14856_v41  ;;  %s10829_s15 = sshll.u32 %s14860_s24, 4  ;;  %s10830_s15 = int_to_ptr.vmem [resolvable:$true] %s10829_s15 }
0x29a9   :  { %s14695_s22 = scalar_lea.vmem %s10830_s15, 32  ;;  %p14700_p5 = scmp.lt.s32.totalorder %s10830_s15, %s10830_s15 }
0x29aa   :  { %p14696_p4 = scmp.ne.s32.totalorder %s10830_s15, %s14695_s22  ;;  %p14701_p6 = scmp.lt.s32.totalorder %s14695_s22, %s14695_s22 }
0x29ac   :  { %p14702_p7 = por %p14701_p6, %p14700_p5 }
0x29ae   :  { %p14703_p8 = pnand %p14702_p7, %p14696_p4 }
0x2a36   :  { %v10221_v48 = vpop.f32.mrf.mxu0 }
0x2a37   :  { %v10222_v56 = vadd.f32 %v10221_v48, %v10145_v51 }
0x2a38   :  { %v10223_v5 = vpop.f32.mrf.mxu0 }
0x2a39   :  { %v10224_v11 = vadd.f32 %v10223_v5, %v10149_v47  ;;  %v10226_v35 = vmax.f32 %v10222_v56, 0.0 }
0x2a3b   :  { %v10227_v55 = vmax.f32 %v10224_v11, 0.0 }
0x2a3d   :  { %11171 = vmatprep.mubr.msk.f32.mxu1 %vm10260_vm9, %v10227_v55  ;;  %11173 = vmatprep.mubr.msk.f32.mxu0 %vm10260_vm9, %v10227_v55 }
0x2a3e   :  { %10329 = vmatmul.mubr.f32.vlgmr.msra.gmra.mxu1 %v10226_v35  ;;  %10444 = vmatmul.mubr.f32.vlgmr.msra.gmra.mxu0 %v10226_v35 }
0x2a3f   :  { %13894 = vmatpush3.msra.mxu1 %v16116_v39  ;;  %13901 = vmatprep.mubr.msk.f32.mxu1 %vm14857_vm2, %v14856_v41  ;;  %v10540_v39 = vld [vmem:[#allocation22 + $0x20] sm:$0xff] }
0x2a40   :  { %13895 = vmatprep.subr.mxu1 %v14856_v41  ;;  %13905 = vmatpush3.msra.mxu0 %v10543_v58 }
0x2a41   :  { %13896 = vmatpush3.msra.mxu1 %v16118_v63  ;;  %13906 = vmatprep.subr.mxu0 %v14856_v41  ;;  %v10539_v63 = vld [vmem:[#allocation22 + $0x18] sm:$0xff] }
0x2a42   :  { %13897 = vmatprep.subr.mxu1 %v14856_v41  ;;  %13907 = vmatpush3.msra.mxu0 %v10542_v22 }
0x2a43   :  { %13898 = vmatpush3.msra.mxu1 %v16122_v43  ;;  %13908 = vmatprep.subr.mxu0 %v14856_v41  ;;  %v10538_v43 = vld [vmem:[#allocation22 + $0x10] sm:$0xff] }
0x2a44   :  { %13899 = vmatprep.subr.mxu1 %v14856_v41  ;;  %13909 = vmatpush3.msra.mxu0 %v10541_v52 }
0x2a45   :  { %13900 = vmatpush3.msra.mxu1 %v16126_v54  ;;  %13910 = vmatprep.subr.mxu0 %v14856_v41  ;;  %v10537_v54 = vld [vmem:[#allocation22 + $0x8] sm:$0xff] }
0x2a46   :  { %13902 = vmatmul.mubr.msk.f32.vlgmr.msra.gmra.mxu1 %vm709_vm1, %v10462_v33  ;;  %13911 = vmatpush3.msra.mxu0 %v10540_v39 }
0x2a47   :  { %13912 = vmatprep.subr.mxu0 %v14856_v41  ;;  %13920 = vmatprep.mubr.msk.f32.mxu0 %vm14857_vm2, %v14856_v41 }
0x2a48   :  { %13923 = vmatprep.subr.mxu1 %v14856_v41  ;;  %13925 = vmatprep.mubr.msk.f32.mxu1 %vm14857_vm2, %v14856_v41 }
0x2a49   :  { %13913 = vmatpush3.msra.mxu0 %v10539_v63  ;;  %13924 = vmatpush3.msk.msra.mxu1 %vm8908_vm5, %v10618_v20 }
0x2a4a   :  { %13914 = vmatprep.subr.mxu0 %v14856_v41  ;;  %13928 = vmatprep.subr.mxu1 %v14856_v41 }
0x2a4b   :  { %13915 = vmatpush3.msra.mxu0 %v10538_v43 }
0x2a4c   :  { %13916 = vmatprep.subr.mxu0 %v14856_v41 }
0x2a4d   :  { %13917 = vmatpush3.msra.mxu0 %v10537_v54 }
0x2a4e   :  { %13918 = vmatprep.subr.mxu0 %v14856_v41 }
0x2a4f   :  { %13919 = vmatpush3.msra.mxu0 %v10536_v21 }
0x2afe   :  { %v10330_v61 = vpop.f32.mrf.mxu1  ;;  %v10445_v30 = vpop.f32.mrf.mxu0 }
0x2aff   :  { %v16746_v50 = vadd.f32 %v11170_v8, %v10330_v61  ;;  %v10446_v26 = vadd.f32 %v11172_v29, %v10445_v30 }
0x2b00   :  { %v10332_v18 = vpop.f32.mrf.mxu1  ;;  %v10447_v34 = vpop.f32.mrf.mxu0 }
0x2b01   :  { %v10450_v32 = vsel %vm10449_vm10, %v10446_v26, -inf  ;;  %v10335_v19 = vsel %vm10334_vm11, %v16746_v50, -inf }
0x2b02   :  { %10451 = vmax.xlane.f32.xlu1 %v10450_v32  ;;  %10336 = vmax.xlane.f32.xlu0 %v10335_v19 }
0x2b06   :  { %v10532_v16 = vpop.f32.mrf.mxu1 }
0x2b07   :  { %13921 = vmatmul.mubr.msk.f32.vlgmr.msra.gmra.mxu0 %vm508_vm0, %v10532_v16 }
0x2b08   :  { %v13903_v0 = vpop.f32.mrf.mxu1 }
0x2b8b   :  { %v10452_v1 = vpop.xlane.xlu1 %10451  ;;  %v10337_v40 = vpop.xlane.xlu0 %10336 }
0x2b8c   :  { %v10453_v42 = vsub.f32 %v10446_v26, %v10452_v1  ;;  %v10338_v60 = vsub.f32 %v16746_v50, %v10337_v40 }
0x2b8e   :  { %v10454_v49 = vmul.f32 1.442695, %v10453_v42 }
0x2b90   :  { %14045 = vpow2.f32 %v10454_v49 }
0x2b9d   :  { %v14046_v3 = vpop.eup %14045 }
0x2b9e   :  { %v10456_v4 = vsel %vm10449_vm10, %v14046_v3, 0.0 }
0x2b9f   :  { %10457 = vadd.xlane.f32.xlu1 %v10456_v4 }
0x2bc7   :  { %v10613_v7 = vpop.f32.mrf.mxu0 }
0x2bc8   :  { %v10617_v10 = vmul.f32 0.00390625, %v10613_v7 }
0x2bc9   :  { %v13922_v23 = vpop.f32.mrf.mxu0 }
0x2bca   :  { %13926 = vmatmul.mubr.msk.f32.vlgmr.msra.gmra.mxu1 %vm10626_vm12, %v10617_v10 }
0x2bcb   :  { %13929 = vmatpush3.msk.msra.mxu1 %vm8908_vm5, %v10716_v12  ;;  %13954 = vmatprep.mubr.msk.f32.mxu1 %vm14857_vm2, %v14856_v41 }
0x2bcc   :  { %13930 = vmatprep.subr.mxu1 %v14856_v41 }
0x2bcd   :  { %13931 = vmatpush3.msra.mxu1 %v10715_v31 }
0x2bce   :  { %13932 = vmatprep.subr.mxu1 %v14856_v41 }
0x2bcf   :  { %13933 = vmatpush3.msra.mxu1 %v10714_v6 }
0x2bd0   :  { %13934 = vmatprep.subr.mxu1 %v14856_v41 }
0x2bd1   :  { %13935 = vmatpush3.msra.mxu1 %v10713_v13 }
0x2bd2   :  { %13936 = vmatprep.subr.mxu1 %v14856_v41 }
0x2bd3   :  { %13937 = vmatpush3.msra.mxu1 %v10712_v59 }
0x2bd4   :  { %13938 = vmatprep.subr.mxu1 %v14856_v41 }
0x2bd5   :  { %13939 = vmatpush3.msra.mxu1 %v10711_v25 }
0x2bd6   :  { %13940 = vmatprep.subr.mxu1 %v14856_v41 }
0x2bd7   :  { %13941 = vmatpush3.msra.mxu1 %v10710_v62 }
0x2bd8   :  { %13942 = vmatprep.subr.mxu1 %v14856_v41 }
0x2bd9   :  { %13943 = vmatpush3.msra.mxu1 %v10709_v2 }
0x2bda   :  { %13944 = vmatprep.subr.mxu1 %v14856_v41 }
0x2bdb   :  { %13945 = vmatpush3.msra.mxu1 %v10708_v27 }
0x2bdc   :  { %13946 = vmatprep.subr.mxu1 %v14856_v41 }
0x2bdd   :  { %13947 = vmatpush3.msra.mxu1 %v10707_v57 }
0x2bde   :  { %13948 = vmatprep.subr.mxu1 %v14856_v41 }
0x2bdf   :  { %13949 = vmatpush3.msra.mxu1 %v10706_v53 }
0x2be0   :  { %13950 = vmatprep.subr.mxu1 %v14856_v41 }
0x2be1   :  { %13951 = vmatpush3.msra.mxu1 %v10705_v28 }
0x2be2   :  { %13952 = vmatprep.subr.mxu1 %v14856_v41  ;;  %v10339_v41 = vmul.f32 1.442695, %v10338_v60 }
0x2be3   :  { %13953 = vmatpush3.msra.mxu1 %v10704_v14 }
0x2c28   :  { %v10458_v24 = vpop.xlane.xlu1 %10457 }
0x2c29   :  { %14047 = vrcp.f32 %v10458_v24 }
0x2c2a   :  { %14049 = vpow2.f32 %v10339_v41 }
0x2c36   :  { %v14048_v9 = vpop.eup %14047 }
0x2c37   :  { %v10460_v38 = vmul.f32 %v14048_v9, %v14046_v3  ;;  %v14050_v56 = vpop.eup %14049 }
0x2c38   :  { %v10341_v5 = vsel %vm10334_vm11, %v14050_v56, 0.0 }
0x2c39   :  { %10461 = vst.msk [vmem:[#allocation44] sm:$0x3] %vm10449_vm10, %v10460_v38 }
0x2c8a   :  { %v10699_v15 = vpop.f32.mrf.mxu1 }
0x2c8b   :  { %v10700_v37 = vadd.f32 %v11176_v36, %v10699_v15 }
0x2c8c   :  { %v13927_v17 = vpop.f32.mrf.mxu1 }
0x2c8d   :  { %v10703_v46 = vmax.f32 %v10700_v37, 0.0 }
0x2c8f   :  { %13955 = vmatmul.mubr.msk.f32.vlgmr.msra.gmra.mxu1 %vm10724_vm13, %v10703_v46 }
0x2d4f   :  { %v10797_v45 = vpop.f32.mrf.mxu1 }
0x2d50   :  { %v10798_v51 = vadd.f32 %v11179_v44, %v10797_v45 }
0x2d51   :  { %v13956_v47 = vpop.f32.mrf.mxu1 }
0x2d52   :  { %v10801_v48 = vsel %vm10334_vm11, %v10798_v51, -inf }
0x2d53   :  { %10802 = vmax.xlane.f32.xlu0 %v10801_v48 }
0x2d57   :  { %10342 = vadd.xlane.f32.xlu0 %v10341_v5 }
0x2ddc   :  { %v10803_v11 = vpop.xlane.xlu0 %10802 }
0x2ddd   :  { %v10804_v55 = vsub.f32 %v10798_v51, %v10803_v11 }
0x2ddf   :  { %v10805_v35 = vmul.f32 1.442695, %v10804_v55 }
0x2de0   :  { %v10343_v58 = vpop.xlane.xlu0 %10342 }
0x2de1   :  { %14051 = vpow2.f32 %v10805_v35 }
0x2de2   :  { %14053 = vrcp.f32 %v10343_v58 }
0x2dee   :  { %v14052_v22 = vpop.eup %14051 }
0x2def   :  { %v14054_v52 = vpop.eup %14053  ;;  %v10807_v33 = vsel %vm10334_vm11, %v14052_v22, 0.0 }
0x2df0   :  { %10808 = vadd.xlane.f32.xlu1 %v10807_v33  ;;  %v10345_v39 = vmul.f32 %v14054_v52, %v14050_v56 }
0x2df2   :  { %10346 = vst.msk [vmem:[#allocation43] sm:$0x3] %vm10334_vm11, %v10345_v39 }
0x2df3   :  { %14706 = shalt.err (!%p14703_p8)
}
0x2df4   :  { %10832 = dma.vmem_to_hbm [thread:$0]  %s10830_s15, 32, %s15051_s14, [#allocation45]  }
0x2df5   :  { %s14715_s23 = scalar_lea.vmem %s10820_s29, 32  ;;  %p14720_p10 = scmp.lt.s32.totalorder %s10820_s29, %s10820_s29 }
0x2df6   :  { %p14716_p9 = scmp.ne.s32.totalorder %s10820_s29, %s14715_s23  ;;  %p14721_p11 = scmp.lt.s32.totalorder %s14715_s23, %s14715_s23 }
0x2df8   :  { %p14722_p12 = por %p14721_p11, %p14720_p10 }
0x2dfa   :  { %p14723_p13 = pnand %p14722_p12, %p14716_p9 }
0x2dfc   :  { %14726 = shalt.err (!%p14723_p13)
}
0x2dfd   :  { %10822 = dma.vmem_to_hbm [thread:$0]  %s10820_s29, 32, %s15046_s3, [#allocation4]  }
0x2dfe   :  { %s14862_s27 = smov [#allocation46]  }
0x2dff   :  { %s10839_s5 = sshll.u32 %s14862_s27, 4  ;;  %s10840_s5 = int_to_ptr.vmem [resolvable:$true] %s10839_s5 }
0x2e00   :  { %s14735_s26 = scalar_lea.vmem %s10840_s5, 32  ;;  %p14740_p1 = scmp.lt.s32.totalorder %s10840_s5, %s10840_s5 }
0x2e01   :  { %p14736_p0 = scmp.ne.s32.totalorder %s10840_s5, %s14735_s26  ;;  %p14741_p2 = scmp.lt.s32.totalorder %s14735_s26, %s14735_s26 }
0x2e03   :  { %p14742_p3 = por %p14741_p2, %p14740_p1 }
0x2e05   :  { %p14743_p4 = pnand %p14742_p3, %p14736_p0 }
0x2e79   :  { %v10809_v63 = vpop.xlane.xlu1 %10808 }
0x2e7a   :  { %14055 = vrcp.f32 %v10809_v63 }
0x2e87   :  { %v14056_v43 = vpop.eup %14055 }
0x2e88   :  { %v10811_v54 = vmul.f32 %v14056_v43, %v14052_v22 }
0x2e8a   :  { %10812 = vst.msk [vmem:[#allocation46] sm:$0x3] %vm10334_vm11, %v10811_v54 }
0x2e8b   :  { %14746 = shalt.err (!%p14743_p4)
}
0x2e8c   :  { %10842 = dma.vmem_to_hbm [thread:$0]  %s10840_s5, 32, %s15056_s25, [#allocation45]  }
0x2e8d   :  { %14783 = dma.done.wait [#allocation4], 32  }
0x2e8e   :  { %14784 = vsyncadd [#allocation4], 4294967264 }
0x2e8f   :  { %14785 = dma.done.wait [#allocation45], 64  }
0x2e90   :  { %14786 = vsyncadd [#allocation45], 4294967232 }
0x2e91   :  { %10852 = vsyncpa [#allocation3], 1 }
0x2e92   :  { %10853 = vsyncpa [#allocation6], 1 }
0x2e93   :  { %10854 = vsyncpa [#allocation9], 1 }
0x2e94   :  { %10855 = vsyncpa [#allocation12], 1 }
0x2e95   :  { %10856 = vsyncpa [#allocation15], 1 }
0x2e96   :  { %10857 = vsyncpa [#allocation18], 1 }
0x2e97   :  { %10858 = vsyncpa [#allocation21], 1 }
0x2e98   :  { %10859 = vsyncpa [#allocation24], 1 }
0x2e99   :  { %10860 = vsyncpa [#allocation27], 1 }
0x2e9a   :  { %10861 = vsyncpa [#allocation30], 1 }
0x2e9b   :  { %10862 = vsyncpa [#allocation33], 1 }
0x2e9c   :  { %10863 = vsyncpa [#allocation36], 1 }
0x2e9d   :  { %10864 = vsyncpa [#allocation39], 1 }
0x2e9e   :  { %10865 = vsyncpa [#allocation42], 1 }
0x2e9f   :  { %10866 = vsyncpa [#allocation4], 1 }
0x2ea0   :  { %10867 = vsyncpa [#allocation45], 1 }

</bundles_post_ra>
